<compile_context>
chip_gen: v7x
topology: tpu7x:2x2x1
jax: 0.10.0
libtpu: 0.0.40
codegen_flags: <defaults>
</compile_context>

<pallas_src>
import math

import jax
import jax.numpy as jnp
from jax.experimental import pallas as pl
from jax.experimental.pallas import tpu as pltpu

# ---- module hyper-parameters (num_orient, num_actions, args) ----
NUM_ORIENT = 1      # num_orient
NUM_ACTIONS = 4     # num_actions
L_H = 32            # args.l_h
K_ITERS = 5         # args.k
F_SIZE = 3          # args.f
K_IN = 9 * (NUM_ORIENT + 1)   # reduction dim of the hid-conv im2col (18)
K_IN_PAD = 32                 # padded to a layout-friendly size
assert K_IN <= K_IN_PAD
assert NUM_ACTIONS * NUM_ORIENT <= L_H


def _taps(f):
    r = f // 2
    return [(dy, dx) for dy in range(-r, r + 1) for dx in range(-r, r + 1)]


def _round_up(v, d):
    return -(-v // d) * d


# --------------------------------------------------------------------------
# Fused Planner forward kernel (one grid step == NB batch elements)
# --------------------------------------------------------------------------
def _make_planner_kernel(m, nb):
    l = L_H
    p = m * m
    n = nb * p                                  # lane width of one grid step
    taps3 = _taps(3)
    tapsf = _taps(F_SIZE)
    rmax = max(1, F_SIZE // 2)
    pad = _round_up(rmax * (m + 1), 128)        # lane padding for tap shifts
    gate_off = 0 if F_SIZE == 3 else len(taps3)
    n_mask_rows = len(taps3) if F_SIZE == 3 else len(taps3) + len(tapsf)

    def kernel(xp_ref, masks_ref, w_hid_ref, b_hid_ref, w_h0c0_ref, b_h0c0_ref,
               w_gates_ref, b_gates_ref, w_pol_ref, negmask_ref,
               out_ref, hbuf_ref):
        # Zero only the pad lanes of the shift scratch (interior is fully
        # overwritten before every use).
        hbuf_ref[:, :pad] = jnp.zeros((l, pad), jnp.float32)
        hbuf_ref[:, pad + n:] = jnp.zeros((l, pad), jnp.float32)

        # Hoist the per-tap validity masks (reused by every conv of the step).
        mask_vals = [masks_ref[t:t + 1, :] for t in range(n_mask_rows)]

        def conv_t(src_t, taps, moff, w_ref, b_ref):
            """'same' conv in transposed (channels, pixels) layout: stack the
            shifted slabs along sublanes and run ONE big-K bf16 MXU matmul."""
            hbuf_ref[:, pad:pad + n] = src_t
            pieces = []
            for t, (dy, dx) in enumerate(taps):
                s = dy * m + dx
                slab = hbuf_ref[:, pad + s:pad + s + n]
                if dy != 0 or dx != 0:                      # centre tap always valid
                    slab = slab * mask_vals[moff + t]
                pieces.append(slab.astype(jnp.bfloat16))
            stacked = jnp.concatenate(pieces, axis=0)       # (taps*l, n) bf16
            acc = jnp.dot(w_ref[...], stacked,
                          preferred_element_type=jnp.float32)   # (cout, n) f32
            return acc + b_ref[...]

        # hid = Conv3x3(cat(map, goal)); im2col patches arrive pre-transposed
        # and pre-cast to bf16 (reduction dim zero-padded 18 -> 32).
        hid_t = (jnp.dot(w_hid_ref[...], xp_ref[...],
                         preferred_element_type=jnp.float32) + b_hid_ref[...])

        # h0 / c0 = Conv3x3(hid); the two convs fused into one 2L-row conv.
        h0c0 = conv_t(hid_t, taps3, 0, w_h0c0_ref, b_h0c0_ref)   # (2l, n)
        h0_t = h0c0[:l, :]
        c_t = h0c0[l:, :]

        # Recurrent PLSTM steps; h / c never leave the core.  The fused gate
        # weight already contains the f x f conv, W_ih and W_hh (centre tap),
        # so each step is ONE bf16 MXU matmul + lane-dense elementwise gates.
        h_t = h0_t
        for _ in range(K_ITERS - 1):
            g = conv_t(h_t, tapsf, gate_off, w_gates_ref, b_gates_ref)  # (4l, n)
            i_g = jax.nn.sigmoid(g[0 * l:1 * l, :])
            f_g = jax.nn.sigmoid(g[1 * l:2 * l, :])
            g_g = jnp.tanh(g[2 * l:3 * l, :])
            o_g = jax.nn.sigmoid(g[3 * l:4 * l, :])
            c_t = f_g * c_t + i_g * g_g
            h_t = o_g * jnp.tanh(c_t)

        # Policy 1x1 conv (weights zero-padded to l rows) + per-pixel softmax
        # over the first A*O rows (-1e30 additive mask kills the padding).
        # Matches PyTorch's Softmax2d over the A actions (exact for O == 1).
        logits_t = jnp.dot(w_pol_ref[...], h_t.astype(jnp.bfloat16),
                           preferred_element_type=jnp.float32)      # (l, n)
        masked = logits_t + negmask_ref[...]
        mx = jnp.max(masked, axis=0, keepdims=True)
        e = jnp.exp(masked - mx)
        denom = jnp.sum(e, axis=0, keepdims=True)
        probs_t = e * pl.reciprocal(denom, approx=True)

        # Single lane-dense (4l, n) = (128, n) store: [h0 | hk | logits | probs].
        out_ref[...] = jnp.concatenate([h0_t, h_t, logits_t, probs_t], axis=0)

    return kernel, pad


# --------------------------------------------------------------------------
# JAX glue: input im2col (one-off, tiny), tap masks, forward pass
# --------------------------------------------------------------------------
def im2col3x3(x_nhwc):
    """(B,H,W,C) -> (B*H*W, 9*C); column order (ky, kx, c); rows (b, y, x)."""
    b, h, w, c = x_nhwc.shape
    xp = jnp.pad(x_nhwc, ((0, 0), (1, 1), (1, 1), (0, 0)))
    cols = [xp[:, ky:ky + h, kx:kx + w, :] for ky in range(3) for kx in range(3)]
    return jnp.concatenate(cols, axis=-1).reshape(b * h * w, 9 * c)


def _tap_masks(m, f, nb):
    """Per-tap boundary validity masks, (f*f, nb*m*m) f32, pixel-major (y, x)."""
    q = jnp.arange(m * m)
    y, x = q // m, q % m
    rows = []
    for dy, dx in _taps(f):
        valid = (y + dy >= 0) & (y + dy < m) & (x + dx >= 0) & (x + dx < m)
        rows.append(valid.astype(jnp.float32))
    return jnp.tile(jnp.stack(rows, 0), (1, nb))


def _pick_nb(b, p, max_nb=8):
    """Batch elements per grid step (keeps lane blocks 128-aligned; prefers an
    even number of grid steps so v7x's two TensorCores stay balanced)."""
    if p % 128 != 0:
        return b
    divs = [d for d in range(1, min(b, max_nb) + 1) if b % d == 0]
    even = [d for d in divs if (b // d) % 2 == 0]
    return max(even) if even else max(divs)


def planner_forward(map_design, goal_map, params):
    b = map_design.shape[0]
    m = map_design.shape[-1]
    l, a, o = L_H, NUM_ACTIONS, NUM_ORIENT
    p = m * m
    nb = _pick_nb(b, p)
    n = nb * p
    n_blocks = b // nb

    # Input im2col (one-off, tiny), transposed to (channels, pixels) and bf16.
    x = jnp.concatenate([map_design, goal_map], axis=1)              # (B, O+1, M, M)
    x_nhwc = jnp.transpose(x, (0, 2, 3, 1)).astype(jnp.float32)      # NHWC
    xp = im2col3x3(x_nhwc).reshape(b, p, K_IN)                       # rows (b, y, x)
    xp_t = jnp.transpose(xp, (2, 0, 1))                              # (K_IN, B, P)
    xp_t = jnp.pad(xp_t, ((0, K_IN_PAD - K_IN), (0, 0), (0, 0)))
    xp_t = xp_t.reshape(K_IN_PAD, b * p).astype(jnp.bfloat16)        # (32, B*P)

    # Per-tap boundary masks (shared by the 3x3 and f x f convs when f == 3).
    masks = _tap_masks(m, 3, nb)
    if F_SIZE != 3:
        masks = jnp.concatenate([masks, _tap_masks(m, F_SIZE, nb)], axis=0)
    rows_pad = _round_up(masks.shape[0], 8)
    masks = jnp.pad(masks, ((0, rows_pad - masks.shape[0]), (0, 0)))

    kernel, pad = _make_planner_kernel(m, nb)
    full = lambda i: (0, 0)

    packed = pl.pallas_call(
        kernel,
        out_shape=jax.ShapeDtypeStruct((4 * l, b * p), jnp.float32),
        grid=(n_blocks,),
        in_specs=[
            pl.BlockSpec((K_IN_PAD, n), lambda i: (0, i)),           # x patches^T
            pl.BlockSpec((rows_pad, n), full),                       # tap masks
            pl.BlockSpec((l, K_IN_PAD), full),                       # hid conv W^T
            pl.BlockSpec((l, 1), full),                              # hid conv b
            pl.BlockSpec((2 * l, 9 * l), full),                      # h0|c0 conv W^T
            pl.BlockSpec((2 * l, 1), full),                          # h0|c0 conv b
            pl.BlockSpec((4 * l, F_SIZE * F_SIZE * l), full),        # fused gate W^T
            pl.BlockSpec((4 * l, 1), full),                          # fused gate b
            pl.BlockSpec((l, l), full),                              # padded policy W^T
            pl.BlockSpec((l, 1), full),                              # softmax pad mask
        ],
        out_specs=pl.BlockSpec((4 * l, n), lambda i: (0, i)),
        scratch_shapes=[pltpu.VMEM((l, n + 2 * pad), jnp.float32)],
        compiler_params=pltpu.CompilerParams(
            dimension_semantics=("parallel",)),                      # 2 TCs on v7x
    )(xp_t, masks, params["hid_w"], params["hid_b"],
      params["h0c0_w"], params["h0c0_b"], params["gates_w"], params["gates_b"],
      params["pol_w"], params["negmask"])

    out = packed.reshape(4 * l, b, m, m)
    h0_t = out[:l]                              # (L, B, H, W)
    hk_t = out[l:2 * l]
    logits_t = out[2 * l:2 * l + a * o]
    probs_t = out[3 * l:3 * l + a * o]

    hk = jnp.transpose(hk_t, (1, 0, 2, 3))                           # (B, L, M, M)
    # PyTorch flattens h0 in (b, W, H) row order (transpose(1, 3) then .view).
    h0 = jnp.transpose(h0_t, (1, 3, 2, 0)).reshape(b * p, l)
    logits = jnp.transpose(logits_t, (1, 0, 2, 3)).reshape(b, a, o, m, m)
    probs = jnp.transpose(probs_t, (1, 0, 2, 3)).reshape(b, a, o, m, m)
    return logits, probs, h0, hk


# --------------------------------------------------------------------------
# Parameters: PyTorch layouts -> fused kernel operands (MXU operands in bf16)
# --------------------------------------------------------------------------
def init_raw_params(key):
    """Random parameters with PyTorch-style init and PyTorch layouts."""
    ks = jax.random.split(key, 13)

    def u(k, shape, fan_in):
        bound = 1.0 / math.sqrt(fan_in)
        return jax.random.uniform(k, shape, jnp.float32, -bound, bound)

    cin = NUM_ORIENT + 1
    l, f, a, o = L_H, F_SIZE, NUM_ACTIONS, NUM_ORIENT
    return dict(
        w_hid=u(ks[0], (l, cin, 3, 3), cin * 9), b_hid=u(ks[1], (l,), cin * 9),
        w_h0=u(ks[2], (l, l, 3, 3), l * 9),      b_h0=u(ks[3], (l,), l * 9),
        w_c0=u(ks[4], (l, l, 3, 3), l * 9),      b_c0=u(ks[5], (l,), l * 9),
        w_conv=u(ks[6], (1, l, f, f), l * f * f), b_conv=u(ks[7], (1,), l * f * f),
        w_ih=u(ks[8], (4 * l, 1), l), w_hh=u(ks[9], (4 * l, l), l),
        b_ih=u(ks[10], (4 * l,), l), b_hh=u(ks[11], (4 * l,), l),
        w_pol=u(ks[12], (a * o, l, 1, 1), l),    # policy conv, bias=False
    )


def prepare_kernel_params(raw):
    """Repack PyTorch-layout weights into the fused (transposed) kernel operands."""
    l, f, a, o = L_H, F_SIZE, NUM_ACTIONS, NUM_ORIENT
    bf = jnp.bfloat16

    def tap_mat_t(w):  # OIHW -> (O, kh*kw*I); column block t = W[:, :, ky, kx]
        oc, ic, kh, kw = w.shape
        return jnp.transpose(w, (0, 2, 3, 1)).reshape(oc, kh * kw * ic)

    hid_w = tap_mat_t(raw["w_hid"])                                  # (l, 9*cin)
    hid_w = jnp.pad(hid_w, ((0, 0), (0, K_IN_PAD - hid_w.shape[1])))
    hid_b = raw["b_hid"].reshape(l, 1)

    h0c0_w = jnp.concatenate([tap_mat_t(raw["w_h0"]), tap_mat_t(raw["w_c0"])], axis=0)
    h0c0_b = jnp.concatenate([raw["b_h0"], raw["b_c0"]]).reshape(2 * l, 1)

    # Fused recurrent gate weight (transposed):
    #   gates^T = W_g^T @ stack_t(shift_t(h)), with
    #   W_g^T[go, t*l+ci] = W_ih[go,0]*w_conv[0,ci,t]  (+ W_hh[go,ci] at centre)
    #   b = b_ih + b_hh + W_ih[:, 0]*b_conv
    wih = raw["w_ih"][:, 0]                                          # (4l,)
    conv_taps = jnp.transpose(raw["w_conv"][0], (1, 2, 0)).reshape(f * f, l)
    gates_w = (wih[:, None, None] * conv_taps[None]).reshape(4 * l, f * f * l)
    centre = (f // 2) * f + (f // 2)
    gates_w = gates_w.at[:, centre * l:(centre + 1) * l].add(raw["w_hh"])
    gates_b = (raw["b_ih"] + raw["b_hh"] + raw["b_conv"][0] * wih).reshape(4 * l, 1)

    pol_w = jnp.pad(raw["w_pol"].reshape(a * o, l), ((0, l - a * o), (0, 0)))
    negmask = jnp.where(jnp.arange(l) < a * o, 0.0, -1e30).astype(jnp.float32)

    return dict(hid_w=hid_w.astype(bf), hid_b=hid_b,
                h0c0_w=h0c0_w.astype(bf), h0c0_b=h0c0_b,
                gates_w=gates_w.astype(bf), gates_b=gates_b,
                pol_w=pol_w.astype(bf), negmask=negmask.reshape(l, 1))


# --------------------------------------------------------------------------
# Pure-JAX mirror of the PyTorch forward (correctness check only)
# --------------------------------------------------------------------------
def planner_reference(map_design, goal_map, raw):
    m = map_design.shape[-1]
    l, a, o = L_H, NUM_ACTIONS, NUM_ORIENT
    dn = ("NCHW", "OIHW", "NCHW")
    hp = jax.lax.Precision.HIGHEST

    def conv(x, w, bias, pad):
        y = jax.lax.conv_general_dilated(x, w, (1, 1), [(pad, pad), (pad, pad)],
                                         dimension_numbers=dn, precision=hp)
        return y if bias is None else y + bias[None, :, None, None]

    x = jnp.concatenate([map_design, goal_map], axis=1).astype(jnp.float32)
    hid = conv(x, raw["w_hid"], raw["b_hid"], 1)
    h0 = conv(hid, raw["w_h0"], raw["b_h0"], 1).transpose(0, 3, 2, 1).reshape(-1, l)
    c0 = conv(hid, raw["w_c0"], raw["b_c0"], 1).transpose(0, 3, 2, 1).reshape(-1, l)
    last_h, last_c = h0, c0
    pad = (F_SIZE - 1) // 2
    for _ in range(K_ITERS - 1):
        h_map = last_h.reshape(-1, m, m, l).transpose(0, 3, 2, 1)
        inp = conv(h_map, raw["w_conv"], raw["b_conv"], pad)
        inp = inp.transpose(0, 3, 2, 1).reshape(-1, 1)
        gates = (jnp.dot(inp, raw["w_ih"].T, precision=hp)
                 + jnp.dot(last_h, raw["w_hh"].T, precision=hp)
                 + raw["b_ih"] + raw["b_hh"])
        i_g = jax.nn.sigmoid(gates[:, :l])
        f_g = jax.nn.sigmoid(gates[:, l:2 * l])
        g_g = jnp.tanh(gates[:, 2 * l:3 * l])
        o_g = jax.nn.sigmoid(gates[:, 3 * l:])
        last_c = f_g * last_c + i_g * g_g
        last_h = o_g * jnp.tanh(last_c)
    hk = last_h.reshape(-1, m, m, l).transpose(0, 3, 2, 1)
    logits = conv(hk, raw["w_pol"], None, 0)
    lg = logits.reshape(-1, a, m, m)
    pr = jax.nn.softmax(lg, axis=1)
    logits5 = lg.reshape(-1, o, a, m, m).transpose(0, 2, 1, 3, 4)
    probs5 = pr.reshape(-1, o, a, m, m).transpose(0, 2, 1, 3, 4)
    return logits5, probs5, h0, hk


if __name__ == "__main__":
    key = jax.random.PRNGKey(0)
    k_map, k_par = jax.random.split(key, 2)
    b, m = 2, 16
    map_design = (jax.random.uniform(k_map, (b, NUM_ORIENT, m, m)) > 0.3).astype(jnp.float32)
    goal_map = jnp.zeros((b, 1, m, m), jnp.float32).at[:, :, m // 2, m // 2].set(1.0)

    raw = init_raw_params(k_par)
    params = prepare_kernel_params(raw)

    fwd = jax.jit(planner_forward)
    logits, probs, h0, hk = fwd(map_design, goal_map, params)
    jax.block_until_ready((logits, probs, h0, hk))

    assert logits.shape == (b, NUM_ACTIONS, NUM_ORIENT, m, m)
    assert probs.shape == (b, NUM_ACTIONS, NUM_ORIENT, m, m)
    assert h0.shape == (b * m * m, L_H)
    assert hk.shape == (b, L_H, m, m)
    assert bool(jnp.allclose(jnp.sum(probs, axis=1), 1.0, atol=5e-3))

    # Correctness vs the pure-JAX (f32 HIGHEST precision) mirror of the PyTorch
    # forward; kernel MXU operands are bf16 (f32 accumulation), hence the
    # slightly looser tolerance.
    r_logits, r_probs, r_h0, r_hk = jax.jit(planner_reference)(map_design, goal_map, raw)
    for name, got, ref in (("logits", logits, r_logits), ("probs", probs, r_probs),
                           ("h0", h0, r_h0), ("hk", hk, r_hk)):
        err = float(jnp.max(jnp.abs(got - ref)))
        assert err < 1e-2, (name, err)

    print("KERNEL_OK")
</pallas_src>

<mosaic_0001>
module attributes {stable_mosaic.version = 11 : i64} {
  func.func @kernel(%arg0: i32, %arg1: memref<32x256xbf16, #tpu.memory_space<vmem>>, %arg2: memref<16x256xf32, #tpu.memory_space<vmem>>, %arg3: memref<32x32xbf16, #tpu.memory_space<vmem>>, %arg4: memref<32x1xf32, #tpu.memory_space<vmem>>, %arg5: memref<64x288xbf16, #tpu.memory_space<vmem>>, %arg6: memref<64x1xf32, #tpu.memory_space<vmem>>, %arg7: memref<128x288xbf16, #tpu.memory_space<vmem>>, %arg8: memref<128x1xf32, #tpu.memory_space<vmem>>, %arg9: memref<32x32xbf16, #tpu.memory_space<vmem>>, %arg10: memref<32x1xf32, #tpu.memory_space<vmem>>, %arg11: memref<128x256xf32, #tpu.memory_space<vmem>>, %arg12: memref<32x512xf32, #tpu.memory_space<vmem>>) attributes {dimension_semantics = [#tpu.dimension_semantics<parallel>], iteration_bounds = array<i64: 2>, scalar_prefetch = 0 : i64, scratch_operands = 1 : i64, tpu.core_type = #tpu.core_type<tc>, window_params = [{transform_indices = @transform_0, window_bounds = array<i64: 32, 256>}, {pipeline_mode = #tpu.pipeline_mode<synchronous>, transform_indices = @transform_1, window_bounds = array<i64: 16, 256>}, {pipeline_mode = #tpu.pipeline_mode<synchronous>, transform_indices = @transform_2, window_bounds = array<i64: 32, 32>}, {pipeline_mode = #tpu.pipeline_mode<synchronous>, transform_indices = @transform_3, window_bounds = array<i64: 32, 1>}, {pipeline_mode = #tpu.pipeline_mode<synchronous>, transform_indices = @transform_4, window_bounds = array<i64: 64, 288>}, {pipeline_mode = #tpu.pipeline_mode<synchronous>, transform_indices = @transform_5, window_bounds = array<i64: 64, 1>}, {pipeline_mode = #tpu.pipeline_mode<synchronous>, transform_indices = @transform_6, window_bounds = array<i64: 128, 288>}, {pipeline_mode = #tpu.pipeline_mode<synchronous>, transform_indices = @transform_7, window_bounds = array<i64: 128, 1>}, {pipeline_mode = #tpu.pipeline_mode<synchronous>, transform_indices = @transform_8, window_bounds = array<i64: 32, 32>}, {pipeline_mode = #tpu.pipeline_mode<synchronous>, transform_indices = @transform_9, window_bounds = array<i64: 32, 1>}, {transform_indices = @transform_10, window_bounds = array<i64: 128, 256>}]} {
    %cst = arith.constant 0.000000e+00 : f32
    %0 = vector.broadcast %cst : f32 to vector<32x128xf32>
    %c0 = arith.constant 0 : index
    %c0_0 = arith.constant 0 : index
    %1 = vector.load %arg12[%c0, %c0_0] : memref<32x512xf32, #tpu.memory_space<vmem>>, vector<32x128xf32>
    tpu.vector_store %arg12[%c0, %c0_0], %0 {strides = array<i32>} : memref<32x512xf32, #tpu.memory_space<vmem>>, vector<32x128xf32>,
    %cst_1 = arith.constant 0.000000e+00 : f32
    %2 = vector.broadcast %cst_1 : f32 to vector<32x128xf32>
    %c0_2 = arith.constant 0 : index
    %c384 = arith.constant 384 : index
    %3 = vector.load %arg12[%c0_2, %c384] : memref<32x512xf32, #tpu.memory_space<vmem>>, vector<32x128xf32>
    tpu.vector_store %arg12[%c0_2, %c384], %2 {strides = array<i32>} : memref<32x512xf32, #tpu.memory_space<vmem>>, vector<32x128xf32>,
    %c0_3 = arith.constant 0 : index
    %c0_4 = arith.constant 0 : index
    %4 = vector.load %arg2[%c0_3, %c0_4] : memref<16x256xf32, #tpu.memory_space<vmem>>, vector<1x256xf32>
    %c1 = arith.constant 1 : index
    %c0_5 = arith.constant 0 : index
    %5 = vector.load %arg2[%c1, %c0_5] : memref<16x256xf32, #tpu.memory_space<vmem>>, vector<1x256xf32>
    %c2 = arith.constant 2 : index
    %c0_6 = arith.constant 0 : index
    %6 = vector.load %arg2[%c2, %c0_6] : memref<16x256xf32, #tpu.memory_space<vmem>>, vector<1x256xf32>
    %c3 = arith.constant 3 : index
    %c0_7 = arith.constant 0 : index
    %7 = vector.load %arg2[%c3, %c0_7] : memref<16x256xf32, #tpu.memory_space<vmem>>, vector<1x256xf32>
    %c5 = arith.constant 5 : index
    %c0_8 = arith.constant 0 : index
    %8 = vector.load %arg2[%c5, %c0_8] : memref<16x256xf32, #tpu.memory_space<vmem>>, vector<1x256xf32>
    %c6 = arith.constant 6 : index
    %c0_9 = arith.constant 0 : index
    %9 = vector.load %arg2[%c6, %c0_9] : memref<16x256xf32, #tpu.memory_space<vmem>>, vector<1x256xf32>
    %c7 = arith.constant 7 : index
    %c0_10 = arith.constant 0 : index
    %10 = vector.load %arg2[%c7, %c0_10] : memref<16x256xf32, #tpu.memory_space<vmem>>, vector<1x256xf32>
    %c8 = arith.constant 8 : index
    %c0_11 = arith.constant 0 : index
    %11 = vector.load %arg2[%c8, %c0_11] : memref<16x256xf32, #tpu.memory_space<vmem>>, vector<1x256xf32>
    %c0_12 = arith.constant 0 : index
    %c0_13 = arith.constant 0 : index
    %12 = vector.load %arg3[%c0_12, %c0_13] : memref<32x32xbf16, #tpu.memory_space<vmem>>, vector<32x32xbf16>
    %c0_14 = arith.constant 0 : index
    %c0_15 = arith.constant 0 : index
    %13 = vector.load %arg1[%c0_14, %c0_15] : memref<32x256xbf16, #tpu.memory_space<vmem>>, vector<32x256xbf16>
    %cst_16 = arith.constant dense<0.000000e+00> : vector<32x256xf32>
    %14 = tpu.matmul %12, %13, %cst_16 {dimension_numbers = #tpu.dot_dimension_numbers<[1], [0], [0], [1], [0, 0, 1, 1], [], []>} : vector<32x32xbf16>, vector<32x256xbf16>, vector<32x256xf32> -> vector<32x256xf32>
    %c0_17 = arith.constant 0 : index
    %c0_18 = arith.constant 0 : index
    %15 = vector.load %arg4[%c0_17, %c0_18] : memref<32x1xf32, #tpu.memory_space<vmem>>, vector<32x1xf32>
    %16 = vector.broadcast %15 : vector<32x1xf32> to vector<32x256xf32>
    %17 = arith.addf %14, %16 : vector<32x256xf32>
    %c0_19 = arith.constant 0 : index
    %c128 = arith.constant 128 : index
    %18 = vector.load %arg12[%c0_19, %c128] : memref<32x512xf32, #tpu.memory_space<vmem>>, vector<32x256xf32>
    tpu.vector_store %arg12[%c0_19, %c128], %17 {strides = array<i32>} : memref<32x512xf32, #tpu.memory_space<vmem>>, vector<32x256xf32>,
    %c0_20 = arith.constant 0 : index
    %c111 = arith.constant 111 : index
    %19 = vector.load %arg12[%c0_20, %c111] : memref<32x512xf32, #tpu.memory_space<vmem>>, vector<32x256xf32>
    %20 = vector.broadcast %4 : vector<1x256xf32> to vector<32x256xf32>
    %21 = arith.mulf %19, %20 : vector<32x256xf32>
    %22 = arith.truncf %21 : vector<32x256xf32> to vector<32x256xbf16>
    %c0_21 = arith.constant 0 : index
    %c112 = arith.constant 112 : index
    %23 = vector.load %arg12[%c0_21, %c112] : memref<32x512xf32, #tpu.memory_space<vmem>>, vector<32x256xf32>
    %24 = vector.broadcast %5 : vector<1x256xf32> to vector<32x256xf32>
    %25 = arith.mulf %23, %24 : vector<32x256xf32>
    %26 = arith.truncf %25 : vector<32x256xf32> to vector<32x256xbf16>
    %c0_22 = arith.constant 0 : index
    %c113 = arith.constant 113 : index
    %27 = vector.load %arg12[%c0_22, %c113] : memref<32x512xf32, #tpu.memory_space<vmem>>, vector<32x256xf32>
    %28 = vector.broadcast %6 : vector<1x256xf32> to vector<32x256xf32>
    %29 = arith.mulf %27, %28 : vector<32x256xf32>
    %30 = arith.truncf %29 : vector<32x256xf32> to vector<32x256xbf16>
    %c0_23 = arith.constant 0 : index
    %c127 = arith.constant 127 : index
    %31 = vector.load %arg12[%c0_23, %c127] : memref<32x512xf32, #tpu.memory_space<vmem>>, vector<32x256xf32>
    %32 = vector.broadcast %7 : vector<1x256xf32> to vector<32x256xf32>
    %33 = arith.mulf %31, %32 : vector<32x256xf32>
    %34 = arith.truncf %33 : vector<32x256xf32> to vector<32x256xbf16>
    %c0_24 = arith.constant 0 : index
    %c128_25 = arith.constant 128 : index
    %35 = vector.load %arg12[%c0_24, %c128_25] : memref<32x512xf32, #tpu.memory_space<vmem>>, vector<32x256xf32>
    %36 = arith.truncf %35 : vector<32x256xf32> to vector<32x256xbf16>
    %c0_26 = arith.constant 0 : index
    %c129 = arith.constant 129 : index
    %37 = vector.load %arg12[%c0_26, %c129] : memref<32x512xf32, #tpu.memory_space<vmem>>, vector<32x256xf32>
    %38 = vector.broadcast %8 : vector<1x256xf32> to vector<32x256xf32>
    %39 = arith.mulf %37, %38 : vector<32x256xf32>
    %40 = arith.truncf %39 : vector<32x256xf32> to vector<32x256xbf16>
    %c0_27 = arith.constant 0 : index
    %c143 = arith.constant 143 : index
    %41 = vector.load %arg12[%c0_27, %c143] : memref<32x512xf32, #tpu.memory_space<vmem>>, vector<32x256xf32>
    %42 = vector.broadcast %9 : vector<1x256xf32> to vector<32x256xf32>
    %43 = arith.mulf %41, %42 : vector<32x256xf32>
    %44 = arith.truncf %43 : vector<32x256xf32> to vector<32x256xbf16>
    %c0_28 = arith.constant 0 : index
    %c144 = arith.constant 144 : index
    %45 = vector.load %arg12[%c0_28, %c144] : memref<32x512xf32, #tpu.memory_space<vmem>>, vector<32x256xf32>
    %46 = vector.broadcast %10 : vector<1x256xf32> to vector<32x256xf32>
    %47 = arith.mulf %45, %46 : vector<32x256xf32>
    %48 = arith.truncf %47 : vector<32x256xf32> to vector<32x256xbf16>
    %c0_29 = arith.constant 0 : index
    %c145 = arith.constant 145 : index
    %49 = vector.load %arg12[%c0_29, %c145] : memref<32x512xf32, #tpu.memory_space<vmem>>, vector<32x256xf32>
    %50 = vector.broadcast %11 : vector<1x256xf32> to vector<32x256xf32>
    %51 = arith.mulf %49, %50 : vector<32x256xf32>
    %52 = arith.truncf %51 : vector<32x256xf32> to vector<32x256xbf16>
    %53 = tpu.concatenate %22, %26, %30, %34, %36, %40, %44, %48, %52 in 0 : vector<32x256xbf16>, vector<32x256xbf16>, vector<32x256xbf16>, vector<32x256xbf16>, vector<32x256xbf16>, vector<32x256xbf16>, vector<32x256xbf16>, vector<32x256xbf16>, vector<32x256xbf16> -> vector<288x256xbf16>
    %c0_30 = arith.constant 0 : index
    %c0_31 = arith.constant 0 : index
    %54 = vector.load %arg5[%c0_30, %c0_31] : memref<64x288xbf16, #tpu.memory_space<vmem>>, vector<64x288xbf16>
    %cst_32 = arith.constant dense<0.000000e+00> : vector<64x256xf32>
    %55 = tpu.matmul %54, %53, %cst_32 {dimension_numbers = #tpu.dot_dimension_numbers<[1], [0], [0], [1], [0, 0, 1, 1], [], []>} : vector<64x288xbf16>, vector<288x256xbf16>, vector<64x256xf32> -> vector<64x256xf32>
    %c0_33 = arith.constant 0 : index
    %c0_34 = arith.constant 0 : index
    %56 = vector.load %arg6[%c0_33, %c0_34] : memref<64x1xf32, #tpu.memory_space<vmem>>, vector<64x1xf32>
    %57 = vector.broadcast %56 : vector<64x1xf32> to vector<64x256xf32>
    %58 = arith.addf %55, %57 : vector<64x256xf32>
    %59 = vector.extract_strided_slice %58 {offsets = [0, 0], sizes = [32, 256], strides = [1, 1]} : vector<64x256xf32> to vector<32x256xf32>
    %60 = vector.extract_strided_slice %58 {offsets = [32, 0], sizes = [32, 256], strides = [1, 1]} : vector<64x256xf32> to vector<32x256xf32>
    %c0_35 = arith.constant 0 : index
    %c128_36 = arith.constant 128 : index
    %61 = vector.load %arg12[%c0_35, %c128_36] : memref<32x512xf32, #tpu.memory_space<vmem>>, vector<32x256xf32>
    tpu.vector_store %arg12[%c0_35, %c128_36], %59 {strides = array<i32>} : memref<32x512xf32, #tpu.memory_space<vmem>>, vector<32x256xf32>,
    %c0_37 = arith.constant 0 : index
    %c111_38 = arith.constant 111 : index
    %62 = vector.load %arg12[%c0_37, %c111_38] : memref<32x512xf32, #tpu.memory_space<vmem>>, vector<32x256xf32>
    %63 = vector.broadcast %4 : vector<1x256xf32> to vector<32x256xf32>
    %64 = arith.mulf %62, %63 : vector<32x256xf32>
    %65 = arith.truncf %64 : vector<32x256xf32> to vector<32x256xbf16>
    %c0_39 = arith.constant 0 : index
    %c112_40 = arith.constant 112 : index
    %66 = vector.load %arg12[%c0_39, %c112_40] : memref<32x512xf32, #tpu.memory_space<vmem>>, vector<32x256xf32>
    %67 = vector.broadcast %5 : vector<1x256xf32> to vector<32x256xf32>
    %68 = arith.mulf %66, %67 : vector<32x256xf32>
    %69 = arith.truncf %68 : vector<32x256xf32> to vector<32x256xbf16>
    %c0_41 = arith.constant 0 : index
    %c113_42 = arith.constant 113 : index
    %70 = vector.load %arg12[%c0_41, %c113_42] : memref<32x512xf32, #tpu.memory_space<vmem>>, vector<32x256xf32>
    %71 = vector.broadcast %6 : vector<1x256xf32> to vector<32x256xf32>
    %72 = arith.mulf %70, %71 : vector<32x256xf32>
    %73 = arith.truncf %72 : vector<32x256xf32> to vector<32x256xbf16>
    %c0_43 = arith.constant 0 : index
    %c127_44 = arith.constant 127 : index
    %74 = vector.load %arg12[%c0_43, %c127_44] : memref<32x512xf32, #tpu.memory_space<vmem>>, vector<32x256xf32>
    %75 = vector.broadcast %7 : vector<1x256xf32> to vector<32x256xf32>
    %76 = arith.mulf %74, %75 : vector<32x256xf32>
    %77 = arith.truncf %76 : vector<32x256xf32> to vector<32x256xbf16>
    %c0_45 = arith.constant 0 : index
    %c128_46 = arith.constant 128 : index
    %78 = vector.load %arg12[%c0_45, %c128_46] : memref<32x512xf32, #tpu.memory_space<vmem>>, vector<32x256xf32>
    %79 = arith.truncf %78 : vector<32x256xf32> to vector<32x256xbf16>
    %c0_47 = arith.constant 0 : index
    %c129_48 = arith.constant 129 : index
    %80 = vector.load %arg12[%c0_47, %c129_48] : memref<32x512xf32, #tpu.memory_space<vmem>>, vector<32x256xf32>
    %81 = vector.broadcast %8 : vector<1x256xf32> to vector<32x256xf32>
    %82 = arith.mulf %80, %81 : vector<32x256xf32>
    %83 = arith.truncf %82 : vector<32x256xf32> to vector<32x256xbf16>
    %c0_49 = arith.constant 0 : index
    %c143_50 = arith.constant 143 : index
    %84 = vector.load %arg12[%c0_49, %c143_50] : memref<32x512xf32, #tpu.memory_space<vmem>>, vector<32x256xf32>
    %85 = vector.broadcast %9 : vector<1x256xf32> to vector<32x256xf32>
    %86 = arith.mulf %84, %85 : vector<32x256xf32>
    %87 = arith.truncf %86 : vector<32x256xf32> to vector<32x256xbf16>
    %c0_51 = arith.constant 0 : index
    %c144_52 = arith.constant 144 : index
    %88 = vector.load %arg12[%c0_51, %c144_52] : memref<32x512xf32, #tpu.memory_space<vmem>>, vector<32x256xf32>
    %89 = vector.broadcast %10 : vector<1x256xf32> to vector<32x256xf32>
    %90 = arith.mulf %88, %89 : vector<32x256xf32>
    %91 = arith.truncf %90 : vector<32x256xf32> to vector<32x256xbf16>
    %c0_53 = arith.constant 0 : index
    %c145_54 = arith.constant 145 : index
    %92 = vector.load %arg12[%c0_53, %c145_54] : memref<32x512xf32, #tpu.memory_space<vmem>>, vector<32x256xf32>
    %93 = vector.broadcast %11 : vector<1x256xf32> to vector<32x256xf32>
    %94 = arith.mulf %92, %93 : vector<32x256xf32>
    %95 = arith.truncf %94 : vector<32x256xf32> to vector<32x256xbf16>
    %96 = tpu.concatenate %65, %69, %73, %77, %79, %83, %87, %91, %95 in 0 : vector<32x256xbf16>, vector<32x256xbf16>, vector<32x256xbf16>, vector<32x256xbf16>, vector<32x256xbf16>, vector<32x256xbf16>, vector<32x256xbf16>, vector<32x256xbf16>, vector<32x256xbf16> -> vector<288x256xbf16>
    %c0_55 = arith.constant 0 : index
    %c0_56 = arith.constant 0 : index
    %97 = vector.load %arg7[%c0_55, %c0_56] : memref<128x288xbf16, #tpu.memory_space<vmem>>, vector<128x288xbf16>
    %cst_57 = arith.constant dense<0.000000e+00> : vector<128x256xf32>
    %98 = tpu.matmul %97, %96, %cst_57 {dimension_numbers = #tpu.dot_dimension_numbers<[1], [0], [0], [1], [0, 0, 1, 1], [], []>} : vector<128x288xbf16>, vector<288x256xbf16>, vector<128x256xf32> -> vector<128x256xf32>
    %c0_58 = arith.constant 0 : index
    %c0_59 = arith.constant 0 : index
    %99 = vector.load %arg8[%c0_58, %c0_59] : memref<128x1xf32, #tpu.memory_space<vmem>>, vector<128x1xf32>
    %100 = vector.broadcast %99 : vector<128x1xf32> to vector<128x256xf32>
    %101 = arith.addf %98, %100 : vector<128x256xf32>
    %102 = vector.extract_strided_slice %101 {offsets = [0, 0], sizes = [32, 256], strides = [1, 1]} : vector<128x256xf32> to vector<32x256xf32>
    %103 = arith.negf %102 : vector<32x256xf32>
    %104 = math.exp %103 : vector<32x256xf32>
    %cst_60 = arith.constant 1.000000e+00 : f32
    %105 = vector.broadcast %cst_60 : f32 to vector<32x256xf32>
    %106 = arith.addf %105, %104 : vector<32x256xf32>
    %107 = arith.divf %105, %106 : vector<32x256xf32>
    %108 = vector.extract_strided_slice %101 {offsets = [32, 0], sizes = [32, 256], strides = [1, 1]} : vector<128x256xf32> to vector<32x256xf32>
    %109 = arith.negf %108 : vector<32x256xf32>
    %110 = math.exp %109 : vector<32x256xf32>
    %cst_61 = arith.constant 1.000000e+00 : f32
    %111 = vector.broadcast %cst_61 : f32 to vector<32x256xf32>
    %112 = arith.addf %111, %110 : vector<32x256xf32>
    %113 = arith.divf %111, %112 : vector<32x256xf32>
    %114 = vector.extract_strided_slice %101 {offsets = [64, 0], sizes = [32, 256], strides = [1, 1]} : vector<128x256xf32> to vector<32x256xf32>
    %115 = math.tanh %114 : vector<32x256xf32>
    %116 = vector.extract_strided_slice %101 {offsets = [96, 0], sizes = [32, 256], strides = [1, 1]} : vector<128x256xf32> to vector<32x256xf32>
    %117 = arith.negf %116 : vector<32x256xf32>
    %118 = math.exp %117 : vector<32x256xf32>
    %cst_62 = arith.constant 1.000000e+00 : f32
    %119 = vector.broadcast %cst_62 : f32 to vector<32x256xf32>
    %120 = arith.addf %119, %118 : vector<32x256xf32>
    %121 = arith.divf %119, %120 : vector<32x256xf32>
    %122 = arith.mulf %113, %60 : vector<32x256xf32>
    %123 = arith.mulf %107, %115 : vector<32x256xf32>
    %124 = arith.addf %122, %123 : vector<32x256xf32>
    %125 = math.tanh %124 : vector<32x256xf32>
    %126 = arith.mulf %121, %125 : vector<32x256xf32>
    %c0_63 = arith.constant 0 : index
    %c128_64 = arith.constant 128 : index
    %127 = vector.load %arg12[%c0_63, %c128_64] : memref<32x512xf32, #tpu.memory_space<vmem>>, vector<32x256xf32>
    tpu.vector_store %arg12[%c0_63, %c128_64], %126 {strides = array<i32>} : memref<32x512xf32, #tpu.memory_space<vmem>>, vector<32x256xf32>,
    %c0_65 = arith.constant 0 : index
    %c111_66 = arith.constant 111 : index
    %128 = vector.load %arg12[%c0_65, %c111_66] : memref<32x512xf32, #tpu.memory_space<vmem>>, vector<32x256xf32>
    %129 = vector.broadcast %4 : vector<1x256xf32> to vector<32x256xf32>
    %130 = arith.mulf %128, %129 : vector<32x256xf32>
    %131 = arith.truncf %130 : vector<32x256xf32> to vector<32x256xbf16>
    %c0_67 = arith.constant 0 : index
    %c112_68 = arith.constant 112 : index
    %132 = vector.load %arg12[%c0_67, %c112_68] : memref<32x512xf32, #tpu.memory_space<vmem>>, vector<32x256xf32>
    %133 = vector.broadcast %5 : vector<1x256xf32> to vector<32x256xf32>
    %134 = arith.mulf %132, %133 : vector<32x256xf32>
    %135 = arith.truncf %134 : vector<32x256xf32> to vector<32x256xbf16>
    %c0_69 = arith.constant 0 : index
    %c113_70 = arith.constant 113 : index
    %136 = vector.load %arg12[%c0_69, %c113_70] : memref<32x512xf32, #tpu.memory_space<vmem>>, vector<32x256xf32>
    %137 = vector.broadcast %6 : vector<1x256xf32> to vector<32x256xf32>
    %138 = arith.mulf %136, %137 : vector<32x256xf32>
    %139 = arith.truncf %138 : vector<32x256xf32> to vector<32x256xbf16>
    %c0_71 = arith.constant 0 : index
    %c127_72 = arith.constant 127 : index
    %140 = vector.load %arg12[%c0_71, %c127_72] : memref<32x512xf32, #tpu.memory_space<vmem>>, vector<32x256xf32>
    %141 = vector.broadcast %7 : vector<1x256xf32> to vector<32x256xf32>
    %142 = arith.mulf %140, %141 : vector<32x256xf32>
    %143 = arith.truncf %142 : vector<32x256xf32> to vector<32x256xbf16>
    %c0_73 = arith.constant 0 : index
    %c128_74 = arith.constant 128 : index
    %144 = vector.load %arg12[%c0_73, %c128_74] : memref<32x512xf32, #tpu.memory_space<vmem>>, vector<32x256xf32>
    %145 = arith.truncf %144 : vector<32x256xf32> to vector<32x256xbf16>
    %c0_75 = arith.constant 0 : index
    %c129_76 = arith.constant 129 : index
    %146 = vector.load %arg12[%c0_75, %c129_76] : memref<32x512xf32, #tpu.memory_space<vmem>>, vector<32x256xf32>
    %147 = vector.broadcast %8 : vector<1x256xf32> to vector<32x256xf32>
    %148 = arith.mulf %146, %147 : vector<32x256xf32>
    %149 = arith.truncf %148 : vector<32x256xf32> to vector<32x256xbf16>
    %c0_77 = arith.constant 0 : index
    %c143_78 = arith.constant 143 : index
    %150 = vector.load %arg12[%c0_77, %c143_78] : memref<32x512xf32, #tpu.memory_space<vmem>>, vector<32x256xf32>
    %151 = vector.broadcast %9 : vector<1x256xf32> to vector<32x256xf32>
    %152 = arith.mulf %150, %151 : vector<32x256xf32>
    %153 = arith.truncf %152 : vector<32x256xf32> to vector<32x256xbf16>
    %c0_79 = arith.constant 0 : index
    %c144_80 = arith.constant 144 : index
    %154 = vector.load %arg12[%c0_79, %c144_80] : memref<32x512xf32, #tpu.memory_space<vmem>>, vector<32x256xf32>
    %155 = vector.broadcast %10 : vector<1x256xf32> to vector<32x256xf32>
    %156 = arith.mulf %154, %155 : vector<32x256xf32>
    %157 = arith.truncf %156 : vector<32x256xf32> to vector<32x256xbf16>
    %c0_81 = arith.constant 0 : index
    %c145_82 = arith.constant 145 : index
    %158 = vector.load %arg12[%c0_81, %c145_82] : memref<32x512xf32, #tpu.memory_space<vmem>>, vector<32x256xf32>
    %159 = vector.broadcast %11 : vector<1x256xf32> to vector<32x256xf32>
    %160 = arith.mulf %158, %159 : vector<32x256xf32>
    %161 = arith.truncf %160 : vector<32x256xf32> to vector<32x256xbf16>
    %162 = tpu.concatenate %131, %135, %139, %143, %145, %149, %153, %157, %161 in 0 : vector<32x256xbf16>, vector<32x256xbf16>, vector<32x256xbf16>, vector<32x256xbf16>, vector<32x256xbf16>, vector<32x256xbf16>, vector<32x256xbf16>, vector<32x256xbf16>, vector<32x256xbf16> -> vector<288x256xbf16>
    %c0_83 = arith.constant 0 : index
    %c0_84 = arith.constant 0 : index
    %163 = vector.load %arg7[%c0_83, %c0_84] : memref<128x288xbf16, #tpu.memory_space<vmem>>, vector<128x288xbf16>
    %cst_85 = arith.constant dense<0.000000e+00> : vector<128x256xf32>
    %164 = tpu.matmul %163, %162, %cst_85 {dimension_numbers = #tpu.dot_dimension_numbers<[1], [0], [0], [1], [0, 0, 1, 1], [], []>} : vector<128x288xbf16>, vector<288x256xbf16>, vector<128x256xf32> -> vector<128x256xf32>
    %c0_86 = arith.constant 0 : index
    %c0_87 = arith.constant 0 : index
    %165 = vector.load %arg8[%c0_86, %c0_87] : memref<128x1xf32, #tpu.memory_space<vmem>>, vector<128x1xf32>
    %166 = vector.broadcast %165 : vector<128x1xf32> to vector<128x256xf32>
    %167 = arith.addf %164, %166 : vector<128x256xf32>
    %168 = vector.extract_strided_slice %167 {offsets = [0, 0], sizes = [32, 256], strides = [1, 1]} : vector<128x256xf32> to vector<32x256xf32>
    %169 = arith.negf %168 : vector<32x256xf32>
    %170 = math.exp %169 : vector<32x256xf32>
    %cst_88 = arith.constant 1.000000e+00 : f32
    %171 = vector.broadcast %cst_88 : f32 to vector<32x256xf32>
    %172 = arith.addf %171, %170 : vector<32x256xf32>
    %173 = arith.divf %171, %172 : vector<32x256xf32>
    %174 = vector.extract_strided_slice %167 {offsets = [32, 0], sizes = [32, 256], strides = [1, 1]} : vector<128x256xf32> to vector<32x256xf32>
    %175 = arith.negf %174 : vector<32x256xf32>
    %176 = math.exp %175 : vector<32x256xf32>
    %cst_89 = arith.constant 1.000000e+00 : f32
    %177 = vector.broadcast %cst_89 : f32 to vector<32x256xf32>
    %178 = arith.addf %177, %176 : vector<32x256xf32>
    %179 = arith.divf %177, %178 : vector<32x256xf32>
    %180 = vector.extract_strided_slice %167 {offsets = [64, 0], sizes = [32, 256], strides = [1, 1]} : vector<128x256xf32> to vector<32x256xf32>
    %181 = math.tanh %180 : vector<32x256xf32>
    %182 = vector.extract_strided_slice %167 {offsets = [96, 0], sizes = [32, 256], strides = [1, 1]} : vector<128x256xf32> to vector<32x256xf32>
    %183 = arith.negf %182 : vector<32x256xf32>
    %184 = math.exp %183 : vector<32x256xf32>
    %cst_90 = arith.constant 1.000000e+00 : f32
    %185 = vector.broadcast %cst_90 : f32 to vector<32x256xf32>
    %186 = arith.addf %185, %184 : vector<32x256xf32>
    %187 = arith.divf %185, %186 : vector<32x256xf32>
    %188 = arith.mulf %179, %124 : vector<32x256xf32>
    %189 = arith.mulf %173, %181 : vector<32x256xf32>
    %190 = arith.addf %188, %189 : vector<32x256xf32>
    %191 = math.tanh %190 : vector<32x256xf32>
    %192 = arith.mulf %187, %191 : vector<32x256xf32>
    %c0_91 = arith.constant 0 : index
    %c128_92 = arith.constant 128 : index
    %193 = vector.load %arg12[%c0_91, %c128_92] : memref<32x512xf32, #tpu.memory_space<vmem>>, vector<32x256xf32>
    tpu.vector_store %arg12[%c0_91, %c128_92], %192 {strides = array<i32>} : memref<32x512xf32, #tpu.memory_space<vmem>>, vector<32x256xf32>,
    %c0_93 = arith.constant 0 : index
    %c111_94 = arith.constant 111 : index
    %194 = vector.load %arg12[%c0_93, %c111_94] : memref<32x512xf32, #tpu.memory_space<vmem>>, vector<32x256xf32>
    %195 = vector.broadcast %4 : vector<1x256xf32> to vector<32x256xf32>
    %196 = arith.mulf %194, %195 : vector<32x256xf32>
    %197 = arith.truncf %196 : vector<32x256xf32> to vector<32x256xbf16>
    %c0_95 = arith.constant 0 : index
    %c112_96 = arith.constant 112 : index
    %198 = vector.load %arg12[%c0_95, %c112_96] : memref<32x512xf32, #tpu.memory_space<vmem>>, vector<32x256xf32>
    %199 = vector.broadcast %5 : vector<1x256xf32> to vector<32x256xf32>
    %200 = arith.mulf %198, %199 : vector<32x256xf32>
    %201 = arith.truncf %200 : vector<32x256xf32> to vector<32x256xbf16>
    %c0_97 = arith.constant 0 : index
    %c113_98 = arith.constant 113 : index
    %202 = vector.load %arg12[%c0_97, %c113_98] : memref<32x512xf32, #tpu.memory_space<vmem>>, vector<32x256xf32>
    %203 = vector.broadcast %6 : vector<1x256xf32> to vector<32x256xf32>
    %204 = arith.mulf %202, %203 : vector<32x256xf32>
    %205 = arith.truncf %204 : vector<32x256xf32> to vector<32x256xbf16>
    %c0_99 = arith.constant 0 : index
    %c127_100 = arith.constant 127 : index
    %206 = vector.load %arg12[%c0_99, %c127_100] : memref<32x512xf32, #tpu.memory_space<vmem>>, vector<32x256xf32>
    %207 = vector.broadcast %7 : vector<1x256xf32> to vector<32x256xf32>
    %208 = arith.mulf %206, %207 : vector<32x256xf32>
    %209 = arith.truncf %208 : vector<32x256xf32> to vector<32x256xbf16>
    %c0_101 = arith.constant 0 : index
    %c128_102 = arith.constant 128 : index
    %210 = vector.load %arg12[%c0_101, %c128_102] : memref<32x512xf32, #tpu.memory_space<vmem>>, vector<32x256xf32>
    %211 = arith.truncf %210 : vector<32x256xf32> to vector<32x256xbf16>
    %c0_103 = arith.constant 0 : index
    %c129_104 = arith.constant 129 : index
    %212 = vector.load %arg12[%c0_103, %c129_104] : memref<32x512xf32, #tpu.memory_space<vmem>>, vector<32x256xf32>
    %213 = vector.broadcast %8 : vector<1x256xf32> to vector<32x256xf32>
    %214 = arith.mulf %212, %213 : vector<32x256xf32>
    %215 = arith.truncf %214 : vector<32x256xf32> to vector<32x256xbf16>
    %c0_105 = arith.constant 0 : index
    %c143_106 = arith.constant 143 : index
    %216 = vector.load %arg12[%c0_105, %c143_106] : memref<32x512xf32, #tpu.memory_space<vmem>>, vector<32x256xf32>
    %217 = vector.broadcast %9 : vector<1x256xf32> to vector<32x256xf32>
    %218 = arith.mulf %216, %217 : vector<32x256xf32>
    %219 = arith.truncf %218 : vector<32x256xf32> to vector<32x256xbf16>
    %c0_107 = arith.constant 0 : index
    %c144_108 = arith.constant 144 : index
    %220 = vector.load %arg12[%c0_107, %c144_108] : memref<32x512xf32, #tpu.memory_space<vmem>>, vector<32x256xf32>
    %221 = vector.broadcast %10 : vector<1x256xf32> to vector<32x256xf32>
    %222 = arith.mulf %220, %221 : vector<32x256xf32>
    %223 = arith.truncf %222 : vector<32x256xf32> to vector<32x256xbf16>
    %c0_109 = arith.constant 0 : index
    %c145_110 = arith.constant 145 : index
    %224 = vector.load %arg12[%c0_109, %c145_110] : memref<32x512xf32, #tpu.memory_space<vmem>>, vector<32x256xf32>
    %225 = vector.broadcast %11 : vector<1x256xf32> to vector<32x256xf32>
    %226 = arith.mulf %224, %225 : vector<32x256xf32>
    %227 = arith.truncf %226 : vector<32x256xf32> to vector<32x256xbf16>
    %228 = tpu.concatenate %197, %201, %205, %209, %211, %215, %219, %223, %227 in 0 : vector<32x256xbf16>, vector<32x256xbf16>, vector<32x256xbf16>, vector<32x256xbf16>, vector<32x256xbf16>, vector<32x256xbf16>, vector<32x256xbf16>, vector<32x256xbf16>, vector<32x256xbf16> -> vector<288x256xbf16>
    %c0_111 = arith.constant 0 : index
    %c0_112 = arith.constant 0 : index
    %229 = vector.load %arg7[%c0_111, %c0_112] : memref<128x288xbf16, #tpu.memory_space<vmem>>, vector<128x288xbf16>
    %cst_113 = arith.constant dense<0.000000e+00> : vector<128x256xf32>
    %230 = tpu.matmul %229, %228, %cst_113 {dimension_numbers = #tpu.dot_dimension_numbers<[1], [0], [0], [1], [0, 0, 1, 1], [], []>} : vector<128x288xbf16>, vector<288x256xbf16>, vector<128x256xf32> -> vector<128x256xf32>
    %c0_114 = arith.constant 0 : index
    %c0_115 = arith.constant 0 : index
    %231 = vector.load %arg8[%c0_114, %c0_115] : memref<128x1xf32, #tpu.memory_space<vmem>>, vector<128x1xf32>
    %232 = vector.broadcast %231 : vector<128x1xf32> to vector<128x256xf32>
    %233 = arith.addf %230, %232 : vector<128x256xf32>
    %234 = vector.extract_strided_slice %233 {offsets = [0, 0], sizes = [32, 256], strides = [1, 1]} : vector<128x256xf32> to vector<32x256xf32>
    %235 = arith.negf %234 : vector<32x256xf32>
    %236 = math.exp %235 : vector<32x256xf32>
    %cst_116 = arith.constant 1.000000e+00 : f32
    %237 = vector.broadcast %cst_116 : f32 to vector<32x256xf32>
    %238 = arith.addf %237, %236 : vector<32x256xf32>
    %239 = arith.divf %237, %238 : vector<32x256xf32>
    %240 = vector.extract_strided_slice %233 {offsets = [32, 0], sizes = [32, 256], strides = [1, 1]} : vector<128x256xf32> to vector<32x256xf32>
    %241 = arith.negf %240 : vector<32x256xf32>
    %242 = math.exp %241 : vector<32x256xf32>
    %cst_117 = arith.constant 1.000000e+00 : f32
    %243 = vector.broadcast %cst_117 : f32 to vector<32x256xf32>
    %244 = arith.addf %243, %242 : vector<32x256xf32>
    %245 = arith.divf %243, %244 : vector<32x256xf32>
    %246 = vector.extract_strided_slice %233 {offsets = [64, 0], sizes = [32, 256], strides = [1, 1]} : vector<128x256xf32> to vector<32x256xf32>
    %247 = math.tanh %246 : vector<32x256xf32>
    %248 = vector.extract_strided_slice %233 {offsets = [96, 0], sizes = [32, 256], strides = [1, 1]} : vector<128x256xf32> to vector<32x256xf32>
    %249 = arith.negf %248 : vector<32x256xf32>
    %250 = math.exp %249 : vector<32x256xf32>
    %cst_118 = arith.constant 1.000000e+00 : f32
    %251 = vector.broadcast %cst_118 : f32 to vector<32x256xf32>
    %252 = arith.addf %251, %250 : vector<32x256xf32>
    %253 = arith.divf %251, %252 : vector<32x256xf32>
    %254 = arith.mulf %245, %190 : vector<32x256xf32>
    %255 = arith.mulf %239, %247 : vector<32x256xf32>
    %256 = arith.addf %254, %255 : vector<32x256xf32>
    %257 = math.tanh %256 : vector<32x256xf32>
    %258 = arith.mulf %253, %257 : vector<32x256xf32>
    %c0_119 = arith.constant 0 : index
    %c128_120 = arith.constant 128 : index
    %259 = vector.load %arg12[%c0_119, %c128_120] : memref<32x512xf32, #tpu.memory_space<vmem>>, vector<32x256xf32>
    tpu.vector_store %arg12[%c0_119, %c128_120], %258 {strides = array<i32>} : memref<32x512xf32, #tpu.memory_space<vmem>>, vector<32x256xf32>,
    %c0_121 = arith.constant 0 : index
    %c111_122 = arith.constant 111 : index
    %260 = vector.load %arg12[%c0_121, %c111_122] : memref<32x512xf32, #tpu.memory_space<vmem>>, vector<32x256xf32>
    %261 = vector.broadcast %4 : vector<1x256xf32> to vector<32x256xf32>
    %262 = arith.mulf %260, %261 : vector<32x256xf32>
    %263 = arith.truncf %262 : vector<32x256xf32> to vector<32x256xbf16>
    %c0_123 = arith.constant 0 : index
    %c112_124 = arith.constant 112 : index
    %264 = vector.load %arg12[%c0_123, %c112_124] : memref<32x512xf32, #tpu.memory_space<vmem>>, vector<32x256xf32>
    %265 = vector.broadcast %5 : vector<1x256xf32> to vector<32x256xf32>
    %266 = arith.mulf %264, %265 : vector<32x256xf32>
    %267 = arith.truncf %266 : vector<32x256xf32> to vector<32x256xbf16>
    %c0_125 = arith.constant 0 : index
    %c113_126 = arith.constant 113 : index
    %268 = vector.load %arg12[%c0_125, %c113_126] : memref<32x512xf32, #tpu.memory_space<vmem>>, vector<32x256xf32>
    %269 = vector.broadcast %6 : vector<1x256xf32> to vector<32x256xf32>
    %270 = arith.mulf %268, %269 : vector<32x256xf32>
    %271 = arith.truncf %270 : vector<32x256xf32> to vector<32x256xbf16>
    %c0_127 = arith.constant 0 : index
    %c127_128 = arith.constant 127 : index
    %272 = vector.load %arg12[%c0_127, %c127_128] : memref<32x512xf32, #tpu.memory_space<vmem>>, vector<32x256xf32>
    %273 = vector.broadcast %7 : vector<1x256xf32> to vector<32x256xf32>
    %274 = arith.mulf %272, %273 : vector<32x256xf32>
    %275 = arith.truncf %274 : vector<32x256xf32> to vector<32x256xbf16>
    %c0_129 = arith.constant 0 : index
    %c128_130 = arith.constant 128 : index
    %276 = vector.load %arg12[%c0_129, %c128_130] : memref<32x512xf32, #tpu.memory_space<vmem>>, vector<32x256xf32>
    %277 = arith.truncf %276 : vector<32x256xf32> to vector<32x256xbf16>
    %c0_131 = arith.constant 0 : index
    %c129_132 = arith.constant 129 : index
    %278 = vector.load %arg12[%c0_131, %c129_132] : memref<32x512xf32, #tpu.memory_space<vmem>>, vector<32x256xf32>
    %279 = vector.broadcast %8 : vector<1x256xf32> to vector<32x256xf32>
    %280 = arith.mulf %278, %279 : vector<32x256xf32>
    %281 = arith.truncf %280 : vector<32x256xf32> to vector<32x256xbf16>
    %c0_133 = arith.constant 0 : index
    %c143_134 = arith.constant 143 : index
    %282 = vector.load %arg12[%c0_133, %c143_134] : memref<32x512xf32, #tpu.memory_space<vmem>>, vector<32x256xf32>
    %283 = vector.broadcast %9 : vector<1x256xf32> to vector<32x256xf32>
    %284 = arith.mulf %282, %283 : vector<32x256xf32>
    %285 = arith.truncf %284 : vector<32x256xf32> to vector<32x256xbf16>
    %c0_135 = arith.constant 0 : index
    %c144_136 = arith.constant 144 : index
    %286 = vector.load %arg12[%c0_135, %c144_136] : memref<32x512xf32, #tpu.memory_space<vmem>>, vector<32x256xf32>
    %287 = vector.broadcast %10 : vector<1x256xf32> to vector<32x256xf32>
    %288 = arith.mulf %286, %287 : vector<32x256xf32>
    %289 = arith.truncf %288 : vector<32x256xf32> to vector<32x256xbf16>
    %c0_137 = arith.constant 0 : index
    %c145_138 = arith.constant 145 : index
    %290 = vector.load %arg12[%c0_137, %c145_138] : memref<32x512xf32, #tpu.memory_space<vmem>>, vector<32x256xf32>
    %291 = vector.broadcast %11 : vector<1x256xf32> to vector<32x256xf32>
    %292 = arith.mulf %290, %291 : vector<32x256xf32>
    %293 = arith.truncf %292 : vector<32x256xf32> to vector<32x256xbf16>
    %294 = tpu.concatenate %263, %267, %271, %275, %277, %281, %285, %289, %293 in 0 : vector<32x256xbf16>, vector<32x256xbf16>, vector<32x256xbf16>, vector<32x256xbf16>, vector<32x256xbf16>, vector<32x256xbf16>, vector<32x256xbf16>, vector<32x256xbf16>, vector<32x256xbf16> -> vector<288x256xbf16>
    %c0_139 = arith.constant 0 : index
    %c0_140 = arith.constant 0 : index
    %295 = vector.load %arg7[%c0_139, %c0_140] : memref<128x288xbf16, #tpu.memory_space<vmem>>, vector<128x288xbf16>
    %cst_141 = arith.constant dense<0.000000e+00> : vector<128x256xf32>
    %296 = tpu.matmul %295, %294, %cst_141 {dimension_numbers = #tpu.dot_dimension_numbers<[1], [0], [0], [1], [0, 0, 1, 1], [], []>} : vector<128x288xbf16>, vector<288x256xbf16>, vector<128x256xf32> -> vector<128x256xf32>
    %c0_142 = arith.constant 0 : index
    %c0_143 = arith.constant 0 : index
    %297 = vector.load %arg8[%c0_142, %c0_143] : memref<128x1xf32, #tpu.memory_space<vmem>>, vector<128x1xf32>
    %298 = vector.broadcast %297 : vector<128x1xf32> to vector<128x256xf32>
    %299 = arith.addf %296, %298 : vector<128x256xf32>
    %300 = vector.extract_strided_slice %299 {offsets = [0, 0], sizes = [32, 256], strides = [1, 1]} : vector<128x256xf32> to vector<32x256xf32>
    %301 = arith.negf %300 : vector<32x256xf32>
    %302 = math.exp %301 : vector<32x256xf32>
    %cst_144 = arith.constant 1.000000e+00 : f32
    %303 = vector.broadcast %cst_144 : f32 to vector<32x256xf32>
    %304 = arith.addf %303, %302 : vector<32x256xf32>
    %305 = arith.divf %303, %304 : vector<32x256xf32>
    %306 = vector.extract_strided_slice %299 {offsets = [32, 0], sizes = [32, 256], strides = [1, 1]} : vector<128x256xf32> to vector<32x256xf32>
    %307 = arith.negf %306 : vector<32x256xf32>
    %308 = math.exp %307 : vector<32x256xf32>
    %cst_145 = arith.constant 1.000000e+00 : f32
    %309 = vector.broadcast %cst_145 : f32 to vector<32x256xf32>
    %310 = arith.addf %309, %308 : vector<32x256xf32>
    %311 = arith.divf %309, %310 : vector<32x256xf32>
    %312 = vector.extract_strided_slice %299 {offsets = [64, 0], sizes = [32, 256], strides = [1, 1]} : vector<128x256xf32> to vector<32x256xf32>
    %313 = math.tanh %312 : vector<32x256xf32>
    %314 = vector.extract_strided_slice %299 {offsets = [96, 0], sizes = [32, 256], strides = [1, 1]} : vector<128x256xf32> to vector<32x256xf32>
    %315 = arith.negf %314 : vector<32x256xf32>
    %316 = math.exp %315 : vector<32x256xf32>
    %cst_146 = arith.constant 1.000000e+00 : f32
    %317 = vector.broadcast %cst_146 : f32 to vector<32x256xf32>
    %318 = arith.addf %317, %316 : vector<32x256xf32>
    %319 = arith.divf %317, %318 : vector<32x256xf32>
    %320 = arith.mulf %311, %256 : vector<32x256xf32>
    %321 = arith.mulf %305, %313 : vector<32x256xf32>
    %322 = arith.addf %320, %321 : vector<32x256xf32>
    %323 = math.tanh %322 : vector<32x256xf32>
    %324 = arith.mulf %319, %323 : vector<32x256xf32>
    %c0_147 = arith.constant 0 : index
    %c0_148 = arith.constant 0 : index
    %325 = vector.load %arg9[%c0_147, %c0_148] : memref<32x32xbf16, #tpu.memory_space<vmem>>, vector<32x32xbf16>
    %326 = arith.truncf %324 : vector<32x256xf32> to vector<32x256xbf16>
    %cst_149 = arith.constant dense<0.000000e+00> : vector<32x256xf32>
    %327 = tpu.matmul %325, %326, %cst_149 {dimension_numbers = #tpu.dot_dimension_numbers<[1], [0], [0], [1], [0, 0, 1, 1], [], []>} : vector<32x32xbf16>, vector<32x256xbf16>, vector<32x256xf32> -> vector<32x256xf32>
    %c0_150 = arith.constant 0 : index
    %c0_151 = arith.constant 0 : index
    %328 = vector.load %arg10[%c0_150, %c0_151] : memref<32x1xf32, #tpu.memory_space<vmem>>, vector<32x1xf32>
    %329 = vector.broadcast %328 : vector<32x1xf32> to vector<32x256xf32>
    %330 = arith.addf %327, %329 : vector<32x256xf32>
    %cst_152 = arith.constant dense<0xFF800000> : vector<256xf32>
    %331 = vector.multi_reduction <maximumf>, %330, %cst_152 [0] : vector<32x256xf32> to vector<256xf32>
    %332 = vector.shape_cast %331 : vector<256xf32> to vector<1x256xf32>
    %333 = vector.broadcast %332 : vector<1x256xf32> to vector<32x256xf32>
    %334 = arith.subf %330, %333 : vector<32x256xf32>
    %335 = math.exp %334 : vector<32x256xf32>
    %cst_153 = arith.constant dense<0.000000e+00> : vector<256xf32>
    %336 = vector.multi_reduction <add>, %335, %cst_153 [0] : vector<32x256xf32> to vector<256xf32>
    %337 = vector.shape_cast %336 : vector<256xf32> to vector<1x256xf32>
    %338 = tpu.reciprocal %337 {approx = true} : vector<1x256xf32> -> vector<1x256xf32>
    %339 = vector.broadcast %338 : vector<1x256xf32> to vector<32x256xf32>
    %340 = arith.mulf %335, %339 : vector<32x256xf32>
    %341 = tpu.concatenate %59, %324, %327, %340 in 0 : vector<32x256xf32>, vector<32x256xf32>, vector<32x256xf32>, vector<32x256xf32> -> vector<128x256xf32>
    %c0_154 = arith.constant 0 : index
    %c0_155 = arith.constant 0 : index
    %342 = vector.load %arg11[%c0_154, %c0_155] : memref<128x256xf32, #tpu.memory_space<vmem>>, vector<128x256xf32>
    tpu.vector_store %arg11[%c0_154, %c0_155], %341 {strides = array<i32>} : memref<128x256xf32, #tpu.memory_space<vmem>>, vector<128x256xf32>,
    return
  }
  func.func @transform_0(%arg0: i32) -> (i32, i32) {
    %c0_i32 = arith.constant 0 : i32
    %c0_i32_0 = arith.constant 0 : i32
    return %c0_i32, %arg0 : i32, i32
  }
  func.func @transform_1(%arg0: i32) -> (i32, i32) {
    %c0_i32 = arith.constant 0 : i32
    %c0_i32_0 = arith.constant 0 : i32
    %c0_i32_1 = arith.constant 0 : i32
    return %c0_i32, %c0_i32_0 : i32, i32
  }
  func.func @transform_2(%arg0: i32) -> (i32, i32) {
    %c0_i32 = arith.constant 0 : i32
    %c0_i32_0 = arith.constant 0 : i32
    %c0_i32_1 = arith.constant 0 : i32
    return %c0_i32, %c0_i32_0 : i32, i32
  }
  func.func @transform_3(%arg0: i32) -> (i32, i32) {
    %c0_i32 = arith.constant 0 : i32
    %c0_i32_0 = arith.constant 0 : i32
    %c0_i32_1 = arith.constant 0 : i32
    return %c0_i32, %c0_i32_0 : i32, i32
  }
  func.func @transform_4(%arg0: i32) -> (i32, i32) {
    %c0_i32 = arith.constant 0 : i32
    %c0_i32_0 = arith.constant 0 : i32
    %c0_i32_1 = arith.constant 0 : i32
    return %c0_i32, %c0_i32_0 : i32, i32
  }
  func.func @transform_5(%arg0: i32) -> (i32, i32) {
    %c0_i32 = arith.constant 0 : i32
    %c0_i32_0 = arith.constant 0 : i32
    %c0_i32_1 = arith.constant 0 : i32
    return %c0_i32, %c0_i32_0 : i32, i32
  }
  func.func @transform_6(%arg0: i32) -> (i32, i32) {
    %c0_i32 = arith.constant 0 : i32
    %c0_i32_0 = arith.constant 0 : i32
    %c0_i32_1 = arith.constant 0 : i32
    return %c0_i32, %c0_i32_0 : i32, i32
  }
  func.func @transform_7(%arg0: i32) -> (i32, i32) {
    %c0_i32 = arith.constant 0 : i32
    %c0_i32_0 = arith.constant 0 : i32
    %c0_i32_1 = arith.constant 0 : i32
    return %c0_i32, %c0_i32_0 : i32, i32
  }
  func.func @transform_8(%arg0: i32) -> (i32, i32) {
    %c0_i32 = arith.constant 0 : i32
    %c0_i32_0 = arith.constant 0 : i32
    %c0_i32_1 = arith.constant 0 : i32
    return %c0_i32, %c0_i32_0 : i32, i32
  }
  func.func @transform_9(%arg0: i32) -> (i32, i32) {
    %c0_i32 = arith.constant 0 : i32
    %c0_i32_0 = arith.constant 0 : i32
    %c0_i32_1 = arith.constant 0 : i32
    return %c0_i32, %c0_i32_0 : i32, i32
  }
  func.func @transform_10(%arg0: i32) -> (i32, i32) {
    %c0_i32 = arith.constant 0 : i32
    %c0_i32_0 = arith.constant 0 : i32
    return %c0_i32, %arg0 : i32, i32
  }
}

</mosaic_0001>

<bundles_post_ra>
// kernel: planner_forward.1
= control target key start
LH: loop header
LB: loop body
LE: loop exit
PB: predicated region body
PF: predicated region fallthrough
CT: control target
= control target key end

     0   :  { %s11975_s0 = inlined_call_operand.vmem [shape: bf16[32,512], index: 0, kind: input, shape index: {}]   ;;  %s11976_s1 = inlined_call_operand.vmem [shape: f32[16,256], index: 1, kind: input, shape index: {}]   ;;  %s11977_s2 = inlined_call_operand.vmem [shape: bf16[32,32], index: 2, kind: input, shape index: {}]   ;;  %s11978_s3 = inlined_call_operand.vmem [shape: f32[32,1], index: 3, kind: input, shape index: {}]   ;;  %s11979_s4 = inlined_call_operand.vmem [shape: bf16[64,288], index: 4, kind: input, shape index: {}]   ;;  %s11980_s5 = inlined_call_operand.vmem [shape: f32[64,1], index: 5, kind: input, shape index: {}]   ;;  %s11981_s6 = inlined_call_operand.vmem [shape: bf16[128,288], index: 6, kind: input, shape index: {}]   ;;  %s11982_s7 = inlined_call_operand.vmem [shape: f32[128,1], index: 7, kind: input, shape index: {}]   ;;  %s11983_s8 = inlined_call_operand.vmem [shape: bf16[32,32], index: 8, kind: input, shape index: {}]   ;;  %s11984_s9 = inlined_call_operand.vmem [shape: f32[32,1], index: 9, kind: input, shape index: {}]   ;;  %s11985_s10 = inlined_call_operand.vmem [shape: f32[128,512], index: 10, kind: output, shape index: {}]  }
   0x1   :  { %12048 = sst [smem:[#allocation19_spill]] %s11975_s0 }
   0x2   :  { %12049 = sst [smem:[#allocation20_spill]] %s11976_s1 }
   0x3   :  { %12050 = sst [smem:[#allocation21_spill]] %s11977_s2 }
   0x4   :  { %12051 = sst [smem:[#allocation22_spill]] %s11978_s3 }
   0x5   :  { %12052 = sst [smem:[#allocation23_spill]] %s11979_s4 }
   0x6   :  { %s8185_s13 = smov 0   ;;  %s8187_s14 = smov 0  }
   0x7   :  { %s8189_s15 = smov 0  }
   0x8 LB: > { %s11990_s16 = sadd.s32 4294967295, %s8114_s15   ;;  %s8202_s17 = sadd.s32 1, %s8114_s15   ;;  %s8114_s15 = sphi %s8189_s15, %s12164_s15   ;;  %s8110_s14 = sphi %s8187_s14, %s12163_s14   ;;  %s8106_s13 = sphi %s8185_s13, %s12162_s13  }
   0x9   : > { %s24_s18 = ssub.s32 %s8114_s15, %s8202_s17  ;;  %s27_s19 = sadd.s32 1, %s8110_s14 }
   0xa   : > { %p25_p0 = scmp.eq.s32.totalorder %s24_s18, 0  ;;  %p34_p1 = scmp.ne.s32.totalorder %s8110_s14, %s8106_s13 }
   0xb   : > { %p35_p2 = scmp.eq.s32.totalorder %s8114_s15, 0  ;;  %p253_p3 = scmp.eq.s32.totalorder %s11990_s16, 1 }
   0xc   : > { %s8213_s20 = scalar_select %p25_p0, %s8110_s14, %s27_s19  }
   0xd   : > { %p36_p4 = por %p35_p2, %p34_p1  ;;  %p8215_p5 = por %p253_p3, %p34_p1 }
   0xe   : > { %p6773_p6 = scmp.ge.s32.totalorder %s8114_s15, 2 }
  0x10   : > { %302 = sbr.rel (%p6773_p6) target bundleno = 35 (0x23), region = 52 }
  0x17   : > { %305 = sbr.rel (!%p36_p4) target bundleno = 35 (0x23), region = 56  ;;  %s307_s22 = sand.u32 (%p36_p4), 1, %s8110_s14  }
  0x18   : > { %s7044_s23 = sshll.u32 (%p36_p4), %s8114_s15, 3  ;;  %s6774_s24 = sshll.u32 (%p36_p4), %s307_s22, 5 }
  0x19   : > { %s12054_s0 = sld [smem:[#allocation19_spill]] (%p36_p4)  ;;  %s309_s28 = scalar_lea.vmem (%p36_p4), [#allocation3], %s6774_s24 }
  0x1f   : > { %s312_s27 = scalar_lea.vmem %s12054_s0, %s7044_s23 }
  0x20   : > { %v346_v0 = vld [vmem:[%s312_s27] sm:$0xff]  ;;  %v348_v1 = vld [vmem:[%s312_s27 + $0x10] sm:$0xff] }
  0x21   : > { %v350_v2 = vld [vmem:[%s312_s27 + $0x20] sm:$0xff]  ;;  %347 = vst [vmem:[%s309_s28] sm:$0xff] %v346_v0  ;;  %349 = vst [vmem:[%s309_s28 + $0x8] sm:$0xff] %v348_v1  ;;  %v352_v3 = vld [vmem:[%s312_s27 + $0x30] sm:$0xff] }
  0x22   : > { %351 = vst [vmem:[%s309_s28 + $0x10] sm:$0xff] %v350_v2  ;;  %353 = vst [vmem:[%s309_s28 + $0x18] sm:$0xff] %v352_v3 }
  0x23 PF: > { %p6777_p7 = scmp.ge.s32.totalorder %s8114_s15, 1  ;;  %p358_p8 = scmp.lt.s32.totalorder %s8114_s15, 3 }
  0x25   : > { %p359_p9 = pnand %p6777_p7, %p358_p8 }
  0x27   : > { %362 = sbr.rel (%p359_p9) target bundleno = 4167 (0x1047), region = 94 }
  0x2e   : > { %s365_s29 = sand.u32 1, %s8106_s13   ;;  %v570_v4 = vlaneseq  ;;  %v11986_v5 = vmov 0   ;;  %s12055_s3 = sld [smem:[#allocation22_spill]]  ;;  %vm489_vm0 = vcmask 261120   ;;  %vm618_vm1 = vcmask 916480  }
  0x2f   : > { %s6778_s30 = sshll.u32 %s365_s29, 5  ;;  %528 = vmatprep.mubr.bf16.mxu0 %v11986_v5  ;;  %7405 = vset.pattern.permute.xlu1 %v11986_v5  ;;  %s12056_s1 = sld [smem:[#allocation20_spill]]  ;;  %vm654_vm2 = vcmask 924672   ;;  %vm690_vm3 = vcmask 1039360   ;;  %vm742_vm4 = vcmask 7168   ;;  %vm778_vm5 = vcmask 121856  }
  0x30   : > { %7404 = vset.pattern.permute.xlu0 %v11986_v5  ;;  %s367_s18 = scalar_lea.vmem [#allocation3], %s6778_s30  ;;  %v571_v8 = vshrl.u32 %v570_v4, 7  ;;  %s12057_s2 = sld [smem:[#allocation21_spill]]  ;;  %vm582_vm6 = vcmask 908288   ;;  %vm814_vm7 = vcmask 130048   ;;  %vm850_vm8 = vcmask 138240  }
  0x31   : > { %v7406_v7 = vld [vmem:[%s367_s18 + $0x4] ss:$8 sps:$4 sm:$0xff]   ;;  %v7408_v9 = vld [vmem:[%s367_s18] ss:$8 sps:$4 sm:$0xff]   ;;  %v7409_v10 = vld [vmem:[%s367_s18 + $0x14] ss:$8 sps:$4 sm:$0xff]  }
  0x32   : > { %496 = vmatprep.subr.bf16.mxu0 %v7406_v7  ;;  %v7411_v11 = vld [vmem:[%s367_s18 + $0x10] ss:$8 sps:$4 sm:$0xff]   ;;  %v8239_v13 = vsub.s32 1, %v571_v8  ;;  %v572_v16 = vsub.s32 0, %v571_v8  ;;  %s12007_s19 = smov 112   ;;  %s8118_s28 = smov 113  }
  0x33   : > { %497 = vmatpush1.bf16.msra.mxu0 %v7408_v9  ;;  %s12032_s12 = smov 127   ;;  %s8120_s23 = smov 1   ;;  %vm914_vm9 = vcmask 1031168   ;;  %vm975_vm10 = vcmask 900096   ;;  %vm998_vm11 = vcmask 785408   ;;  %vm1021_vm12 = vcmask 777216  }
  0x34   : > { %v437_v6 = vld [vmem:[%s12055_s3 + $0x10] sm:$0xff]  ;;  %v435_v12 = vld [vmem:[%s12055_s3] sm:$0xff]  ;;  %v438_v14 = vld [vmem:[%s12055_s3 + $0x18] sm:$0xff]  ;;  %498 = vmatprep.subr.bf16.mxu0 %v7409_v10  ;;  %s8121_s26 = smov 15   ;;  %s8122_s27 = smov 16   ;;  %vm1044_vm13 = vcmask 769024  }
  0x35   : > { %451 = vperm.xlu1 %7405, %v437_v6   ;;  %441 = vperm.xlu0 %7404, %v435_v12   ;;  %v6780_v15 = vld [vmem:[%s12056_s1 + $0x1] ss:$8 sm:$0x3]  ;;  %v6781_v19 = vld [vmem:[%s12056_s1 + $0x2] ss:$8 sm:$0x3] }
  0x36   : > { %v436_v17 = vld [vmem:[%s12055_s3 + $0x8] sm:$0xff]  ;;  %v613_v18 = vrot.slane %v6780_v15, %v8239_v13  ;;  %v7412_v20 = vld [vmem:[%s12057_s2] sm:$0xff]   ;;  %v609_v21 = vrot.slane %v6780_v15, %v572_v16  ;;  %v649_v22 = vrot.slane %v6781_v19, %v8239_v13  ;;  %v645_v24 = vrot.slane %v6781_v19, %v572_v16  ;;  %v6786_v35 = vld [vmem:[%s12056_s1 + $0x10] ss:$8 sm:$0x3]  ;;  %s12009_s11 = smov 17  }
  0x37   : > { %499 = vmatpush1.bf16.msra.mxu0 %v7411_v11  ;;  %v6782_v23 = vld [vmem:[%s12056_s1 + $0x3] ss:$8 sm:$0x3]  ;;  %v6783_v25 = vld [vmem:[%s12056_s1 + $0x5] ss:$8 sm:$0x3]  ;;  %v845_v38 = vrot.slane %v6786_v35, %v8239_v13  ;;  %v841_v40 = vrot.slane %v6786_v35, %v572_v16 }
  0x38   : > { %v7413_v26 = vld [vmem:[%s12057_s2 + $0x8] sm:$0xff]   ;;  %v685_v27 = vrot.slane %v6782_v23, %v8239_v13  ;;  %v681_v28 = vrot.slane %v6782_v23, %v572_v16  ;;  %v737_v30 = vrot.slane %v6783_v25, %v8239_v13  ;;  %v733_v31 = vrot.slane %v6783_v25, %v572_v16  ;;  %s11993_s18 = smov 111   ;;  %s12011_s22 = smov 126  }
  0x39   : > { %456 = vperm.xlu1 %7405, %v438_v14   ;;  %446 = vperm.xlu0 %7404, %v436_v17   ;;  %v6784_v29 = vld [vmem:[%s12056_s1 + $0x6] ss:$8 sm:$0x3]  ;;  %v6785_v32 = vld [vmem:[%s12056_s1 + $0x7] ss:$8 sm:$0x3] }
  0x3a   : > { %6793 = vmatmul.mubr.msk.bf16.vlgmr.msra.gmra.mrb[0].mxu0 %vm489_vm0, %v7412_v20  ;;  %v773_v33 = vrot.slane %v6784_v29, %v8239_v13  ;;  %v769_v34 = vrot.slane %v6784_v29, %v572_v16  ;;  %v809_v36 = vrot.slane %v6785_v32, %v8239_v13  ;;  %v805_v37 = vrot.slane %v6785_v32, %v572_v16  ;;  %v412_v39 = vld [vmem:[%s12056_s1] ss:$8 sm:$0x3]  ;;  %s12003_s24 = smov 96   ;;  %s12001_s25 = smov 95  }
  0x3b   : > { %538 = vmatprep.mubr.bf16.mxu0 %v11986_v5  ;;  %v577_v41 = vrot.slane %v412_v39, %v8239_v13  ;;  %v573_v42 = vrot.slane %v412_v39, %v572_v16  ;;  %s12073_s4 = sld [smem:[#allocation23_spill]]  ;;  %s6779_s16 = sshll.u32 %s365_s29, 8 }
  0x3c   : > { %s8902_s30 = scalar_lea.vmem [#allocation4], %s6779_s16  ;;  %s12075_s13 = smov 111  }
  0x3d   : > { %616 = vrot.lane.b32.xlu1 %v613_v18, %s12007_s19  ;;  %614 = vrot.lane.b32.xlu0 %v609_v21, %s12007_s19  ;;  %s12083_s29 = smov 94   ;;  %s12085_s16 = smov 112  }
  0x3e   : > { %s12161_s1 = sadd.s32 (%p8215_p5), 4294967295, %s8114_s15  }
  0x41   : > { %652 = vrot.lane.b32.xlu1 %v649_v22, %s8118_s28  ;;  %650 = vrot.lane.b32.xlu0 %v645_v24, %s8118_s28  ;;  %s7045_s28 = sshll.u32 (%p8215_p5), %s12161_s1, 4 }
  0x42   : > { %6794 = vmatmul.mubr.msk.bf16.gmra.mrb[4].mxu0 %vm489_vm0, %v7413_v26  ;;  %s11902_s21 = scalar_lea.vmem (%p8215_p5), %s11985_s10, %s7045_s28 }
  0x43   : > { %1477 = vmatprep.mubr.bf16.mxu0 %v11986_v5 }
  0x45   : > { %688 = vrot.lane.b32.xlu1 %v685_v27, %s12032_s12  ;;  %686 = vrot.lane.b32.xlu0 %v681_v28, %s12032_s12 }
  0x49   : > { %740 = vrot.lane.b32.xlu1 %v737_v30, %s8120_s23  ;;  %738 = vrot.lane.b32.xlu0 %v733_v31, %s8120_s23  ;;  %s12005_s23 = smov 110  }
  0x4d   : > { %776 = vrot.lane.b32.xlu1 %v773_v33, %s8121_s26  ;;  %774 = vrot.lane.b32.xlu0 %v769_v34, %s8121_s26  ;;  %s11991_s26 = smov 94  }
  0x51   : > { %812 = vrot.lane.b32.xlu1 %v809_v36, %s8122_s27  ;;  %810 = vrot.lane.b32.xlu0 %v805_v37, %s8122_s27 }
  0x55   : > { %848 = vrot.lane.b32.xlu1 %v845_v38, %s12009_s11  ;;  %846 = vrot.lane.b32.xlu0 %v841_v40, %s12009_s11 }
  0x59   : > { %580 = vrot.lane.b32.xlu1 %v577_v41, %s11993_s18  ;;  %578 = vrot.lane.b32.xlu0 %v573_v42, %s11993_s18 }
  0xb4   : > { %v8297_v43 = vpop.permute.xlu1 %451  ;;  %v8299_v44 = vpop.permute.xlu0 %441 }
  0xb8   : > { %v8301_v45 = vpop.permute.xlu1 %456  ;;  %v8303_v46 = vpop.permute.xlu0 %446 }
  0xbc   : > { %v8305_v47 = vpop.permute.xlu1 %616  ;;  %v615_v48 = vpop.permute.xlu0 %614 }
  0xbd   : > { %12058 = vst [vmem:[#allocation5_spill] sm:$0xff] %v8305_v47  ;;  %v623_v49 = vmul.f32 0.0, %v615_v48  ;;  %v8371_v16 = vsel %vm618_vm1, %v615_v48, %v8305_v47 }
  0xbe   : > { %12063 = vst [vmem:[#allocation10_spill] sm:$0xff] %v8371_v16 }
  0xbf   : > { %v8309_v51 = vpack.c.bf16 %v623_v49, %v623_v49 }
  0xc0   : > { %v8307_v50 = vpop.permute.xlu1 %652  ;;  %v651_v52 = vpop.permute.xlu0 %650 }
  0xc1   : > { %12059 = vst [vmem:[#allocation6_spill] sm:$0xff] %v8307_v50  ;;  %v659_v53 = vmul.f32 0.0, %v651_v52  ;;  %879 = vrot.lane.b32.xlu0 %v8309_v51, %s12032_s12  ;;  %885 = vrot.lane.b32.xlu1 %v8309_v51, %s12032_s12  ;;  %v8374_v17 = vsel %vm654_vm2, %v651_v52, %v8307_v50 }
  0xc2   : > { %12064 = vst [vmem:[#allocation11_spill] sm:$0xff] %v8374_v17 }
  0xc3   : > { %v8317_v55 = vpack.c.bf16 %v659_v53, %v659_v53 }
  0xc4   : > { %v8313_v54 = vpop.permute.xlu1 %688  ;;  %v687_v56 = vpop.permute.xlu0 %686 }
  0xc5   : > { %12060 = vst [vmem:[#allocation7_spill] sm:$0xff] %v8313_v54  ;;  %v695_v57 = vmul.f32 0.0, %v687_v56  ;;  %902 = vrot.lane.b32.xlu0 %v8317_v55, %s12011_s22  ;;  %908 = vrot.lane.b32.xlu1 %v8317_v55, %s12011_s22  ;;  %v8378_v19 = vsel %vm690_vm3, %v687_v56, %v8313_v54 }
  0xc7   : > { %v8323_v60 = vpack.c.bf16 %v695_v57, %v695_v57 }
  0xc8   : > { %v741_v58 = vpop.permute.xlu1 %740  ;;  %v8325_v61 = vpop.permute.xlu0 %738 }
  0xc9   : > { %v749_v59 = vmul.f32 0.0, %v741_v58  ;;  %925 = vrot.lane.b32.xlu0 %v8323_v60, %s12007_s19  ;;  %931 = vrot.lane.b32.xlu1 %v8323_v60, %s12007_s19  ;;  %v8382_v22 = vsel %vm742_vm4, %v8325_v61, %v741_v58 }
  0xca   : > { %12065 = vst [vmem:[#allocation12_spill] sm:$0xff] %v8382_v22 }
  0xcb   : > { %v8327_v62 = vpack.c.bf16 %v749_v59, %v749_v59 }
  0xcc   : > { %v777_v63 = vpop.permute.xlu1 %776  ;;  %v8333_v1 = vpop.permute.xlu0 %774 }
  0xcd   : > { %v785_v0 = vmul.f32 0.0, %v777_v63  ;;  %12061 = vst [vmem:[#allocation8_spill] sm:$0xff] %v8333_v1  ;;  %967 = vrot.lane.b32.xlu0 %v8327_v62, %s12005_s23  ;;  %973 = vrot.lane.b32.xlu1 %v8327_v62, %s12005_s23  ;;  %v8385_v23 = vsel %vm778_vm5, %v8333_v1, %v777_v63 }
  0xce   : > { %12066 = vst [vmem:[#allocation13_spill] sm:$0xff] %v8385_v23 }
  0xcf   : > { %v8335_v2 = vpack.c.bf16 %v785_v0, %v785_v0 }
  0xd0   : > { %v813_v3 = vpop.permute.xlu1 %812  ;;  %v8341_v6 = vpop.permute.xlu0 %810 }
  0xd1   : > { %v821_v4 = vmul.f32 0.0, %v813_v3  ;;  %990 = vrot.lane.b32.xlu0 %v8335_v2, %s12003_s24  ;;  %996 = vrot.lane.b32.xlu1 %v8335_v2, %s12003_s24  ;;  %v8395_v27 = vsel %vm814_vm7, %v8341_v6, %v813_v3 }
  0xd3   : > { %v8343_v7 = vpack.c.bf16 %v821_v4, %v821_v4 }
  0xd4   : > { %v849_v8 = vpop.permute.xlu1 %848  ;;  %v8351_v11 = vpop.permute.xlu0 %846 }
  0xd5   : > { %v857_v9 = vmul.f32 0.0, %v849_v8  ;;  %1013 = vrot.lane.b32.xlu0 %v8343_v7, %s12001_s25  ;;  %v8399_v28 = vsel %vm850_vm8, %v8351_v11, %v849_v8 }
  0xd7   : > { %v8349_v10 = vpack.c.bf16 %v857_v9, %v857_v9 }
  0xd8   : > { %v579_v12 = vpop.permute.xlu0 %578  ;;  %v8367_v15 = vpop.permute.xlu1 %580 }
  0xd9   : > { %12062 = vst [vmem:[#allocation9_spill] sm:$0xff] %v8349_v10  ;;  %1036 = vrot.lane.b32.xlu1 %v8349_v10, %s11991_s26  ;;  %v587_v13 = vmul.f32 0.0, %v579_v12  ;;  %1019 = vrot.lane.b32.xlu0 %v8343_v7, %s12001_s25  ;;  %v8392_v26 = vsel %vm582_vm6, %v579_v12, %v8367_v15 }
  0xdb   : > { %v8359_v14 = vpack.c.bf16 %v587_v13, %v587_v13 }
  0xdd   : > { %1042 = vrot.lane.b32.xlu0 %v8349_v10, %s11991_s26  ;;  %1179 = vrot.lane.b32.xlu1 %v8359_v14, %s12009_s11 }
  0xe1   : > { %1185 = vrot.lane.b32.xlu1 %v8359_v14, %s12009_s11 }
 0x10d   : > { %v530_v18 = vpop.f32.mrb[0].mxu0 }
 0x10e   : > { %v531_v20 = vadd.f32 %v530_v18, %v8299_v44  ;;  %v532_v21 = vpop.f32.mrb[1].mxu0 }
 0x10f   : > { %v8388_v24 = vadd.f32 %v532_v21, %v8299_v44  ;;  %v534_v25 = vpop.f32.mrb[2].mxu0 }
 0x110   : > { %v535_v29 = vadd.f32 %v534_v25, %v8303_v46  ;;  %v536_v30 = vpop.f32.mrb[3].mxu0  ;;  %v624_v31 = vmul.f32 %v8371_v16, %v531_v20  ;;  %v855_v32 = vmul.f32 %v8351_v11, %v531_v20  ;;  %v660_v33 = vmul.f32 %v8374_v17, %v531_v20 }
 0x111   : > { %v537_v34 = vadd.f32 %v536_v30, %v8303_v46  ;;  %v625_v35 = vmul.f32 %v8305_v47, %v8388_v24  ;;  %v8409_v36 = vmul.f32 %v8378_v19, %v531_v20  ;;  %v8413_v37 = vmul.f32 %v8307_v50, %v8388_v24 }
 0x112   : > { %v713_v38 = vpack.c.bf16 %v535_v29, %v531_v20  ;;  %v627_v39 = vmul.f32 %v8371_v16, %v535_v29  ;;  %v858_v40 = vmul.f32 %v8351_v11, %v535_v29  ;;  %v663_v41 = vmul.f32 %v8374_v17, %v535_v29 }
 0x113   : > { %v714_v42 = vpack.c.bf16 %v537_v34, %v8388_v24  ;;  %v628_v44 = vmul.f32 %v8305_v47, %v537_v34  ;;  %v699_v46 = vmul.f32 %v8378_v19, %v535_v29  ;;  %v8422_v48 = vmul.f32 %v8307_v50, %v537_v34 }
 0x114   : > { %946 = vrot.lane.b32.xlu0 %v713_v38, %s11993_s18  ;;  %v636_v49 = vpack.c.bf16 %v627_v39, %v624_v31  ;;  %v867_v52 = vpack.c.bf16 %v858_v40, %v855_v32  ;;  %v672_v53 = vpack.c.bf16 %v663_v41, %v660_v33  ;;  %v8426_v56 = vmul.f32 %v8325_v61, %v531_v20 }
 0x115   : > { %v540_v57 = vpop.f32.mrb[4].mxu0  ;;  %948 = vrot.lane.b32.xlu1 %v714_v42, %s11993_s18  ;;  %v637_v58 = vpack.c.bf16 %v628_v44, %v625_v35  ;;  %v708_v59 = vpack.c.bf16 %v699_v46, %v8409_v36  ;;  %v673_v63 = vpack.c.bf16 %v8422_v48, %v8413_v37  ;;  %v8433_v0 = vmul.f32 %v8325_v61, %v535_v29 }
 0x116   : > { %v8436_v3 = vadd.f32 %v540_v57, %v8297_v43  ;;  %v542_v4 = vpop.f32.mrb[5].mxu0  ;;  %v8440_v8 = vmul.f32 %v8313_v54, %v8388_v24  ;;  %v8443_v9 = vmul.f32 %v8313_v54, %v537_v34  ;;  %v8446_v12 = vmul.f32 %v8333_v1, %v531_v20 }
 0x117   : > { %v8449_v13 = vadd.f32 %v542_v4, %v8297_v43  ;;  %v544_v18 = vpop.f32.mrb[6].mxu0  ;;  %v759_v21 = vpack.c.bf16 %v8433_v0, %v8426_v56  ;;  %v8454_v25 = vmul.f32 %v8333_v1, %v535_v29  ;;  %v8458_v30 = vmul.f32 %v8382_v22, %v8388_v24 }
 0x118   : > { %v8461_v31 = vadd.f32 %v544_v18, %v8301_v45  ;;  %v546_v32 = vpop.f32.mrb[7].mxu0  ;;  %881 = vrot.lane.b32.xlu0 %v636_v49, %s12032_s12  ;;  %v709_v43 = vpack.c.bf16 %v8443_v9, %v8440_v8  ;;  %v8467_v33 = vmul.f32 %v8382_v22, %v537_v34  ;;  %v8470_v35 = vmul.f32 %v8341_v6, %v531_v20 }
 0x119   : > { %v8473_v36 = vadd.f32 %v546_v32, %v8301_v45  ;;  %1032 = vrot.lane.b32.xlu1 %v867_v52, %s11991_s26  ;;  %v795_v37 = vpack.c.bf16 %v8454_v25, %v8446_v12  ;;  %v8479_v38 = vmul.f32 %v8341_v6, %v535_v29  ;;  %v8483_v39 = vmul.f32 %v8385_v23, %v8388_v24 }
 0x11a   : > { %v8488_v41 = vmul.f32 %v8385_v23, %v537_v34  ;;  %v8491_v45 = vmul.f32 %v8392_v26, %v531_v20  ;;  %v8494_v42 = vmul.f32 %v8392_v26, %v535_v29  ;;  %v8500_v46 = vmul.f32 %v8395_v27, %v8388_v24 }
 0x11b   : > { %v8503_v48 = vmul.f32 %v8395_v27, %v537_v34  ;;  %v8507_v49 = vmul.f32 %v8399_v28, %v8388_v24  ;;  %v8515_v52 = vmul.f32 %v8399_v28, %v537_v34  ;;  %v8519_v56 = vmul.f32 %v8367_v15, %v8388_v24 }
 0x11c   : > { %904 = vrot.lane.b32.xlu0 %v672_v53, %s12011_s22  ;;  %v8525_v53 = vmul.f32 %v8367_v15, %v537_v34  ;;  %v8535_v24 = vmul.f32 %v8341_v6, %v8436_v3  ;;  %v630_v34 = vmul.f32 %v8371_v16, %v8436_v3  ;;  %v633_v18 = vmul.f32 %v8371_v16, %v8461_v31 }
 0x11d   : > { %883 = vrot.lane.b32.xlu1 %v637_v58, %s12032_s12  ;;  %v832_v57 = vpack.c.bf16 %v8503_v48, %v8500_v46  ;;  %v868_v8 = vpack.c.bf16 %v8515_v52, %v8507_v49  ;;  %v828_v58 = vmul.f32 %v8341_v6, %v8461_v31  ;;  %v861_v32 = vmul.f32 %v8351_v11, %v8436_v3 }
 0x11e   : > { %v601_v9 = vpack.c.bf16 %v8525_v53, %v8519_v56  ;;  %v864_v46 = vmul.f32 %v8351_v11, %v8461_v31  ;;  %v666_v49 = vmul.f32 %v8374_v17, %v8436_v3  ;;  %v669_v52 = vmul.f32 %v8374_v17, %v8461_v31 }
 0x11f   : > { %v834_v48 = vpack.c.bf16 %v828_v58, %v8535_v24  ;;  %v631_v56 = vmul.f32 %v8305_v47, %v8449_v13  ;;  %v639_v53 = vpack.c.bf16 %v633_v18, %v630_v34  ;;  %v634_v4 = vmul.f32 %v8305_v47, %v8473_v36 }
 0x120   : > { %927 = vrot.lane.b32.xlu0 %v708_v59, %s12007_s19  ;;  %v870_v5 = vpack.c.bf16 %v864_v46, %v861_v32  ;;  %v702_v59 = vmul.f32 %v8378_v19, %v8436_v3  ;;  %v675_v24 = vpack.c.bf16 %v669_v52, %v666_v49  ;;  %v705_v58 = vmul.f32 %v8378_v19, %v8461_v31 }
 0x121   : > { %906 = vrot.lane.b32.xlu1 %v673_v63, %s12011_s22  ;;  %v667_v0 = vmul.f32 %v8307_v50, %v8449_v13  ;;  %v670_v29 = vmul.f32 %v8307_v50, %v8473_v36  ;;  %v640_v20 = vpack.c.bf16 %v634_v4, %v631_v56  ;;  %v753_v63 = vmul.f32 %v8325_v61, %v8436_v3 }
 0x122   : > { %v756_v34 = vmul.f32 %v8325_v61, %v8461_v31  ;;  %v703_v18 = vmul.f32 %v8313_v54, %v8449_v13  ;;  %v711_v32 = vpack.c.bf16 %v705_v58, %v702_v59  ;;  %v706_v49 = vmul.f32 %v8313_v54, %v8473_v36 }
 0x123   : > { %v676_v46 = vpack.c.bf16 %v670_v29, %v667_v0  ;;  %v789_v52 = vmul.f32 %v8333_v1, %v8436_v3  ;;  %v792_v56 = vmul.f32 %v8333_v1, %v8461_v31  ;;  %v754_v44 = vmul.f32 %v8382_v22, %v8449_v13 }
 0x124   : > { %963 = vrot.lane.b32.xlu0 %v759_v21, %s12005_s23  ;;  %v762_v4 = vpack.c.bf16 %v756_v34, %v753_v63  ;;  %v757_v21 = vmul.f32 %v8382_v22, %v8473_v36  ;;  %v712_v59 = vpack.c.bf16 %v706_v49, %v703_v18  ;;  %v594_v29 = vmul.f32 %v8392_v26, %v8436_v3 }
 0x125   : > { %929 = vrot.lane.b32.xlu1 %v709_v43, %s12007_s19  ;;  %v597_v0 = vmul.f32 %v8392_v26, %v8461_v31  ;;  %v790_v43 = vmul.f32 %v8385_v23, %v8449_v13  ;;  %v798_v58 = vpack.c.bf16 %v792_v56, %v789_v52  ;;  %v793_v34 = vmul.f32 %v8385_v23, %v8473_v36 }
 0x126   : > { %v763_v63 = vpack.c.bf16 %v757_v21, %v754_v44  ;;  %v826_v40 = vmul.f32 %v8395_v27, %v8449_v13  ;;  %v829_v49 = vmul.f32 %v8395_v27, %v8473_v36  ;;  %v595_v10 = vmul.f32 %v8367_v15, %v8449_v13 }
 0x127   : > { %v603_v18 = vpack.c.bf16 %v597_v0, %v594_v29  ;;  %v598_v44 = vmul.f32 %v8367_v15, %v8473_v36  ;;  %v12067_v52 = vpack.c.bf16 %v8467_v33, %v8458_v30  ;;  %v799_v56 = vpack.c.bf16 %v793_v34, %v790_v43 }
 0x128   : > { %986 = vrot.lane.b32.xlu0 %v795_v37, %s12003_s24  ;;  %v862_v12 = vmul.f32 %v8399_v28, %v8449_v13  ;;  %v865_v25 = vmul.f32 %v8399_v28, %v8473_v36  ;;  %v835_v37 = vpack.c.bf16 %v829_v49, %v826_v40  ;;  %v12068_v0 = vpack.c.bf16 %v8479_v38, %v8470_v35 }
 0x129   : > { %965 = vrot.lane.b32.xlu1 %v12067_v52, %s12005_s23  ;;  %v604_v21 = vpack.c.bf16 %v598_v44, %v595_v10  ;;  %v12069_v30 = vpack.c.bf16 %v8488_v41, %v8483_v39  ;;  %v12070_v33 = vpack.c.bf16 %v8494_v42, %v8491_v45  ;;  %v12071_v10 = vpack.c.bf16 %v8461_v31, %v8436_v3 }
 0x12a   : > { %v871_v29 = vpack.c.bf16 %v865_v25, %v862_v12  ;;  %v12072_v35 = vpack.c.bf16 %v8473_v36, %v8449_v13 }
 0x12c   : > { %1009 = vrot.lane.b32.xlu0 %v12068_v0, %s12001_s25 }
 0x12d   : > { %988 = vrot.lane.b32.xlu1 %v12069_v30, %s12003_s24 }
 0x130   : > { %1181 = vrot.lane.b32.xlu0 %v12070_v33, %s12009_s11 }
 0x131   : > { %1011 = vrot.lane.b32.xlu1 %v832_v57, %s12001_s25 }
 0x133   : > { %v8653_v3 = vpop.permute.xlu1 %885 }
 0x134   : > { %1034 = vrot.lane.b32.xlu0 %v868_v8, %s11991_s26 }
 0x135   : > { %1183 = vrot.lane.b32.xlu1 %v601_v9, %s12009_s11 }
 0x137   : > { %v8655_v31 = vpop.permute.xlu1 %908 }
 0x138   : > { %950 = vrot.lane.b32.xlu0 %v12071_v10, %s11993_s18 }
 0x139   : > { %952 = vrot.lane.b32.xlu1 %v12072_v35, %s11993_s18  ;;  %s12086_s18 = smov 110  }
 0x13b   : > { %v8657_v38 = vpop.permute.xlu1 %931 }
 0x13c   : > { %1015 = vrot.lane.b32.xlu0 %v834_v48, %s12001_s25 }
 0x13d   : > { %887 = vrot.lane.b32.xlu1 %v639_v53, %s12032_s12 }
 0x13f   : > { %v8659_v40 = vpop.permute.xlu1 %973 }
 0x140   : > { %1038 = vrot.lane.b32.xlu0 %v870_v5, %s11991_s26  ;;  %v880_v5 = vpop.permute.xlu0 %879 }
 0x141   : > { %910 = vrot.lane.b32.xlu1 %v675_v24, %s12011_s22 }
 0x143   : > { %v8663_v45 = vpop.permute.xlu1 %996 }
 0x144   : > { %889 = vrot.lane.b32.xlu0 %v640_v20, %s12032_s12  ;;  %v903_v13 = vpop.permute.xlu0 %902 }
 0x145   : > { %933 = vrot.lane.b32.xlu1 %v711_v32, %s12007_s19 }
 0x148   : > { %912 = vrot.lane.b32.xlu0 %v676_v46, %s12011_s22  ;;  %v926_v36 = vpop.permute.xlu0 %925 }
 0x149   : > { %969 = vrot.lane.b32.xlu1 %v762_v4, %s12005_s23 }
 0x14b   : > { %v8667_v20 = vpop.permute.xlu1 %1036 }
 0x14c   : > { %935 = vrot.lane.b32.xlu0 %v712_v59, %s12007_s19  ;;  %v968_v39 = vpop.permute.xlu0 %967 }
 0x14d   : > { %992 = vrot.lane.b32.xlu1 %v798_v58, %s12003_s24 }
 0x14f   : > { %v1180_v8 = vpop.permute.xlu1 %1179 }
 0x150   : > { %971 = vrot.lane.b32.xlu0 %v763_v63, %s12005_s23  ;;  %v8661_v41 = vpop.permute.xlu0 %990 }
 0x151   : > { %1187 = vrot.lane.b32.xlu1 %v603_v18, %s12009_s11 }
 0x153   : > { %v8673_v48 = vpop.permute.xlu1 %1185 }
 0x154   : > { %994 = vrot.lane.b32.xlu0 %v799_v56, %s12003_s24  ;;  %v8665_v42 = vpop.permute.xlu0 %1013 }
 0x155   : > { %1017 = vrot.lane.b32.xlu1 %v835_v37, %s12001_s25 }
 0x158   : > { %1189 = vrot.lane.b32.xlu0 %v604_v21, %s12009_s11  ;;  %v8669_v57 = vpop.permute.xlu0 %1019 }
 0x159   : > { %1040 = vrot.lane.b32.xlu1 %v871_v29, %s11991_s26  ;;  %s12089_s26 = smov 17  }
 0x15c   : > { %v8671_v9 = vpop.permute.xlu0 %1042 }
 0x186   : > { %v947_v53 = vpop.permute.xlu0 %946 }
 0x187   : > { %v949_v24 = vpop.permute.xlu1 %948  ;;  %1227 = vrot.lane.b32.xlu0 %v947_v53, %s12009_s11 }
 0x188   : > { %1231 = vrot.lane.b32.xlu1 %v949_v24, %s12009_s11  ;;  %v955_v46 = vsel %vm582_vm6, %v947_v53, %v949_v24 }
 0x18a   : > { %v882_v32 = vpop.permute.xlu0 %881 }
 0x18b   : > { %v8678_v4 = vpop.permute.xlu1 %1032  ;;  %1229 = vrot.lane.b32.xlu0 %v955_v46, %s12009_s11  ;;  %v892_v43 = vsel %vm690_vm3, %v880_v5, %v882_v32 }
 0x18e   : > { %v905_v59 = vpop.permute.xlu0 %904 }
 0x18f   : > { %v884_v58 = vpop.permute.xlu1 %883  ;;  %1191 = vrot.lane.b32.xlu0 %v892_v43, %s12009_s11  ;;  %v915_v34 = vsel %vm914_vm9, %v903_v13, %v905_v59 }
 0x190   : > { %1195 = vrot.lane.b32.xlu1 %v884_v58, %s12009_s11  ;;  %v893_v12 = vsel %vm690_vm3, %v882_v32, %v884_v58 }
 0x192   : > { %v928_v63 = vpop.permute.xlu0 %927 }
 0x193   : > { %v907_v18 = vpop.permute.xlu1 %906  ;;  %1203 = vrot.lane.b32.xlu0 %v915_v34, %s12009_s11  ;;  %v938_v44 = vsel %vm618_vm1, %v926_v36, %v928_v63 }
 0x194   : > { %1207 = vrot.lane.b32.xlu1 %v907_v18, %s12009_s11  ;;  %v916_v29 = vsel %vm914_vm9, %v905_v59, %v907_v18 }
 0x196   : > { %v964_v49 = vpop.permute.xlu0 %963 }
 0x197   : > { %v930_v52 = vpop.permute.xlu1 %929  ;;  %1215 = vrot.lane.b32.xlu0 %v938_v44, %s12009_s11 }
 0x198   : > { %1219 = vrot.lane.b32.xlu1 %v930_v52, %s12009_s11  ;;  %v939_v33 = vsel %vm618_vm1, %v928_v63, %v930_v52 }
 0x19a   : > { %v987_v56 = vpop.permute.xlu0 %986 }
 0x19b   : > { %v966_v25 = vpop.permute.xlu1 %965  ;;  %1193 = vrot.lane.b32.xlu0 %v893_v12, %s12009_s11 }
 0x19c   : > { %v977_v37 = vsel %vm975_vm10, %v966_v25, %v968_v39  ;;  %v976_v5 = vsel %vm975_vm10, %v964_v49, %v966_v25 }
 0x19d   : > { %1243 = vrot.lane.b32.xlu1 %v977_v37, %s12009_s11 }
 0x19e   : > { %v8694_v21 = vpop.permute.xlu0 %1009 }
 0x19f   : > { %v989_v0 = vpop.permute.xlu1 %988  ;;  %1205 = vrot.lane.b32.xlu0 %v916_v29, %s12009_s11 }
 0x1a2   : > { %v1182_v30 = vpop.permute.xlu0 %1181 }
 0x1a3   : > { %v8699_v10 = vpop.permute.xlu1 %1011  ;;  %1217 = vrot.lane.b32.xlu0 %v939_v33, %s12009_s11  ;;  %v1288_v39 = vsel %vm850_vm8, %v1180_v8, %v1182_v30 }
 0x1a6   : > { %v8702_v35 = vpop.permute.xlu0 %1034 }
 0x1a7   : > { %v1184_v13 = vpop.permute.xlu1 %1183  ;;  %1241 = vrot.lane.b32.xlu0 %v976_v5, %s12009_s11  ;;  %v1000_v5 = vsel %vm998_vm11, %v989_v0, %v8661_v41  ;;  %v1023_v41 = vsel %vm1021_vm12, %v8699_v10, %v8665_v42 }
 0x1a8   : > { %v1289_v36 = vsel %vm850_vm8, %v1182_v30, %v1184_v13 }
 0x1a9   : > { %1372 = vmatprep.subr.bf16.mxu1 %v1289_v36 }
 0x1aa   : > { %1373 = vmatpush1.bf16.msra.mxu1 %v1288_v39  ;;  %v951_v53 = vpop.permute.xlu0 %950 }
 0x1ab   : > { %v953_v24 = vpop.permute.xlu1 %952  ;;  %1233 = vrot.lane.b32.xlu1 %v951_v53, %s12009_s11 }
 0x1ac   : > { %1237 = vrot.lane.b32.xlu0 %v953_v24, %s12009_s11  ;;  %v956_v46 = vsel %vm582_vm6, %v951_v53, %v953_v24  ;;  %v1022_v53 = vsel %vm1021_vm12, %v8694_v21, %v8699_v10 }
 0x1ae   : > { %v8710_v32 = vpop.permute.xlu0 %1015 }
 0x1af   : > { %v888_v59 = vpop.permute.xlu1 %887  ;;  %1235 = vrot.lane.b32.xlu1 %v956_v46, %s12009_s11 }
 0x1b0   : > { %v894_v58 = vsel %vm690_vm3, %v8653_v3, %v888_v59 }
 0x1b2   : > { %v8714_v43 = vpop.permute.xlu0 %1038 }
 0x1b3   : > { %v911_v8 = vpop.permute.xlu1 %910  ;;  %1197 = vrot.lane.b32.xlu1 %v894_v58, %s12009_s11 }
 0x1b4   : > { %v917_v34 = vsel %vm914_vm9, %v8655_v31, %v911_v8 }
 0x1b6   : > { %v890_v63 = vpop.permute.xlu0 %889 }
 0x1b7   : > { %v934_v18 = vpop.permute.xlu1 %933  ;;  %1209 = vrot.lane.b32.xlu1 %v917_v34, %s12009_s11  ;;  %1201 = vrot.lane.b32.xlu0 %v890_v63, %s12009_s11  ;;  %v895_v25 = vsel %vm690_vm3, %v888_v59, %v890_v63  ;;  %v1068_v59 = vld [vmem:[%s11980_s5 + $0x18] sm:$0xff] }
 0x1b8   : > { %v940_v52 = vsel %vm618_vm1, %v8657_v38, %v934_v18 }
 0x1ba   : > { %v913_v44 = vpop.permute.xlu0 %912 }
 0x1bb   : > { %1221 = vrot.lane.b32.xlu1 %v940_v52, %s12009_s11  ;;  %1239 = vrot.lane.b32.xlu0 %v964_v49, %s12009_s11  ;;  %v970_v3 = vpop.permute.xlu1 %969  ;;  %v918_v29 = vsel %vm914_vm9, %v911_v8, %v913_v44  ;;  %v999_v49 = vsel %vm998_vm11, %v987_v56, %v989_v0 }
 0x1be   : > { %v936_v12 = vpop.permute.xlu0 %935 }
 0x1bf   : > { %1199 = vrot.lane.b32.xlu1 %v895_v25, %s12009_s11  ;;  %1213 = vrot.lane.b32.xlu0 %v913_v44, %s12009_s11  ;;  %v993_v37 = vpop.permute.xlu1 %992  ;;  %v941_v39 = vsel %vm618_vm1, %v934_v18, %v936_v12 }
 0x1c2   : > { %v972_v31 = vpop.permute.xlu0 %971 }
 0x1c3   : > { %1245 = vrot.lane.b32.xlu1 %v970_v3, %s12009_s11  ;;  %1225 = vrot.lane.b32.xlu0 %v936_v12, %s12009_s11  ;;  %v1188_v30 = vpop.permute.xlu1 %1187  ;;  %v978_v42 = vsel %vm975_vm10, %v970_v3, %v972_v31 }
 0x1c4   : > { %v1290_v36 = vsel %vm850_vm8, %v8673_v48, %v1188_v30  ;;  %v979_v48 = vsel %vm975_vm10, %v972_v31, %v8659_v40 }
 0x1c6   : > { %v995_v38 = vpop.permute.xlu0 %994 }
 0x1c7   : > { %1211 = vrot.lane.b32.xlu1 %v918_v29, %s12009_s11  ;;  %1253 = vrot.lane.b32.xlu0 %v999_v49, %s12009_s11  ;;  %v1002_v40 = vsel %vm998_vm11, %v995_v38, %v8663_v45  ;;  %v1018_v0 = vpop.permute.xlu1 %1017  ;;  %v1001_v10 = vsel %vm998_vm11, %v993_v37, %v995_v38  ;;  %v7416_v45 = vld [vmem:[%s12073_s4 + $0x4] ss:$12 sps:$4 sm:$0xff]  }
 0x1c8   : > { %1404 = vmatprep.mubr.bf16.mxu1 %v7416_v45  ;;  %v1025_v24 = vsel %vm1021_vm12, %v1018_v0, %v8669_v57  ;;  %v1066_v57 = vld [vmem:[%s11980_s5 + $0x8] sm:$0xff] }
 0x1ca   : > { %v1190_v33 = vpop.permute.xlu0 %1189 }
 0x1cb   : > { %1255 = vrot.lane.b32.xlu1 %v1000_v5, %s12009_s11  ;;  %1251 = vrot.lane.b32.xlu0 %v987_v56, %s12009_s11  ;;  %v1291_v13 = vsel %vm850_vm8, %v1188_v30, %v1190_v33  ;;  %v1045_v56 = vsel %vm1044_vm13, %v8678_v4, %v8702_v35 }
 0x1cc   : > { %1374 = vmatprep.subr.bf16.mxu1 %v1291_v13 }
 0x1cd   : > { %1375 = vmatpush1.bf16.msra.mxu1 %v1290_v36 }
 0x1cf   : > { %1223 = vrot.lane.b32.xlu1 %v941_v39, %s12009_s11  ;;  %1265 = vrot.lane.b32.xlu0 %v1022_v53, %s12009_s11 }
 0x1d3   : > { %1257 = vrot.lane.b32.xlu1 %v993_v37, %s12009_s11  ;;  %1263 = vrot.lane.b32.xlu0 %v8694_v21, %s12009_s11  ;;  %v1046_v21 = vsel %vm1044_vm13, %v8702_v35, %v8667_v20  ;;  %v1024_v20 = vsel %vm1021_vm12, %v8710_v32, %v1018_v0  ;;  %v1041_v35 = vpop.permute.xlu1 %1040 }
 0x1d4   : > { %v1047_v46 = vsel %vm1044_vm13, %v8714_v43, %v1041_v35 }
 0x1d7   : > { %1267 = vrot.lane.b32.xlu1 %v1023_v41, %s12009_s11  ;;  %1249 = vrot.lane.b32.xlu0 %v979_v48, %s12009_s11 }
 0x1db   : > { %1277 = vrot.lane.b32.xlu1 %v1045_v56, %s12009_s11  ;;  %1279 = vrot.lane.b32.xlu0 %v1046_v21, %s12009_s11 }
 0x1df   : > { %1247 = vrot.lane.b32.xlu1 %v978_v42, %s12009_s11  ;;  %1261 = vrot.lane.b32.xlu0 %v1002_v40, %s12009_s11 }
 0x1e3   : > { %1275 = vrot.lane.b32.xlu1 %v8678_v4, %s12009_s11  ;;  %1269 = vrot.lane.b32.xlu0 %v8710_v32, %s12009_s11  ;;  %v1048_v4 = vsel %vm1044_vm13, %v1041_v35, %v8671_v9  ;;  %v1065_v32 = vld [vmem:[%s11980_s5] sm:$0xff]  ;;  %v1067_v9 = vld [vmem:[%s11980_s5 + $0x10] sm:$0xff] }
 0x1e7   : > { %1271 = vrot.lane.b32.xlu0 %v1024_v20, %s12009_s11  ;;  %1259 = vrot.lane.b32.xlu1 %v1001_v10, %s12009_s11 }
 0x1eb   : > { %1285 = vrot.lane.b32.xlu0 %v1048_v4, %s12009_s11  ;;  %1273 = vrot.lane.b32.xlu1 %v1025_v24, %s12009_s11 }
 0x1ef   : > { %1075 = vperm.xlu0 %7404, %v1065_v32   ;;  %1283 = vrot.lane.b32.xlu1 %v1047_v46, %s12009_s11 }
 0x1f3   : > { %1085 = vperm.xlu0 %7404, %v1067_v9   ;;  %1281 = vrot.lane.b32.xlu1 %v8714_v43, %s12009_s11 }
 0x1f7   : > { %1704 = vrot.lane.b32.xlu0 %v8309_v51, %s12032_s12  ;;  %1080 = vperm.xlu1 %7405, %v1066_v57  }
 0x1f9   : > { %v8809_v58 = vpop.permute.xlu0 %1227 }
 0x1fa   : > { %v8819_v63 = vpop.permute.xlu1 %1231 }
 0x1fb   : > { %1726 = vrot.lane.b32.xlu0 %v8317_v55, %s12011_s22  ;;  %1090 = vperm.xlu1 %7405, %v1068_v59  }
 0x1fd   : > { %v8813_v8 = vpop.permute.xlu0 %1229 }
 0x1ff   : > { %1748 = vrot.lane.b32.xlu0 %v8323_v60, %s12007_s19  ;;  %1710 = vrot.lane.b32.xlu1 %v8309_v51, %s12032_s12 }
 0x201   : > { %v1192_v43 = vpop.permute.xlu0 %1191 }
 0x202   : > { %v1196_v18 = vpop.permute.xlu1 %1195 }
 0x203   : > { %1788 = vrot.lane.b32.xlu0 %v8327_v62, %s12005_s23  ;;  %1732 = vrot.lane.b32.xlu1 %v8317_v55, %s12011_s22 }
 0x205   : > { %v1204_v34 = vpop.permute.xlu0 %1203 }
 0x206   : > { %v1208_v52 = vpop.permute.xlu1 %1207 }
 0x207   : > { %1810 = vrot.lane.b32.xlu0 %v8335_v2, %s12003_s24  ;;  %1754 = vrot.lane.b32.xlu1 %v8323_v60, %s12007_s19 }
 0x209   : > { %v1216_v44 = vpop.permute.xlu0 %1215 }
 0x20a   : > { %v1220_v31 = vpop.permute.xlu1 %1219 }
 0x20b   : > { %1832 = vrot.lane.b32.xlu0 %v8343_v7, %s12001_s25  ;;  %1794 = vrot.lane.b32.xlu1 %v8327_v62, %s12005_s23 }
 0x20d   : > { %v1194_v3 = vpop.permute.xlu0 %1193 }
 0x20e   : > { %v1293_v12 = vsel %vm850_vm8, %v1194_v3, %v1196_v18  ;;  %v1292_v25 = vsel %vm850_vm8, %v1192_v43, %v1194_v3 }
 0x20f   : > { %2120 = vrot.lane.b32.xlu0 %v8359_v14, %s12009_s11  ;;  %1816 = vrot.lane.b32.xlu1 %v8335_v2, %s12003_s24  ;;  %v1244_v38 = vpop.permute.xlu1 %1243 }
 0x210   : > { %1376 = vmatprep.subr.bf16.mxu1 %v1293_v12 }
 0x211   : > { %1377 = vmatpush1.bf16.msra.mxu1 %v1292_v25  ;;  %v1206_v37 = vpop.permute.xlu0 %1205 }
 0x212   : > { %v1297_v40 = vsel %vm850_vm8, %v1206_v37, %v1208_v52  ;;  %v1296_v10 = vsel %vm850_vm8, %v1204_v34, %v1206_v37  ;;  %v1305_v52 = vsel %vm850_vm8, %v8813_v8, %v8819_v63 }
 0x213   : > { %1838 = vrot.lane.b32.xlu1 %v8343_v7, %s12001_s25 }
 0x215   : > { %v1218_v29 = vpop.permute.xlu0 %1217 }
 0x216   : > { %v1301_v32 = vsel %vm850_vm8, %v1218_v29, %v1220_v31  ;;  %v1300_v57 = vsel %vm850_vm8, %v1216_v44, %v1218_v29  ;;  %v1304_v44 = vsel %vm850_vm8, %v8809_v58, %v8813_v8 }
 0x217   : > { %2126 = vrot.lane.b32.xlu1 %v8359_v14, %s12009_s11 }
 0x219   : > { %v1242_v30 = vpop.permute.xlu0 %1241 }
 0x21d   : > { %v1234_v49 = vpop.permute.xlu1 %1233 }
 0x21e   : > { %v1238_v5 = vpop.permute.xlu0 %1237 }
 0x221   : > { %v1236_v33 = vpop.permute.xlu1 %1235 }
 0x222   : > { %v1307_v25 = vsel %vm850_vm8, %v1236_v33, %v1238_v5  ;;  %v1306_v29 = vsel %vm850_vm8, %v1234_v49, %v1236_v33 }
 0x225   : > { %v1198_v13 = vpop.permute.xlu1 %1197 }
 0x229   : > { %v1210_v36 = vpop.permute.xlu1 %1209  ;;  %v1202_v39 = vpop.permute.xlu0 %1201 }
 0x22d   : > { %v1222_v53 = vpop.permute.xlu1 %1221  ;;  %v1240_v41 = vpop.permute.xlu0 %1239 }
 0x231   : > { %v1200_v48 = vpop.permute.xlu1 %1199  ;;  %v1214_v56 = vpop.permute.xlu0 %1213 }
 0x232   : > { %v1295_v21 = vsel %vm850_vm8, %v1200_v48, %v1202_v39  ;;  %v1294_v42 = vsel %vm850_vm8, %v1198_v13, %v1200_v48  ;;  %v1309_v13 = vsel %vm850_vm8, %v1242_v30, %v1244_v38 }
 0x233   : > { %1378 = vmatprep.subr.bf16.mxu1 %v1295_v21 }
 0x234   : > { %1379 = vmatpush1.bf16.msra.mxu1 %v1294_v42 }
 0x235   : > { %v1246_v0 = vpop.permute.xlu1 %1245  ;;  %1380 = vmatprep.subr.bf16.mxu1 %v1297_v40  ;;  %v1226_v20 = vpop.permute.xlu0 %1225 }
 0x238   : > { %1381 = vmatpush1.bf16.msra.mxu1 %v1296_v10 }
 0x239   : > { %v1212_v45 = vpop.permute.xlu1 %1211  ;;  %v1254_v35 = vpop.permute.xlu0 %1253 }
 0x23a   : > { %v1299_v4 = vsel %vm850_vm8, %v1212_v45, %v1214_v56  ;;  %v1298_v24 = vsel %vm850_vm8, %v1210_v36, %v1212_v45 }
 0x23b   : > { %1382 = vmatprep.subr.bf16.mxu1 %v1299_v4 }
 0x23c   : > { %1383 = vmatpush1.bf16.msra.mxu1 %v1298_v24 }
 0x23d   : > { %v1256_v46 = vpop.permute.xlu1 %1255  ;;  %1384 = vmatprep.subr.bf16.mxu1 %v1301_v32  ;;  %v1252_v9 = vpop.permute.xlu0 %1251 }
 0x23e   : > { %v1313_v49 = vsel %vm850_vm8, %v1254_v35, %v1256_v46  ;;  %v1312_v21 = vsel %vm850_vm8, %v1252_v9, %v1254_v35  ;;  %v7414_v46 = vld [vmem:[%s12073_s4] ss:$12 sps:$4 sm:$0xff]   ;;  %v7418_v9 = vld [vmem:[%s12073_s4 + $0x1c] ss:$12 sps:$4 sm:$0xff]  }
 0x240   : > { %1385 = vmatpush1.bf16.msra.mxu1 %v1300_v57 }
 0x241   : > { %v1224_v59 = vpop.permute.xlu1 %1223  ;;  %v1266_v43 = vpop.permute.xlu0 %1265 }
 0x242   : > { %v1303_v34 = vsel %vm850_vm8, %v1224_v59, %v1226_v20  ;;  %v1302_v18 = vsel %vm850_vm8, %v1222_v53, %v1224_v59  ;;  %v1308_v53 = vsel %vm850_vm8, %v1240_v41, %v1242_v30 }
 0x243   : > { %1386 = vmatprep.subr.bf16.mxu1 %v1303_v34  ;;  %v7420_v34 = vld [vmem:[%s12073_s4 + $0x18] ss:$12 sps:$4 sm:$0xff]  }
 0x244   : > { %1387 = vmatpush1.bf16.msra.mxu1 %v1302_v18  ;;  %v12074_v18 = vmov 0  }
 0x245   : > { %v1258_v3 = vpop.permute.xlu1 %1257  ;;  %1388 = vmatprep.subr.bf16.mxu1 %v1305_v52  ;;  %v1264_v12 = vpop.permute.xlu0 %1263  ;;  %v7421_v52 = vld [vmem:[%s12073_s4 + $0x20] ss:$12 sps:$4 sm:$0xff]  }
 0x246   : > { %v1316_v10 = vsel %vm850_vm8, %v1264_v12, %v1266_v43 }
 0x248   : > { %1389 = vmatpush1.bf16.msra.mxu1 %v1304_v44 }
 0x249   : > { %v1268_v31 = vpop.permute.xlu1 %1267  ;;  %1390 = vmatprep.subr.bf16.mxu1 %v1307_v25  ;;  %v1250_v37 = vpop.permute.xlu0 %1249 }
 0x24c   : > { %1391 = vmatpush1.bf16.msra.mxu1 %v1306_v29 }
 0x24d   : > { %v1278_v36 = vpop.permute.xlu1 %1277  ;;  %1392 = vmatprep.subr.bf16.mxu1 %v1309_v13  ;;  %v1280_v63 = vpop.permute.xlu0 %1279 }
 0x24e   : > { %v1321_v39 = vsel %vm850_vm8, %v1278_v36, %v1280_v63 }
 0x24f   : > { %1445 = vmatprep.subr.bf16.mxu0 %v1321_v39 }
 0x250   : > { %1393 = vmatpush1.bf16.msra.mxu1 %v1308_v53 }
 0x251   : > { %v1248_v58 = vpop.permute.xlu1 %1247  ;;  %v1262_v8 = vpop.permute.xlu0 %1261 }
 0x252   : > { %v1311_v5 = vsel %vm850_vm8, %v1248_v58, %v1250_v37  ;;  %v1310_v48 = vsel %vm850_vm8, %v1246_v0, %v1248_v58  ;;  %v1317_v0 = vsel %vm850_vm8, %v1266_v43, %v1268_v31  ;;  %v7417_v43 = vld [vmem:[%s12073_s4 + $0x8] ss:$12 sps:$4 sm:$0xff]  }
 0x253   : > { %1394 = vmatprep.subr.bf16.mxu1 %v1311_v5 }
 0x254   : > { %1395 = vmatpush1.bf16.msra.mxu1 %v1310_v48 }
 0x255   : > { %v1276_v38 = vpop.permute.xlu1 %1275  ;;  %1396 = vmatprep.subr.bf16.mxu1 %v1313_v49  ;;  %v1270_v33 = vpop.permute.xlu0 %1269 }
 0x256   : > { %v1320_v56 = vsel %vm850_vm8, %v1276_v38, %v1278_v36 }
 0x257   : > { %1446 = vmatpush1.bf16.msra.mxu0 %v1320_v56 }
 0x258   : > { %1397 = vmatpush1.bf16.msra.mxu1 %v1312_v21 }
 0x259   : > { %v1260_v30 = vpop.permute.xlu1 %1259  ;;  %v1272_v40 = vpop.permute.xlu0 %1271 }
 0x25a   : > { %v1315_v41 = vsel %vm850_vm8, %v1260_v30, %v1262_v8  ;;  %v1314_v42 = vsel %vm850_vm8, %v1258_v3, %v1260_v30  ;;  %v1318_v32 = vsel %vm850_vm8, %v1270_v33, %v1272_v40 }
 0x25b   : > { %1398 = vmatprep.subr.bf16.mxu1 %v1315_v41 }
 0x25c   : > { %1399 = vmatpush1.bf16.msra.mxu1 %v1314_v42 }
 0x25d   : > { %v1274_v20 = vpop.permute.xlu1 %1273  ;;  %1400 = vmatprep.subr.bf16.mxu1 %v1317_v0  ;;  %v1286_v4 = vpop.permute.xlu0 %1285 }
 0x25e   : > { %v1319_v45 = vsel %vm850_vm8, %v1272_v40, %v1274_v20 }
 0x260   : > { %1401 = vmatpush1.bf16.msra.mxu1 %v1316_v10 }
 0x261   : > { %v1284_v35 = vpop.permute.xlu1 %1283  ;;  %1402 = vmatprep.subr.bf16.mxu1 %v1319_v45 }
 0x262   : > { %v1323_v24 = vsel %vm850_vm8, %v1284_v35, %v1286_v4 }
 0x263   : > { %1447 = vmatprep.subr.bf16.mxu0 %v1323_v24 }
 0x264   : > { %1403 = vmatpush1.bf16.msra.mxu1 %v1318_v32 }
 0x265   : > { %v1282_v57 = vpop.permute.xlu1 %1281 }
 0x266   : > { %v1322_v59 = vsel %vm850_vm8, %v1282_v57, %v1284_v35 }
 0x267   : > { %1405 = vmatmul.mubr.bf16.vlgmr.msra.gmra.mrb[0].mxu1 %v7414_v46  ;;  %1448 = vmatpush1.bf16.msra.mxu0 %v1322_v59 }
 0x268   : > { %1414 = vmatprep.mubr.bf16.mxu1 %v7418_v9 }
 0x26a   : > { %6807 = vmatmul.mubr.msk.bf16.vlgmr.msra.gmra.mrb[8].mxu0 %vm489_vm0, %v7417_v43 }
 0x26b   : > { %1487 = vmatprep.mubr.bf16.mxu0 %v12074_v18 }
 0x26e   : > { %v1076_v3 = vpop.permute.xlu0 %1075 }
 0x26f   : > { %1415 = vmatmul.mubr.bf16.gmra.mrb[4].mxu1 %v7420_v34 }
 0x272   : > { %6808 = vmatmul.mubr.msk.bf16.gmra.mrb[12].mxu0 %vm489_vm0, %v7421_v52  ;;  %v1086_v40 = vpop.permute.xlu0 %1085 }
 0x273   : > { %1497 = vmatprep.mubr.bf16.mxu0 %v12074_v18 }
 0x276   : > { %v1081_v31 = vpop.permute.xlu1 %1080 }
 0x27a   : > { %v1091_v57 = vpop.permute.xlu1 %1090 }
 0x33a   : > { %v1406_v12 = vpop.f32.mrb[0].mxu1 }
 0x33b   : > { %v1407_v44 = vadd.f32 %v1406_v12, %v1076_v3  ;;  %v1408_v25 = vpop.f32.mrb[1].mxu1 }
 0x33c   : > { %v1409_v37 = vadd.f32 %v1408_v25, %v1076_v3  ;;  %v1410_v29 = vpop.f32.mrb[2].mxu1 }
 0x33d   : > { %v1411_v13 = vadd.f32 %v1410_v29, %v1081_v31  ;;  %v1412_v36 = vpop.f32.mrb[3].mxu1  ;;  %v1479_v63 = vpop.f32.mrb[8].mxu0 }
 0x33e   : > { %v1413_v39 = vadd.f32 %v1412_v36, %v1081_v31  ;;  %v8898_v53 = vadd.f32 %v1479_v63, %v1407_v44  ;;  %v1481_v58 = vpop.f32.mrb[9].mxu0 }
 0x33f   : > { %v8900_v8 = vadd.f32 %v1481_v58, %v1409_v37  ;;  %v1483_v5 = vpop.f32.mrb[10].mxu0 }
 0x340   : > { %6593 = vst [vmem:[%s8902_s30] sm:$0xff] %v8898_v53  ;;  %v8906_v48 = vadd.f32 %v1483_v5, %v1411_v13  ;;  %v1485_v49 = vpop.f32.mrb[11].mxu0  ;;  %v1557_v38 = vmul.f32 %v8898_v53, %v8371_v16  ;;  %v1539_v33 = vmul.f32 %v8898_v53, %v8392_v26  ;;  %v8914_v56 = vmul.f32 %v8898_v53, %v8374_v17 }
 0x341   : > { %6594 = vst [vmem:[%s8902_s30 + $0x8] sm:$0xff] %v8900_v8  ;;  %v8918_v21 = vadd.f32 %v1485_v49, %v1413_v39  ;;  %v8922_v30 = vmul.f32 %v8900_v8, %v8305_v47  ;;  %v8926_v41 = vmul.f32 %v8898_v53, %v8378_v19  ;;  %v8930_v42 = vmul.f32 %v8900_v8, %v8307_v50 }
 0x342   : > { %6595 = vst [vmem:[%s8902_s30 + $0x10] sm:$0xff] %v8906_v48  ;;  %v1416_v0 = vpop.f32.mrb[4].mxu1  ;;  %v1610_v20 = vpack.c.bf16 %v8906_v48, %v8898_v53  ;;  %v1560_v10 = vmul.f32 %v8906_v48, %v8371_v16  ;;  %v1542_v45 = vmul.f32 %v8906_v48, %v8392_v26  ;;  %v1578_v4 = vmul.f32 %v8906_v48, %v8374_v17 }
 0x343   : > { %6596 = vst [vmem:[%s8902_s30 + $0x18] sm:$0xff] %v8918_v21  ;;  %v1417_v35 = vadd.f32 %v1416_v0, %v1086_v40  ;;  %v1418_v24 = vpop.f32.mrb[5].mxu1  ;;  %v1611_v32 = vpack.c.bf16 %v8918_v21, %v8900_v8  ;;  %v1561_v46 = vmul.f32 %v8918_v21, %v8305_v47  ;;  %v8950_v9 = vmul.f32 %v8906_v48, %v8378_v19 }
 0x344   : > { %v1419_v59 = vadd.f32 %v1418_v24, %v1086_v40  ;;  %v1420_v43 = vpop.f32.mrb[6].mxu1  ;;  %1768 = vrot.lane.b32.xlu0 %v1610_v20, %s12075_s13  ;;  %v1569_v34 = vpack.c.bf16 %v1560_v10, %v1557_v38  ;;  %v1551_v52 = vpack.c.bf16 %v1542_v45, %v1539_v33  ;;  %v1587_v3 = vpack.c.bf16 %v1578_v4, %v8914_v56 }
 0x345   : > { %v1421_v12 = vadd.f32 %v1420_v43, %v1091_v57  ;;  %v1422_v44 = vpop.f32.mrb[7].mxu1  ;;  %v1489_v25 = vpop.f32.mrb[12].mxu0  ;;  %1770 = vrot.lane.b32.xlu1 %v1611_v32, %s12075_s13  ;;  %v1570_v31 = vpack.c.bf16 %v1561_v46, %v8922_v30  ;;  %v1605_v37 = vpack.c.bf16 %v8950_v9, %v8926_v41  ;;  %v1579_v29 = vmul.f32 %v8918_v21, %v8307_v50 }
 0x346   : > { %v1423_v13 = vadd.f32 %v1422_v44, %v1091_v57  ;;  %v8960_v36 = vadd.f32 %v1489_v25, %v1417_v35  ;;  %v1491_v63 = vpop.f32.mrb[13].mxu0  ;;  %v8964_v39 = vmul.f32 %v8898_v53, %v8325_v61  ;;  %v8968_v58 = vmul.f32 %v8906_v48, %v8325_v61 }
 0x347   : > { %v8970_v5 = vadd.f32 %v1491_v63, %v1419_v59  ;;  %v1493_v49 = vpop.f32.mrb[14].mxu0  ;;  %v1588_v38 = vpack.c.bf16 %v1579_v29, %v8930_v42  ;;  %v8975_v33 = vmul.f32 %v8900_v8, %v8313_v54  ;;  %v8979_v56 = vmul.f32 %v8918_v21, %v8313_v54 }
 0x348   : > { %6597 = vst [vmem:[%s8902_s30 + $0x20] sm:$0xff] %v8960_v36  ;;  %v8983_v30 = vadd.f32 %v1493_v49, %v1421_v12  ;;  %v1495_v41 = vpop.f32.mrb[15].mxu0  ;;  %1706 = vrot.lane.b32.xlu0 %v1569_v34, %s12032_s12  ;;  %v1638_v42 = vpack.c.bf16 %v8968_v58, %v8964_v39  ;;  %v8990_v40 = vmul.f32 %v8898_v53, %v8333_v1 }
 0x349   : > { %v8994_v0 = vmul.f32 %v8906_v48, %v8333_v1  ;;  %6598 = vst [vmem:[%s8902_s30 + $0x28] sm:$0xff] %v8970_v5  ;;  %v8998_v20 = vadd.f32 %v1495_v41, %v1423_v13  ;;  %2122 = vrot.lane.b32.xlu1 %v1551_v52, %s12009_s11  ;;  %v1606_v10 = vpack.c.bf16 %v8979_v56, %v8975_v33 }
 0x34a   : > { %v9005_v45 = vmul.f32 %v8900_v8, %v8382_v22  ;;  %v9009_v4 = vmul.f32 %v8918_v21, %v8382_v22  ;;  %6599 = vst [vmem:[%s8902_s30 + $0x30] sm:$0xff] %v8983_v30  ;;  %v9017_v24 = vmul.f32 %v8898_v53, %v8341_v6  ;;  %v9021_v32 = vmul.f32 %v8906_v48, %v8341_v6 }
 0x34b   : > { %v9025_v46 = vmul.f32 %v8900_v8, %v8385_v23  ;;  %6600 = vst [vmem:[%s8902_s30 + $0x38] sm:$0xff] %v8998_v20  ;;  %v9033_v57 = vmul.f32 %v8918_v21, %v8385_v23  ;;  %v9037_v59 = vmul.f32 %v8900_v8, %v8367_v15  ;;  %v9041_v43 = vmul.f32 %v8918_v21, %v8367_v15 }
 0x34c   : > { %1728 = vrot.lane.b32.xlu0 %v1587_v3, %s12011_s22  ;;  %v9048_v52 = vmul.f32 %v8900_v8, %v8395_v27  ;;  %v9052_v12 = vmul.f32 %v8918_v21, %v8395_v27  ;;  %v9065_v13 = vmul.f32 %v8970_v5, %v8305_v47  ;;  %v9071_v39 = vmul.f32 %v8998_v20, %v8305_v47 }
 0x34d   : > { %1708 = vrot.lane.b32.xlu1 %v1570_v31, %s12032_s12  ;;  %v9075_v31 = vmul.f32 %v8960_v36, %v8371_v16  ;;  %v9079_v58 = vmul.f32 %v8983_v30, %v8371_v16  ;;  %v9083_v49 = vmul.f32 %v8970_v5, %v8307_v50  ;;  %v9087_v33 = vmul.f32 %v8998_v20, %v8307_v50 }
 0x34e   : > { %v1675_v63 = vpack.c.bf16 %v9052_v12, %v9048_v52  ;;  %v9091_v56 = vmul.f32 %v8960_v36, %v8374_v17  ;;  %v1584_v41 = vmul.f32 %v8983_v30, %v8374_v17  ;;  %v1573_v52 = vpack.c.bf16 %v9071_v39, %v9065_v13 }
 0x34f   : > { %v1572_v12 = vpack.c.bf16 %v9079_v58, %v9075_v31  ;;  %v1600_v29 = vmul.f32 %v8970_v5, %v8313_v54  ;;  %v1603_v44 = vmul.f32 %v8998_v20, %v8313_v54  ;;  %v1591_v3 = vpack.c.bf16 %v9087_v33, %v9083_v49 }
 0x350   : > { %1750 = vrot.lane.b32.xlu0 %v1605_v37, %s12007_s19  ;;  %v1590_v25 = vpack.c.bf16 %v1584_v41, %v9091_v56  ;;  %v1599_v37 = vmul.f32 %v8960_v36, %v8378_v19  ;;  %v1602_v13 = vmul.f32 %v8983_v30, %v8378_v19  ;;  %v1633_v31 = vmul.f32 %v8970_v5, %v8382_v22 }
 0x351   : > { %1730 = vrot.lane.b32.xlu1 %v1588_v38, %s12011_s22  ;;  %v1609_v39 = vpack.c.bf16 %v1603_v44, %v1600_v29  ;;  %v1636_v58 = vmul.f32 %v8998_v20, %v8382_v22  ;;  %v1632_v38 = vmul.f32 %v8960_v36, %v8325_v61  ;;  %v1635_v49 = vmul.f32 %v8983_v30, %v8325_v61 }
 0x352   : > { %v1608_v34 = vpack.c.bf16 %v1602_v13, %v1599_v37  ;;  %v1651_v33 = vmul.f32 %v8970_v5, %v8385_v23  ;;  %v1654_v56 = vmul.f32 %v8998_v20, %v8385_v23  ;;  %v1650_v29 = vmul.f32 %v8960_v36, %v8333_v1 }
 0x353   : > { %v1642_v44 = vpack.c.bf16 %v1636_v58, %v1633_v31  ;;  %v1653_v41 = vmul.f32 %v8983_v30, %v8333_v1  ;;  %v1669_v37 = vmul.f32 %v8970_v5, %v8395_v27  ;;  %v1641_v13 = vpack.c.bf16 %v1635_v49, %v1632_v38 }
 0x354   : > { %1784 = vrot.lane.b32.xlu0 %v1638_v42, %s12005_s23  ;;  %v1660_v9 = vpack.c.bf16 %v1654_v56, %v1651_v33  ;;  %v1672_v35 = vmul.f32 %v8998_v20, %v8395_v27  ;;  %v1668_v42 = vmul.f32 %v8960_v36, %v8341_v6  ;;  %v1671_v58 = vmul.f32 %v8983_v30, %v8341_v6 }
 0x355   : > { %1752 = vrot.lane.b32.xlu1 %v1606_v10, %s12007_s19  ;;  %v1659_v31 = vpack.c.bf16 %v1653_v41, %v1650_v29  ;;  %v1546_v23 = vmul.f32 %v8970_v5, %v8367_v15  ;;  %v1549_v22 = vmul.f32 %v8998_v20, %v8367_v15  ;;  %v1545_v10 = vmul.f32 %v8960_v36, %v8392_v26 }
 0x356   : > { %v1678_v54 = vpack.c.bf16 %v1672_v35, %v1669_v37  ;;  %v1548_v38 = vmul.f32 %v8983_v30, %v8392_v26  ;;  %v9148_v49 = vmul.f32 %v8900_v8, %v8399_v28  ;;  %v12076_v33 = vpack.c.bf16 %v8994_v0, %v8990_v40 }
 0x357   : > { %v1677_v56 = vpack.c.bf16 %v1671_v58, %v1668_v42  ;;  %v1555_v29 = vpack.c.bf16 %v1549_v22, %v1546_v23  ;;  %v9156_v35 = vmul.f32 %v8918_v21, %v8399_v28  ;;  %v9160_v41 = vmul.f32 %v8898_v53, %v8351_v11 }
 0x358   : > { %1806 = vrot.lane.b32.xlu0 %v12076_v33, %s12003_s24  ;;  %v12077_v8 = vpack.c.bf16 %v9009_v4, %v9005_v45  ;;  %v1554_v37 = vpack.c.bf16 %v1548_v38, %v1545_v10  ;;  %v9168_v40 = vmul.f32 %v8906_v48, %v8351_v11  ;;  %v9172_v22 = vmul.f32 %v8970_v5, %v8399_v28 }
 0x359   : > { %v9176_v23 = vmul.f32 %v8998_v20, %v8399_v28  ;;  %v1693_v53 = vpack.c.bf16 %v9156_v35, %v9148_v49  ;;  %v9182_v21 = vmul.f32 %v8960_v36, %v8351_v11  ;;  %v9186_v0 = vmul.f32 %v8983_v30, %v8351_v11  ;;  %v12084_v49 = vld [vmem:[#allocation9_spill] sm:$0xff] }
 0x35a   : > { %1786 = vrot.lane.b32.xlu1 %v12077_v8, %s12005_s23  ;;  %v1692_v48 = vpack.c.bf16 %v9168_v40, %v9160_v41  ;;  %v12078_v4 = vpack.c.bf16 %v9021_v32, %v9017_v24  ;;  %v12079_v58 = vpack.c.bf16 %v9033_v57, %v9025_v46  ;;  %v12080_v10 = vpack.c.bf16 %v9041_v43, %v9037_v59 }
 0x35b   : > { %v1696_v45 = vpack.c.bf16 %v9176_v23, %v9172_v22  ;;  %v1695_v42 = vpack.c.bf16 %v9186_v0, %v9182_v21  ;;  %v12081_v24 = vpack.c.bf16 %v8983_v30, %v8960_v36  ;;  %v12082_v32 = vpack.c.bf16 %v8998_v20, %v8970_v5  ;;  %v1705_v36 = vpop.permute.xlu0 %1704  ;;  %v9229_v5 = vpop.permute.xlu1 %1710 }
 0x35c   : > { %1828 = vrot.lane.b32.xlu0 %v12078_v4, %s12001_s25 }
 0x35e   : > { %1808 = vrot.lane.b32.xlu1 %v12079_v58, %s12003_s24 }
 0x35f   : > { %v1727_v30 = vpop.permute.xlu0 %1726  ;;  %v9231_v20 = vpop.permute.xlu1 %1732 }
 0x360   : > { %2124 = vrot.lane.b32.xlu0 %v12080_v10, %s12009_s11 }
 0x362   : > { %1830 = vrot.lane.b32.xlu1 %v1675_v63, %s12001_s25 }
 0x363   : > { %v1749_v46 = vpop.permute.xlu0 %1748  ;;  %v9233_v57 = vpop.permute.xlu1 %1754 }
 0x364   : > { %1772 = vrot.lane.b32.xlu0 %v12081_v24, %s12075_s13 }
 0x366   : > { %1774 = vrot.lane.b32.xlu1 %v12082_v32, %s12075_s13 }
 0x367   : > { %v9237_v59 = vpop.permute.xlu1 %1794 }
 0x368   : > { %1714 = vrot.lane.b32.xlu0 %v1573_v52, %s12032_s12 }
 0x36a   : > { %1712 = vrot.lane.b32.xlu1 %v1572_v12, %s12032_s12 }
 0x36b   : > { %v9241_v43 = vpop.permute.xlu1 %1816 }
 0x36c   : > { %1736 = vrot.lane.b32.xlu0 %v1591_v3, %s12011_s22 }
 0x36e   : > { %1734 = vrot.lane.b32.xlu1 %v1590_v25, %s12011_s22 }
 0x36f   : > { %v9245_v25 = vpop.permute.xlu1 %1838 }
 0x370   : > { %1758 = vrot.lane.b32.xlu0 %v1609_v39, %s12007_s19 }
 0x372   : > { %1756 = vrot.lane.b32.xlu1 %v1608_v34, %s12007_s19  ;;  %s12087_s19 = smov 96  }
 0x373   : > { %v9247_v63 = vpop.permute.xlu1 %2126 }
 0x374   : > { %1792 = vrot.lane.b32.xlu0 %v1642_v44, %s12005_s23 }
 0x376   : > { %1790 = vrot.lane.b32.xlu1 %v1641_v13, %s12005_s23  ;;  %s12099_s23 = smov 126  }
 0x378   : > { %1814 = vrot.lane.b32.xlu0 %v1660_v9, %s12003_s24  ;;  %v9235_v9 = vpop.permute.xlu0 %1788 }
 0x37a   : > { %1812 = vrot.lane.b32.xlu1 %v1659_v31, %s12003_s24 }
 0x37c   : > { %1836 = vrot.lane.b32.xlu0 %v1678_v54, %s12001_s25  ;;  %v9239_v54 = vpop.permute.xlu0 %1810 }
 0x37e   : > { %1834 = vrot.lane.b32.xlu1 %v1677_v56, %s12001_s25 }
 0x380   : > { %2130 = vrot.lane.b32.xlu0 %v1555_v29, %s12009_s11  ;;  %v9243_v34 = vpop.permute.xlu0 %1832 }
 0x382   : > { %2128 = vrot.lane.b32.xlu1 %v1554_v37, %s12009_s11 }
 0x384   : > { %v2121_v3 = vpop.permute.xlu0 %2120 }
 0x3b6   : > { %v1769_v52 = vpop.permute.xlu0 %1768 }
 0x3b7   : > { %v1771_v12 = vpop.permute.xlu1 %1770  ;;  %2168 = vrot.lane.b32.xlu0 %v1769_v52, %s12009_s11 }
 0x3b8   : > { %2172 = vrot.lane.b32.xlu1 %v1771_v12, %s12009_s11  ;;  %v1776_v44 = vsel %vm582_vm6, %v1769_v52, %v1771_v12 }
 0x3ba   : > { %v1707_v39 = vpop.permute.xlu0 %1706 }
 0x3bb   : > { %v2123_v13 = vpop.permute.xlu1 %2122  ;;  %2170 = vrot.lane.b32.xlu0 %v1776_v44, %s12009_s11  ;;  %v1716_v38 = vsel %vm690_vm3, %v1705_v36, %v1707_v39 }
 0x3be   : > { %v1729_v31 = vpop.permute.xlu0 %1728 }
 0x3bf   : > { %v1709_v33 = vpop.permute.xlu1 %1708  ;;  %2132 = vrot.lane.b32.xlu0 %v1716_v38, %s12009_s11  ;;  %v1738_v29 = vsel %vm914_vm9, %v1727_v30, %v1729_v31  ;;  %v2228_v38 = vsel %vm850_vm8, %v2121_v3, %v2123_v13 }
 0x3c0   : > { %2136 = vrot.lane.b32.xlu1 %v1709_v33, %s12009_s11  ;;  %v1717_v24 = vsel %vm690_vm3, %v1707_v39, %v1709_v33 }
 0x3c2   : > { %v1751_v56 = vpop.permute.xlu0 %1750 }
 0x3c3   : > { %v1731_v8 = vpop.permute.xlu1 %1730  ;;  %2144 = vrot.lane.b32.xlu0 %v1738_v29, %s12009_s11  ;;  %v1760_v4 = vsel %vm618_vm1, %v1749_v46, %v1751_v56 }
 0x3c4   : > { %2148 = vrot.lane.b32.xlu1 %v1731_v8, %s12009_s11  ;;  %v1739_v30 = vsel %vm914_vm9, %v1729_v31, %v1731_v8 }
 0x3c6   : > { %v9259_v37 = vpop.permute.xlu0 %1784 }
 0x3c7   : > { %v1753_v58 = vpop.permute.xlu1 %1752  ;;  %2156 = vrot.lane.b32.xlu0 %v1760_v4, %s12009_s11 }
 0x3c8   : > { %2160 = vrot.lane.b32.xlu1 %v1753_v58, %s12009_s11  ;;  %v1761_v12 = vsel %vm618_vm1, %v1751_v56, %v1753_v58 }
 0x3ca   : > { %v9264_v10 = vpop.permute.xlu0 %1806 }
 0x3cb   : > { %2134 = vrot.lane.b32.xlu0 %v1717_v24, %s12009_s11  ;;  %v7422_v24 = vld [vmem:[%s12073_s4 + $0x34] ss:$12 sps:$4 sm:$0xff]  }
 0x3cc   : > { %v1787_v32 = vpop.permute.xlu1 %1786  ;;  %1424 = vmatprep.mubr.bf16.mxu1 %v7422_v24 }
 0x3ce   : > { %v9268_v36 = vpop.permute.xlu0 %1828 }
 0x3cf   : > { %2146 = vrot.lane.b32.xlu0 %v1739_v30, %s12009_s11  ;;  %v7424_v30 = vld [vmem:[%s12073_s4 + $0x30] ss:$12 sps:$4 sm:$0xff]  }
 0x3d0   : > { %v9271_v52 = vpop.permute.xlu1 %1808  ;;  %1425 = vmatmul.mubr.bf16.gmra.mrb[8].mxu1 %v7424_v30 }
 0x3d2   : > { %v2125_v46 = vpop.permute.xlu0 %2124 }
 0x3d3   : > { %2158 = vrot.lane.b32.xlu0 %v1761_v12, %s12009_s11  ;;  %v2229_v39 = vsel %vm850_vm8, %v2123_v13, %v2125_v46  ;;  %v1796_v13 = vsel %vm975_vm10, %v9259_v37, %v1787_v32 }
 0x3d4   : > { %v9275_v44 = vpop.permute.xlu1 %1830  ;;  %2324 = vmatprep.subr.bf16.mxu0 %v2229_v39 }
 0x3d5   : > { %2325 = vmatpush1.bf16.msra.mxu0 %v2228_v38 }
 0x3d6   : > { %v1773_v33 = vpop.permute.xlu0 %1772 }
 0x3d7   : > { %2174 = vrot.lane.b32.xlu1 %v1773_v33, %s12009_s11 }
 0x3d8   : > { %v1775_v29 = vpop.permute.xlu1 %1774 }
 0x3d9   : > { %2178 = vrot.lane.b32.xlu0 %v1775_v29, %s12009_s11  ;;  %v1777_v8 = vsel %vm582_vm6, %v1773_v33, %v1775_v29 }
 0x3da   : > { %v1715_v31 = vpop.permute.xlu0 %1714 }
 0x3db   : > { %2176 = vrot.lane.b32.xlu1 %v1777_v8, %s12009_s11  ;;  %v7428_v8 = vld [vmem:[%s12073_s4 + $0x48] ss:$12 sps:$4 sm:$0xff]  }
 0x3dc   : > { %v1713_v56 = vpop.permute.xlu1 %1712 }
 0x3dd   : > { %2142 = vrot.lane.b32.xlu0 %v1715_v31, %s12009_s11  ;;  %v1718_v58 = vsel %vm690_vm3, %v9229_v5, %v1713_v56  ;;  %v7425_v5 = vld [vmem:[%s12073_s4 + $0x38] ss:$12 sps:$4 sm:$0xff]  }
 0x3de   : > { %v1737_v4 = vpop.permute.xlu0 %1736  ;;  %6809 = vmatmul.mubr.msk.bf16.gmra.mrb[16].mxu0 %vm489_vm0, %v7425_v5  ;;  %v1797_v5 = vsel %vm975_vm10, %v1787_v32, %v9235_v9  ;;  %v1840_v32 = vsel %vm1021_vm12, %v9268_v36, %v9275_v44 }
 0x3df   : > { %2138 = vrot.lane.b32.xlu1 %v1718_v58, %s12009_s11  ;;  %1507 = vmatprep.mubr.bf16.mxu0 %v12074_v18  ;;  %v7429_v58 = vld [vmem:[%s12073_s4 + $0x50] ss:$12 sps:$4 sm:$0xff]  }
 0x3e0   : > { %v1735_v3 = vpop.permute.xlu1 %1734 }
 0x3e1   : > { %2182 = vrot.lane.b32.xlu0 %v1796_v13, %s12009_s11  ;;  %v1740_v12 = vsel %vm914_vm9, %v9231_v20, %v1735_v3  ;;  %v7426_v20 = vld [vmem:[%s12073_s4 + $0x4c] ss:$12 sps:$4 sm:$0xff]  }
 0x3e2   : > { %v1759_v46 = vpop.permute.xlu0 %1758  ;;  %1434 = vmatprep.mubr.bf16.mxu1 %v7426_v20 }
 0x3e3   : > { %2150 = vrot.lane.b32.xlu1 %v1740_v12, %s12009_s11  ;;  %1435 = vmatmul.mubr.bf16.gmra.mrb[12].mxu1 %v7428_v8 }
 0x3e4   : > { %v1757_v39 = vpop.permute.xlu1 %1756 }
 0x3e5   : > { %2154 = vrot.lane.b32.xlu0 %v1737_v4, %s12009_s11  ;;  %v1762_v33 = vsel %vm618_vm1, %v9233_v57, %v1757_v39  ;;  %v1719_v57 = vsel %vm690_vm3, %v1713_v56, %v1715_v31  ;;  %v1818_v31 = vsel %vm998_vm11, %v9264_v10, %v9271_v52 }
 0x3e6   : > { %v1793_v38 = vpop.permute.xlu0 %1792  ;;  %6810 = vmatmul.mubr.msk.bf16.gmra.mrb[20].mxu0 %vm489_vm0, %v7429_v58 }
 0x3e7   : > { %2162 = vrot.lane.b32.xlu1 %v1762_v33, %s12009_s11  ;;  %v1741_v33 = vsel %vm914_vm9, %v1735_v3, %v1737_v4  ;;  %v1763_v4 = vsel %vm618_vm1, %v1757_v39, %v1759_v46 }
 0x3e8   : > { %v1791_v29 = vpop.permute.xlu1 %1790 }
 0x3e9   : > { %2166 = vrot.lane.b32.xlu0 %v1759_v46, %s12009_s11 }
 0x3ea   : > { %v1815_v13 = vpop.permute.xlu0 %1814 }
 0x3eb   : > { %2140 = vrot.lane.b32.xlu1 %v1719_v57, %s12009_s11  ;;  %v1821_v3 = vsel %vm998_vm11, %v1815_v13, %v9241_v43 }
 0x3ec   : > { %v1813_v24 = vpop.permute.xlu1 %1812 }
 0x3ed   : > { %2180 = vrot.lane.b32.xlu0 %v9259_v37, %s12009_s11 }
 0x3ee   : > { %v1837_v30 = vpop.permute.xlu0 %1836 }
 0x3ef   : > { %2184 = vrot.lane.b32.xlu1 %v1797_v5, %s12009_s11  ;;  %v1843_v43 = vsel %vm1021_vm12, %v1837_v30, %v9245_v25 }
 0x3f0   : > { %v1835_v12 = vpop.permute.xlu1 %1834 }
 0x3f1   : > { %2194 = vrot.lane.b32.xlu0 %v1818_v31, %s12009_s11  ;;  %v1842_v35 = vsel %vm1021_vm12, %v1835_v12, %v1837_v30 }
 0x3f2   : > { %v2131_v56 = vpop.permute.xlu0 %2130 }
 0x3f3   : > { %2152 = vrot.lane.b32.xlu1 %v1741_v33, %s12009_s11 }
 0x3f4   : > { %v2129_v20 = vpop.permute.xlu1 %2128 }
 0x3f5   : > { %2192 = vrot.lane.b32.xlu0 %v9264_v10, %s12009_s11  ;;  %v2231_v9 = vsel %vm850_vm8, %v2129_v20, %v2131_v56  ;;  %v2230_v37 = vsel %vm850_vm8, %v9247_v63, %v2129_v20  ;;  %v1799_v10 = vsel %vm975_vm10, %v1793_v38, %v9237_v59  ;;  %v1819_v63 = vsel %vm998_vm11, %v9271_v52, %v9239_v54 }
 0x3f6   : > { %2326 = vmatprep.subr.bf16.mxu0 %v2231_v9  ;;  %v1841_v59 = vsel %vm1021_vm12, %v9275_v44, %v9243_v34  ;;  %v1798_v54 = vsel %vm975_vm10, %v1791_v29, %v1793_v38  ;;  %v1820_v34 = vsel %vm998_vm11, %v1813_v24, %v1815_v13  ;;  %v7432_v38 = vld [vmem:[%s11981_s6 + $0x4] ss:$12 sps:$4 sm:$0xff]  }
 0x3f7   : > { %2327 = vmatpush1.bf16.msra.mxu0 %v2230_v37  ;;  %2186 = vrot.lane.b32.xlu1 %v1791_v29, %s12009_s11 }
 0x3f8   : > { %2356 = vmatprep.mubr.bf16.mxu0 %v7432_v38 }
 0x3f9   : > { %2206 = vrot.lane.b32.xlu0 %v1840_v32, %s12009_s11 }
 0x3fb   : > { %2164 = vrot.lane.b32.xlu1 %v1763_v4, %s12009_s11 }
 0x3fd   : > { %2190 = vrot.lane.b32.xlu0 %v1799_v10, %s12009_s11 }
 0x3ff   : > { %2196 = vrot.lane.b32.xlu1 %v1819_v63, %s12009_s11 }
 0x401   : > { %2204 = vrot.lane.b32.xlu0 %v9268_v36, %s12009_s11 }
 0x403   : > { %2198 = vrot.lane.b32.xlu1 %v1813_v24, %s12009_s11 }
 0x405   : > { %2202 = vrot.lane.b32.xlu0 %v1821_v3, %s12009_s11 }
 0x407   : > { %2208 = vrot.lane.b32.xlu1 %v1841_v59, %s12009_s11 }
 0x409   : > { %1852 = vrot.lane.b32.xlu0 %v1693_v53, %s12083_s29 }
 0x40b   : > { %2188 = vrot.lane.b32.xlu1 %v1798_v54, %s12009_s11 }
 0x40d   : > { %2214 = vrot.lane.b32.xlu0 %v1843_v43, %s12009_s11 }
 0x40f   : > { %1850 = vrot.lane.b32.xlu1 %v1692_v48, %s12083_s29 }
 0x411   : > { %2210 = vrot.lane.b32.xlu0 %v1835_v12, %s12009_s11 }
 0x413   : > { %2200 = vrot.lane.b32.xlu1 %v1820_v34, %s12009_s11 }
 0x415   : > { %1858 = vrot.lane.b32.xlu0 %v1696_v45, %s12083_s29 }
 0x417   : > { %1854 = vrot.lane.b32.xlu1 %v12084_v49, %s12083_s29 }
 0x41b   : > { %2212 = vrot.lane.b32.xlu1 %v1842_v35, %s12009_s11 }
 0x41f   : > { %1856 = vrot.lane.b32.xlu1 %v1695_v42, %s12083_s29 }
 0x423   : > { %1860 = vrot.lane.b32.xlu1 %v12084_v49, %s12083_s29 }
 0x429   : > { %v9392_v41 = vpop.permute.xlu0 %2168 }
 0x42a   : > { %v2173_v23 = vpop.permute.xlu1 %2172 }
 0x42d   : > { %v2171_v40 = vpop.permute.xlu0 %2170 }
 0x431   : > { %v2133_v22 = vpop.permute.xlu0 %2132 }
 0x432   : > { %v2137_v48 = vpop.permute.xlu1 %2136 }
 0x435   : > { %v2145_v53 = vpop.permute.xlu0 %2144 }
 0x436   : > { %v2149_v44 = vpop.permute.xlu1 %2148 }
 0x439   : > { %v2157_v45 = vpop.permute.xlu0 %2156 }
 0x43a   : > { %v2161_v0 = vpop.permute.xlu1 %2160 }
 0x43d   : > { %v2135_v25 = vpop.permute.xlu0 %2134 }
 0x43e   : > { %v2233_v36 = vsel %vm850_vm8, %v2135_v25, %v2137_v48  ;;  %v2232_v52 = vsel %vm850_vm8, %v2133_v22, %v2135_v25  ;;  %v2245_v25 = vsel %vm850_vm8, %v2171_v40, %v2173_v23 }
 0x43f   : > { %2328 = vmatprep.subr.bf16.mxu0 %v2233_v36 }
 0x440   : > { %2329 = vmatpush1.bf16.msra.mxu0 %v2232_v52 }
 0x441   : > { %v2147_v21 = vpop.permute.xlu0 %2146 }
 0x442   : > { %v2237_v20 = vsel %vm850_vm8, %v2147_v21, %v2149_v44  ;;  %v2236_v32 = vsel %vm850_vm8, %v2145_v53, %v2147_v21  ;;  %v2244_v44 = vsel %vm850_vm8, %v9392_v41, %v2171_v40 }
 0x445   : > { %v2159_v42 = vpop.permute.xlu0 %2158 }
 0x446   : > { %v2241_v59 = vsel %vm850_vm8, %v2159_v42, %v2161_v0  ;;  %v2240_v34 = vsel %vm850_vm8, %v2157_v45, %v2159_v42 }
 0x449   : > { %v2175_v46 = vpop.permute.xlu1 %2174 }
 0x44b   : > { %v2179_v39 = vpop.permute.xlu0 %2178 }
 0x44d   : > { %v2177_v29 = vpop.permute.xlu1 %2176 }
 0x44e   : > { %v2247_v45 = vsel %vm850_vm8, %v2177_v29, %v2179_v39  ;;  %v2246_v0 = vsel %vm850_vm8, %v2175_v46, %v2177_v29 }
 0x44f   : > { %v2143_v8 = vpop.permute.xlu0 %2142 }
 0x451   : > { %v2139_v58 = vpop.permute.xlu1 %2138 }
 0x453   : > { %v2183_v13 = vpop.permute.xlu0 %2182 }
 0x455   : > { %v2151_v57 = vpop.permute.xlu1 %2150 }
 0x457   : > { %v2155_v24 = vpop.permute.xlu0 %2154 }
 0x459   : > { %v2163_v30 = vpop.permute.xlu1 %2162 }
 0x45b   : > { %v2167_v5 = vpop.permute.xlu0 %2166 }
 0x45d   : > { %v2141_v12 = vpop.permute.xlu1 %2140 }
 0x45e   : > { %v2235_v56 = vsel %vm850_vm8, %v2141_v12, %v2143_v8  ;;  %v2234_v33 = vsel %vm850_vm8, %v2139_v58, %v2141_v12 }
 0x45f   : > { %v2181_v31 = vpop.permute.xlu0 %2180  ;;  %2330 = vmatprep.subr.bf16.mxu0 %v2235_v56 }
 0x460   : > { %2331 = vmatpush1.bf16.msra.mxu0 %v2234_v33  ;;  %v2248_v23 = vsel %vm850_vm8, %v2181_v31, %v2183_v13 }
 0x461   : > { %v2185_v9 = vpop.permute.xlu1 %2184  ;;  %2332 = vmatprep.subr.bf16.mxu0 %v2237_v20 }
 0x462   : > { %v2249_v42 = vsel %vm850_vm8, %v2183_v13, %v2185_v9 }
 0x463   : > { %v2195_v37 = vpop.permute.xlu0 %2194 }
 0x464   : > { %2333 = vmatpush1.bf16.msra.mxu0 %v2236_v32 }
 0x465   : > { %v2153_v4 = vpop.permute.xlu1 %2152 }
 0x466   : > { %v2239_v63 = vsel %vm850_vm8, %v2153_v4, %v2155_v24  ;;  %v2238_v3 = vsel %vm850_vm8, %v2151_v57, %v2153_v4 }
 0x467   : > { %v2193_v10 = vpop.permute.xlu0 %2192  ;;  %2334 = vmatprep.subr.bf16.mxu0 %v2239_v63  ;;  %v7433_v63 = vld [vmem:[%s11981_s6 + $0x1c] ss:$12 sps:$4 sm:$0xff]  }
 0x468   : > { %2335 = vmatpush1.bf16.msra.mxu0 %v2238_v3  ;;  %v2252_v24 = vsel %vm850_vm8, %v2193_v10, %v2195_v37  ;;  %v7430_v10 = vld [vmem:[%s11981_s6] ss:$12 sps:$4 sm:$0xff]  }
 0x469   : > { %v2187_v54 = vpop.permute.xlu1 %2186  ;;  %2336 = vmatprep.subr.bf16.mxu0 %v2241_v59 }
 0x46b   : > { %v2207_v43 = vpop.permute.xlu0 %2206 }
 0x46c   : > { %2337 = vmatpush1.bf16.msra.mxu0 %v2240_v34 }
 0x46d   : > { %v2165_v35 = vpop.permute.xlu1 %2164 }
 0x46e   : > { %v2243_v53 = vsel %vm850_vm8, %v2165_v35, %v2167_v5  ;;  %v2242_v48 = vsel %vm850_vm8, %v2163_v30, %v2165_v35  ;;  %v1898_v35 = vld [vmem:[%s11982_s7] sm:$0xff] }
 0x46f   : > { %v2191_v22 = vpop.permute.xlu0 %2190  ;;  %2338 = vmatprep.subr.bf16.mxu0 %v2243_v53  ;;  %v7435_v53 = vld [vmem:[%s11981_s6 + $0x18] ss:$12 sps:$4 sm:$0xff]  }
 0x470   : > { %2339 = vmatpush1.bf16.msra.mxu0 %v2242_v48  ;;  %v7436_v48 = vld [vmem:[%s11981_s6 + $0x34] ss:$12 sps:$4 sm:$0xff]  }
 0x471   : > { %v2197_v36 = vpop.permute.xlu1 %2196  ;;  %2340 = vmatprep.subr.bf16.mxu0 %v2245_v25  ;;  %v1902_v25 = vld [vmem:[%s11982_s7 + $0x20] sm:$0xff] }
 0x472   : > { %v2253_v39 = vsel %vm850_vm8, %v2195_v37, %v2197_v36  ;;  %v1903_v36 = vld [vmem:[%s11982_s7 + $0x28] sm:$0xff] }
 0x473   : > { %v2205_v52 = vpop.permute.xlu0 %2204 }
 0x474   : > { %2341 = vmatpush1.bf16.msra.mxu0 %v2244_v44  ;;  %v2256_v20 = vsel %vm850_vm8, %v2205_v52, %v2207_v43  ;;  %v1900_v52 = vld [vmem:[%s11982_s7 + $0x10] sm:$0xff]  ;;  %v1901_v44 = vld [vmem:[%s11982_s7 + $0x18] sm:$0xff] }
 0x475   : > { %v2199_v21 = vpop.permute.xlu1 %2198  ;;  %2342 = vmatprep.subr.bf16.mxu0 %v2247_v45  ;;  %v7438_v45 = vld [vmem:[%s11981_s6 + $0x30] ss:$12 sps:$4 sm:$0xff]  }
 0x477   : > { %v2203_v38 = vpop.permute.xlu0 %2202 }
 0x478   : > { %2343 = vmatpush1.bf16.msra.mxu0 %v2246_v0  ;;  %v1904_v0 = vld [vmem:[%s11982_s7 + $0x30] sm:$0xff] }
 0x479   : > { %v2209_v8 = vpop.permute.xlu1 %2208  ;;  %2344 = vmatprep.subr.bf16.mxu0 %v2249_v42  ;;  %v1905_v42 = vld [vmem:[%s11982_s7 + $0x38] sm:$0xff] }
 0x47a   : > { %v2257_v31 = vsel %vm850_vm8, %v2207_v43, %v2209_v8  ;;  %v1907_v8 = vld [vmem:[%s11982_s7 + $0x48] sm:$0xff] }
 0x47b   : > { %v1853_v40 = vpop.permute.xlu0 %1852 }
 0x47c   : > { %2345 = vmatpush1.bf16.msra.mxu0 %v2248_v23  ;;  %v7441_v23 = vld [vmem:[%s11981_s6 + $0x48] ss:$12 sps:$4 sm:$0xff]  }
 0x47d   : > { %v2189_v58 = vpop.permute.xlu1 %2188 }
 0x47e   : > { %v2251_v57 = vsel %vm850_vm8, %v2189_v58, %v2191_v22  ;;  %v2250_v41 = vsel %vm850_vm8, %v2187_v54, %v2189_v58  ;;  %v1899_v22 = vld [vmem:[%s11982_s7 + $0x8] sm:$0xff]  ;;  %v7442_v58 = vld [vmem:[%s11981_s6 + $0x64] ss:$12 sps:$4 sm:$0xff]  }
 0x47f   : > { %2346 = vmatprep.subr.bf16.mxu0 %v2251_v57  ;;  %v2215_v13 = vpop.permute.xlu0 %2214  ;;  %v1910_v57 = vld [vmem:[%s11982_s7 + $0x60] sm:$0xff] }
 0x480   : > { %2347 = vmatpush1.bf16.msra.mxu0 %v2250_v41  ;;  %v1911_v41 = vld [vmem:[%s11982_s7 + $0x68] sm:$0xff] }
 0x481   : > { %v1851_v46 = vpop.permute.xlu1 %1850  ;;  %2348 = vmatprep.subr.bf16.mxu0 %v2253_v39  ;;  %v1909_v39 = vld [vmem:[%s11982_s7 + $0x58] sm:$0xff] }
 0x482   : > { %v1862_v29 = vsel %vm1044_vm13, %v1851_v46, %v1853_v40 }
 0x483   : > { %2218 = vrot.lane.b32.xlu0 %v1862_v29, %s12009_s11  ;;  %v2211_v9 = vpop.permute.xlu0 %2210  ;;  %v7445_v29 = vld [vmem:[%s11981_s6 + $0x7c] ss:$12 sps:$4 sm:$0xff]  }
 0x484   : > { %2349 = vmatpush1.bf16.msra.mxu0 %v2252_v24  ;;  %v1912_v24 = vld [vmem:[%s11982_s7 + $0x70] sm:$0xff] }
 0x485   : > { %v2201_v30 = vpop.permute.xlu1 %2200 }
 0x486   : > { %v2255_v5 = vsel %vm850_vm8, %v2201_v30, %v2203_v38  ;;  %v2254_v12 = vsel %vm850_vm8, %v2199_v21, %v2201_v30  ;;  %v7439_v21 = vld [vmem:[%s11981_s6 + $0x4c] ss:$12 sps:$4 sm:$0xff]   ;;  %v1906_v38 = vld [vmem:[%s11982_s7 + $0x40] sm:$0xff] }
 0x487   : > { %2350 = vmatprep.subr.bf16.mxu0 %v2255_v5  ;;  %2216 = vrot.lane.b32.xlu0 %v1851_v46, %s12009_s11  ;;  %v1859_v3 = vpop.permute.xlu0 %1858  ;;  %v7444_v46 = vld [vmem:[%s11981_s6 + $0x60] ss:$12 sps:$4 sm:$0xff]  }
 0x488   : > { %2351 = vmatpush1.bf16.msra.mxu0 %v2254_v12 }
 0x489   : > { %v1855_v56 = vpop.permute.xlu1 %1854  ;;  %2352 = vmatprep.subr.bf16.mxu0 %v2257_v31  ;;  %v1069_v31 = vld [vmem:[%s11980_s5 + $0x20] sm:$0xff] }
 0x48a   : > { %v1863_v33 = vsel %vm1044_vm13, %v1853_v40, %v1855_v56  ;;  %v1908_v40 = vld [vmem:[%s11982_s7 + $0x50] sm:$0xff]  ;;  %v1070_v56 = vld [vmem:[%s11980_s5 + $0x28] sm:$0xff] }
 0x48b   : > { %2220 = vrot.lane.b32.xlu1 %v1863_v33, %s12009_s11  ;;  %v7447_v33 = vld [vmem:[%s11981_s6 + $0x78] ss:$12 sps:$4 sm:$0xff]  }
 0x48c   : > { %2353 = vmatpush1.bf16.msra.mxu0 %v2256_v20 }
 0x48d   : > { %v2213_v37 = vpop.permute.xlu1 %2212 }
 0x48e   : > { %v2259_v32 = vsel %vm850_vm8, %v2213_v37, %v2215_v13  ;;  %v2258_v4 = vsel %vm850_vm8, %v2211_v9, %v2213_v37  ;;  %v1913_v13 = vld [vmem:[%s11982_s7 + $0x78] sm:$0xff]  ;;  %v7448_v37 = vld [vmem:[%s11981_s6 + $0x94] ss:$12 sps:$4 sm:$0xff]  }
 0x48f   : > { %2354 = vmatprep.subr.bf16.mxu0 %v2259_v32 }
 0x490   : > { %2355 = vmatpush1.bf16.msra.mxu0 %v2258_v4  ;;  %v1071_v4 = vld [vmem:[%s11980_s5 + $0x30] sm:$0xff] }
 0x491   : > { %v1857_v59 = vpop.permute.xlu1 %1856 }
 0x492   : > { %v1864_v54 = vsel %vm1044_vm13, %v1857_v59, %v1859_v3 }
 0x493   : > { %2224 = vrot.lane.b32.xlu1 %v1864_v54, %s12009_s11  ;;  %2357 = vmatmul.mubr.bf16.vlgmr.msra.gmra.mrb[24].mxu0 %v7430_v10  ;;  %v1072_v10 = vld [vmem:[%s11980_s5 + $0x38] sm:$0xff] }
 0x494   : > { %2366 = vmatprep.mubr.bf16.mxu0 %v7433_v63 }
 0x495   : > { %v1861_v43 = vpop.permute.xlu1 %1860 }
 0x496   : > { %v1865_v34 = vsel %vm1044_vm13, %v1859_v3, %v1861_v43 }
 0x497   : > { %2226 = vrot.lane.b32.xlu0 %v1865_v34, %s12009_s11  ;;  %2222 = vrot.lane.b32.xlu1 %v1857_v59, %s12009_s11  ;;  %s12088_s11 = smov 95  }
 0x49b   : > { %1916 = vperm.xlu0 %7404, %v1898_v35   ;;  %1921 = vperm.xlu1 %7405, %v1899_v22   ;;  %v7450_v35 = vld [vmem:[%s11981_s6 + $0x90] ss:$12 sps:$4 sm:$0xff]  }
 0x49c   : > { %2367 = vmatmul.mubr.bf16.gmra.mrb[28].mxu0 %v7435_v53 }
 0x49d   : > { %2376 = vmatprep.mubr.bf16.mxu0 %v7436_v48  ;;  %v7451_v48 = vld [vmem:[%s11981_s6 + $0xac] ss:$12 sps:$4 sm:$0xff]  }
 0x49f   : > { %1936 = vperm.xlu0 %7404, %v1902_v25   ;;  %1941 = vperm.xlu1 %7405, %v1903_v36  }
 0x4a3   : > { %1926 = vperm.xlu0 %7404, %v1900_v52   ;;  %1931 = vperm.xlu1 %7405, %v1901_v44   ;;  %v9514_v30 = vpop.f32.mrb[8].mxu1  ;;  %v7453_v52 = vld [vmem:[%s11981_s6 + $0xa8] ss:$12 sps:$4 sm:$0xff]  }
 0x4a4   : > { %2377 = vmatmul.mubr.bf16.gmra.mrb[32].mxu0 %v7438_v45  ;;  %v9516_v5 = vpop.f32.mrb[9].mxu1 }
 0x4a5   : > { %2386 = vmatprep.mubr.bf16.mxu0 %v7439_v21  ;;  %v9529_v20 = vpop.f32.mrb[10].mxu1 }
 0x4a6   : > { %v9536_v32 = vpop.f32.mrb[11].mxu1 }
 0x4a7   : > { %1946 = vperm.xlu0 %7404, %v1904_v0   ;;  %1951 = vperm.xlu1 %7405, %v1905_v42  }
 0x4ab   : > { %1956 = vperm.xlu0 %7404, %v1906_v38   ;;  %1961 = vperm.xlu1 %7405, %v1907_v8  }
 0x4ac   : > { %2387 = vmatmul.mubr.bf16.gmra.mrb[36].mxu0 %v7441_v23 }
 0x4ad   : > { %2396 = vmatprep.mubr.bf16.mxu0 %v7442_v58 }
 0x4af   : > { %1976 = vperm.xlu0 %7404, %v1910_v57   ;;  %1981 = vperm.xlu1 %7405, %v1911_v41   ;;  %v7454_v41 = vld [vmem:[%s11981_s6 + $0x8] ss:$12 sps:$4 sm:$0xff]  }
 0x4b1   : > { %v9518_v12 = vpop.f32.mrb[16].mxu0 }
 0x4b2   : > { %v9531_v9 = vpop.f32.mrb[17].mxu0 }
 0x4b3   : > { %1966 = vperm.xlu0 %7404, %v1908_v40   ;;  %1971 = vperm.xlu1 %7405, %v1909_v39   ;;  %v9546_v3 = vpop.f32.mrb[18].mxu0  ;;  %v7455_v40 = vld [vmem:[%s11981_s6 + $0x20] ss:$12 sps:$4 sm:$0xff]  }
 0x4b4   : > { %2397 = vmatmul.mubr.bf16.gmra.mrb[40].mxu0 %v7444_v46  ;;  %v9550_v54 = vpop.f32.mrb[19].mxu0 }
 0x4b5   : > { %2406 = vmatprep.mubr.bf16.mxu0 %v7445_v29  ;;  %v7456_v29 = vld [vmem:[%s11981_s6 + $0x38] ss:$12 sps:$4 sm:$0xff]  }
 0x4b6   : > { %v9544_v63 = vpop.f32.mrb[12].mxu1 }
 0x4b7   : > { %1986 = vperm.xlu0 %7404, %v1912_v24   ;;  %1991 = vperm.xlu1 %7405, %v1913_v13   ;;  %v9548_v59 = vpop.f32.mrb[13].mxu1 }
 0x4b8   : > { %v9552_v43 = vpop.f32.mrb[14].mxu1 }
 0x4b9   : > { %v9554_v34 = vpop.f32.mrb[20].mxu0  ;;  %v9559_v22 = vpop.f32.mrb[15].mxu1 }
 0x4ba   : > { %v9561_v53 = vpop.f32.mrb[21].mxu0 }
 0x4bb   : > { %1095 = vperm.xlu0 %7404, %v1069_v31   ;;  %1100 = vperm.xlu1 %7405, %v1070_v56   ;;  %v9566_v25 = vpop.f32.mrb[22].mxu0 }
 0x4bc   : > { %2407 = vmatmul.mubr.bf16.gmra.mrb[44].mxu0 %v7447_v33  ;;  %v9568_v36 = vpop.f32.mrb[23].mxu0  ;;  %v7457_v33 = vld [vmem:[%s11981_s6 + $0x50] ss:$12 sps:$4 sm:$0xff]  }
 0x4bd   : > { %2416 = vmatprep.mubr.bf16.mxu0 %v7448_v37 }
 0x4bf   : > { %1105 = vperm.xlu0 %7404, %v1071_v4   ;;  %1110 = vperm.xlu1 %7405, %v1072_v10  }
 0x4c3   : > { %2928 = vrot.lane.b32.xlu0 %v8309_v51, %s12032_s12  ;;  %2934 = vrot.lane.b32.xlu1 %v8309_v51, %s12032_s12 }
 0x4c4   : > { %2417 = vmatmul.mubr.bf16.gmra.mrb[48].mxu0 %v7450_v35 }
 0x4c5   : > { %2426 = vmatprep.mubr.bf16.mxu0 %v7451_v48  ;;  %v7458_v48 = vld [vmem:[%s11981_s6 + $0x68] ss:$12 sps:$4 sm:$0xff]  }
 0x4c7   : > { %2950 = vrot.lane.b32.xlu0 %v8317_v55, %s12011_s22  ;;  %2956 = vrot.lane.b32.xlu1 %v8317_v55, %s12011_s22 }
 0x4cb   : > { %2972 = vrot.lane.b32.xlu0 %v8323_v60, %s12085_s16  ;;  %2978 = vrot.lane.b32.xlu1 %v8323_v60, %s12085_s16 }
 0x4cc   : > { %2427 = vmatmul.mubr.bf16.gmra.mrb[52].mxu0 %v7453_v52 }
 0x4cd   : > { %2469 = vmatprep.mubr.bf16.mxu0 %v12074_v18 }
 0x4cf   : > { %3012 = vrot.lane.b32.xlu0 %v8327_v62, %s12086_s18  ;;  %3018 = vrot.lane.b32.xlu1 %v8327_v62, %s12086_s18 }
 0x4d3   : > { %3034 = vrot.lane.b32.xlu0 %v8335_v2, %s12087_s19  ;;  %3040 = vrot.lane.b32.xlu1 %v8335_v2, %s12087_s19 }
 0x4d7   : > { %3056 = vrot.lane.b32.xlu0 %v8343_v7, %s12088_s11  ;;  %3062 = vrot.lane.b32.xlu1 %v8343_v7, %s12088_s11 }
 0x4db   : > { %3344 = vrot.lane.b32.xlu0 %v8359_v14, %s12089_s26  ;;  %3350 = vrot.lane.b32.xlu1 %v8359_v14, %s12089_s26 }
 0x4f5   : > { %v2219_v44 = vpop.permute.xlu0 %2218 }
 0x4f9   : > { %v2217_v45 = vpop.permute.xlu0 %2216 }
 0x4fa   : > { %v2260_v42 = vsel %vm850_vm8, %v2217_v45, %v2219_v44 }
 0x4fd   : > { %v2221_v21 = vpop.permute.xlu1 %2220 }
 0x4fe   : > { %v2261_v0 = vsel %vm850_vm8, %v2219_v44, %v2221_v21 }
 0x4ff   : > { %2437 = vmatprep.subr.bf16.mxu0 %v2261_v0  ;;  %v7459_v0 = vld [vmem:[%s11981_s6 + $0x80] ss:$12 sps:$4 sm:$0xff]  }
 0x500   : > { %2438 = vmatpush1.bf16.msra.mxu0 %v2260_v42 }
 0x505   : > { %v2225_v38 = vpop.permute.xlu1 %2224 }
 0x509   : > { %v2223_v8 = vpop.permute.xlu1 %2222  ;;  %v2227_v23 = vpop.permute.xlu0 %2226 }
 0x50a   : > { %v2262_v58 = vsel %vm850_vm8, %v2223_v8, %v2225_v38  ;;  %v2263_v57 = vsel %vm850_vm8, %v2225_v38, %v2227_v23 }
 0x50b   : > { %2439 = vmatprep.subr.bf16.mxu0 %v2263_v57 }
 0x50c   : > { %2440 = vmatpush1.bf16.msra.mxu0 %v2262_v58 }
 0x50f   : > { %6835 = vmatmul.mubr.msk.bf16.vlgmr.msra.gmra.mrb[24].mxu0 %vm489_vm0, %v7454_v41 }
 0x510   : > { %2479 = vmatprep.mubr.bf16.mxu0 %v12074_v18 }
 0x517   : > { %6836 = vmatmul.mubr.msk.bf16.gmra.mrb[28].mxu0 %vm489_vm0, %v7455_v40 }
 0x518   : > { %2489 = vmatprep.mubr.bf16.mxu0 %v12074_v18 }
 0x51a   : > { %v1922_v39 = vpop.permute.xlu1 %1921  ;;  %v1917_v46 = vpop.permute.xlu0 %1916 }
 0x51e   : > { %v9619_v24 = vpop.permute.xlu1 %1941  ;;  %v9621_v13 = vpop.permute.xlu0 %1936 }
 0x51f   : > { %6837 = vmatmul.mubr.msk.bf16.gmra.mrb[32].mxu0 %vm489_vm0, %v7456_v29  ;;  %v7460_v29 = vld [vmem:[%s11981_s6 + $0x98] ss:$12 sps:$4 sm:$0xff]  }
 0x520   : > { %2499 = vmatprep.mubr.bf16.mxu0 %v12074_v18 }
 0x522   : > { %v9625_v31 = vpop.permute.xlu1 %1931  ;;  %v9627_v56 = vpop.permute.xlu0 %1926 }
 0x526   : > { %v9632_v37 = vpop.permute.xlu1 %1951  ;;  %v9634_v4 = vpop.permute.xlu0 %1946 }
 0x527   : > { %6838 = vmatmul.mubr.msk.bf16.gmra.mrb[36].mxu0 %vm489_vm0, %v7457_v33 }
 0x528   : > { %2509 = vmatprep.mubr.bf16.mxu0 %v12074_v18 }
 0x52a   : > { %v9638_v10 = vpop.permute.xlu1 %1961  ;;  %v9640_v35 = vpop.permute.xlu0 %1956 }
 0x52e   : > { %v9645_v52 = vpop.permute.xlu1 %1981  ;;  %v9647_v44 = vpop.permute.xlu0 %1976 }
 0x52f   : > { %6839 = vmatmul.mubr.msk.bf16.gmra.mrb[40].mxu0 %vm489_vm0, %v7458_v48 }
 0x530   : > { %2519 = vmatprep.mubr.bf16.mxu0 %v12074_v18 }
 0x532   : > { %v9651_v45 = vpop.permute.xlu1 %1971  ;;  %v9653_v21 = vpop.permute.xlu0 %1966 }
 0x536   : > { %v9658_v42 = vpop.permute.xlu1 %1991  ;;  %v9660_v38 = vpop.permute.xlu0 %1986 }
 0x537   : > { %6840 = vmatmul.mubr.msk.bf16.gmra.mrb[44].mxu0 %vm489_vm0, %v7459_v0 }
 0x538   : > { %2529 = vmatprep.mubr.bf16.mxu0 %v12074_v18 }
 0x53a   : > { %v1101_v8 = vpop.permute.xlu1 %1100  ;;  %v1096_v23 = vpop.permute.xlu0 %1095 }
 0x53b   : > { %v1427_v58 = vadd.f32 %v9514_v30, %v1096_v23  ;;  %v1429_v57 = vadd.f32 %v9516_v5, %v1096_v23  ;;  %v1431_v41 = vadd.f32 %v9529_v20, %v1101_v8  ;;  %v1433_v40 = vadd.f32 %v9536_v32, %v1101_v8 }
 0x53d   : > { %v9672_v33 = vadd.f32 %v9518_v12, %v1427_v58  ;;  %v9675_v48 = vadd.f32 %v9531_v9, %v1429_v57  ;;  %v9678_v0 = vadd.f32 %v9546_v3, %v1431_v41  ;;  %v9681_v30 = vadd.f32 %v9550_v54, %v1433_v40 }
 0x53e   : > { %v1111_v5 = vpop.permute.xlu1 %1110  ;;  %v1106_v20 = vpop.permute.xlu0 %1105 }
 0x53f   : > { %v1437_v32 = vadd.f32 %v9544_v63, %v1106_v20  ;;  %v1439_v8 = vadd.f32 %v9548_v59, %v1106_v20  ;;  %v1441_v23 = vadd.f32 %v9552_v43, %v1111_v5  ;;  %6841 = vmatmul.mubr.msk.bf16.gmra.mrb[48].mxu0 %vm489_vm0, %v7460_v29  ;;  %v1443_v12 = vadd.f32 %v9559_v22, %v1111_v5  ;;  %v7461_v59 = vld [vmem:[%s11981_s6 + $0xb0] ss:$12 sps:$4 sm:$0xff]  }
 0x540   : > { %2539 = vmatprep.mubr.bf16.mxu0 %v12074_v18 }
 0x541   : > { %v9690_v9 = vadd.f32 %v9554_v34, %v1437_v32  ;;  %v9693_v3 = vadd.f32 %v9561_v53, %v1439_v8  ;;  %v9696_v54 = vadd.f32 %v9566_v25, %v1441_v23  ;;  %v9699_v63 = vadd.f32 %v9568_v36, %v1443_v12 }
 0x547   : > { %6842 = vmatmul.mubr.msk.bf16.gmra.mrb[52].mxu0 %vm489_vm0, %v7461_v59 }
 0x5e2   : > { %v2471_v43 = vpop.f32.mrb[24].mxu0 }
 0x5e3   : > { %v7110_v22 = vadd.f32 %v2471_v43, %v1917_v46  ;;  %v2473_v58 = vpop.f32.mrb[25].mxu0 }
 0x5e4   : > { %v7111_v34 = vadd.f32 %v2473_v58, %v1917_v46  ;;  %v2475_v57 = vpop.f32.mrb[26].mxu0 }
 0x5e5   : > { %v6843_v41 = vmul.f32 -1.442695, %v7110_v22  ;;  %v7112_v53 = vadd.f32 %v2475_v57, %v1922_v39  ;;  %v2477_v40 = vpop.f32.mrb[27].mxu0 }
 0x5e6   : > { %v6844_v29 = vmul.f32 -1.442695, %v7111_v34  ;;  %v7113_v25 = vadd.f32 %v2477_v40, %v1922_v39 }
 0x5e7   : > { %7560 = vpow2.f32 %v6843_v41  ;;  %v6845_v5 = vmul.f32 -1.442695, %v7112_v53 }
 0x5e8   : > { %7562 = vpow2.f32 %v6844_v29  ;;  %v6846_v36 = vmul.f32 -1.442695, %v7113_v25 }
 0x5e9   : > { %7564 = vpow2.f32 %v6845_v5 }
 0x5ea   : > { %v2481_v20 = vpop.f32.mrb[28].mxu0  ;;  %7566 = vpow2.f32 %v6846_v36 }
 0x5eb   : > { %v7114_v32 = vadd.f32 %v2481_v20, %v9627_v56  ;;  %v2483_v8 = vpop.f32.mrb[29].mxu0 }
 0x5ec   : > { %v7115_v23 = vadd.f32 %v2483_v8, %v9627_v56  ;;  %v2485_v12 = vpop.f32.mrb[30].mxu0 }
 0x5ed   : > { %v6847_v46 = vmul.f32 -1.442695, %v7114_v32  ;;  %v7116_v59 = vadd.f32 %v2485_v12, %v9625_v31  ;;  %v2487_v43 = vpop.f32.mrb[31].mxu0 }
 0x5ee   : > { %v6848_v22 = vmul.f32 -1.442695, %v7115_v23  ;;  %v7117_v39 = vadd.f32 %v2487_v43, %v9625_v31 }
 0x5ef   : > { %7568 = vpow2.f32 %v6847_v46  ;;  %v6849_v58 = vmul.f32 -1.442695, %v7116_v59 }
 0x5f0   : > { %7570 = vpow2.f32 %v6848_v22  ;;  %v6850_v34 = vmul.f32 -1.442695, %v7117_v39 }
 0x5f1   : > { %v7561_v57 = vpop.eup %7560  ;;  %7572 = vpow2.f32 %v6849_v58 }
 0x5f2   : > { %v7563_v41 = vpop.eup %7562  ;;  %v2574_v53 = vadd.f32 1.0, %v7561_v57  ;;  %v2491_v40 = vpop.f32.mrb[32].mxu0  ;;  %7574 = vpow2.f32 %v6850_v34 }
 0x5f3   : > { %v7565_v29 = vpop.eup %7564  ;;  %v2575_v25 = vadd.f32 1.0, %v7563_v41  ;;  %v7118_v56 = vadd.f32 %v2491_v40, %v9621_v13  ;;  %v2493_v5 = vpop.f32.mrb[33].mxu0 }
 0x5f4   : > { %v2576_v36 = vadd.f32 1.0, %v7565_v29  ;;  %v7119_v20 = vadd.f32 %v2493_v5, %v9621_v13  ;;  %v2495_v32 = vpop.f32.mrb[34].mxu0  ;;  %v7567_v31 = vpop.eup %7566  ;;  %7576 = vrcp.f32 %v2574_v53 }
 0x5f5   : > { %v6851_v8 = vmul.f32 -1.442695, %v7118_v56  ;;  %v7120_v23 = vadd.f32 %v2495_v32, %v9619_v24  ;;  %v2497_v12 = vpop.f32.mrb[35].mxu0  ;;  %7578 = vrcp.f32 %v2575_v25  ;;  %v2577_v22 = vadd.f32 1.0, %v7567_v31 }
 0x5f6   : > { %v6852_v46 = vmul.f32 -1.442695, %v7119_v20  ;;  %v7121_v59 = vadd.f32 %v2497_v12, %v9619_v24  ;;  %7580 = vrcp.f32 %v2576_v36 }
 0x5f7   : > { %v6853_v43 = vmul.f32 -1.442695, %v7120_v23  ;;  %7582 = vpow2.f32 %v6851_v8 }
 0x5f8   : > { %v6854_v39 = vmul.f32 -1.442695, %v7121_v59  ;;  %7584 = vpow2.f32 %v6852_v46 }
 0x5f9   : > { %v7569_v58 = vpop.eup %7568  ;;  %7586 = vpow2.f32 %v6853_v43 }
 0x5fa   : > { %v7571_v34 = vpop.eup %7570  ;;  %v2578_v13 = vadd.f32 1.0, %v7569_v58  ;;  %v2501_v57 = vpop.f32.mrb[36].mxu0  ;;  %7588 = vpow2.f32 %v6854_v39 }
 0x5fb   : > { %v7573_v41 = vpop.eup %7572  ;;  %v2579_v53 = vadd.f32 1.0, %v7571_v34  ;;  %v7122_v40 = vadd.f32 %v2501_v57, %v9634_v4  ;;  %v2503_v29 = vpop.f32.mrb[37].mxu0  ;;  %7590 = vrcp.f32 %v2577_v22 }
 0x5fc   : > { %v2580_v25 = vadd.f32 1.0, %v7573_v41  ;;  %v7123_v24 = vadd.f32 %v2503_v29, %v9634_v4  ;;  %v2505_v56 = vpop.f32.mrb[38].mxu0  ;;  %v7575_v5 = vpop.eup %7574  ;;  %7592 = vrcp.f32 %v2578_v13 }
 0x5fd   : > { %v6855_v36 = vmul.f32 -1.442695, %v7122_v40  ;;  %v7124_v20 = vadd.f32 %v2505_v56, %v9632_v37  ;;  %v2507_v32 = vpop.f32.mrb[39].mxu0  ;;  %7594 = vrcp.f32 %v2579_v53  ;;  %v2581_v59 = vadd.f32 1.0, %v7575_v5 }
 0x5fe   : > { %v6856_v31 = vmul.f32 -1.442695, %v7123_v24  ;;  %v7125_v8 = vadd.f32 %v2507_v32, %v9632_v37  ;;  %v9717_v23 = vpop.eup %7576  ;;  %7596 = vrcp.f32 %v2580_v25 }
 0x5ff   : > { %v6857_v12 = vmul.f32 -1.442695, %v7124_v20  ;;  %v9719_v46 = vpop.eup %7578  ;;  %7598 = vpow2.f32 %v6855_v36 }
 0x600   : > { %v6858_v4 = vmul.f32 -1.442695, %v7125_v8  ;;  %v9721_v43 = vpop.eup %7580  ;;  %7600 = vpow2.f32 %v6856_v31 }
 0x601   : > { %v7583_v22 = vpop.eup %7582  ;;  %7602 = vpow2.f32 %v6857_v12 }
 0x602   : > { %v2511_v39 = vpop.f32.mrb[40].mxu0  ;;  %v7585_v58 = vpop.eup %7584  ;;  %v2622_v34 = vadd.f32 1.0, %v7583_v22  ;;  %7604 = vpow2.f32 %v6858_v4 }
 0x603   : > { %v2513_v13 = vpop.f32.mrb[41].mxu0  ;;  %v7587_v37 = vpop.eup %7586  ;;  %7606 = vrcp.f32 %v2581_v59  ;;  %v2623_v57 = vadd.f32 1.0, %v7585_v58  ;;  %v7126_v29 = vadd.f32 %v2511_v39, %v9640_v35 }
 0x604   : > { %v2515_v41 = vpop.f32.mrb[42].mxu0  ;;  %v7589_v53 = vpop.eup %7588  ;;  %7608 = vrcp.f32 %v2622_v34  ;;  %v2624_v40 = vadd.f32 1.0, %v7587_v37  ;;  %v7127_v5 = vadd.f32 %v2513_v13, %v9640_v35 }
 0x605   : > { %v2517_v25 = vpop.f32.mrb[43].mxu0  ;;  %v9724_v24 = vpop.eup %7590  ;;  %7610 = vrcp.f32 %v2623_v57  ;;  %v2625_v56 = vadd.f32 1.0, %v7589_v53  ;;  %v7128_v20 = vadd.f32 %v2515_v41, %v9638_v10 }
 0x606   : > { %v9727_v36 = vpop.eup %7592  ;;  %7612 = vrcp.f32 %v2624_v40  ;;  %v7129_v31 = vadd.f32 %v2517_v25, %v9638_v10 }
 0x607   : > { %v9730_v32 = vpop.eup %7594  ;;  %7614 = vrcp.f32 %v2625_v56 }
 0x608   : > { %v9733_v8 = vpop.eup %7596  ;;  %7616 = vtanh.f32 %v7126_v29 }
 0x609   : > { %v7599_v12 = vpop.eup %7598  ;;  %7618 = vtanh.f32 %v7127_v5 }
 0x60a   : > { %v2521_v59 = vpop.f32.mrb[44].mxu0  ;;  %v7601_v4 = vpop.eup %7600  ;;  %v2626_v22 = vadd.f32 1.0, %v7599_v12  ;;  %7620 = vtanh.f32 %v7128_v20 }
 0x60b   : > { %v2523_v35 = vpop.f32.mrb[45].mxu0  ;;  %v7603_v39 = vpop.eup %7602  ;;  %v2627_v58 = vadd.f32 1.0, %v7601_v4  ;;  %7622 = vtanh.f32 %v7129_v31  ;;  %v7130_v57 = vadd.f32 %v2521_v59, %v9653_v21 }
 0x60c   : > { %v2525_v34 = vpop.f32.mrb[46].mxu0  ;;  %v7605_v13 = vpop.eup %7604  ;;  %7624 = vrcp.f32 %v2626_v22  ;;  %v2628_v37 = vadd.f32 1.0, %v7603_v39  ;;  %v7131_v40 = vadd.f32 %v2523_v35, %v9653_v21 }
 0x60d   : > { %v2527_v10 = vpop.f32.mrb[47].mxu0  ;;  %v9736_v41 = vpop.eup %7606  ;;  %7626 = vrcp.f32 %v2627_v58  ;;  %v2629_v53 = vadd.f32 1.0, %v7605_v13  ;;  %v7132_v25 = vadd.f32 %v2525_v34, %v9651_v45 }
 0x60e   : > { %v7609_v29 = vpop.eup %7608  ;;  %7628 = vrcp.f32 %v2628_v37  ;;  %v7133_v20 = vadd.f32 %v2527_v10, %v9651_v45 }
 0x60f   : > { %v7611_v56 = vpop.eup %7610  ;;  %v2702_v5 = vmul.f32 %v7609_v29, %v9672_v33  ;;  %7630 = vrcp.f32 %v2629_v53 }
 0x610   : > { %v7613_v31 = vpop.eup %7612  ;;  %v2703_v12 = vmul.f32 %v7611_v56, %v9675_v48  ;;  %7632 = vtanh.f32 %v7130_v57 }
 0x611   : > { %v7615_v59 = vpop.eup %7614  ;;  %v2704_v4 = vmul.f32 %v7613_v31, %v9678_v0  ;;  %7634 = vtanh.f32 %v7131_v40 }
 0x612   : > { %v2531_v22 = vpop.f32.mrb[48].mxu0  ;;  %v7617_v21 = vpop.eup %7616  ;;  %v2705_v35 = vmul.f32 %v7615_v59, %v9681_v30  ;;  %7636 = vtanh.f32 %v7132_v25 }
 0x613   : > { %v7134_v39 = vadd.f32 %v2531_v22, %v9647_v44  ;;  %v2533_v58 = vpop.f32.mrb[49].mxu0  ;;  %v7619_v33 = vpop.eup %7618  ;;  %v2710_v34 = vmul.f32 %v7617_v21, %v9717_v23  ;;  %7638 = vtanh.f32 %v7133_v20 }
 0x614   : > { %v7135_v45 = vadd.f32 %v2533_v58, %v9647_v44  ;;  %v2535_v48 = vpop.f32.mrb[50].mxu0  ;;  %v7621_v13 = vpop.eup %7620  ;;  %v2711_v37 = vmul.f32 %v7619_v33, %v9719_v46 }
 0x615   : > { %v6859_v0 = vmul.f32 -1.442695, %v7134_v39  ;;  %v7136_v57 = vadd.f32 %v2535_v48, %v9645_v52  ;;  %v2537_v10 = vpop.f32.mrb[51].mxu0  ;;  %v7623_v53 = vpop.eup %7622  ;;  %v9750_v30 = vadd.f32 %v2710_v34, %v2702_v5  ;;  %v2712_v40 = vmul.f32 %v7621_v13, %v9721_v43 }
 0x616   : > { %v7137_v29 = vadd.f32 %v2537_v10, %v9645_v52  ;;  %v7625_v25 = vpop.eup %7624  ;;  %v9754_v23 = vadd.f32 %v2711_v37, %v2703_v12  ;;  %v2713_v44 = vmul.f32 %v7623_v53, %v9724_v24  ;;  %v6860_v31 = vmul.f32 -1.442695, %v7135_v45 }
 0x617   : > { %7640 = vpow2.f32 %v6859_v0  ;;  %v7627_v56 = vpop.eup %7626  ;;  %v2706_v46 = vmul.f32 %v7625_v25, %v9690_v9  ;;  %v9758_v20 = vadd.f32 %v2712_v40, %v2704_v4  ;;  %v6861_v43 = vmul.f32 -1.442695, %v7136_v57 }
 0x618   : > { %v7629_v59 = vpop.eup %7628  ;;  %v2707_v5 = vmul.f32 %v7627_v56, %v9693_v3  ;;  %v9761_v22 = vadd.f32 %v2713_v44, %v2705_v35  ;;  %v6862_v12 = vmul.f32 -1.442695, %v7137_v29  ;;  %7642 = vpow2.f32 %v6860_v31 }
 0x619   : > { %12090 = vst [vmem:[#allocation9_spill] sm:$0xff] %v9758_v20  ;;  %v7631_v21 = vpop.eup %7630  ;;  %v2708_v52 = vmul.f32 %v7629_v59, %v9696_v54  ;;  %7644 = vpow2.f32 %v6861_v43 }
 0x61a   : > { %12091 = vst [vmem:[#allocation14_spill] sm:$0xff] %v9761_v22  ;;  %v2541_v39 = vpop.f32.mrb[52].mxu0  ;;  %v7633_v58 = vpop.eup %7632  ;;  %v2709_v24 = vmul.f32 %v7631_v21, %v9699_v63  ;;  %7646 = vpow2.f32 %v6862_v12 }
 0x61b   : > { %v7138_v33 = vadd.f32 %v2541_v39, %v9660_v38  ;;  %v2543_v9 = vpop.f32.mrb[53].mxu0  ;;  %v7635_v4 = vpop.eup %7634  ;;  %v2714_v34 = vmul.f32 %v7633_v58, %v9727_v36 }
 0x61c   : > { %v2545_v45 = vpop.f32.mrb[54].mxu0  ;;  %v7637_v3 = vpop.eup %7636  ;;  %v2715_v35 = vmul.f32 %v7635_v4, %v9730_v32  ;;  %v7139_v54 = vadd.f32 %v2543_v9, %v9660_v38 }
 0x61d   : > { %v6863_v48 = vmul.f32 -1.442695, %v7138_v33  ;;  %v2547_v13 = vpop.f32.mrb[55].mxu0  ;;  %v7639_v37 = vpop.eup %7638  ;;  %v9769_v0 = vadd.f32 %v2714_v34, %v2706_v46  ;;  %v2716_v63 = vmul.f32 %v7637_v3, %v9733_v8  ;;  %v7140_v57 = vadd.f32 %v2545_v45, %v9658_v42 }
 0x61e   : > { %v9773_v10 = vadd.f32 %v2715_v35, %v2707_v5  ;;  %v2717_v36 = vmul.f32 %v7639_v37, %v9736_v41  ;;  %v7141_v38 = vadd.f32 %v2547_v13, %v9658_v42  ;;  %v6864_v8 = vmul.f32 -1.442695, %v7139_v54 }
 0x61f   : > { %12092 = vst [vmem:[#allocation15_spill] sm:$0xff] %v9769_v0  ;;  %7648 = vpow2.f32 %v6863_v48  ;;  %v9777_v32 = vadd.f32 %v2716_v63, %v2708_v52  ;;  %v6865_v25 = vmul.f32 -1.442695, %v7140_v57 }
 0x620   : > { %12093 = vst [vmem:[#allocation16_spill] sm:$0xff] %v9773_v10  ;;  %7650 = vtanh.f32 %v9750_v30  ;;  %v9781_v40 = vadd.f32 %v2717_v36, %v2709_v24  ;;  %v6866_v41 = vmul.f32 -1.442695, %v7141_v38 }
 0x621   : > { %12094 = vst [vmem:[#allocation17_spill] sm:$0xff] %v9777_v32  ;;  %v7641_v53 = vpop.eup %7640  ;;  %7652 = vtanh.f32 %v9754_v23 }
 0x622   : > { %12095 = vst [vmem:[#allocation18_spill] sm:$0xff] %v9781_v40  ;;  %7654 = vtanh.f32 %v9758_v20  ;;  %v2678_v29 = vadd.f32 1.0, %v7641_v53  ;;  %v7643_v44 = vpop.eup %7642 }
 0x623   : > { %7656 = vtanh.f32 %v9761_v22  ;;  %v7645_v56 = vpop.eup %7644  ;;  %v2679_v46 = vadd.f32 1.0, %v7643_v44 }
 0x624   : > { %7658 = vrcp.f32 %v2678_v29  ;;  %v7647_v42 = vpop.eup %7646  ;;  %v2680_v31 = vadd.f32 1.0, %v7645_v56 }
 0x625   : > { %7660 = vpow2.f32 %v6864_v8  ;;  %v2681_v5 = vadd.f32 1.0, %v7647_v42 }
 0x626   : > { %7662 = vpow2.f32 %v6865_v25 }
 0x627   : > { %7664 = vpow2.f32 %v6866_v41 }
 0x628   : > { %7666 = vtanh.f32 %v9769_v0 }
 0x629   : > { %v7649_v59 = vpop.eup %7648  ;;  %7668 = vrcp.f32 %v2679_v46 }
 0x62a   : > { %v7651_v43 = vpop.eup %7650  ;;  %7670 = vrcp.f32 %v2680_v31  ;;  %v2682_v21 = vadd.f32 1.0, %v7649_v59  ;;  %v12096_v31 = vld [vmem:[#allocation7_spill] sm:$0xff] }
 0x62b   : > { %v7653_v52 = vpop.eup %7652  ;;  %7672 = vrcp.f32 %v2681_v5 }
 0x62c   : > { %v7655_v12 = vpop.eup %7654  ;;  %7674 = vrcp.f32 %v2682_v21 }
 0x62d   : > { %v7657_v39 = vpop.eup %7656  ;;  %7676 = vtanh.f32 %v9773_v10 }
 0x62e   : > { %v7659_v58 = vpop.eup %7658  ;;  %7678 = vtanh.f32 %v9777_v32 }
 0x62f   : > { %v7661_v24 = vpop.eup %7660  ;;  %v2734_v33 = vmul.f32 %v7659_v58, %v7651_v43  ;;  %7680 = vtanh.f32 %v9781_v40 }
 0x630   : > { %v7663_v9 = vpop.eup %7662  ;;  %v2683_v4 = vadd.f32 1.0, %v7661_v24 }
 0x631   : > { %v7665_v34 = vpop.eup %7664  ;;  %v2684_v45 = vadd.f32 1.0, %v7663_v9  ;;  %v2781_v54 = vmul.f32 %v2734_v33, %v8371_v16  ;;  %v2763_v13 = vmul.f32 %v2734_v33, %v8392_v26  ;;  %v9792_v37 = vmul.f32 %v2734_v33, %v8374_v17 }
 0x632   : > { %v7667_v3 = vpop.eup %7666  ;;  %7682 = vrcp.f32 %v2683_v4  ;;  %v2685_v35 = vadd.f32 1.0, %v7665_v34  ;;  %v9797_v36 = vmul.f32 %v2734_v33, %v8378_v19  ;;  %v9800_v38 = vmul.f32 %v2734_v33, %v8325_v61 }
 0x633   : > { %v7669_v48 = vpop.eup %7668  ;;  %7684 = vrcp.f32 %v2684_v45  ;;  %v9805_v29 = vmul.f32 %v2734_v33, %v8333_v1  ;;  %v9808_v25 = vmul.f32 %v2734_v33, %v8341_v6  ;;  %v9811_v41 = vmul.f32 %v2734_v33, %v8351_v11 }
 0x634   : > { %v7671_v63 = vpop.eup %7670  ;;  %v9794_v57 = vmul.f32 %v7669_v48, %v7653_v52  ;;  %7686 = vrcp.f32 %v2685_v35 }
 0x635   : > { %v7673_v53 = vpop.eup %7672  ;;  %v9802_v8 = vmul.f32 %v7671_v63, %v7655_v12 }
 0x636   : > { %v7675_v44 = vpop.eup %7674  ;;  %v9813_v56 = vmul.f32 %v7673_v53, %v7657_v39  ;;  %v2782_v46 = vmul.f32 %v9794_v57, %v8305_v47  ;;  %v9819_v42 = vmul.f32 %v9794_v57, %v8307_v50  ;;  %v9823_v59 = vmul.f32 %v9794_v57, %v12096_v31 }
 0x637   : > { %v9825_v5 = vmul.f32 %v7675_v44, %v7667_v3  ;;  %v2834_v43 = vpack.c.bf16 %v9802_v8, %v2734_v33  ;;  %v2784_v21 = vmul.f32 %v9802_v8, %v8371_v16  ;;  %v2766_v52 = vmul.f32 %v9802_v8, %v8392_v26  ;;  %v7677_v9 = vpop.eup %7676 }
 0x638   : > { %v2835_v12 = vpack.c.bf16 %v9813_v56, %v9794_v57  ;;  %v2802_v39 = vmul.f32 %v9802_v8, %v8374_v17  ;;  %v2785_v58 = vmul.f32 %v9813_v56, %v8305_v47  ;;  %v2820_v24 = vmul.f32 %v9802_v8, %v8378_v19  ;;  %v7679_v3 = vpop.eup %7678 }
 0x639   : > { %2992 = vrot.lane.b32.xlu0 %v2834_v43, %s12075_s13  ;;  %v2793_v33 = vpack.c.bf16 %v2784_v21, %v2781_v54  ;;  %v2775_v4 = vpack.c.bf16 %v2766_v52, %v2763_v13  ;;  %v2803_v34 = vmul.f32 %v9813_v56, %v8307_v50  ;;  %v9845_v45 = vmul.f32 %v9802_v8, %v8325_v61  ;;  %v7681_v54 = vpop.eup %7680  ;;  %v12097_v21 = vld [vmem:[#allocation12_spill] sm:$0xff] }
 0x63a   : > { %2994 = vrot.lane.b32.xlu1 %v2835_v12, %s12075_s13  ;;  %v2811_v35 = vpack.c.bf16 %v2802_v39, %v9792_v37  ;;  %v2794_v48 = vpack.c.bf16 %v2785_v58, %v2782_v46  ;;  %v2829_v63 = vpack.c.bf16 %v2820_v24, %v9797_v36  ;;  %v9852_v53 = vmul.f32 %v9813_v56, %v12096_v31  ;;  %v12098_v12 = vld [vmem:[#allocation13_spill] sm:$0xff] }
 0x63b   : > { %v2812_v13 = vpack.c.bf16 %v2803_v34, %v9819_v42  ;;  %v9859_v43 = vmul.f32 %v9802_v8, %v8333_v1  ;;  %v9863_v37 = vmul.f32 %v9794_v57, %v12097_v21  ;;  %v9869_v52 = vmul.f32 %v9813_v56, %v12097_v21 }
 0x63c   : > { %v7683_v46 = vpop.eup %7682  ;;  %v9873_v42 = vmul.f32 %v9802_v8, %v8341_v6  ;;  %v9877_v39 = vmul.f32 %v9794_v57, %v12098_v12  ;;  %v9886_v36 = vmul.f32 %v9813_v56, %v12098_v12  ;;  %v9890_v44 = vmul.f32 %v9794_v57, %v8367_v15 }
 0x63d   : > { %v7685_v58 = vpop.eup %7684  ;;  %v9879_v24 = vmul.f32 %v7683_v46, %v7677_v9  ;;  %2930 = vrot.lane.b32.xlu0 %v2793_v33, %s12032_s12  ;;  %v9901_v46 = vmul.f32 %v9813_v56, %v8367_v15  ;;  %v2823_v20 = vmul.f32 %v9825_v5, %v8378_v19 }
 0x63e   : > { %v7687_v40 = vpop.eup %7686  ;;  %v9892_v32 = vmul.f32 %v7685_v58, %v7679_v3  ;;  %3346 = vrot.lane.b32.xlu1 %v2775_v4, %s12089_s26  ;;  %v9909_v3 = vmul.f32 %v9794_v57, %v8395_v27  ;;  %v9913_v4 = vmul.f32 %v9813_v56, %v8395_v27 }
 0x63f   : > { %v9903_v34 = vmul.f32 %v7687_v40, %v7681_v54  ;;  %v9921_v40 = vmul.f32 %v9879_v24, %v8305_v47  ;;  %v9925_v54 = vmul.f32 %v9825_v5, %v8371_v16  ;;  %v9943_v0 = vmul.f32 %v9879_v24, %v8307_v50 }
 0x640   : > { %v2899_v10 = vpack.c.bf16 %v9913_v4, %v9909_v3  ;;  %v9938_v33 = vmul.f32 %v9892_v32, %v8371_v16  ;;  %v2805_v3 = vmul.f32 %v9825_v5, %v8374_v17  ;;  %v2808_v4 = vmul.f32 %v9892_v32, %v8374_v17 }
 0x641   : > { %2952 = vrot.lane.b32.xlu0 %v2811_v35, %s12099_s23  ;;  %v9934_v58 = vmul.f32 %v9903_v34, %v8305_v47  ;;  %v2809_v35 = vmul.f32 %v9903_v34, %v8307_v50  ;;  %v2827_v16 = vmul.f32 %v9903_v34, %v12096_v31  ;;  %v2826_v17 = vmul.f32 %v9892_v32, %v8378_v19 }
 0x642   : > { %2932 = vrot.lane.b32.xlu1 %v2794_v48, %s12032_s12  ;;  %v2796_v47 = vpack.c.bf16 %v9938_v33, %v9925_v54  ;;  %v2824_v48 = vmul.f32 %v9879_v24, %v12096_v31  ;;  %v2814_v22 = vpack.c.bf16 %v2808_v4, %v2805_v3  ;;  %v2857_v33 = vmul.f32 %v9879_v24, %v12097_v21 }
 0x643   : > { %v2797_v9 = vpack.c.bf16 %v9934_v58, %v9921_v40  ;;  %v2815_v50 = vpack.c.bf16 %v2809_v35, %v9943_v0  ;;  %v2860_v40 = vmul.f32 %v9903_v34, %v12097_v21  ;;  %v2856_v54 = vmul.f32 %v9825_v5, %v8325_v61 }
 0x644   : > { %v2833_v58 = vpack.c.bf16 %v2827_v16, %v2824_v48  ;;  %v2832_v0 = vpack.c.bf16 %v2826_v17, %v2823_v20  ;;  %v2859_v35 = vmul.f32 %v9892_v32, %v8325_v61  ;;  %v2875_v3 = vmul.f32 %v9879_v24, %v12098_v12 }
 0x645   : > { %2974 = vrot.lane.b32.xlu0 %v2829_v63, %s12085_s16  ;;  %v2878_v16 = vmul.f32 %v9903_v34, %v12098_v12  ;;  %v2866_v63 = vpack.c.bf16 %v2860_v40, %v2857_v33  ;;  %v2874_v4 = vmul.f32 %v9825_v5, %v8333_v1  ;;  %v2877_v48 = vmul.f32 %v9892_v32, %v8333_v1 }
 0x646   : > { %2954 = vrot.lane.b32.xlu1 %v2812_v13, %s12099_s23  ;;  %v2893_v13 = vmul.f32 %v9879_v24, %v8395_v27  ;;  %v2865_v17 = vpack.c.bf16 %v2859_v35, %v2856_v54  ;;  %v2896_v21 = vmul.f32 %v9903_v34, %v8395_v27  ;;  %v2892_v31 = vmul.f32 %v9825_v5, %v8341_v6 }
 0x647   : > { %v2884_v20 = vpack.c.bf16 %v2878_v16, %v2875_v3  ;;  %v12100_v33 = vpack.c.bf16 %v9845_v45, %v9800_v38  ;;  %v2883_v40 = vpack.c.bf16 %v2877_v48, %v2874_v4  ;;  %v2895_v12 = vmul.f32 %v9892_v32, %v8341_v6 }
 0x648   : > { %v2770_v1 = vmul.f32 %v9879_v24, %v8367_v15  ;;  %v2773_v54 = vmul.f32 %v9903_v34, %v8367_v15  ;;  %v12101_v35 = vpack.c.bf16 %v9852_v53, %v9823_v59  ;;  %v2902_v3 = vpack.c.bf16 %v2896_v21, %v2893_v13 }
 0x649   : > { %3008 = vrot.lane.b32.xlu0 %v12100_v33, %s12086_s18  ;;  %v2769_v38 = vmul.f32 %v9825_v5, %v8392_v26  ;;  %v2772_v45 = vmul.f32 %v9892_v32, %v8392_v26  ;;  %v10008_v16 = vmul.f32 %v9794_v57, %v8399_v28  ;;  %v2901_v4 = vpack.c.bf16 %v2895_v12, %v2892_v31 }
 0x64a   : > { %2976 = vrot.lane.b32.xlu1 %v12101_v35, %s12085_s16  ;;  %v2779_v48 = vpack.c.bf16 %v2773_v54, %v2770_v1  ;;  %v10012_v33 = vmul.f32 %v9813_v56, %v8399_v28  ;;  %v10016_v59 = vmul.f32 %v9802_v8, %v8351_v11  ;;  %v10020_v21 = vmul.f32 %v9879_v24, %v8399_v28 }
 0x64b   : > { %v2778_v53 = vpack.c.bf16 %v2772_v45, %v2769_v38  ;;  %v10024_v13 = vmul.f32 %v9903_v34, %v8399_v28  ;;  %v12102_v1 = vpack.c.bf16 %v9859_v43, %v9805_v29  ;;  %v10036_v56 = vmul.f32 %v9825_v5, %v8351_v11 }
 0x64c   : > { %v2917_v57 = vpack.c.bf16 %v10012_v33, %v10008_v16  ;;  %v2916_v8 = vpack.c.bf16 %v10016_v59, %v9811_v41  ;;  %v10040_v31 = vmul.f32 %v9892_v32, %v8351_v11  ;;  %v12103_v12 = vpack.c.bf16 %v9869_v52, %v9863_v37 }
 0x64d   : > { %3030 = vrot.lane.b32.xlu0 %v12102_v1, %s12087_s19  ;;  %v2920_v29 = vpack.c.bf16 %v10024_v13, %v10020_v21  ;;  %v12104_v54 = vpack.c.bf16 %v9873_v42, %v9808_v25  ;;  %v12105_v35 = vpack.c.bf16 %v9886_v36, %v9877_v39  ;;  %v12106_v37 = vpack.c.bf16 %v9901_v46, %v9890_v44 }
 0x64e   : > { %3010 = vrot.lane.b32.xlu1 %v12103_v12, %s12086_s18  ;;  %v2919_v43 = vpack.c.bf16 %v10040_v31, %v10036_v56  ;;  %v12107_v52 = vpack.c.bf16 %v9892_v32, %v9825_v5  ;;  %v12108_v25 = vpack.c.bf16 %v9903_v34, %v9879_v24 }
 0x651   : > { %3052 = vrot.lane.b32.xlu0 %v12104_v54, %s12088_s11 }
 0x652   : > { %3032 = vrot.lane.b32.xlu1 %v12105_v35, %s12087_s19 }
 0x655   : > { %3348 = vrot.lane.b32.xlu0 %v12106_v37, %s12089_s26 }
 0x656   : > { %3054 = vrot.lane.b32.xlu1 %v2899_v10, %s12088_s11 }
 0x659   : > { %2996 = vrot.lane.b32.xlu0 %v12107_v52, %s12075_s13 }
 0x65a   : > { %2998 = vrot.lane.b32.xlu1 %v12108_v25, %s12075_s13 }
 0x65d   : > { %2938 = vrot.lane.b32.xlu0 %v2797_v9, %s12032_s12 }
 0x65e   : > { %2936 = vrot.lane.b32.xlu1 %v2796_v47, %s12032_s12  ;;  %v2929_v47 = vpop.permute.xlu0 %2928  ;;  %s12109_s12 = smov 127  }
 0x661   : > { %2960 = vrot.lane.b32.xlu0 %v2815_v50, %s12099_s23  ;;  %v10085_v50 = vpop.permute.xlu1 %2934 }
 0x662   : > { %2958 = vrot.lane.b32.xlu1 %v2814_v22, %s12099_s23  ;;  %v2951_v22 = vpop.permute.xlu0 %2950 }
 0x665   : > { %2982 = vrot.lane.b32.xlu0 %v2833_v58, %s12085_s16  ;;  %v10087_v10 = vpop.permute.xlu1 %2956 }
 0x666   : > { %2980 = vrot.lane.b32.xlu1 %v2832_v0, %s12085_s16  ;;  %v2973_v32 = vpop.permute.xlu0 %2972 }
 0x669   : > { %3016 = vrot.lane.b32.xlu0 %v2866_v63, %s12086_s18  ;;  %v10089_v5 = vpop.permute.xlu1 %2978 }
 0x66a   : > { %3014 = vrot.lane.b32.xlu1 %v2865_v17, %s12086_s18  ;;  %v10091_v44 = vpop.permute.xlu0 %3012 }
 0x66d   : > { %3038 = vrot.lane.b32.xlu0 %v2884_v20, %s12087_s19  ;;  %v10093_v36 = vpop.permute.xlu1 %3018 }
 0x66e   : > { %3036 = vrot.lane.b32.xlu1 %v2883_v40, %s12087_s19  ;;  %v10095_v42 = vpop.permute.xlu0 %3034 }
 0x671   : > { %3060 = vrot.lane.b32.xlu0 %v2902_v3, %s12088_s11  ;;  %v10097_v39 = vpop.permute.xlu1 %3040 }
 0x672   : > { %3058 = vrot.lane.b32.xlu1 %v2901_v4, %s12088_s11  ;;  %v10099_v24 = vpop.permute.xlu0 %3056 }
 0x675   : > { %3354 = vrot.lane.b32.xlu0 %v2779_v48, %s12089_s26  ;;  %v10101_v34 = vpop.permute.xlu1 %3062 }
 0x676   : > { %3352 = vrot.lane.b32.xlu1 %v2778_v53, %s12089_s26  ;;  %v3345_v9 = vpop.permute.xlu0 %3344 }
 0x679   : > { %v10103_v46 = vpop.permute.xlu1 %3350 }
 0x6ab   : > { %v2993_v58 = vpop.permute.xlu0 %2992 }
 0x6ac   : > { %v2995_v0 = vpop.permute.xlu1 %2994  ;;  %3392 = vrot.lane.b32.xlu0 %v2993_v58, %s12089_s26 }
 0x6ad   : > { %3396 = vrot.lane.b32.xlu1 %v2995_v0, %s12089_s26  ;;  %v3000_v17 = vsel %vm582_vm6, %v2993_v58, %v2995_v0 }
 0x6af   : > { %v2931_v63 = vpop.permute.xlu0 %2930 }
 0x6b0   : > { %v3347_v20 = vpop.permute.xlu1 %3346  ;;  %3394 = vrot.lane.b32.xlu0 %v3000_v17, %s12089_s26  ;;  %v2940_v3 = vsel %vm690_vm3, %v2929_v47, %v2931_v63 }
 0x6b3   : > { %v2953_v40 = vpop.permute.xlu0 %2952 }
 0x6b4   : > { %v2933_v38 = vpop.permute.xlu1 %2932  ;;  %3356 = vrot.lane.b32.xlu0 %v2940_v3, %s12089_s26  ;;  %v2962_v4 = vsel %vm914_vm9, %v2951_v22, %v2953_v40 }
 0x6b5   : > { %3360 = vrot.lane.b32.xlu1 %v2933_v38, %s12089_s26  ;;  %v2941_v35 = vsel %vm690_vm3, %v2931_v63, %v2933_v38  ;;  %v3452_v63 = vsel %vm850_vm8, %v3345_v9, %v3347_v20 }
 0x6b7   : > { %v2975_v45 = vpop.permute.xlu0 %2974 }
 0x6b8   : > { %v2955_v48 = vpop.permute.xlu1 %2954  ;;  %3368 = vrot.lane.b32.xlu0 %v2962_v4, %s12089_s26  ;;  %v2984_v1 = vsel %vm618_vm1, %v2973_v32, %v2975_v45 }
 0x6b9   : > { %3372 = vrot.lane.b32.xlu1 %v2955_v48, %s12089_s26  ;;  %v2963_v25 = vsel %vm914_vm9, %v2953_v40, %v2955_v48 }
 0x6bb   : > { %v3009_v53 = vpop.permute.xlu0 %3008 }
 0x6bc   : > { %v2977_v12 = vpop.permute.xlu1 %2976  ;;  %3380 = vrot.lane.b32.xlu0 %v2984_v1, %s12089_s26 }
 0x6bd   : > { %3384 = vrot.lane.b32.xlu1 %v2977_v12, %s12089_s26  ;;  %v2985_v32 = vsel %vm618_vm1, %v2975_v45, %v2977_v12 }
 0x6bf   : > { %v3031_v54 = vpop.permute.xlu0 %3030 }
 0x6c0   : > { %v3011_v37 = vpop.permute.xlu1 %3010  ;;  %3358 = vrot.lane.b32.xlu0 %v2941_v35, %s12089_s26 }
 0x6c3   : > { %v10120_v52 = vpop.permute.xlu0 %3052 }
 0x6c4   : > { %v10123_v47 = vpop.permute.xlu1 %3032  ;;  %3370 = vrot.lane.b32.xlu0 %v2963_v25, %s12089_s26 }
 0x6c7   : > { %v3349_v22 = vpop.permute.xlu0 %3348 }
 0x6c8   : > { %v10127_v58 = vpop.permute.xlu1 %3054  ;;  %3382 = vrot.lane.b32.xlu0 %v2985_v32, %s12089_s26  ;;  %v3453_v0 = vsel %vm850_vm8, %v3347_v20, %v3349_v22  ;;  %v3020_v20 = vsel %vm975_vm10, %v3009_v53, %v3011_v37 }
 0x6c9   : > { %3548 = vmatprep.subr.bf16.mxu1 %v3453_v0 }
 0x6ca   : > { %3549 = vmatpush1.bf16.msra.mxu1 %v3452_v63 }
 0x6cb   : > { %v2997_v17 = vpop.permute.xlu0 %2996 }
 0x6cc   : > { %v2999_v3 = vpop.permute.xlu1 %2998  ;;  %3398 = vrot.lane.b32.xlu1 %v2997_v17, %s12089_s26 }
 0x6cd   : > { %3402 = vrot.lane.b32.xlu0 %v2999_v3, %s12089_s26  ;;  %v3001_v38 = vsel %vm582_vm6, %v2997_v17, %v2999_v3  ;;  %v3021_v17 = vsel %vm975_vm10, %v3011_v37, %v10091_v44  ;;  %v3064_v37 = vsel %vm1021_vm12, %v10120_v52, %v10127_v58 }
 0x6cf   : > { %v2939_v40 = vpop.permute.xlu0 %2938 }
 0x6d0   : > { %v2937_v45 = vpop.permute.xlu1 %2936  ;;  %3400 = vrot.lane.b32.xlu1 %v3001_v38, %s12089_s26 }
 0x6d1   : > { %3366 = vrot.lane.b32.xlu0 %v2939_v40, %s12089_s26  ;;  %v2942_v48 = vsel %vm690_vm3, %v10085_v50, %v2937_v45  ;;  %v2943_v0 = vsel %vm690_vm3, %v2937_v45, %v2939_v40 }
 0x6d3   : > { %v2961_v4 = vpop.permute.xlu0 %2960 }
 0x6d4   : > { %v2959_v9 = vpop.permute.xlu1 %2958  ;;  %3362 = vrot.lane.b32.xlu1 %v2942_v48, %s12089_s26 }
 0x6d5   : > { %3406 = vrot.lane.b32.xlu0 %v3020_v20, %s12089_s26  ;;  %v2964_v12 = vsel %vm914_vm9, %v10087_v10, %v2959_v9  ;;  %v2965_v40 = vsel %vm914_vm9, %v2959_v9, %v2961_v4  ;;  %v7464_v20 = vld [vmem:[%s11981_s6 + $0x4] ss:$12 sps:$4 sm:$0xff]  }
 0x6d6   : > { %3580 = vmatprep.mubr.bf16.mxu1 %v7464_v20 }
 0x6d7   : > { %v2983_v1 = vpop.permute.xlu0 %2982 }
 0x6d8   : > { %v2981_v35 = vpop.permute.xlu1 %2980  ;;  %3374 = vrot.lane.b32.xlu1 %v2964_v12, %s12089_s26 }
 0x6d9   : > { %3378 = vrot.lane.b32.xlu0 %v2961_v4, %s12089_s26  ;;  %v2986_v50 = vsel %vm618_vm1, %v10089_v5, %v2981_v35  ;;  %v3042_v5 = vsel %vm998_vm11, %v3031_v54, %v10123_v47  ;;  %v2987_v4 = vsel %vm618_vm1, %v2981_v35, %v2983_v1 }
 0x6db   : > { %v3017_v25 = vpop.permute.xlu0 %3016 }
 0x6dc   : > { %v3015_v22 = vpop.permute.xlu1 %3014  ;;  %3386 = vrot.lane.b32.xlu1 %v2986_v50, %s12089_s26 }
 0x6dd   : > { %3390 = vrot.lane.b32.xlu0 %v2983_v1, %s12089_s26 }
 0x6df   : > { %v3039_v32 = vpop.permute.xlu0 %3038 }
 0x6e0   : > { %v3037_v63 = vpop.permute.xlu1 %3036  ;;  %3364 = vrot.lane.b32.xlu1 %v2943_v0, %s12089_s26  ;;  %v3045_v48 = vsel %vm998_vm11, %v3039_v32, %v10097_v39 }
 0x6e1   : > { %3404 = vrot.lane.b32.xlu0 %v3009_v53, %s12089_s26 }
 0x6e3   : > { %v3061_v10 = vpop.permute.xlu0 %3060 }
 0x6e4   : > { %v3059_v3 = vpop.permute.xlu1 %3058  ;;  %3408 = vrot.lane.b32.xlu1 %v3021_v17, %s12089_s26  ;;  %v3067_v39 = vsel %vm1021_vm12, %v3061_v10, %v10101_v34 }
 0x6e5   : > { %3418 = vrot.lane.b32.xlu0 %v3042_v5, %s12089_s26  ;;  %v3066_v16 = vsel %vm1021_vm12, %v3059_v3, %v3061_v10 }
 0x6e7   : > { %v3355_v38 = vpop.permute.xlu0 %3354 }
 0x6e8   : > { %v3353_v45 = vpop.permute.xlu1 %3352  ;;  %3376 = vrot.lane.b32.xlu1 %v2965_v40, %s12089_s26 }
 0x6e9   : > { %3416 = vrot.lane.b32.xlu0 %v3031_v54, %s12089_s26  ;;  %v3455_v53 = vsel %vm850_vm8, %v3353_v45, %v3355_v38  ;;  %v3454_v44 = vsel %vm850_vm8, %v10103_v46, %v3353_v45  ;;  %v3023_v54 = vsel %vm975_vm10, %v3017_v25, %v10093_v36  ;;  %v3043_v46 = vsel %vm998_vm11, %v10123_v47, %v10095_v42 }
 0x6ea   : > { %3550 = vmatprep.subr.bf16.mxu1 %v3455_v53  ;;  %v3065_v36 = vsel %vm1021_vm12, %v10127_v58, %v10099_v24  ;;  %v3022_v42 = vsel %vm975_vm10, %v3015_v22, %v3017_v25  ;;  %v3044_v24 = vsel %vm998_vm11, %v3037_v63, %v3039_v32 }
 0x6eb   : > { %3551 = vmatpush1.bf16.msra.mxu1 %v3454_v44 }
 0x6ec   : > { %3410 = vrot.lane.b32.xlu1 %v3015_v22, %s12089_s26 }
 0x6ed   : > { %3430 = vrot.lane.b32.xlu0 %v3064_v37, %s12089_s26 }
 0x6f0   : > { %3388 = vrot.lane.b32.xlu1 %v2987_v4, %s12089_s26 }
 0x6f1   : > { %3414 = vrot.lane.b32.xlu0 %v3023_v54, %s12089_s26 }
 0x6f4   : > { %3420 = vrot.lane.b32.xlu1 %v3043_v46, %s12089_s26 }
 0x6f5   : > { %3428 = vrot.lane.b32.xlu0 %v10120_v52, %s12089_s26 }
 0x6f8   : > { %3422 = vrot.lane.b32.xlu1 %v3037_v63, %s12089_s26 }
 0x6f9   : > { %3426 = vrot.lane.b32.xlu0 %v3045_v48, %s12089_s26 }
 0x6fc   : > { %3432 = vrot.lane.b32.xlu1 %v3065_v36, %s12089_s26 }
 0x6fd   : > { %3076 = vrot.lane.b32.xlu0 %v2917_v57, %s12083_s29 }
 0x700   : > { %3412 = vrot.lane.b32.xlu1 %v3022_v42, %s12089_s26 }
 0x701   : > { %3438 = vrot.lane.b32.xlu0 %v3067_v39, %s12089_s26 }
 0x704   : > { %3074 = vrot.lane.b32.xlu1 %v2916_v8, %s12083_s29 }
 0x705   : > { %3434 = vrot.lane.b32.xlu0 %v3059_v3, %s12089_s26 }
 0x708   : > { %3424 = vrot.lane.b32.xlu1 %v3044_v24, %s12089_s26 }
 0x709   : > { %3082 = vrot.lane.b32.xlu0 %v2920_v29, %s12083_s29 }
 0x70c   : > { %3078 = vrot.lane.b32.xlu1 %v12084_v49, %s12083_s29 }
 0x710   : > { %3436 = vrot.lane.b32.xlu1 %v3066_v16, %s12089_s26 }
 0x714   : > { %3080 = vrot.lane.b32.xlu1 %v2919_v43, %s12083_s29 }
 0x718   : > { %3084 = vrot.lane.b32.xlu1 %v12084_v49, %s12083_s29 }
 0x71e   : > { %v10219_v41 = vpop.permute.xlu0 %3392 }
 0x71f   : > { %v3397_v21 = vpop.permute.xlu1 %3396 }
 0x722   : > { %v3395_v33 = vpop.permute.xlu0 %3394 }
 0x726   : > { %v3357_v59 = vpop.permute.xlu0 %3356 }
 0x727   : > { %v3361_v57 = vpop.permute.xlu1 %3360 }
 0x72a   : > { %v3369_v13 = vpop.permute.xlu0 %3368 }
 0x72b   : > { %v3373_v47 = vpop.permute.xlu1 %3372 }
 0x72e   : > { %v3381_v8 = vpop.permute.xlu0 %3380 }
 0x72f   : > { %v3385_v31 = vpop.permute.xlu1 %3384 }
 0x732   : > { %v3359_v29 = vpop.permute.xlu0 %3358 }
 0x733   : > { %v3457_v34 = vsel %vm850_vm8, %v3359_v29, %v3361_v57  ;;  %v3456_v52 = vsel %vm850_vm8, %v3357_v59, %v3359_v29  ;;  %v3469_v59 = vsel %vm850_vm8, %v3395_v33, %v3397_v21  ;;  %v3468_v29 = vsel %vm850_vm8, %v10219_v41, %v3395_v33 }
 0x734   : > { %3552 = vmatprep.subr.bf16.mxu1 %v3457_v34 }
 0x735   : > { %3553 = vmatpush1.bf16.msra.mxu1 %v3456_v52 }
 0x736   : > { %v3371_v56 = vpop.permute.xlu0 %3370 }
 0x737   : > { %v3461_v5 = vsel %vm850_vm8, %v3371_v56, %v3373_v47  ;;  %v3460_v45 = vsel %vm850_vm8, %v3369_v13, %v3371_v56 }
 0x73a   : > { %v3383_v43 = vpop.permute.xlu0 %3382 }
 0x73b   : > { %v3465_v54 = vsel %vm850_vm8, %v3383_v43, %v3385_v31  ;;  %v3464_v36 = vsel %vm850_vm8, %v3381_v8, %v3383_v43 }
 0x73e   : > { %v3399_v58 = vpop.permute.xlu1 %3398 }
 0x73f   : > { %v3403_v9 = vpop.permute.xlu0 %3402 }
 0x742   : > { %v3401_v1 = vpop.permute.xlu1 %3400 }
 0x743   : > { %v3367_v12 = vpop.permute.xlu0 %3366  ;;  %v3471_v8 = vsel %vm850_vm8, %v3401_v1, %v3403_v9  ;;  %v3470_v52 = vsel %vm850_vm8, %v3399_v58, %v3401_v1 }
 0x746   : > { %v3363_v35 = vpop.permute.xlu1 %3362 }
 0x747   : > { %v3407_v25 = vpop.permute.xlu0 %3406 }
 0x74a   : > { %v3375_v50 = vpop.permute.xlu1 %3374 }
 0x74b   : > { %v3379_v22 = vpop.permute.xlu0 %3378 }
 0x74e   : > { %v3387_v32 = vpop.permute.xlu1 %3386 }
 0x74f   : > { %v3391_v0 = vpop.permute.xlu0 %3390 }
 0x752   : > { %v3365_v63 = vpop.permute.xlu1 %3364 }
 0x753   : > { %v3405_v10 = vpop.permute.xlu0 %3404  ;;  %v3459_v17 = vsel %vm850_vm8, %v3365_v63, %v3367_v12  ;;  %v3458_v3 = vsel %vm850_vm8, %v3363_v35, %v3365_v63 }
 0x754   : > { %3554 = vmatprep.subr.bf16.mxu1 %v3459_v17  ;;  %v3472_v21 = vsel %vm850_vm8, %v3405_v10, %v3407_v25 }
 0x755   : > { %3555 = vmatpush1.bf16.msra.mxu1 %v3458_v3 }
 0x756   : > { %v3409_v38 = vpop.permute.xlu1 %3408  ;;  %3556 = vmatprep.subr.bf16.mxu1 %v3461_v5 }
 0x757   : > { %v3419_v40 = vpop.permute.xlu0 %3418  ;;  %v3473_v47 = vsel %vm850_vm8, %v3407_v25, %v3409_v38 }
 0x759   : > { %3557 = vmatpush1.bf16.msra.mxu1 %v3460_v45  ;;  %v7465_v45 = vld [vmem:[%s11981_s6 + $0x1c] ss:$12 sps:$4 sm:$0xff]  }
 0x75a   : > { %v3377_v53 = vpop.permute.xlu1 %3376 }
 0x75b   : > { %v3417_v44 = vpop.permute.xlu0 %3416  ;;  %v3463_v37 = vsel %vm850_vm8, %v3377_v53, %v3379_v22  ;;  %v3462_v4 = vsel %vm850_vm8, %v3375_v50, %v3377_v53 }
 0x75c   : > { %3558 = vmatprep.subr.bf16.mxu1 %v3463_v37  ;;  %v3476_v12 = vsel %vm850_vm8, %v3417_v44, %v3419_v40 }
 0x75d   : > { %3559 = vmatpush1.bf16.msra.mxu1 %v3462_v4 }
 0x75e   : > { %v3411_v46 = vpop.permute.xlu1 %3410  ;;  %3560 = vmatprep.subr.bf16.mxu1 %v3465_v54 }
 0x75f   : > { %v3431_v48 = vpop.permute.xlu0 %3430 }
 0x761   : > { %3561 = vmatpush1.bf16.msra.mxu1 %v3464_v36  ;;  %v7467_v36 = vld [vmem:[%s11981_s6 + $0x18] ss:$12 sps:$4 sm:$0xff]  }
 0x762   : > { %v3389_v42 = vpop.permute.xlu1 %3388 }
 0x763   : > { %v3415_v39 = vpop.permute.xlu0 %3414  ;;  %v3467_v24 = vsel %vm850_vm8, %v3389_v42, %v3391_v0  ;;  %v3466_v16 = vsel %vm850_vm8, %v3387_v32, %v3389_v42  ;;  %v7468_v42 = vld [vmem:[%s11981_s6 + $0x34] ss:$12 sps:$4 sm:$0xff]  }
 0x764   : > { %3562 = vmatprep.subr.bf16.mxu1 %v3467_v24  ;;  %v3127_v24 = vld [vmem:[%s11982_s7 + $0x28] sm:$0xff] }
 0x765   : > { %3563 = vmatpush1.bf16.msra.mxu1 %v3466_v16  ;;  %v3124_v16 = vld [vmem:[%s11982_s7 + $0x10] sm:$0xff] }
 0x766   : > { %v3421_v13 = vpop.permute.xlu1 %3420  ;;  %3564 = vmatprep.subr.bf16.mxu1 %v3469_v59  ;;  %v3125_v59 = vld [vmem:[%s11982_s7 + $0x18] sm:$0xff] }
 0x767   : > { %v3429_v57 = vpop.permute.xlu0 %3428  ;;  %v3477_v9 = vsel %vm850_vm8, %v3419_v40, %v3421_v13  ;;  %v7462_v40 = vld [vmem:[%s11981_s6] ss:$12 sps:$4 sm:$0xff]   ;;  %v7470_v13 = vld [vmem:[%s11981_s6 + $0x30] ss:$12 sps:$4 sm:$0xff]  }
 0x768   : > { %v3480_v10 = vsel %vm850_vm8, %v3429_v57, %v3431_v48  ;;  %v7471_v57 = vld [vmem:[%s11981_s6 + $0x4c] ss:$12 sps:$4 sm:$0xff]  }
 0x769   : > { %3565 = vmatpush1.bf16.msra.mxu1 %v3468_v29  ;;  %v3128_v29 = vld [vmem:[%s11982_s7 + $0x30] sm:$0xff] }
 0x76a   : > { %v3423_v34 = vpop.permute.xlu1 %3422  ;;  %3566 = vmatprep.subr.bf16.mxu1 %v3471_v8  ;;  %v3129_v8 = vld [vmem:[%s11982_s7 + $0x38] sm:$0xff] }
 0x76b   : > { %v3427_v56 = vpop.permute.xlu0 %3426 }
 0x76d   : > { %3567 = vmatpush1.bf16.msra.mxu1 %v3470_v52  ;;  %v3131_v52 = vld [vmem:[%s11982_s7 + $0x48] sm:$0xff] }
 0x76e   : > { %v3433_v31 = vpop.permute.xlu1 %3432  ;;  %3568 = vmatprep.subr.bf16.mxu1 %v3473_v47  ;;  %v7473_v47 = vld [vmem:[%s11981_s6 + $0x48] ss:$12 sps:$4 sm:$0xff]  }
 0x76f   : > { %v3077_v33 = vpop.permute.xlu0 %3076  ;;  %v3481_v32 = vsel %vm850_vm8, %v3431_v48, %v3433_v31  ;;  %v3123_v48 = vld [vmem:[%s11982_s7 + $0x8] sm:$0xff]  ;;  %v3134_v31 = vld [vmem:[%s11982_s7 + $0x60] sm:$0xff] }
 0x771   : > { %3569 = vmatpush1.bf16.msra.mxu1 %v3472_v21  ;;  %v3135_v21 = vld [vmem:[%s11982_s7 + $0x68] sm:$0xff] }
 0x772   : > { %v3413_v43 = vpop.permute.xlu1 %3412 }
 0x773   : > { %v3475_v20 = vsel %vm850_vm8, %v3413_v43, %v3415_v39  ;;  %v3474_v41 = vsel %vm850_vm8, %v3411_v46, %v3413_v43  ;;  %v3439_v35 = vpop.permute.xlu0 %3438  ;;  %v3122_v46 = vld [vmem:[%s11982_s7] sm:$0xff]  ;;  %v3132_v43 = vld [vmem:[%s11982_s7 + $0x50] sm:$0xff] }
 0x774   : > { %3570 = vmatprep.subr.bf16.mxu1 %v3475_v20  ;;  %v3126_v39 = vld [vmem:[%s11982_s7 + $0x20] sm:$0xff]  ;;  %v3133_v20 = vld [vmem:[%s11982_s7 + $0x58] sm:$0xff] }
 0x775   : > { %3571 = vmatpush1.bf16.msra.mxu1 %v3474_v41  ;;  %v7476_v41 = vld [vmem:[%s11981_s6 + $0x60] ss:$12 sps:$4 sm:$0xff]  }
 0x776   : > { %v3075_v58 = vpop.permute.xlu1 %3074  ;;  %3572 = vmatprep.subr.bf16.mxu1 %v3477_v9  ;;  %v3136_v9 = vld [vmem:[%s11982_s7 + $0x70] sm:$0xff] }
 0x777   : > { %v3086_v1 = vsel %vm1044_vm13, %v3075_v58, %v3077_v33  ;;  %v3435_v17 = vpop.permute.xlu0 %3434 }
 0x778   : > { %3442 = vrot.lane.b32.xlu0 %v3086_v1, %s12089_s26  ;;  %v7479_v1 = vld [vmem:[%s11981_s6 + $0x78] ss:$12 sps:$4 sm:$0xff]  }
 0x779   : > { %3573 = vmatpush1.bf16.msra.mxu1 %v3476_v12  ;;  %v7480_v12 = vld [vmem:[%s11981_s6 + $0x94] ss:$12 sps:$4 sm:$0xff]  }
 0x77a   : > { %v3425_v25 = vpop.permute.xlu1 %3424 }
 0x77b   : > { %v3479_v50 = vsel %vm850_vm8, %v3425_v25, %v3427_v56  ;;  %v3478_v22 = vsel %vm850_vm8, %v3423_v34, %v3425_v25  ;;  %v3083_v53 = vpop.permute.xlu0 %3082  ;;  %v3130_v34 = vld [vmem:[%s11982_s7 + $0x40] sm:$0xff]  ;;  %v7483_v25 = vld [vmem:[%s11981_s6 + $0xac] ss:$12 sps:$4 sm:$0xff]  }
 0x77c   : > { %3574 = vmatprep.subr.bf16.mxu1 %v3479_v50  ;;  %3440 = vrot.lane.b32.xlu0 %v3075_v58, %s12089_s26  ;;  %v7474_v56 = vld [vmem:[%s11981_s6 + $0x64] ss:$12 sps:$4 sm:$0xff]   ;;  %v3137_v58 = vld [vmem:[%s11982_s7 + $0x78] sm:$0xff]  ;;  %v7485_v50 = vld [vmem:[%s11981_s6 + $0xa8] ss:$12 sps:$4 sm:$0xff]  }
 0x77d   : > { %3575 = vmatpush1.bf16.msra.mxu1 %v3478_v22 }
 0x77e   : > { %v3079_v0 = vpop.permute.xlu1 %3078  ;;  %3576 = vmatprep.subr.bf16.mxu1 %v3481_v32 }
 0x77f   : > { %v3087_v63 = vsel %vm1044_vm13, %v3077_v33, %v3079_v0  ;;  %v7477_v33 = vld [vmem:[%s11981_s6 + $0x7c] ss:$12 sps:$4 sm:$0xff]  }
 0x780   : > { %3444 = vrot.lane.b32.xlu1 %v3087_v63, %s12089_s26 }
 0x781   : > { %3577 = vmatpush1.bf16.msra.mxu1 %v3480_v10 }
 0x782   : > { %v3437_v3 = vpop.permute.xlu1 %3436 }
 0x783   : > { %v3483_v5 = vsel %vm850_vm8, %v3437_v3, %v3439_v35  ;;  %v3482_v38 = vsel %vm850_vm8, %v3435_v17, %v3437_v3  ;;  %v7482_v35 = vld [vmem:[%s11981_s6 + $0x90] ss:$12 sps:$4 sm:$0xff]  }
 0x784   : > { %3578 = vmatprep.subr.bf16.mxu1 %v3483_v5 }
 0x785   : > { %3579 = vmatpush1.bf16.msra.mxu1 %v3482_v38 }
 0x786   : > { %v3081_v44 = vpop.permute.xlu1 %3080 }
 0x787   : > { %v3088_v37 = vsel %vm1044_vm13, %v3081_v44, %v3083_v53 }
 0x788   : > { %3448 = vrot.lane.b32.xlu1 %v3088_v37, %s12089_s26  ;;  %3581 = vmatmul.mubr.bf16.vlgmr.msra.gmra.mrb[16].mxu1 %v7462_v40  ;;  %v7489_v37 = vld [vmem:[%s11981_s6 + $0x50] ss:$12 sps:$4 sm:$0xff]  }
 0x789   : > { %3590 = vmatprep.mubr.bf16.mxu1 %v7465_v45  ;;  %v7486_v45 = vld [vmem:[%s11981_s6 + $0x8] ss:$12 sps:$4 sm:$0xff]  }
 0x78a   : > { %v3085_v4 = vpop.permute.xlu1 %3084 }
 0x78b   : > { %v3089_v54 = vsel %vm1044_vm13, %v3083_v53, %v3085_v4  ;;  %v7487_v53 = vld [vmem:[%s11981_s6 + $0x20] ss:$12 sps:$4 sm:$0xff]   ;;  %v7490_v4 = vld [vmem:[%s11981_s6 + $0x68] ss:$12 sps:$4 sm:$0xff]  }
 0x78c   : > { %3450 = vrot.lane.b32.xlu0 %v3089_v54, %s12089_s26  ;;  %3446 = vrot.lane.b32.xlu1 %v3081_v44, %s12089_s26  ;;  %v7488_v44 = vld [vmem:[%s11981_s6 + $0x38] ss:$12 sps:$4 sm:$0xff]   ;;  %v7491_v54 = vld [vmem:[%s11981_s6 + $0x80] ss:$12 sps:$4 sm:$0xff]  }
 0x790   : > { %3140 = vperm.xlu0 %7404, %v3122_v46   ;;  %3145 = vperm.xlu1 %7405, %v3123_v48   ;;  %v7492_v46 = vld [vmem:[%s11981_s6 + $0x98] ss:$12 sps:$4 sm:$0xff]   ;;  %v7493_v48 = vld [vmem:[%s11981_s6 + $0xb0] ss:$12 sps:$4 sm:$0xff]  }
 0x791   : > { %3591 = vmatmul.mubr.bf16.gmra.mrb[20].mxu1 %v7467_v36 }
 0x792   : > { %3600 = vmatprep.mubr.bf16.mxu1 %v7468_v42 }
 0x794   : > { %3160 = vperm.xlu0 %7404, %v3126_v39   ;;  %3165 = vperm.xlu1 %7405, %v3127_v24  }
 0x798   : > { %3150 = vperm.xlu0 %7404, %v3124_v16   ;;  %3155 = vperm.xlu1 %7405, %v3125_v59  }
 0x799   : > { %3601 = vmatmul.mubr.bf16.gmra.mrb[24].mxu1 %v7470_v13 }
 0x79a   : > { %3610 = vmatprep.mubr.bf16.mxu1 %v7471_v57 }
 0x79c   : > { %3170 = vperm.xlu0 %7404, %v3128_v29   ;;  %3175 = vperm.xlu1 %7405, %v3129_v8  }
 0x7a0   : > { %3180 = vperm.xlu0 %7404, %v3130_v34   ;;  %3185 = vperm.xlu1 %7405, %v3131_v52  }
 0x7a1   : > { %3611 = vmatmul.mubr.bf16.gmra.mrb[28].mxu1 %v7473_v47 }
 0x7a2   : > { %3620 = vmatprep.mubr.bf16.mxu1 %v7474_v56 }
 0x7a4   : > { %3200 = vperm.xlu0 %7404, %v3134_v31   ;;  %3205 = vperm.xlu1 %7405, %v3135_v21  }
 0x7a8   : > { %3190 = vperm.xlu0 %7404, %v3132_v43   ;;  %3195 = vperm.xlu1 %7405, %v3133_v20  }
 0x7a9   : > { %3621 = vmatmul.mubr.bf16.gmra.mrb[32].mxu1 %v7476_v41 }
 0x7aa   : > { %3630 = vmatprep.mubr.bf16.mxu1 %v7477_v33 }
 0x7ac   : > { %3210 = vperm.xlu0 %7404, %v3136_v9   ;;  %3215 = vperm.xlu1 %7405, %v3137_v58  }
 0x7b0   : > { %4152 = vrot.lane.b32.xlu0 %v8309_v51, %s12109_s12  ;;  %4158 = vrot.lane.b32.xlu1 %v8309_v51, %s12109_s12 }
 0x7b1   : > { %3631 = vmatmul.mubr.bf16.gmra.mrb[36].mxu1 %v7479_v1 }
 0x7b2   : > { %3640 = vmatprep.mubr.bf16.mxu1 %v7480_v12 }
 0x7b4   : > { %4174 = vrot.lane.b32.xlu0 %v8317_v55, %s12099_s23  ;;  %4180 = vrot.lane.b32.xlu1 %v8317_v55, %s12099_s23 }
 0x7b8   : > { %4196 = vrot.lane.b32.xlu0 %v8323_v60, %s12085_s16  ;;  %4202 = vrot.lane.b32.xlu1 %v8323_v60, %s12085_s16 }
 0x7b9   : > { %3641 = vmatmul.mubr.bf16.gmra.mrb[40].mxu1 %v7482_v35 }
 0x7ba   : > { %3650 = vmatprep.mubr.bf16.mxu1 %v7483_v25 }
 0x7bc   : > { %4236 = vrot.lane.b32.xlu0 %v8327_v62, %s12086_s18  ;;  %4242 = vrot.lane.b32.xlu1 %v8327_v62, %s12086_s18 }
 0x7c0   : > { %4258 = vrot.lane.b32.xlu0 %v8335_v2, %s12087_s19  ;;  %4264 = vrot.lane.b32.xlu1 %v8335_v2, %s12087_s19 }
 0x7c1   : > { %3651 = vmatmul.mubr.bf16.gmra.mrb[44].mxu1 %v7485_v50 }
 0x7c2   : > { %3693 = vmatprep.mubr.bf16.mxu1 %v12074_v18 }
 0x7c4   : > { %4280 = vrot.lane.b32.xlu0 %v8343_v7, %s12088_s11  ;;  %4286 = vrot.lane.b32.xlu1 %v8343_v7, %s12088_s11 }
 0x7c8   : > { %4568 = vrot.lane.b32.xlu0 %v8359_v14, %s12089_s26  ;;  %4574 = vrot.lane.b32.xlu1 %v8359_v14, %s12089_s26 }
 0x7ea   : > { %v3443_v22 = vpop.permute.xlu0 %3442 }
 0x7ee   : > { %v3441_v32 = vpop.permute.xlu0 %3440 }
 0x7ef   : > { %v3484_v10 = vsel %vm850_vm8, %v3441_v32, %v3443_v22 }
 0x7f2   : > { %v3445_v0 = vpop.permute.xlu1 %3444 }
 0x7f3   : > { %v3485_v63 = vsel %vm850_vm8, %v3443_v22, %v3445_v0 }
 0x7f4   : > { %3661 = vmatprep.subr.bf16.mxu1 %v3485_v63 }
 0x7f5   : > { %3662 = vmatpush1.bf16.msra.mxu1 %v3484_v10 }
 0x7fa   : > { %v3449_v17 = vpop.permute.xlu1 %3448 }
 0x7fe   : > { %v3447_v3 = vpop.permute.xlu1 %3446  ;;  %v3451_v5 = vpop.permute.xlu0 %3450 }
 0x7ff   : > { %v3486_v38 = vsel %vm850_vm8, %v3447_v3, %v3449_v17  ;;  %v3487_v40 = vsel %vm850_vm8, %v3449_v17, %v3451_v5 }
 0x800   : > { %3663 = vmatprep.subr.bf16.mxu1 %v3487_v40 }
 0x801   : > { %3664 = vmatpush1.bf16.msra.mxu1 %v3486_v38 }
 0x804   : > { %6891 = vmatmul.mubr.msk.bf16.vlgmr.msra.gmra.mrb[16].mxu1 %vm489_vm0, %v7486_v45 }
 0x805   : > { %3703 = vmatprep.mubr.bf16.mxu1 %v12074_v18 }
 0x80c   : > { %6892 = vmatmul.mubr.msk.bf16.gmra.mrb[20].mxu1 %vm489_vm0, %v7487_v53 }
 0x80d   : > { %3713 = vmatprep.mubr.bf16.mxu1 %v12074_v18 }
 0x80f   : > { %v3141_v36 = vpop.permute.xlu0 %3140  ;;  %v3146_v42 = vpop.permute.xlu1 %3145 }
 0x813   : > { %v3161_v59 = vpop.permute.xlu0 %3160  ;;  %v3166_v52 = vpop.permute.xlu1 %3165 }
 0x814   : > { %6893 = vmatmul.mubr.msk.bf16.gmra.mrb[24].mxu1 %vm489_vm0, %v7488_v44 }
 0x815   : > { %3723 = vmatprep.mubr.bf16.mxu1 %v12074_v18 }
 0x817   : > { %v3151_v43 = vpop.permute.xlu0 %3150  ;;  %v3156_v9 = vpop.permute.xlu1 %3155 }
 0x81c   : > { %6894 = vmatmul.mubr.msk.bf16.gmra.mrb[28].mxu1 %vm489_vm0, %v7489_v37 }
 0x81d   : > { %3733 = vmatprep.mubr.bf16.mxu1 %v12074_v18 }
 0x824   : > { %6895 = vmatmul.mubr.msk.bf16.gmra.mrb[32].mxu1 %vm489_vm0, %v7490_v4 }
 0x825   : > { %3743 = vmatprep.mubr.bf16.mxu1 %v12074_v18 }
 0x82c   : > { %6896 = vmatmul.mubr.msk.bf16.gmra.mrb[36].mxu1 %vm489_vm0, %v7491_v54 }
 0x82d   : > { %3753 = vmatprep.mubr.bf16.mxu1 %v12074_v18 }
 0x834   : > { %6897 = vmatmul.mubr.msk.bf16.gmra.mrb[40].mxu1 %vm489_vm0, %v7492_v46 }
 0x835   : > { %3763 = vmatprep.mubr.bf16.mxu1 %v12074_v18 }
 0x83c   : > { %6898 = vmatmul.mubr.msk.bf16.gmra.mrb[44].mxu1 %vm489_vm0, %v7493_v48 }
 0x8d7   : > { %v3695_v39 = vpop.f32.mrb[16].mxu1 }
 0x8d8   : > { %v7142_v24 = vadd.f32 %v3695_v39, %v3141_v36  ;;  %v3697_v16 = vpop.f32.mrb[17].mxu1 }
 0x8d9   : > { %v7143_v13 = vadd.f32 %v3697_v16, %v3141_v36  ;;  %v3699_v57 = vpop.f32.mrb[18].mxu1 }
 0x8da   : > { %v6899_v29 = vmul.f32 -1.442695, %v7142_v24  ;;  %v7144_v8 = vadd.f32 %v3699_v57, %v3146_v42  ;;  %v3701_v34 = vpop.f32.mrb[19].mxu1 }
 0x8db   : > { %v6900_v47 = vmul.f32 -1.442695, %v7143_v13  ;;  %v7145_v56 = vadd.f32 %v3701_v34, %v3146_v42 }
 0x8dc   : > { %7688 = vpow2.f32 %v6899_v29  ;;  %v6901_v31 = vmul.f32 -1.442695, %v7144_v8  ;;  %v3171_v29 = vpop.permute.xlu0 %3170 }
 0x8dd   : > { %7690 = vpow2.f32 %v6900_v47  ;;  %v6902_v21 = vmul.f32 -1.442695, %v7145_v56 }
 0x8de   : > { %7692 = vpow2.f32 %v6901_v31 }
 0x8df   : > { %v3705_v20 = vpop.f32.mrb[20].mxu1  ;;  %7694 = vpow2.f32 %v6902_v21  ;;  %v3176_v21 = vpop.permute.xlu1 %3175 }
 0x8e0   : > { %v7146_v41 = vadd.f32 %v3705_v20, %v3151_v43  ;;  %v3707_v33 = vpop.f32.mrb[21].mxu1 }
 0x8e1   : > { %v7147_v58 = vadd.f32 %v3707_v33, %v3151_v43  ;;  %v3709_v1 = vpop.f32.mrb[22].mxu1 }
 0x8e2   : > { %v6903_v12 = vmul.f32 -1.442695, %v7146_v41  ;;  %v7148_v35 = vadd.f32 %v3709_v1, %v3156_v9  ;;  %v3711_v25 = vpop.f32.mrb[23].mxu1 }
 0x8e3   : > { %v6904_v50 = vmul.f32 -1.442695, %v7147_v58  ;;  %v7149_v22 = vadd.f32 %v3711_v25, %v3156_v9 }
 0x8e4   : > { %7696 = vpow2.f32 %v6903_v12  ;;  %v6905_v32 = vmul.f32 -1.442695, %v7148_v35 }
 0x8e5   : > { %7698 = vpow2.f32 %v6904_v50  ;;  %v6906_v0 = vmul.f32 -1.442695, %v7149_v22  ;;  %v3181_v22 = vpop.permute.xlu0 %3180 }
 0x8e6   : > { %v7689_v63 = vpop.eup %7688  ;;  %7700 = vpow2.f32 %v6905_v32 }
 0x8e7   : > { %v7691_v10 = vpop.eup %7690  ;;  %v3798_v17 = vadd.f32 1.0, %v7689_v63  ;;  %v3715_v3 = vpop.f32.mrb[24].mxu1  ;;  %7702 = vpow2.f32 %v6906_v0 }
 0x8e8   : > { %v7693_v5 = vpop.eup %7692  ;;  %v3799_v38 = vadd.f32 1.0, %v7691_v10  ;;  %v7150_v40 = vadd.f32 %v3715_v3, %v3161_v59  ;;  %v3717_v45 = vpop.f32.mrb[25].mxu1 }
 0x8e9   : > { %v3800_v53 = vadd.f32 1.0, %v7693_v5  ;;  %v7151_v44 = vadd.f32 %v3717_v45, %v3161_v59  ;;  %v3719_v37 = vpop.f32.mrb[26].mxu1  ;;  %v7695_v4 = vpop.eup %7694  ;;  %7704 = vrcp.f32 %v3798_v17 }
 0x8ea   : > { %v6907_v54 = vmul.f32 -1.442695, %v7150_v40  ;;  %v7152_v46 = vadd.f32 %v3719_v37, %v3166_v52  ;;  %v3721_v48 = vpop.f32.mrb[27].mxu1  ;;  %7706 = vrcp.f32 %v3799_v38  ;;  %v3801_v24 = vadd.f32 1.0, %v7695_v4  ;;  %v3186_v17 = vpop.permute.xlu1 %3185 }
 0x8eb   : > { %v6908_v36 = vmul.f32 -1.442695, %v7151_v44  ;;  %v7153_v42 = vadd.f32 %v3721_v48, %v3166_v52  ;;  %7708 = vrcp.f32 %v3800_v53 }
 0x8ec   : > { %v6909_v39 = vmul.f32 -1.442695, %v7152_v46  ;;  %7710 = vpow2.f32 %v6907_v54 }
 0x8ed   : > { %v6910_v16 = vmul.f32 -1.442695, %v7153_v42  ;;  %7712 = vpow2.f32 %v6908_v36  ;;  %v3201_v36 = vpop.permute.xlu0 %3200 }
 0x8ee   : > { %v7697_v13 = vpop.eup %7696  ;;  %7714 = vpow2.f32 %v6909_v39 }
 0x8ef   : > { %v7699_v57 = vpop.eup %7698  ;;  %v3802_v8 = vadd.f32 1.0, %v7697_v13  ;;  %v3725_v59 = vpop.f32.mrb[28].mxu1  ;;  %7716 = vpow2.f32 %v6910_v16 }
 0x8f0   : > { %v7701_v34 = vpop.eup %7700  ;;  %v3803_v47 = vadd.f32 1.0, %v7699_v57  ;;  %v7154_v56 = vadd.f32 %v3725_v59, %v3171_v29  ;;  %v3727_v31 = vpop.f32.mrb[29].mxu1  ;;  %7718 = vrcp.f32 %v3801_v24 }
 0x8f1   : > { %v3804_v52 = vadd.f32 1.0, %v7701_v34  ;;  %v7155_v43 = vadd.f32 %v3727_v31, %v3171_v29  ;;  %v3729_v20 = vpop.f32.mrb[30].mxu1  ;;  %v7703_v41 = vpop.eup %7702  ;;  %7720 = vrcp.f32 %v3802_v8 }
 0x8f2   : > { %v6911_v33 = vmul.f32 -1.442695, %v7154_v56  ;;  %v7156_v9 = vadd.f32 %v3729_v20, %v3176_v21  ;;  %v3731_v58 = vpop.f32.mrb[31].mxu1  ;;  %7722 = vrcp.f32 %v3803_v47  ;;  %v3805_v32 = vadd.f32 1.0, %v7703_v41  ;;  %v3206_v57 = vpop.permute.xlu1 %3205 }
 0x8f3   : > { %v6912_v1 = vmul.f32 -1.442695, %v7155_v43  ;;  %v7157_v12 = vadd.f32 %v3731_v58, %v3176_v21  ;;  %v10428_v35 = vpop.eup %7704  ;;  %7724 = vrcp.f32 %v3804_v52  ;;  %v3191_v52 = vpop.permute.xlu0 %3190 }
 0x8f4   : > { %v6913_v25 = vmul.f32 -1.442695, %v7156_v9  ;;  %v10430_v50 = vpop.eup %7706  ;;  %7726 = vpow2.f32 %v6911_v33 }
 0x8f5   : > { %v6914_v0 = vmul.f32 -1.442695, %v7157_v12  ;;  %v10432_v63 = vpop.eup %7708  ;;  %7728 = vpow2.f32 %v6912_v1 }
 0x8f6   : > { %v7711_v10 = vpop.eup %7710  ;;  %7730 = vpow2.f32 %v6913_v25  ;;  %v3196_v12 = vpop.permute.xlu1 %3195 }
 0x8f7   : > { %v3735_v3 = vpop.f32.mrb[32].mxu1  ;;  %v7713_v5 = vpop.eup %7712  ;;  %v3846_v38 = vadd.f32 1.0, %v7711_v10  ;;  %7732 = vpow2.f32 %v6914_v0 }
 0x8f8   : > { %v3737_v40 = vpop.f32.mrb[33].mxu1  ;;  %v7715_v45 = vpop.eup %7714  ;;  %7734 = vrcp.f32 %v3805_v32  ;;  %v3847_v53 = vadd.f32 1.0, %v7713_v5  ;;  %v7158_v54 = vadd.f32 %v3735_v3, %v3181_v22 }
 0x8f9   : > { %v3739_v44 = vpop.f32.mrb[34].mxu1  ;;  %v7717_v37 = vpop.eup %7716  ;;  %7736 = vrcp.f32 %v3846_v38  ;;  %v3848_v4 = vadd.f32 1.0, %v7715_v45  ;;  %v7159_v39 = vadd.f32 %v3737_v40, %v3181_v22 }
 0x8fa   : > { %v3741_v46 = vpop.f32.mrb[35].mxu1  ;;  %v10434_v48 = vpop.eup %7718  ;;  %7738 = vrcp.f32 %v3847_v53  ;;  %v3849_v42 = vadd.f32 1.0, %v7717_v37  ;;  %v7160_v16 = vadd.f32 %v3739_v44, %v3186_v17 }
 0x8fb   : > { %v10436_v24 = vpop.eup %7720  ;;  %7740 = vrcp.f32 %v3848_v4  ;;  %v7161_v29 = vadd.f32 %v3741_v46, %v3186_v17 }
 0x8fc   : > { %v10438_v13 = vpop.eup %7722  ;;  %7742 = vrcp.f32 %v3849_v42 }
 0x8fd   : > { %v10440_v8 = vpop.eup %7724  ;;  %7744 = vtanh.f32 %v7158_v54  ;;  %v12110_v54 = vld [vmem:[#allocation9_spill] sm:$0xff] }
 0x8fe   : > { %v7727_v59 = vpop.eup %7726  ;;  %7746 = vtanh.f32 %v7159_v39 }
 0x8ff   : > { %v3745_v34 = vpop.f32.mrb[36].mxu1  ;;  %v7729_v47 = vpop.eup %7728  ;;  %v3850_v56 = vadd.f32 1.0, %v7727_v59  ;;  %7748 = vtanh.f32 %v7160_v16  ;;  %v12111_v59 = vld [vmem:[#allocation14_spill] sm:$0xff] }
 0x900   : > { %v3747_v31 = vpop.f32.mrb[37].mxu1  ;;  %v7731_v21 = vpop.eup %7730  ;;  %v3851_v43 = vadd.f32 1.0, %v7729_v47  ;;  %7750 = vtanh.f32 %v7161_v29  ;;  %v7162_v9 = vadd.f32 %v3745_v34, %v3191_v52 }
 0x901   : > { %v3749_v20 = vpop.f32.mrb[38].mxu1  ;;  %v7733_v41 = vpop.eup %7732  ;;  %7752 = vrcp.f32 %v3850_v56  ;;  %v3852_v33 = vadd.f32 1.0, %v7731_v21  ;;  %v7163_v22 = vadd.f32 %v3747_v31, %v3191_v52 }
 0x902   : > { %v3751_v58 = vpop.f32.mrb[39].mxu1  ;;  %v10442_v1 = vpop.eup %7734  ;;  %7754 = vrcp.f32 %v3851_v43  ;;  %v3853_v25 = vadd.f32 1.0, %v7733_v41  ;;  %v7164_v0 = vadd.f32 %v3749_v20, %v3196_v12 }
 0x903   : > { %v7737_v32 = vpop.eup %7736  ;;  %7756 = vrcp.f32 %v3852_v33  ;;  %v7165_v17 = vadd.f32 %v3751_v58, %v3196_v12 }
 0x904   : > { %v7739_v10 = vpop.eup %7738  ;;  %7758 = vrcp.f32 %v3853_v25  ;;  %v3926_v38 = vmul.f32 %v7737_v32, %v9750_v30  ;;  %v12114_v32 = vld [vmem:[#allocation15_spill] sm:$0xff] }
 0x905   : > { %v7741_v3 = vpop.eup %7740  ;;  %7760 = vtanh.f32 %v7162_v9  ;;  %v3927_v53 = vmul.f32 %v7739_v10, %v9754_v23 }
 0x906   : > { %v7743_v5 = vpop.eup %7742  ;;  %7762 = vtanh.f32 %v7163_v22  ;;  %v3928_v46 = vmul.f32 %v7741_v3, %v12110_v54  ;;  %v3211_v22 = vpop.permute.xlu0 %3210 }
 0x907   : > { %v3755_v40 = vpop.f32.mrb[40].mxu1  ;;  %v7745_v45 = vpop.eup %7744  ;;  %7764 = vtanh.f32 %v7164_v0  ;;  %v3929_v34 = vmul.f32 %v7743_v5, %v12111_v59 }
 0x908   : > { %v7166_v44 = vadd.f32 %v3755_v40, %v3201_v36  ;;  %v3757_v37 = vpop.f32.mrb[41].mxu1  ;;  %v7747_v4 = vpop.eup %7746  ;;  %v3934_v42 = vmul.f32 %v7745_v45, %v10428_v35  ;;  %7766 = vtanh.f32 %v7165_v17  ;;  %v12115_v17 = vld [vmem:[#allocation16_spill] sm:$0xff]  ;;  %v12116_v40 = vld [vmem:[#allocation17_spill] sm:$0xff] }
 0x909   : > { %v7167_v39 = vadd.f32 %v3757_v37, %v3201_v36  ;;  %v3759_v16 = vpop.f32.mrb[42].mxu1  ;;  %v7749_v29 = vpop.eup %7748  ;;  %v3935_v30 = vmul.f32 %v7747_v4, %v10430_v50 }
 0x90a   : > { %v6915_v47 = vmul.f32 -1.442695, %v7166_v44  ;;  %v7168_v56 = vadd.f32 %v3759_v16, %v3206_v57  ;;  %v3761_v31 = vpop.f32.mrb[43].mxu1  ;;  %v7751_v23 = vpop.eup %7750  ;;  %v10450_v21 = vadd.f32 %v3934_v42, %v3926_v38  ;;  %v3936_v52 = vmul.f32 %v7749_v29, %v10432_v63 }
 0x90b   : > { %v7169_v43 = vadd.f32 %v3761_v31, %v3206_v57  ;;  %v7753_v20 = vpop.eup %7752  ;;  %v10453_v41 = vadd.f32 %v3935_v30, %v3927_v53  ;;  %v3937_v35 = vmul.f32 %v7751_v23, %v10434_v48  ;;  %v6916_v9 = vmul.f32 -1.442695, %v7167_v39  ;;  %v12117_v53 = vld [vmem:[#allocation18_spill] sm:$0xff] }
 0x90c   : > { %7768 = vpow2.f32 %v6915_v47  ;;  %v7755_v36 = vpop.eup %7754  ;;  %v10456_v33 = vadd.f32 %v3936_v52, %v3928_v46  ;;  %v6917_v12 = vmul.f32 -1.442695, %v7168_v56  ;;  %v3930_v0 = vmul.f32 %v7753_v20, %v12114_v32  ;;  %v3216_v46 = vpop.permute.xlu1 %3215 }
 0x90d   : > { %v7757_v50 = vpop.eup %7756  ;;  %v10458_v58 = vadd.f32 %v3937_v35, %v3929_v34  ;;  %v6918_v63 = vmul.f32 -1.442695, %v7169_v43  ;;  %v3931_v3 = vmul.f32 %v7755_v36, %v12115_v17  ;;  %7770 = vpow2.f32 %v6916_v9 }
 0x90e   : > { %12112 = vst [vmem:[#allocation9_spill] sm:$0xff] %v10456_v33  ;;  %v7759_v25 = vpop.eup %7758  ;;  %v3932_v45 = vmul.f32 %v7757_v50, %v12116_v40  ;;  %7772 = vpow2.f32 %v6917_v12 }
 0x90f   : > { %12113 = vst [vmem:[#allocation14_spill] sm:$0xff] %v10458_v58  ;;  %v3765_v57 = vpop.f32.mrb[44].mxu1  ;;  %v7761_v10 = vpop.eup %7760  ;;  %v3933_v44 = vmul.f32 %v7759_v25, %v12117_v53  ;;  %7774 = vpow2.f32 %v6918_v63 }
 0x910   : > { %v7170_v5 = vadd.f32 %v3765_v57, %v3211_v22  ;;  %v3767_v48 = vpop.f32.mrb[45].mxu1  ;;  %v7763_v38 = vpop.eup %7762  ;;  %v3938_v37 = vmul.f32 %v7761_v10, %v10436_v24 }
 0x911   : > { %v3769_v4 = vpop.f32.mrb[46].mxu1  ;;  %v7765_v54 = vpop.eup %7764  ;;  %v3939_v42 = vmul.f32 %v7763_v38, %v10438_v13  ;;  %v7171_v16 = vadd.f32 %v3767_v48, %v3211_v22 }
 0x912   : > { %v6919_v39 = vmul.f32 -1.442695, %v7170_v5  ;;  %v3771_v29 = vpop.f32.mrb[47].mxu1  ;;  %v7767_v59 = vpop.eup %7766  ;;  %v10466_v34 = vadd.f32 %v3938_v37, %v3930_v0  ;;  %v3940_v30 = vmul.f32 %v7765_v54, %v10440_v8  ;;  %v7172_v47 = vadd.f32 %v3769_v4, %v3216_v46  ;;  %v12122_v4 = vld [vmem:[#allocation10_spill] sm:$0xff] }
 0x913   : > { %v10469_v56 = vadd.f32 %v3939_v42, %v3931_v3  ;;  %v3941_v24 = vmul.f32 %v7767_v59, %v10442_v1  ;;  %v7173_v13 = vadd.f32 %v3771_v29, %v3216_v46  ;;  %v6920_v43 = vmul.f32 -1.442695, %v7171_v16  ;;  %v12123_v42 = vld [vmem:[#allocation11_spill] sm:$0xff] }
 0x914   : > { %12118 = vst [vmem:[#allocation15_spill] sm:$0xff] %v10466_v34  ;;  %7776 = vpow2.f32 %v6919_v39  ;;  %v10473_v31 = vadd.f32 %v3940_v30, %v3932_v45  ;;  %v6921_v20 = vmul.f32 -1.442695, %v7172_v47 }
 0x915   : > { %12119 = vst [vmem:[#allocation16_spill] sm:$0xff] %v10469_v56  ;;  %7778 = vtanh.f32 %v10450_v21  ;;  %v10476_v52 = vadd.f32 %v3941_v24, %v3933_v44  ;;  %v6922_v35 = vmul.f32 -1.442695, %v7173_v13  ;;  %v12124_v13 = vld [vmem:[#allocation8_spill] sm:$0xff] }
 0x916   : > { %12120 = vst [vmem:[#allocation17_spill] sm:$0xff] %v10473_v31  ;;  %v7769_v23 = vpop.eup %7768  ;;  %7780 = vtanh.f32 %v10453_v41 }
 0x917   : > { %12121 = vst [vmem:[#allocation18_spill] sm:$0xff] %v10476_v52  ;;  %7782 = vtanh.f32 %v10456_v33  ;;  %v3902_v8 = vadd.f32 1.0, %v7769_v23  ;;  %v7771_v1 = vpop.eup %7770 }
 0x918   : > { %7784 = vtanh.f32 %v10458_v58  ;;  %v7773_v36 = vpop.eup %7772  ;;  %v3903_v9 = vadd.f32 1.0, %v7771_v1  ;;  %v12125_v1 = vld [vmem:[#allocation5_spill] sm:$0xff] }
 0x919   : > { %7786 = vrcp.f32 %v3902_v8  ;;  %v7775_v50 = vpop.eup %7774  ;;  %v3904_v12 = vadd.f32 1.0, %v7773_v36 }
 0x91a   : > { %7788 = vpow2.f32 %v6920_v43  ;;  %v3905_v22 = vadd.f32 1.0, %v7775_v50 }
 0x91b   : > { %7790 = vpow2.f32 %v6921_v20 }
 0x91c   : > { %7792 = vpow2.f32 %v6922_v35 }
 0x91d   : > { %7794 = vtanh.f32 %v10466_v34 }
 0x91e   : > { %v7777_v25 = vpop.eup %7776  ;;  %7796 = vrcp.f32 %v3903_v9  ;;  %v12126_v9 = vld [vmem:[#allocation6_spill] sm:$0xff] }
 0x91f   : > { %v7779_v32 = vpop.eup %7778  ;;  %7798 = vrcp.f32 %v3904_v12  ;;  %v3906_v0 = vadd.f32 1.0, %v7777_v25  ;;  %v12127_v12 = vld [vmem:[#allocation7_spill] sm:$0xff] }
 0x920   : > { %v7781_v63 = vpop.eup %7780  ;;  %7800 = vrcp.f32 %v3905_v22 }
 0x921   : > { %v7783_v57 = vpop.eup %7782  ;;  %7802 = vrcp.f32 %v3906_v0 }
 0x922   : > { %v7785_v10 = vpop.eup %7784  ;;  %7804 = vtanh.f32 %v10469_v56 }
 0x923   : > { %v7787_v17 = vpop.eup %7786  ;;  %7806 = vtanh.f32 %v10473_v31 }
 0x924   : > { %v7789_v3 = vpop.eup %7788  ;;  %v3958_v5 = vmul.f32 %v7787_v17, %v7779_v32  ;;  %7808 = vtanh.f32 %v10476_v52 }
 0x925   : > { %v7791_v48 = vpop.eup %7790  ;;  %v3907_v38 = vadd.f32 1.0, %v7789_v3 }
 0x926   : > { %v7793_v40 = vpop.eup %7792  ;;  %v3908_v45 = vadd.f32 1.0, %v7791_v48  ;;  %v4005_v54 = vmul.f32 %v3958_v5, %v12122_v4  ;;  %v3987_v46 = vmul.f32 %v3958_v5, %v8392_v26  ;;  %v10487_v39 = vmul.f32 %v3958_v5, %v12123_v42 }
 0x927   : > { %v7795_v53 = vpop.eup %7794  ;;  %7810 = vrcp.f32 %v3907_v38  ;;  %v3909_v44 = vadd.f32 1.0, %v7793_v40  ;;  %v10492_v59 = vmul.f32 %v3958_v5, %v8378_v19  ;;  %v10495_v30 = vmul.f32 %v3958_v5, %v8325_v61 }
 0x928   : > { %v7797_v37 = vpop.eup %7796  ;;  %7812 = vrcp.f32 %v3908_v45  ;;  %v10500_v23 = vmul.f32 %v3958_v5, %v12124_v13  ;;  %v10503_v43 = vmul.f32 %v3958_v5, %v8341_v6  ;;  %v10506_v8 = vmul.f32 %v3958_v5, %v8351_v11 }
 0x929   : > { %v7799_v16 = vpop.eup %7798  ;;  %v10489_v29 = vmul.f32 %v7797_v37, %v7781_v63  ;;  %7814 = vrcp.f32 %v3909_v44 }
 0x92a   : > { %v7801_v47 = vpop.eup %7800  ;;  %v10497_v24 = vmul.f32 %v7799_v16, %v7783_v57 }
 0x92b   : > { %v7803_v20 = vpop.eup %7802  ;;  %v10508_v35 = vmul.f32 %v7801_v47, %v7785_v10  ;;  %v4006_v36 = vmul.f32 %v10489_v29, %v12125_v1  ;;  %v10514_v50 = vmul.f32 %v10489_v29, %v12126_v9  ;;  %v10518_v25 = vmul.f32 %v10489_v29, %v12127_v12 }
 0x92c   : > { %v10520_v22 = vmul.f32 %v7803_v20, %v7795_v53  ;;  %v4058_v32 = vpack.c.bf16 %v10497_v24, %v3958_v5  ;;  %v4008_v0 = vmul.f32 %v10497_v24, %v12122_v4  ;;  %v3990_v63 = vmul.f32 %v10497_v24, %v8392_v26  ;;  %v7805_v48 = vpop.eup %7804 }
 0x92d   : > { %v4059_v57 = vpack.c.bf16 %v10508_v35, %v10489_v29  ;;  %v4026_v10 = vmul.f32 %v10497_v24, %v12123_v42  ;;  %v4009_v17 = vmul.f32 %v10508_v35, %v12125_v1  ;;  %v4044_v3 = vmul.f32 %v10497_v24, %v8378_v19  ;;  %v7807_v53 = vpop.eup %7806 }
 0x92e   : > { %4216 = vrot.lane.b32.xlu0 %v4058_v32, %s12075_s13  ;;  %v4017_v5 = vpack.c.bf16 %v4008_v0, %v4005_v54  ;;  %v3999_v38 = vpack.c.bf16 %v3990_v63, %v3987_v46  ;;  %v4027_v40 = vmul.f32 %v10508_v35, %v12126_v9  ;;  %v10540_v45 = vmul.f32 %v10497_v24, %v8325_v61  ;;  %v7809_v54 = vpop.eup %7808  ;;  %v12128_v0 = vld [vmem:[#allocation12_spill] sm:$0xff] }
 0x92f   : > { %4218 = vrot.lane.b32.xlu1 %v4059_v57, %s12075_s13  ;;  %v4035_v44 = vpack.c.bf16 %v4026_v10, %v10487_v39  ;;  %v4018_v37 = vpack.c.bf16 %v4009_v17, %v4006_v36  ;;  %v4053_v16 = vpack.c.bf16 %v4044_v3, %v10492_v59  ;;  %v10547_v47 = vmul.f32 %v10508_v35, %v12127_v12  ;;  %v12129_v57 = vld [vmem:[#allocation13_spill] sm:$0xff] }
 0x930   : > { %v4036_v46 = vpack.c.bf16 %v4027_v40, %v10514_v50  ;;  %v10554_v32 = vmul.f32 %v10497_v24, %v12124_v13  ;;  %v10558_v39 = vmul.f32 %v10489_v29, %v12128_v0  ;;  %v10564_v63 = vmul.f32 %v10508_v35, %v12128_v0 }
 0x931   : > { %v7811_v36 = vpop.eup %7810  ;;  %v10568_v50 = vmul.f32 %v10497_v24, %v8341_v6  ;;  %v10572_v10 = vmul.f32 %v10489_v29, %v12129_v57  ;;  %v10581_v59 = vmul.f32 %v10508_v35, %v12129_v57  ;;  %v10585_v20 = vmul.f32 %v10489_v29, %v8367_v15 }
 0x932   : > { %v7813_v17 = vpop.eup %7812  ;;  %v10574_v3 = vmul.f32 %v7811_v36, %v7805_v48  ;;  %4154 = vrot.lane.b32.xlu0 %v4017_v5, %s12109_s12  ;;  %v10596_v36 = vmul.f32 %v10508_v35, %v8367_v15  ;;  %v4047_v33 = vmul.f32 %v10520_v22, %v8378_v19 }
 0x933   : > { %v7815_v52 = vpop.eup %7814  ;;  %v10587_v31 = vmul.f32 %v7813_v17, %v7807_v53  ;;  %4570 = vrot.lane.b32.xlu1 %v3999_v38, %s12089_s26  ;;  %v10604_v53 = vmul.f32 %v10489_v29, %v8395_v27  ;;  %v10608_v38 = vmul.f32 %v10508_v35, %v8395_v27 }
 0x934   : > { %v10598_v40 = vmul.f32 %v7815_v52, %v7809_v54  ;;  %v10616_v52 = vmul.f32 %v10574_v3, %v12125_v1  ;;  %v10620_v54 = vmul.f32 %v10520_v22, %v12122_v4  ;;  %v10638_v34 = vmul.f32 %v10574_v3, %v12126_v9 }
 0x935   : > { %v4123_v56 = vpack.c.bf16 %v10608_v38, %v10604_v53  ;;  %v10633_v5 = vmul.f32 %v10587_v31, %v12122_v4  ;;  %v4029_v53 = vmul.f32 %v10520_v22, %v12123_v42  ;;  %v4032_v38 = vmul.f32 %v10587_v31, %v12123_v42 }
 0x936   : > { %4176 = vrot.lane.b32.xlu0 %v4035_v44, %s12099_s23  ;;  %v10629_v17 = vmul.f32 %v10598_v40, %v12125_v1  ;;  %v4033_v44 = vmul.f32 %v10598_v40, %v12126_v9  ;;  %v4051_v4 = vmul.f32 %v10598_v40, %v12127_v12  ;;  %v4050_v42 = vmul.f32 %v10587_v31, %v8378_v19 }
 0x937   : > { %4156 = vrot.lane.b32.xlu1 %v4018_v37, %s12109_s12  ;;  %v4020_v1 = vpack.c.bf16 %v10633_v5, %v10620_v54  ;;  %v4048_v37 = vmul.f32 %v10574_v3, %v12127_v12  ;;  %v4038_v58 = vpack.c.bf16 %v4032_v38, %v4029_v53  ;;  %v4081_v5 = vmul.f32 %v10574_v3, %v12128_v0 }
 0x938   : > { %v4021_v48 = vpack.c.bf16 %v10629_v17, %v10616_v52  ;;  %v4039_v9 = vpack.c.bf16 %v4033_v44, %v10638_v34  ;;  %v4084_v52 = vmul.f32 %v10598_v40, %v12128_v0  ;;  %v4080_v54 = vmul.f32 %v10520_v22, %v8325_v61 }
 0x939   : > { %v4057_v17 = vpack.c.bf16 %v4051_v4, %v4048_v37  ;;  %v4056_v34 = vpack.c.bf16 %v4050_v42, %v4047_v33  ;;  %v4083_v44 = vmul.f32 %v10587_v31, %v8325_v61  ;;  %v4099_v53 = vmul.f32 %v10574_v3, %v12129_v57 }
 0x93a   : > { %4198 = vrot.lane.b32.xlu0 %v4053_v16, %s12085_s16  ;;  %v4102_v4 = vmul.f32 %v10598_v40, %v12129_v57  ;;  %v4090_v16 = vpack.c.bf16 %v4084_v52, %v4081_v5  ;;  %v4098_v38 = vmul.f32 %v10520_v22, %v12124_v13  ;;  %v4101_v37 = vmul.f32 %v10587_v31, %v12124_v13 }
 0x93b   : > { %4178 = vrot.lane.b32.xlu1 %v4036_v46, %s12099_s23  ;;  %v4117_v46 = vmul.f32 %v10574_v3, %v8395_v27  ;;  %v4089_v33 = vpack.c.bf16 %v4083_v44, %v4080_v54  ;;  %v4120_v0 = vmul.f32 %v10598_v40, %v8395_v27  ;;  %v4116_v12 = vmul.f32 %v10520_v22, %v8341_v6 }
 0x93c   : > { %v4108_v42 = vpack.c.bf16 %v4102_v4, %v4099_v53  ;;  %v12130_v5 = vpack.c.bf16 %v10540_v45, %v10495_v30  ;;  %v4107_v52 = vpack.c.bf16 %v4101_v37, %v4098_v38  ;;  %v4119_v57 = vmul.f32 %v10587_v31, %v8341_v6 }
 0x93d   : > { %v3994_v13 = vmul.f32 %v10574_v3, %v8367_v15  ;;  %v3997_v54 = vmul.f32 %v10598_v40, %v8367_v15  ;;  %v12131_v44 = vpack.c.bf16 %v10547_v47, %v10518_v25  ;;  %v4126_v53 = vpack.c.bf16 %v4120_v0, %v4117_v46 }
 0x93e   : > { %4232 = vrot.lane.b32.xlu0 %v12130_v5, %s12086_s18  ;;  %v3993_v30 = vmul.f32 %v10520_v22, %v8392_v26  ;;  %v3996_v45 = vmul.f32 %v10587_v31, %v8392_v26  ;;  %v10703_v4 = vmul.f32 %v10489_v29, %v8399_v28  ;;  %v4125_v38 = vpack.c.bf16 %v4119_v57, %v4116_v12 }
 0x93f   : > { %4200 = vrot.lane.b32.xlu1 %v12131_v44, %s12085_s16  ;;  %v4003_v37 = vpack.c.bf16 %v3997_v54, %v3994_v13  ;;  %v10707_v5 = vmul.f32 %v10508_v35, %v8399_v28  ;;  %v10711_v25 = vmul.f32 %v10497_v24, %v8351_v11  ;;  %v10715_v0 = vmul.f32 %v10574_v3, %v8399_v28 }
 0x940   : > { %v4002_v47 = vpack.c.bf16 %v3996_v45, %v3993_v30  ;;  %v10719_v46 = vmul.f32 %v10598_v40, %v8399_v28  ;;  %v12132_v29 = vpack.c.bf16 %v10554_v32, %v10500_v23  ;;  %v10731_v35 = vmul.f32 %v10520_v22, %v8351_v11 }
 0x941   : > { %v4141_v13 = vpack.c.bf16 %v10707_v5, %v10703_v4  ;;  %v4140_v24 = vpack.c.bf16 %v10711_v25, %v10506_v8  ;;  %v10735_v12 = vmul.f32 %v10587_v31, %v8351_v11  ;;  %v12133_v57 = vpack.c.bf16 %v10564_v63, %v10558_v39 }
 0x942   : > { %4254 = vrot.lane.b32.xlu0 %v12132_v29, %s12087_s19  ;;  %v4144_v23 = vpack.c.bf16 %v10719_v46, %v10715_v0  ;;  %v12134_v54 = vpack.c.bf16 %v10568_v50, %v10503_v43  ;;  %v12135_v44 = vpack.c.bf16 %v10581_v59, %v10572_v10  ;;  %v12136_v39 = vpack.c.bf16 %v10596_v36, %v10585_v20 }
 0x943   : > { %4234 = vrot.lane.b32.xlu1 %v12133_v57, %s12086_s18  ;;  %v4143_v32 = vpack.c.bf16 %v10735_v12, %v10731_v35  ;;  %v12137_v63 = vpack.c.bf16 %v10587_v31, %v10520_v22  ;;  %v12138_v43 = vpack.c.bf16 %v10598_v40, %v10574_v3 }
 0x946   : > { %4276 = vrot.lane.b32.xlu0 %v12134_v54, %s12088_s11 }
 0x947   : > { %4256 = vrot.lane.b32.xlu1 %v12135_v44, %s12087_s19 }
 0x94a   : > { %4572 = vrot.lane.b32.xlu0 %v12136_v39, %s12089_s26 }
 0x94b   : > { %4278 = vrot.lane.b32.xlu1 %v4123_v56, %s12088_s11  ;;  %v10780_v56 = vpop.permute.xlu1 %4158 }
 0x94e   : > { %4220 = vrot.lane.b32.xlu0 %v12137_v63, %s12075_s13 }
 0x94f   : > { %4222 = vrot.lane.b32.xlu1 %v12138_v43, %s12075_s13 }
 0x952   : > { %4162 = vrot.lane.b32.xlu0 %v4021_v48, %s12109_s12 }
 0x953   : > { %4160 = vrot.lane.b32.xlu1 %v4020_v1, %s12109_s12  ;;  %v10782_v1 = vpop.permute.xlu1 %4180 }
 0x956   : > { %4184 = vrot.lane.b32.xlu0 %v4039_v9, %s12099_s23 }
 0x957   : > { %4182 = vrot.lane.b32.xlu1 %v4038_v58, %s12099_s23  ;;  %v4153_v58 = vpop.permute.xlu0 %4152  ;;  %v10784_v22 = vpop.permute.xlu1 %4202 }
 0x95a   : > { %4206 = vrot.lane.b32.xlu0 %v4057_v17, %s12085_s16 }
 0x95b   : > { %4204 = vrot.lane.b32.xlu1 %v4056_v34, %s12085_s16  ;;  %v4175_v31 = vpop.permute.xlu0 %4174  ;;  %v10788_v59 = vpop.permute.xlu1 %4242 }
 0x95e   : > { %4240 = vrot.lane.b32.xlu0 %v4090_v16, %s12086_s18 }
 0x95f   : > { %4238 = vrot.lane.b32.xlu1 %v4089_v33, %s12086_s18  ;;  %v4197_v9 = vpop.permute.xlu0 %4196  ;;  %v10792_v10 = vpop.permute.xlu1 %4264 }
 0x962   : > { %4262 = vrot.lane.b32.xlu0 %v4108_v42, %s12087_s19 }
 0x963   : > { %4260 = vrot.lane.b32.xlu1 %v4107_v52, %s12087_s19  ;;  %v10786_v20 = vpop.permute.xlu0 %4236  ;;  %v10796_v40 = vpop.permute.xlu1 %4286 }
 0x966   : > { %4284 = vrot.lane.b32.xlu0 %v4126_v53, %s12088_s11 }
 0x967   : > { %4282 = vrot.lane.b32.xlu1 %v4125_v38, %s12088_s11  ;;  %v10790_v50 = vpop.permute.xlu0 %4258  ;;  %v10798_v36 = vpop.permute.xlu1 %4574 }
 0x96a   : > { %4578 = vrot.lane.b32.xlu0 %v4003_v37, %s12089_s26 }
 0x96b   : > { %4576 = vrot.lane.b32.xlu1 %v4002_v47, %s12089_s26  ;;  %v10794_v3 = vpop.permute.xlu0 %4280 }
 0x96f   : > { %v4569_v48 = vpop.permute.xlu0 %4568 }
 0x9a0   : > { %v4217_v17 = vpop.permute.xlu0 %4216 }
 0x9a1   : > { %v4219_v34 = vpop.permute.xlu1 %4218  ;;  %4616 = vrot.lane.b32.xlu0 %v4217_v17, %s12089_s26 }
 0x9a2   : > { %4620 = vrot.lane.b32.xlu1 %v4219_v34, %s12089_s26  ;;  %v4224_v33 = vsel %vm582_vm6, %v4217_v17, %v4219_v34 }
 0x9a4   : > { %v4155_v16 = vpop.permute.xlu0 %4154 }
 0x9a5   : > { %v4571_v42 = vpop.permute.xlu1 %4570  ;;  %4618 = vrot.lane.b32.xlu0 %v4224_v33, %s12089_s26  ;;  %v4164_v53 = vsel %vm690_vm3, %v4153_v58, %v4155_v16 }
 0x9a8   : > { %v4177_v52 = vpop.permute.xlu0 %4176 }
 0x9a9   : > { %v4157_v30 = vpop.permute.xlu1 %4156  ;;  %4580 = vrot.lane.b32.xlu0 %v4164_v53, %s12089_s26  ;;  %v4186_v38 = vsel %vm914_vm9, %v4175_v31, %v4177_v52 }
 0x9aa   : > { %4584 = vrot.lane.b32.xlu1 %v4157_v30, %s12089_s26  ;;  %v4165_v44 = vsel %vm690_vm3, %v4155_v16, %v4157_v30  ;;  %v4676_v16 = vsel %vm850_vm8, %v4569_v48, %v4571_v42 }
 0x9ac   : > { %v4199_v45 = vpop.permute.xlu0 %4198 }
 0x9ad   : > { %v4179_v37 = vpop.permute.xlu1 %4178  ;;  %4592 = vrot.lane.b32.xlu0 %v4186_v38, %s12089_s26  ;;  %v4208_v29 = vsel %vm618_vm1, %v4197_v9, %v4199_v45 }
 0x9ae   : > { %4596 = vrot.lane.b32.xlu1 %v4179_v37, %s12089_s26  ;;  %v4187_v43 = vsel %vm914_vm9, %v4177_v52, %v4179_v37 }
 0x9b0   : > { %v4233_v47 = vpop.permute.xlu0 %4232 }
 0x9b1   : > { %v4201_v57 = vpop.permute.xlu1 %4200  ;;  %4604 = vrot.lane.b32.xlu0 %v4208_v29, %s12089_s26 }
 0x9b2   : > { %4608 = vrot.lane.b32.xlu1 %v4201_v57, %s12089_s26  ;;  %v4209_v9 = vsel %vm618_vm1, %v4199_v45, %v4201_v57 }
 0x9b4   : > { %v4255_v54 = vpop.permute.xlu0 %4254 }
 0x9b5   : > { %v4235_v39 = vpop.permute.xlu1 %4234  ;;  %4582 = vrot.lane.b32.xlu0 %v4165_v44, %s12089_s26 }
 0x9b8   : > { %v10815_v63 = vpop.permute.xlu0 %4276 }
 0x9b9   : > { %v10818_v58 = vpop.permute.xlu1 %4256  ;;  %4594 = vrot.lane.b32.xlu0 %v4187_v43, %s12089_s26 }
 0x9bc   : > { %v4573_v31 = vpop.permute.xlu0 %4572 }
 0x9bd   : > { %v10822_v17 = vpop.permute.xlu1 %4278  ;;  %4606 = vrot.lane.b32.xlu0 %v4209_v9, %s12089_s26  ;;  %v4677_v34 = vsel %vm850_vm8, %v4571_v42, %v4573_v31  ;;  %v4244_v42 = vsel %vm975_vm10, %v4233_v47, %v4235_v39 }
 0x9be   : > { %4772 = vmatprep.subr.bf16.mxu0 %v4677_v34 }
 0x9bf   : > { %4773 = vmatpush1.bf16.msra.mxu0 %v4676_v16 }
 0x9c0   : > { %v4221_v33 = vpop.permute.xlu0 %4220 }
 0x9c1   : > { %v4223_v53 = vpop.permute.xlu1 %4222  ;;  %4622 = vrot.lane.b32.xlu1 %v4221_v33, %s12089_s26 }
 0x9c2   : > { %4626 = vrot.lane.b32.xlu0 %v4223_v53, %s12089_s26  ;;  %v4225_v30 = vsel %vm582_vm6, %v4221_v33, %v4223_v53  ;;  %v4245_v33 = vsel %vm975_vm10, %v4235_v39, %v10786_v20  ;;  %v4288_v39 = vsel %vm1021_vm12, %v10815_v63, %v10822_v17 }
 0x9c4   : > { %v4163_v52 = vpop.permute.xlu0 %4162 }
 0x9c5   : > { %v4161_v45 = vpop.permute.xlu1 %4160  ;;  %4624 = vrot.lane.b32.xlu1 %v4225_v30, %s12089_s26 }
 0x9c6   : > { %4590 = vrot.lane.b32.xlu0 %v4163_v52, %s12089_s26  ;;  %v4166_v37 = vsel %vm690_vm3, %v10780_v56, %v4161_v45  ;;  %v4167_v34 = vsel %vm690_vm3, %v4161_v45, %v4163_v52 }
 0x9c8   : > { %v4185_v38 = vpop.permute.xlu0 %4184 }
 0x9c9   : > { %v4183_v48 = vpop.permute.xlu1 %4182  ;;  %4586 = vrot.lane.b32.xlu1 %v4166_v37, %s12089_s26 }
 0x9ca   : > { %4630 = vrot.lane.b32.xlu0 %v4244_v42, %s12089_s26  ;;  %v4188_v57 = vsel %vm914_vm9, %v10782_v1, %v4183_v48  ;;  %v4189_v52 = vsel %vm914_vm9, %v4183_v48, %v4185_v38  ;;  %v7496_v42 = vld [vmem:[%s11981_s6 + $0x4] ss:$12 sps:$4 sm:$0xff]  }
 0x9cb   : > { %4804 = vmatprep.mubr.bf16.mxu0 %v7496_v42 }
 0x9cc   : > { %v4207_v29 = vpop.permute.xlu0 %4206 }
 0x9cd   : > { %v4205_v44 = vpop.permute.xlu1 %4204  ;;  %4598 = vrot.lane.b32.xlu1 %v4188_v57, %s12089_s26 }
 0x9ce   : > { %4602 = vrot.lane.b32.xlu0 %v4185_v38, %s12089_s26  ;;  %v4210_v56 = vsel %vm618_vm1, %v10784_v22, %v4205_v44  ;;  %v4266_v22 = vsel %vm998_vm11, %v4255_v54, %v10818_v58  ;;  %v4211_v38 = vsel %vm618_vm1, %v4205_v44, %v4207_v29 }
 0x9d0   : > { %v4241_v43 = vpop.permute.xlu0 %4240 }
 0x9d1   : > { %v4239_v31 = vpop.permute.xlu1 %4238  ;;  %4610 = vrot.lane.b32.xlu1 %v4210_v56, %s12089_s26 }
 0x9d2   : > { %4614 = vrot.lane.b32.xlu0 %v4207_v29, %s12089_s26 }
 0x9d4   : > { %v4263_v9 = vpop.permute.xlu0 %4262 }
 0x9d5   : > { %v4261_v16 = vpop.permute.xlu1 %4260  ;;  %4588 = vrot.lane.b32.xlu1 %v4167_v34, %s12089_s26  ;;  %v4269_v37 = vsel %vm998_vm11, %v4263_v9, %v10792_v10 }
 0x9d6   : > { %4628 = vrot.lane.b32.xlu0 %v4233_v47, %s12089_s26 }
 0x9d8   : > { %v4285_v1 = vpop.permute.xlu0 %4284 }
 0x9d9   : > { %v4283_v53 = vpop.permute.xlu1 %4282  ;;  %4632 = vrot.lane.b32.xlu1 %v4245_v33, %s12089_s26  ;;  %v4291_v10 = vsel %vm1021_vm12, %v4285_v1, %v10796_v40 }
 0x9da   : > { %4642 = vrot.lane.b32.xlu0 %v4266_v22, %s12089_s26  ;;  %v4290_v4 = vsel %vm1021_vm12, %v4283_v53, %v4285_v1 }
 0x9dc   : > { %v4579_v30 = vpop.permute.xlu0 %4578 }
 0x9dd   : > { %v4577_v45 = vpop.permute.xlu1 %4576  ;;  %4600 = vrot.lane.b32.xlu1 %v4189_v52, %s12089_s26 }
 0x9de   : > { %4640 = vrot.lane.b32.xlu0 %v4255_v54, %s12089_s26  ;;  %v4679_v47 = vsel %vm850_vm8, %v4577_v45, %v4579_v30  ;;  %v4678_v20 = vsel %vm850_vm8, %v10798_v36, %v4577_v45  ;;  %v4247_v54 = vsel %vm975_vm10, %v4241_v43, %v10788_v59  ;;  %v4267_v36 = vsel %vm998_vm11, %v10818_v58, %v10790_v50 }
 0x9df   : > { %4774 = vmatprep.subr.bf16.mxu0 %v4679_v47  ;;  %v4289_v59 = vsel %vm1021_vm12, %v10822_v17, %v10794_v3  ;;  %v4246_v50 = vsel %vm975_vm10, %v4239_v31, %v4241_v43  ;;  %v4268_v3 = vsel %vm998_vm11, %v4261_v16, %v4263_v9 }
 0x9e0   : > { %4775 = vmatpush1.bf16.msra.mxu0 %v4678_v20 }
 0x9e1   : > { %4634 = vrot.lane.b32.xlu1 %v4239_v31, %s12089_s26 }
 0x9e2   : > { %4654 = vrot.lane.b32.xlu0 %v4288_v39, %s12089_s26 }
 0x9e5   : > { %4612 = vrot.lane.b32.xlu1 %v4211_v38, %s12089_s26 }
 0x9e6   : > { %4638 = vrot.lane.b32.xlu0 %v4247_v54, %s12089_s26 }
 0x9e9   : > { %4644 = vrot.lane.b32.xlu1 %v4267_v36, %s12089_s26 }
 0x9ea   : > { %4652 = vrot.lane.b32.xlu0 %v10815_v63, %s12089_s26 }
 0x9ed   : > { %4646 = vrot.lane.b32.xlu1 %v4261_v16, %s12089_s26 }
 0x9ee   : > { %4650 = vrot.lane.b32.xlu0 %v4269_v37, %s12089_s26 }
 0x9f1   : > { %4656 = vrot.lane.b32.xlu1 %v4289_v59, %s12089_s26 }
 0x9f2   : > { %4300 = vrot.lane.b32.xlu0 %v4141_v13, %s12083_s29 }
 0x9f5   : > { %4636 = vrot.lane.b32.xlu1 %v4246_v50, %s12089_s26 }
 0x9f6   : > { %4662 = vrot.lane.b32.xlu0 %v4291_v10, %s12089_s26 }
 0x9f9   : > { %4298 = vrot.lane.b32.xlu1 %v4140_v24, %s12083_s29 }
 0x9fa   : > { %4658 = vrot.lane.b32.xlu0 %v4283_v53, %s12089_s26 }
 0x9fd   : > { %4648 = vrot.lane.b32.xlu1 %v4268_v3, %s12089_s26 }
 0x9fe   : > { %4306 = vrot.lane.b32.xlu0 %v4144_v23, %s12083_s29 }
 0xa01   : > { %4302 = vrot.lane.b32.xlu1 %v12084_v49, %s12083_s29 }
 0xa05   : > { %4660 = vrot.lane.b32.xlu1 %v4290_v4, %s12089_s26 }
 0xa09   : > { %4304 = vrot.lane.b32.xlu1 %v4143_v32, %s12083_s29 }
 0xa0d   : > { %4308 = vrot.lane.b32.xlu1 %v12084_v49, %s12083_s29 }
 0xa13   : > { %v10914_v8 = vpop.permute.xlu0 %4616 }
 0xa14   : > { %v4621_v0 = vpop.permute.xlu1 %4620 }
 0xa17   : > { %v4619_v5 = vpop.permute.xlu0 %4618 }
 0xa1b   : > { %v4581_v25 = vpop.permute.xlu0 %4580 }
 0xa1c   : > { %v4585_v13 = vpop.permute.xlu1 %4584 }
 0xa1f   : > { %v4593_v46 = vpop.permute.xlu0 %4592 }
 0xa20   : > { %v4597_v58 = vpop.permute.xlu1 %4596 }
 0xa23   : > { %v4605_v24 = vpop.permute.xlu0 %4604 }
 0xa24   : > { %v4609_v12 = vpop.permute.xlu1 %4608 }
 0xa27   : > { %v4583_v23 = vpop.permute.xlu0 %4582 }
 0xa28   : > { %v4681_v40 = vsel %vm850_vm8, %v4583_v23, %v4585_v13  ;;  %v4680_v63 = vsel %vm850_vm8, %v4581_v25, %v4583_v23  ;;  %v4693_v25 = vsel %vm850_vm8, %v4619_v5, %v4621_v0  ;;  %v4692_v23 = vsel %vm850_vm8, %v10914_v8, %v4619_v5 }
 0xa29   : > { %4776 = vmatprep.subr.bf16.mxu0 %v4681_v40 }
 0xa2a   : > { %4777 = vmatpush1.bf16.msra.mxu0 %v4680_v63 }
 0xa2b   : > { %v4595_v35 = vpop.permute.xlu0 %4594 }
 0xa2c   : > { %v4685_v22 = vsel %vm850_vm8, %v4595_v35, %v4597_v58  ;;  %v4684_v45 = vsel %vm850_vm8, %v4593_v46, %v4595_v35 }
 0xa2f   : > { %v4607_v32 = vpop.permute.xlu0 %4606 }
 0xa30   : > { %v4689_v54 = vsel %vm850_vm8, %v4607_v32, %v4609_v12  ;;  %v4688_v59 = vsel %vm850_vm8, %v4605_v24, %v4607_v32 }
 0xa33   : > { %v4623_v17 = vpop.permute.xlu1 %4622 }
 0xa34   : > { %v4627_v48 = vpop.permute.xlu0 %4626 }
 0xa37   : > { %v4625_v29 = vpop.permute.xlu1 %4624 }
 0xa38   : > { %v4591_v57 = vpop.permute.xlu0 %4590  ;;  %v4695_v24 = vsel %vm850_vm8, %v4625_v29, %v4627_v48  ;;  %v4694_v63 = vsel %vm850_vm8, %v4623_v17, %v4625_v29 }
 0xa3b   : > { %v4587_v44 = vpop.permute.xlu1 %4586 }
 0xa3c   : > { %v4631_v43 = vpop.permute.xlu0 %4630 }
 0xa3f   : > { %v4599_v56 = vpop.permute.xlu1 %4598 }
 0xa40   : > { %v4603_v31 = vpop.permute.xlu0 %4602 }
 0xa43   : > { %v4611_v9 = vpop.permute.xlu1 %4610 }
 0xa44   : > { %v4615_v34 = vpop.permute.xlu0 %4614 }
 0xa47   : > { %v4589_v16 = vpop.permute.xlu1 %4588 }
 0xa48   : > { %v4629_v1 = vpop.permute.xlu0 %4628  ;;  %v4683_v33 = vsel %vm850_vm8, %v4589_v16, %v4591_v57  ;;  %v4682_v53 = vsel %vm850_vm8, %v4587_v44, %v4589_v16 }
 0xa49   : > { %4778 = vmatprep.subr.bf16.mxu0 %v4683_v33  ;;  %v4696_v0 = vsel %vm850_vm8, %v4629_v1, %v4631_v43 }
 0xa4a   : > { %4779 = vmatpush1.bf16.msra.mxu0 %v4682_v53 }
 0xa4b   : > { %v4633_v30 = vpop.permute.xlu1 %4632  ;;  %4780 = vmatprep.subr.bf16.mxu0 %v4685_v22 }
 0xa4c   : > { %v4643_v52 = vpop.permute.xlu0 %4642  ;;  %v4697_v58 = vsel %vm850_vm8, %v4631_v43, %v4633_v30 }
 0xa4e   : > { %4781 = vmatpush1.bf16.msra.mxu0 %v4684_v45  ;;  %v7497_v45 = vld [vmem:[%s11981_s6 + $0x1c] ss:$12 sps:$4 sm:$0xff]  }
 0xa4f   : > { %v4601_v47 = vpop.permute.xlu1 %4600 }
 0xa50   : > { %v4641_v20 = vpop.permute.xlu0 %4640  ;;  %v4687_v39 = vsel %vm850_vm8, %v4601_v47, %v4603_v31  ;;  %v4686_v38 = vsel %vm850_vm8, %v4599_v56, %v4601_v47 }
 0xa51   : > { %4782 = vmatprep.subr.bf16.mxu0 %v4687_v39  ;;  %v4700_v57 = vsel %vm850_vm8, %v4641_v20, %v4643_v52 }
 0xa52   : > { %4783 = vmatpush1.bf16.msra.mxu0 %v4686_v38 }
 0xa53   : > { %v4635_v36 = vpop.permute.xlu1 %4634  ;;  %4784 = vmatprep.subr.bf16.mxu0 %v4689_v54 }
 0xa54   : > { %v4655_v37 = vpop.permute.xlu0 %4654 }
 0xa56   : > { %4785 = vmatpush1.bf16.msra.mxu0 %v4688_v59  ;;  %v7499_v59 = vld [vmem:[%s11981_s6 + $0x18] ss:$12 sps:$4 sm:$0xff]  }
 0xa57   : > { %v4613_v50 = vpop.permute.xlu1 %4612 }
 0xa58   : > { %v4639_v10 = vpop.permute.xlu0 %4638  ;;  %v4691_v3 = vsel %vm850_vm8, %v4613_v50, %v4615_v34  ;;  %v4690_v4 = vsel %vm850_vm8, %v4611_v9, %v4613_v50  ;;  %v7500_v50 = vld [vmem:[%s11981_s6 + $0x34] ss:$12 sps:$4 sm:$0xff]  }
 0xa59   : > { %4786 = vmatprep.subr.bf16.mxu0 %v4691_v3  ;;  %v4351_v3 = vld [vmem:[%s11982_s7 + $0x28] sm:$0xff] }
 0xa5a   : > { %4787 = vmatpush1.bf16.msra.mxu0 %v4690_v4  ;;  %v4348_v4 = vld [vmem:[%s11982_s7 + $0x10] sm:$0xff] }
 0xa5b   : > { %v4645_v46 = vpop.permute.xlu1 %4644  ;;  %4788 = vmatprep.subr.bf16.mxu0 %v4693_v25  ;;  %v4349_v25 = vld [vmem:[%s11982_s7 + $0x18] sm:$0xff] }
 0xa5c   : > { %v4653_v13 = vpop.permute.xlu0 %4652  ;;  %v4701_v48 = vsel %vm850_vm8, %v4643_v52, %v4645_v46  ;;  %v7494_v52 = vld [vmem:[%s11981_s6] ss:$12 sps:$4 sm:$0xff]   ;;  %v7502_v46 = vld [vmem:[%s11981_s6 + $0x30] ss:$12 sps:$4 sm:$0xff]  }
 0xa5d   : > { %v4704_v1 = vsel %vm850_vm8, %v4653_v13, %v4655_v37  ;;  %v7503_v13 = vld [vmem:[%s11981_s6 + $0x4c] ss:$12 sps:$4 sm:$0xff]  }
 0xa5e   : > { %4789 = vmatpush1.bf16.msra.mxu0 %v4692_v23  ;;  %v4352_v23 = vld [vmem:[%s11982_s7 + $0x30] sm:$0xff] }
 0xa5f   : > { %v4647_v40 = vpop.permute.xlu1 %4646  ;;  %4790 = vmatprep.subr.bf16.mxu0 %v4695_v24  ;;  %v4353_v24 = vld [vmem:[%s11982_s7 + $0x38] sm:$0xff] }
 0xa60   : > { %v4651_v35 = vpop.permute.xlu0 %4650 }
 0xa62   : > { %4791 = vmatpush1.bf16.msra.mxu0 %v4694_v63  ;;  %v4355_v63 = vld [vmem:[%s11982_s7 + $0x48] sm:$0xff] }
 0xa63   : > { %v4657_v12 = vpop.permute.xlu1 %4656  ;;  %4792 = vmatprep.subr.bf16.mxu0 %v4697_v58  ;;  %v7505_v58 = vld [vmem:[%s11981_s6 + $0x48] ss:$12 sps:$4 sm:$0xff]  }
 0xa64   : > { %v4301_v5 = vpop.permute.xlu0 %4300  ;;  %v4705_v9 = vsel %vm850_vm8, %v4655_v37, %v4657_v12  ;;  %v4347_v37 = vld [vmem:[%s11982_s7 + $0x8] sm:$0xff]  ;;  %v4358_v12 = vld [vmem:[%s11982_s7 + $0x60] sm:$0xff] }
 0xa66   : > { %4793 = vmatpush1.bf16.msra.mxu0 %v4696_v0  ;;  %v4359_v0 = vld [vmem:[%s11982_s7 + $0x68] sm:$0xff] }
 0xa67   : > { %v4637_v32 = vpop.permute.xlu1 %4636 }
 0xa68   : > { %v4699_v42 = vsel %vm850_vm8, %v4637_v32, %v4639_v10  ;;  %v4698_v8 = vsel %vm850_vm8, %v4635_v36, %v4637_v32  ;;  %v4663_v44 = vpop.permute.xlu0 %4662  ;;  %v4346_v36 = vld [vmem:[%s11982_s7] sm:$0xff]  ;;  %v4356_v32 = vld [vmem:[%s11982_s7 + $0x50] sm:$0xff] }
 0xa69   : > { %4794 = vmatprep.subr.bf16.mxu0 %v4699_v42  ;;  %v4350_v10 = vld [vmem:[%s11982_s7 + $0x20] sm:$0xff]  ;;  %v4357_v42 = vld [vmem:[%s11982_s7 + $0x58] sm:$0xff] }
 0xa6a   : > { %4795 = vmatpush1.bf16.msra.mxu0 %v4698_v8  ;;  %v7508_v8 = vld [vmem:[%s11981_s6 + $0x60] ss:$12 sps:$4 sm:$0xff]  }
 0xa6b   : > { %v4299_v17 = vpop.permute.xlu1 %4298  ;;  %4796 = vmatprep.subr.bf16.mxu0 %v4701_v48  ;;  %v4360_v48 = vld [vmem:[%s11982_s7 + $0x70] sm:$0xff] }
 0xa6c   : > { %v4310_v29 = vsel %vm1044_vm13, %v4299_v17, %v4301_v5  ;;  %v4659_v33 = vpop.permute.xlu0 %4658 }
 0xa6d   : > { %4666 = vrot.lane.b32.xlu0 %v4310_v29, %s12089_s26  ;;  %v7511_v29 = vld [vmem:[%s11981_s6 + $0x78] ss:$12 sps:$4 sm:$0xff]  }
 0xa6e   : > { %4797 = vmatpush1.bf16.msra.mxu0 %v4700_v57  ;;  %v7512_v57 = vld [vmem:[%s11981_s6 + $0x94] ss:$12 sps:$4 sm:$0xff]  }
 0xa6f   : > { %v4649_v43 = vpop.permute.xlu1 %4648 }
 0xa70   : > { %v4703_v56 = vsel %vm850_vm8, %v4649_v43, %v4651_v35  ;;  %v4702_v31 = vsel %vm850_vm8, %v4647_v40, %v4649_v43  ;;  %v4307_v47 = vpop.permute.xlu0 %4306  ;;  %v4354_v40 = vld [vmem:[%s11982_s7 + $0x40] sm:$0xff]  ;;  %v7515_v43 = vld [vmem:[%s11981_s6 + $0xac] ss:$12 sps:$4 sm:$0xff]  }
 0xa71   : > { %4798 = vmatprep.subr.bf16.mxu0 %v4703_v56  ;;  %4664 = vrot.lane.b32.xlu0 %v4299_v17, %s12089_s26  ;;  %v7506_v35 = vld [vmem:[%s11981_s6 + $0x64] ss:$12 sps:$4 sm:$0xff]   ;;  %v4361_v17 = vld [vmem:[%s11982_s7 + $0x78] sm:$0xff] }
 0xa72   : > { %4799 = vmatpush1.bf16.msra.mxu0 %v4702_v31 }
 0xa73   : > { %v4303_v34 = vpop.permute.xlu1 %4302  ;;  %4800 = vmatprep.subr.bf16.mxu0 %v4705_v9 }
 0xa74   : > { %v4311_v16 = vsel %vm1044_vm13, %v4301_v5, %v4303_v34  ;;  %v7509_v5 = vld [vmem:[%s11981_s6 + $0x7c] ss:$12 sps:$4 sm:$0xff]  }
 0xa75   : > { %4668 = vrot.lane.b32.xlu1 %v4311_v16, %s12089_s26 }
 0xa76   : > { %4801 = vmatpush1.bf16.msra.mxu0 %v4704_v1  ;;  %v7519_v1 = vld [vmem:[%s11981_s6 + $0x20] ss:$12 sps:$4 sm:$0xff]  }
 0xa77   : > { %v4661_v53 = vpop.permute.xlu1 %4660 }
 0xa78   : > { %v4707_v22 = vsel %vm850_vm8, %v4661_v53, %v4663_v44  ;;  %v4706_v30 = vsel %vm850_vm8, %v4659_v33, %v4661_v53  ;;  %v7514_v44 = vld [vmem:[%s11981_s6 + $0x90] ss:$12 sps:$4 sm:$0xff]   ;;  %v7520_v33 = vld [vmem:[%s11981_s6 + $0x38] ss:$12 sps:$4 sm:$0xff]  }
 0xa79   : > { %4802 = vmatprep.subr.bf16.mxu0 %v4707_v22  ;;  %v7521_v53 = vld [vmem:[%s11981_s6 + $0x50] ss:$12 sps:$4 sm:$0xff]   ;;  %v7522_v22 = vld [vmem:[%s11981_s6 + $0x68] ss:$12 sps:$4 sm:$0xff]  }
 0xa7a   : > { %4803 = vmatpush1.bf16.msra.mxu0 %v4706_v30  ;;  %v7523_v30 = vld [vmem:[%s11981_s6 + $0x80] ss:$12 sps:$4 sm:$0xff]  }
 0xa7b   : > { %v4305_v20 = vpop.permute.xlu1 %4304 }
 0xa7c   : > { %v4312_v39 = vsel %vm1044_vm13, %v4305_v20, %v4307_v47 }
 0xa7d   : > { %4672 = vrot.lane.b32.xlu1 %v4312_v39, %s12089_s26  ;;  %4805 = vmatmul.mubr.bf16.vlgmr.msra.gmra.mrb[56].mxu0 %v7494_v52  ;;  %v7524_v52 = vld [vmem:[%s11981_s6 + $0x98] ss:$12 sps:$4 sm:$0xff]  }
 0xa7e   : > { %4814 = vmatprep.mubr.bf16.mxu0 %v7497_v45  ;;  %v7525_v45 = vld [vmem:[%s11981_s6 + $0xb0] ss:$12 sps:$4 sm:$0xff]  }
 0xa7f   : > { %v4309_v38 = vpop.permute.xlu1 %4308 }
 0xa80   : > { %v4313_v54 = vsel %vm1044_vm13, %v4307_v47, %v4309_v38 }
 0xa81   : > { %4674 = vrot.lane.b32.xlu0 %v4313_v54, %s12089_s26  ;;  %4670 = vrot.lane.b32.xlu1 %v4305_v20, %s12089_s26 }
 0xa85   : > { %4364 = vperm.xlu0 %7404, %v4346_v36   ;;  %4369 = vperm.xlu1 %7405, %v4347_v37  }
 0xa86   : > { %4815 = vmatmul.mubr.bf16.gmra.mrb[60].mxu0 %v7499_v59 }
 0xa87   : > { %4824 = vmatprep.mubr.bf16.mxu0 %v7500_v50 }
 0xa89   : > { %4384 = vperm.xlu0 %7404, %v4350_v10   ;;  %4389 = vperm.xlu1 %7405, %v4351_v3  }
 0xa8d   : > { %4374 = vperm.xlu0 %7404, %v4348_v4   ;;  %4379 = vperm.xlu1 %7405, %v4349_v25  }
 0xa8e   : > { %4825 = vmatmul.mubr.bf16.gmra.mrb[64].mxu0 %v7502_v46 }
 0xa8f   : > { %4834 = vmatprep.mubr.bf16.mxu0 %v7503_v13 }
 0xa91   : > { %4394 = vperm.xlu0 %7404, %v4352_v23   ;;  %4399 = vperm.xlu1 %7405, %v4353_v24  }
 0xa95   : > { %4404 = vperm.xlu0 %7404, %v4354_v40   ;;  %4409 = vperm.xlu1 %7405, %v4355_v63  }
 0xa96   : > { %4835 = vmatmul.mubr.bf16.gmra.mrb[68].mxu0 %v7505_v58 }
 0xa97   : > { %4844 = vmatprep.mubr.bf16.mxu0 %v7506_v35 }
 0xa99   : > { %4424 = vperm.xlu0 %7404, %v4358_v12   ;;  %4429 = vperm.xlu1 %7405, %v4359_v0  }
 0xa9d   : > { %4414 = vperm.xlu0 %7404, %v4356_v32   ;;  %4419 = vperm.xlu1 %7405, %v4357_v42  }
 0xa9e   : > { %4845 = vmatmul.mubr.bf16.gmra.mrb[72].mxu0 %v7508_v8 }
 0xa9f   : > { %4854 = vmatprep.mubr.bf16.mxu0 %v7509_v5 }
 0xaa1   : > { %4434 = vperm.xlu0 %7404, %v4360_v48   ;;  %4439 = vperm.xlu1 %7405, %v4361_v17  }
 0xaa5   : > { %5376 = vrot.lane.b32.xlu0 %v8309_v51, %s12109_s12  ;;  %5382 = vrot.lane.b32.xlu1 %v8309_v51, %s12109_s12  ;;  %v7517_v51 = vld [vmem:[%s11981_s6 + $0xa8] ss:$12 sps:$4 sm:$0xff]  }
 0xaa6   : > { %4855 = vmatmul.mubr.bf16.gmra.mrb[76].mxu0 %v7511_v29 }
 0xaa7   : > { %4864 = vmatprep.mubr.bf16.mxu0 %v7512_v57 }
 0xaa9   : > { %5398 = vrot.lane.b32.xlu0 %v8317_v55, %s12099_s23  ;;  %5404 = vrot.lane.b32.xlu1 %v8317_v55, %s12099_s23 }
 0xaad   : > { %5420 = vrot.lane.b32.xlu0 %v8323_v60, %s12085_s16  ;;  %5426 = vrot.lane.b32.xlu1 %v8323_v60, %s12085_s16 }
 0xaae   : > { %4865 = vmatmul.mubr.bf16.gmra.mrb[80].mxu0 %v7514_v44 }
 0xaaf   : > { %4874 = vmatprep.mubr.bf16.mxu0 %v7515_v43 }
 0xab1   : > { %5460 = vrot.lane.b32.xlu0 %v8327_v62, %s12086_s18  ;;  %5466 = vrot.lane.b32.xlu1 %v8327_v62, %s12086_s18 }
 0xab5   : > { %5482 = vrot.lane.b32.xlu0 %v8335_v2, %s12087_s19  ;;  %5488 = vrot.lane.b32.xlu1 %v8335_v2, %s12087_s19 }
 0xab6   : > { %4875 = vmatmul.mubr.bf16.gmra.mrb[84].mxu0 %v7517_v51 }
 0xab7   : > { %4917 = vmatprep.mubr.bf16.mxu0 %v12074_v18 }
 0xab9   : > { %5504 = vrot.lane.b32.xlu0 %v8343_v7, %s12088_s11  ;;  %5510 = vrot.lane.b32.xlu1 %v8343_v7, %s12088_s11 }
 0xabd   : > { %5792 = vrot.lane.b32.xlu0 %v8359_v14, %s12089_s26  ;;  %5798 = vrot.lane.b32.xlu1 %v8359_v14, %s12089_s26  ;;  %v7518_v14 = vld [vmem:[%s11981_s6 + $0x8] ss:$12 sps:$4 sm:$0xff]  }
 0xadf   : > { %v4667_v55 = vpop.permute.xlu0 %4666 }
 0xae3   : > { %v4665_v60 = vpop.permute.xlu0 %4664 }
 0xae4   : > { %v4708_v56 = vsel %vm850_vm8, %v4665_v60, %v4667_v55 }
 0xae7   : > { %v4669_v62 = vpop.permute.xlu1 %4668 }
 0xae8   : > { %v4709_v2 = vsel %vm850_vm8, %v4667_v55, %v4669_v62 }
 0xae9   : > { %4885 = vmatprep.subr.bf16.mxu0 %v4709_v2 }
 0xaea   : > { %4886 = vmatpush1.bf16.msra.mxu0 %v4708_v56 }
 0xaef   : > { %v4673_v31 = vpop.permute.xlu1 %4672 }
 0xaf3   : > { %v4671_v9 = vpop.permute.xlu1 %4670  ;;  %v4675_v34 = vpop.permute.xlu0 %4674 }
 0xaf4   : > { %v4710_v7 = vsel %vm850_vm8, %v4671_v9, %v4673_v31  ;;  %v4711_v16 = vsel %vm850_vm8, %v4673_v31, %v4675_v34 }
 0xaf5   : > { %4887 = vmatprep.subr.bf16.mxu0 %v4711_v16 }
 0xaf6   : > { %4888 = vmatpush1.bf16.msra.mxu0 %v4710_v7 }
 0xaf9   : > { %6947 = vmatmul.mubr.msk.bf16.vlgmr.msra.gmra.mrb[56].mxu0 %vm489_vm0, %v7518_v14 }
 0xafa   : > { %4927 = vmatprep.mubr.bf16.mxu0 %v12074_v18 }
 0xb01   : > { %6948 = vmatmul.mubr.msk.bf16.gmra.mrb[60].mxu0 %vm489_vm0, %v7519_v1 }
 0xb02   : > { %4937 = vmatprep.mubr.bf16.mxu0 %v12074_v18 }
 0xb04   : > { %v4365_v47 = vpop.permute.xlu0 %4364  ;;  %v4370_v20 = vpop.permute.xlu1 %4369 }
 0xb08   : > { %v4385_v36 = vpop.permute.xlu0 %4384  ;;  %v4390_v4 = vpop.permute.xlu1 %4389 }
 0xb09   : > { %6949 = vmatmul.mubr.msk.bf16.gmra.mrb[64].mxu0 %vm489_vm0, %v7520_v33 }
 0xb0a   : > { %4947 = vmatprep.mubr.bf16.mxu0 %v12074_v18 }
 0xb0c   : > { %v4375_v24 = vpop.permute.xlu0 %4374  ;;  %v4380_v35 = vpop.permute.xlu1 %4379 }
 0xb11   : > { %6950 = vmatmul.mubr.msk.bf16.gmra.mrb[68].mxu0 %vm489_vm0, %v7521_v53 }
 0xb12   : > { %4957 = vmatprep.mubr.bf16.mxu0 %v12074_v18 }
 0xb19   : > { %6951 = vmatmul.mubr.msk.bf16.gmra.mrb[72].mxu0 %vm489_vm0, %v7522_v22 }
 0xb1a   : > { %4967 = vmatprep.mubr.bf16.mxu0 %v12074_v18 }
 0xb21   : > { %6952 = vmatmul.mubr.msk.bf16.gmra.mrb[76].mxu0 %vm489_vm0, %v7523_v30 }
 0xb22   : > { %4977 = vmatprep.mubr.bf16.mxu0 %v12074_v18 }
 0xb29   : > { %6953 = vmatmul.mubr.msk.bf16.gmra.mrb[80].mxu0 %vm489_vm0, %v7524_v52 }
 0xb2a   : > { %4987 = vmatprep.mubr.bf16.mxu0 %v12074_v18 }
 0xb31   : > { %6954 = vmatmul.mubr.msk.bf16.gmra.mrb[84].mxu0 %vm489_vm0, %v7525_v45 }
 0xbcc   : > { %v4919_v39 = vpop.f32.mrb[56].mxu0 }
 0xbcd   : > { %v7174_v38 = vadd.f32 %v4919_v39, %v4365_v47  ;;  %v4921_v54 = vpop.f32.mrb[57].mxu0 }
 0xbce   : > { %v7175_v37 = vadd.f32 %v4921_v54, %v4365_v47  ;;  %v4923_v59 = vpop.f32.mrb[58].mxu0  ;;  %v4395_v47 = vpop.permute.xlu0 %4394 }
 0xbcf   : > { %v6955_v50 = vmul.f32 -1.442695, %v7174_v38  ;;  %v7176_v10 = vadd.f32 %v4923_v59, %v4370_v20  ;;  %v4925_v3 = vpop.f32.mrb[59].mxu0  ;;  %v4400_v59 = vpop.permute.xlu1 %4399 }
 0xbd0   : > { %v6956_v25 = vmul.f32 -1.442695, %v7175_v37  ;;  %v7177_v46 = vadd.f32 %v4925_v3, %v4370_v20 }
 0xbd1   : > { %7816 = vpow2.f32 %v6955_v50  ;;  %v6957_v13 = vmul.f32 -1.442695, %v7176_v10 }
 0xbd2   : > { %7818 = vpow2.f32 %v6956_v25  ;;  %v6958_v23 = vmul.f32 -1.442695, %v7177_v46 }
 0xbd3   : > { %7820 = vpow2.f32 %v6957_v13 }
 0xbd4   : > { %v4929_v40 = vpop.f32.mrb[60].mxu0  ;;  %7822 = vpow2.f32 %v6958_v23 }
 0xbd5   : > { %v7178_v63 = vadd.f32 %v4929_v40, %v4375_v24  ;;  %v4931_v58 = vpop.f32.mrb[61].mxu0 }
 0xbd6   : > { %v7179_v12 = vadd.f32 %v4931_v58, %v4375_v24  ;;  %v4933_v0 = vpop.f32.mrb[62].mxu0 }
 0xbd7   : > { %v6959_v32 = vmul.f32 -1.442695, %v7178_v63  ;;  %v7180_v42 = vadd.f32 %v4933_v0, %v4380_v35  ;;  %v4935_v8 = vpop.f32.mrb[63].mxu0 }
 0xbd8   : > { %v6960_v5 = vmul.f32 -1.442695, %v7179_v12  ;;  %v7181_v48 = vadd.f32 %v4935_v8, %v4380_v35  ;;  %v4405_v35 = vpop.permute.xlu0 %4404  ;;  %v4410_v8 = vpop.permute.xlu1 %4409 }
 0xbd9   : > { %7824 = vpow2.f32 %v6959_v32  ;;  %v6961_v17 = vmul.f32 -1.442695, %v7180_v42 }
 0xbda   : > { %7826 = vpow2.f32 %v6960_v5  ;;  %v6962_v29 = vmul.f32 -1.442695, %v7181_v48 }
 0xbdb   : > { %v7817_v57 = vpop.eup %7816  ;;  %7828 = vpow2.f32 %v6961_v17 }
 0xbdc   : > { %v7819_v44 = vpop.eup %7818  ;;  %v5022_v43 = vadd.f32 1.0, %v7817_v57  ;;  %v4939_v51 = vpop.f32.mrb[64].mxu0  ;;  %7830 = vpow2.f32 %v6962_v29 }
 0xbdd   : > { %v7821_v55 = vpop.eup %7820  ;;  %v5023_v60 = vadd.f32 1.0, %v7819_v44  ;;  %v7182_v62 = vadd.f32 %v4939_v51, %v4385_v36  ;;  %v4941_v2 = vpop.f32.mrb[65].mxu0 }
 0xbde   : > { %v5024_v56 = vadd.f32 1.0, %v7821_v55  ;;  %v7183_v31 = vadd.f32 %v4941_v2, %v4385_v36  ;;  %v4943_v9 = vpop.f32.mrb[66].mxu0  ;;  %v7823_v34 = vpop.eup %7822  ;;  %7832 = vrcp.f32 %v5022_v43 }
 0xbdf   : > { %v6963_v7 = vmul.f32 -1.442695, %v7182_v62  ;;  %v7184_v16 = vadd.f32 %v4943_v9, %v4390_v4  ;;  %v4945_v14 = vpop.f32.mrb[67].mxu0  ;;  %7834 = vrcp.f32 %v5023_v60  ;;  %v5025_v22 = vadd.f32 1.0, %v7823_v34 }
 0xbe0   : > { %v6964_v1 = vmul.f32 -1.442695, %v7183_v31  ;;  %v7185_v33 = vadd.f32 %v4945_v14, %v4390_v4  ;;  %7836 = vrcp.f32 %v5024_v56  ;;  %v4425_v56 = vpop.permute.xlu0 %4424  ;;  %v4430_v14 = vpop.permute.xlu1 %4429 }
 0xbe1   : > { %v6965_v53 = vmul.f32 -1.442695, %v7184_v16  ;;  %7838 = vpow2.f32 %v6963_v7 }
 0xbe2   : > { %v6966_v30 = vmul.f32 -1.442695, %v7185_v33  ;;  %7840 = vpow2.f32 %v6964_v1 }
 0xbe3   : > { %v7825_v52 = vpop.eup %7824  ;;  %7842 = vpow2.f32 %v6965_v53 }
 0xbe4   : > { %v7827_v45 = vpop.eup %7826  ;;  %v5026_v20 = vadd.f32 1.0, %v7825_v52  ;;  %v4949_v39 = vpop.f32.mrb[68].mxu0  ;;  %7844 = vpow2.f32 %v6966_v30 }
 0xbe5   : > { %v7829_v38 = vpop.eup %7828  ;;  %v5027_v54 = vadd.f32 1.0, %v7827_v45  ;;  %v7186_v36 = vadd.f32 %v4949_v39, %v4395_v47  ;;  %v4951_v37 = vpop.f32.mrb[69].mxu0  ;;  %7846 = vrcp.f32 %v5025_v22 }
 0xbe6   : > { %v5028_v50 = vadd.f32 1.0, %v7829_v38  ;;  %v7187_v10 = vadd.f32 %v4951_v37, %v4395_v47  ;;  %v4953_v3 = vpop.f32.mrb[70].mxu0  ;;  %v7831_v4 = vpop.eup %7830  ;;  %7848 = vrcp.f32 %v5026_v20 }
 0xbe7   : > { %v6967_v25 = vmul.f32 -1.442695, %v7186_v36  ;;  %v7188_v46 = vadd.f32 %v4953_v3, %v4400_v59  ;;  %v4955_v13 = vpop.f32.mrb[71].mxu0  ;;  %7850 = vrcp.f32 %v5027_v54  ;;  %v5029_v12 = vadd.f32 1.0, %v7831_v4  ;;  %v4415_v20 = vpop.permute.xlu0 %4414 }
 0xbe8   : > { %v6968_v23 = vmul.f32 -1.442695, %v7187_v10  ;;  %v7189_v24 = vadd.f32 %v4955_v13, %v4400_v59  ;;  %v11123_v40 = vpop.eup %7832  ;;  %7852 = vrcp.f32 %v5028_v50  ;;  %v4420_v10 = vpop.permute.xlu1 %4419 }
 0xbe9   : > { %v6969_v63 = vmul.f32 -1.442695, %v7188_v46  ;;  %v11125_v58 = vpop.eup %7834  ;;  %7854 = vpow2.f32 %v6967_v25 }
 0xbea   : > { %v6970_v0 = vmul.f32 -1.442695, %v7189_v24  ;;  %v11127_v32 = vpop.eup %7836  ;;  %7856 = vpow2.f32 %v6968_v23 }
 0xbeb   : > { %v7839_v42 = vpop.eup %7838  ;;  %7858 = vpow2.f32 %v6969_v63 }
 0xbec   : > { %v4959_v5 = vpop.f32.mrb[72].mxu0  ;;  %v7841_v48 = vpop.eup %7840  ;;  %v5070_v17 = vadd.f32 1.0, %v7839_v42  ;;  %7860 = vpow2.f32 %v6970_v0 }
 0xbed   : > { %v4961_v29 = vpop.f32.mrb[73].mxu0  ;;  %v7843_v57 = vpop.eup %7842  ;;  %7862 = vrcp.f32 %v5029_v12  ;;  %v5071_v44 = vadd.f32 1.0, %v7841_v48  ;;  %v7190_v60 = vadd.f32 %v4959_v5, %v4405_v35 }
 0xbee   : > { %v4963_v43 = vpop.f32.mrb[74].mxu0  ;;  %v7845_v51 = vpop.eup %7844  ;;  %7864 = vrcp.f32 %v5070_v17  ;;  %v5072_v55 = vadd.f32 1.0, %v7843_v57  ;;  %v7191_v9 = vadd.f32 %v4961_v29, %v4405_v35  ;;  %v12139_v17 = vld [vmem:[#allocation9_spill] sm:$0xff] }
 0xbef   : > { %v4965_v62 = vpop.f32.mrb[75].mxu0  ;;  %v11129_v2 = vpop.eup %7846  ;;  %7866 = vrcp.f32 %v5071_v44  ;;  %v5073_v31 = vadd.f32 1.0, %v7845_v51  ;;  %v7192_v7 = vadd.f32 %v4963_v43, %v4410_v8 }
 0xbf0   : > { %v11131_v34 = vpop.eup %7848  ;;  %7868 = vrcp.f32 %v5072_v55  ;;  %v7193_v1 = vadd.f32 %v4965_v62, %v4410_v8  ;;  %v12140_v55 = vld [vmem:[#allocation14_spill] sm:$0xff] }
 0xbf1   : > { %v11133_v16 = vpop.eup %7850  ;;  %7870 = vrcp.f32 %v5073_v31 }
 0xbf2   : > { %v11135_v33 = vpop.eup %7852  ;;  %7872 = vtanh.f32 %v7190_v60 }
 0xbf3   : > { %v7855_v53 = vpop.eup %7854  ;;  %7874 = vtanh.f32 %v7191_v9 }
 0xbf4   : > { %v4969_v22 = vpop.f32.mrb[76].mxu0  ;;  %v7857_v30 = vpop.eup %7856  ;;  %v5074_v52 = vadd.f32 1.0, %v7855_v53  ;;  %7876 = vtanh.f32 %v7192_v7 }
 0xbf5   : > { %v4971_v45 = vpop.f32.mrb[77].mxu0  ;;  %v7859_v47 = vpop.eup %7858  ;;  %v5075_v39 = vadd.f32 1.0, %v7857_v30  ;;  %7878 = vtanh.f32 %v7193_v1  ;;  %v7194_v37 = vadd.f32 %v4969_v22, %v4415_v20 }
 0xbf6   : > { %v4973_v38 = vpop.f32.mrb[78].mxu0  ;;  %v7861_v54 = vpop.eup %7860  ;;  %7880 = vrcp.f32 %v5074_v52  ;;  %v5076_v36 = vadd.f32 1.0, %v7859_v47  ;;  %v7195_v4 = vadd.f32 %v4971_v45, %v4415_v20 }
 0xbf7   : > { %v4975_v59 = vpop.f32.mrb[79].mxu0  ;;  %v11137_v50 = vpop.eup %7862  ;;  %7882 = vrcp.f32 %v5075_v39  ;;  %v5077_v3 = vadd.f32 1.0, %v7861_v54  ;;  %v7196_v46 = vadd.f32 %v4973_v38, %v4420_v10  ;;  %v12141_v54 = vld [vmem:[#allocation15_spill] sm:$0xff] }
 0xbf8   : > { %v7865_v25 = vpop.eup %7864  ;;  %7884 = vrcp.f32 %v5076_v36  ;;  %v7197_v23 = vadd.f32 %v4975_v59, %v4420_v10  ;;  %v4435_v38 = vpop.permute.xlu0 %4434  ;;  %v12142_v59 = vld [vmem:[#allocation16_spill] sm:$0xff] }
 0xbf9   : > { %v7867_v13 = vpop.eup %7866  ;;  %7886 = vrcp.f32 %v5077_v3  ;;  %v5150_v35 = vmul.f32 %v7865_v25, %v10450_v21  ;;  %v12143_v25 = vld [vmem:[#allocation17_spill] sm:$0xff] }
 0xbfa   : > { %v7869_v24 = vpop.eup %7868  ;;  %7888 = vtanh.f32 %v7194_v37  ;;  %v5151_v42 = vmul.f32 %v7867_v13, %v10453_v41  ;;  %v12144_v13 = vld [vmem:[#allocation18_spill] sm:$0xff] }
 0xbfb   : > { %v7871_v63 = vpop.eup %7870  ;;  %7890 = vtanh.f32 %v7195_v4  ;;  %v5152_v29 = vmul.f32 %v7869_v24, %v12139_v17 }
 0xbfc   : > { %v4979_v12 = vpop.f32.mrb[80].mxu0  ;;  %v7873_v0 = vpop.eup %7872  ;;  %7892 = vtanh.f32 %v7196_v46  ;;  %v5153_v60 = vmul.f32 %v7871_v63, %v12140_v55 }
 0xbfd   : > { %v7198_v8 = vadd.f32 %v4979_v12, %v4425_v56  ;;  %v4981_v5 = vpop.f32.mrb[81].mxu0  ;;  %v7875_v48 = vpop.eup %7874  ;;  %v5158_v57 = vmul.f32 %v7873_v0, %v11123_v40  ;;  %7894 = vtanh.f32 %v7197_v23 }
 0xbfe   : > { %v7199_v44 = vadd.f32 %v4981_v5, %v4425_v56  ;;  %v4983_v43 = vpop.f32.mrb[82].mxu0  ;;  %v7877_v51 = vpop.eup %7876  ;;  %v5159_v21 = vmul.f32 %v7875_v48, %v11125_v58 }
 0xbff   : > { %v6971_v62 = vmul.f32 -1.442695, %v7198_v8  ;;  %v7200_v31 = vadd.f32 %v4983_v43, %v4430_v14  ;;  %v4985_v9 = vpop.f32.mrb[83].mxu0  ;;  %v7879_v41 = vpop.eup %7878  ;;  %v11145_v7 = vadd.f32 %v5158_v57, %v5150_v35  ;;  %v5160_v1 = vmul.f32 %v7877_v51, %v11127_v32 }
 0xc00   : > { %v7201_v53 = vadd.f32 %v4985_v9, %v4430_v14  ;;  %v7881_v22 = vpop.eup %7880  ;;  %v11148_v30 = vadd.f32 %v5159_v21, %v5151_v42  ;;  %v5161_v40 = vmul.f32 %v7879_v41, %v11129_v2  ;;  %v6972_v45 = vmul.f32 -1.442695, %v7199_v44  ;;  %v4440_v12 = vpop.permute.xlu1 %4439 }
 0xc01   : > { %7896 = vpow2.f32 %v6971_v62  ;;  %v7883_v56 = vpop.eup %7882  ;;  %v11151_v52 = vadd.f32 %v5160_v1, %v5152_v29  ;;  %v6973_v20 = vmul.f32 -1.442695, %v7200_v31  ;;  %v5154_v36 = vmul.f32 %v7881_v22, %v12141_v54 }
 0xc02   : > { %v7885_v58 = vpop.eup %7884  ;;  %v11153_v47 = vadd.f32 %v5161_v40, %v5153_v60  ;;  %v6974_v32 = vmul.f32 -1.442695, %v7201_v53  ;;  %v5155_v10 = vmul.f32 %v7883_v56, %v12142_v59  ;;  %7898 = vpow2.f32 %v6972_v45 }
 0xc03   : > { %v7887_v39 = vpop.eup %7886  ;;  %v5156_v46 = vmul.f32 %v7885_v58, %v12143_v25  ;;  %7900 = vpow2.f32 %v6973_v20 }
 0xc04   : > { %v4989_v14 = vpop.f32.mrb[84].mxu0  ;;  %v7889_v37 = vpop.eup %7888  ;;  %v5157_v23 = vmul.f32 %v7887_v39, %v12144_v13  ;;  %7902 = vpow2.f32 %v6974_v32 }
 0xc05   : > { %v7202_v3 = vadd.f32 %v4989_v14, %v4435_v38  ;;  %v4991_v2 = vpop.f32.mrb[85].mxu0  ;;  %v7891_v4 = vpop.eup %7890  ;;  %v5162_v24 = vmul.f32 %v7889_v37, %v11131_v34 }
 0xc06   : > { %v4993_v63 = vpop.f32.mrb[86].mxu0  ;;  %v7893_v35 = vpop.eup %7892  ;;  %v5163_v0 = vmul.f32 %v7891_v4, %v11133_v16  ;;  %v7203_v8 = vadd.f32 %v4991_v2, %v4435_v38  ;;  %v12145_v2 = vld [vmem:[#allocation10_spill] sm:$0xff] }
 0xc07   : > { %v6975_v42 = vmul.f32 -1.442695, %v7202_v3  ;;  %v4995_v5 = vpop.f32.mrb[87].mxu0  ;;  %v7895_v48 = vpop.eup %7894  ;;  %v11161_v17 = vadd.f32 %v5162_v24, %v5154_v36  ;;  %v5164_v29 = vmul.f32 %v7893_v35, %v11135_v33  ;;  %v7204_v57 = vadd.f32 %v4993_v63, %v4440_v12 }
 0xc08   : > { %v11164_v44 = vadd.f32 %v5163_v0, %v5155_v10  ;;  %v5165_v34 = vmul.f32 %v7895_v48, %v11137_v50  ;;  %v7205_v16 = vadd.f32 %v4995_v5, %v4440_v12  ;;  %v6976_v60 = vmul.f32 -1.442695, %v7203_v8 }
 0xc09   : > { %7904 = vpow2.f32 %v6975_v42  ;;  %v11168_v43 = vadd.f32 %v5164_v29, %v5156_v46  ;;  %v6977_v21 = vmul.f32 -1.442695, %v7204_v57  ;;  %v12146_v46 = vld [vmem:[#allocation11_spill] sm:$0xff]  ;;  %v12147_v42 = vld [vmem:[#allocation8_spill] sm:$0xff] }
 0xc0a   : > { %7906 = vtanh.f32 %v11145_v7  ;;  %v11171_v55 = vadd.f32 %v5165_v34, %v5157_v23  ;;  %v6978_v62 = vmul.f32 -1.442695, %v7205_v16  ;;  %v12148_v34 = vld [vmem:[#allocation5_spill] sm:$0xff] }
 0xc0b   : > { %v7897_v51 = vpop.eup %7896  ;;  %7908 = vtanh.f32 %v11148_v30 }
 0xc0c   : > { %7910 = vtanh.f32 %v11151_v52  ;;  %v5126_v33 = vadd.f32 1.0, %v7897_v51  ;;  %v7899_v50 = vpop.eup %7898  ;;  %v12149_v51 = vld [vmem:[#allocation6_spill] sm:$0xff] }
 0xc0d   : > { %7912 = vtanh.f32 %v11153_v47  ;;  %v7901_v31 = vpop.eup %7900  ;;  %v5127_v9 = vadd.f32 1.0, %v7899_v50 }
 0xc0e   : > { %7914 = vrcp.f32 %v5126_v33  ;;  %v7903_v41 = vpop.eup %7902  ;;  %v5128_v1 = vadd.f32 1.0, %v7901_v31  ;;  %v12150_v33 = vld [vmem:[#allocation7_spill] sm:$0xff] }
 0xc0f   : > { %7916 = vpow2.f32 %v6976_v60  ;;  %v5129_v22 = vadd.f32 1.0, %v7903_v41 }
 0xc10   : > { %7918 = vpow2.f32 %v6977_v21 }
 0xc11   : > { %7920 = vpow2.f32 %v6978_v62 }
 0xc12   : > { %7922 = vtanh.f32 %v11161_v17 }
 0xc13   : > { %v7905_v53 = vpop.eup %7904  ;;  %7924 = vrcp.f32 %v5127_v9 }
 0xc14   : > { %v7907_v40 = vpop.eup %7906  ;;  %7926 = vrcp.f32 %v5128_v1  ;;  %v5130_v56 = vadd.f32 1.0, %v7905_v53 }
 0xc15   : > { %v7909_v45 = vpop.eup %7908  ;;  %7928 = vrcp.f32 %v5129_v22 }
 0xc16   : > { %v7911_v58 = vpop.eup %7910  ;;  %7930 = vrcp.f32 %v5130_v56 }
 0xc17   : > { %v7913_v20 = vpop.eup %7912  ;;  %7932 = vtanh.f32 %v11164_v44 }
 0xc18   : > { %v7915_v39 = vpop.eup %7914  ;;  %7934 = vtanh.f32 %v11168_v43 }
 0xc19   : > { %v7917_v38 = vpop.eup %7916  ;;  %v5182_v54 = vmul.f32 %v7915_v39, %v7907_v40  ;;  %7936 = vtanh.f32 %v11171_v55 }
 0xc1a   : > { %v7919_v36 = vpop.eup %7918  ;;  %v5131_v32 = vadd.f32 1.0, %v7917_v38 }
 0xc1b   : > { %v7921_v14 = vpop.eup %7920  ;;  %v5132_v37 = vadd.f32 1.0, %v7919_v36  ;;  %v5229_v4 = vmul.f32 %v5182_v54, %v12145_v2  ;;  %v5211_v25 = vmul.f32 %v5182_v54, %v8392_v26  ;;  %v11182_v13 = vmul.f32 %v5182_v54, %v12146_v46 }
 0xc1c   : > { %v7923_v59 = vpop.eup %7922  ;;  %7938 = vrcp.f32 %v5131_v32  ;;  %v5133_v10 = vadd.f32 1.0, %v7921_v14  ;;  %v11187_v63 = vmul.f32 %v5182_v54, %v8378_v19  ;;  %v11190_v35 = vmul.f32 %v5182_v54, %v8325_v61 }
 0xc1d   : > { %v7925_v3 = vpop.eup %7924  ;;  %7940 = vrcp.f32 %v5132_v37  ;;  %v11195_v8 = vmul.f32 %v5182_v54, %v12147_v42  ;;  %v11198_v5 = vmul.f32 %v5182_v54, %v8341_v6  ;;  %v11201_v48 = vmul.f32 %v5182_v54, %v8351_v11 }
 0xc1e   : > { %v7927_v23 = vpop.eup %7926  ;;  %v11184_v24 = vmul.f32 %v7925_v3, %v7909_v45  ;;  %7942 = vrcp.f32 %v5133_v10  ;;  %v12151_v3 = vld [vmem:[#allocation12_spill] sm:$0xff] }
 0xc1f   : > { %v7929_v12 = vpop.eup %7928  ;;  %v11192_v0 = vmul.f32 %v7927_v23, %v7911_v58 }
 0xc20   : > { %v7931_v29 = vpop.eup %7930  ;;  %v11203_v57 = vmul.f32 %v7929_v12, %v7913_v20  ;;  %v5230_v16 = vmul.f32 %v11184_v24, %v12148_v34  ;;  %v11209_v60 = vmul.f32 %v11184_v24, %v12149_v51  ;;  %v11213_v21 = vmul.f32 %v11184_v24, %v12150_v33  ;;  %v12152_v12 = vld [vmem:[#allocation13_spill] sm:$0xff] }
 0xc21   : > { %v11215_v62 = vmul.f32 %v7931_v29, %v7923_v59  ;;  %v5282_v50 = vpack.c.bf16 %v11192_v0, %v5182_v54  ;;  %v5232_v31 = vmul.f32 %v11192_v0, %v12145_v2  ;;  %v5214_v9 = vmul.f32 %v11192_v0, %v8392_v26  ;;  %v7933_v40 = vpop.eup %7932 }
 0xc22   : > { %v5283_v41 = vpack.c.bf16 %v11203_v57, %v11184_v24  ;;  %v5250_v1 = vmul.f32 %v11192_v0, %v12146_v46  ;;  %v5233_v53 = vmul.f32 %v11203_v57, %v12148_v34  ;;  %v5268_v22 = vmul.f32 %v11192_v0, %v8378_v19  ;;  %v7935_v39 = vpop.eup %7934 }
 0xc23   : > { %5440 = vrot.lane.b32.xlu0 %v5282_v50, %s12075_s13  ;;  %v5241_v56 = vpack.c.bf16 %v5232_v31, %v5229_v4  ;;  %v5223_v45 = vpack.c.bf16 %v5214_v9, %v5211_v25  ;;  %v5251_v58 = vmul.f32 %v11203_v57, %v12149_v51  ;;  %v11235_v20 = vmul.f32 %v11192_v0, %v8325_v61  ;;  %v7937_v14 = vpop.eup %7936 }
 0xc24   : > { %5442 = vrot.lane.b32.xlu1 %v5283_v41, %s12075_s13  ;;  %v5259_v38 = vpack.c.bf16 %v5250_v1, %v11182_v13  ;;  %v5242_v54 = vpack.c.bf16 %v5233_v53, %v5230_v16  ;;  %v5277_v36 = vpack.c.bf16 %v5268_v22, %v11187_v63  ;;  %v11242_v32 = vmul.f32 %v11203_v57, %v12150_v33 }
 0xc25   : > { %v5260_v37 = vpack.c.bf16 %v5251_v58, %v11209_v60  ;;  %v5310_v59 = vpack.c.bf16 %v11235_v20, %v11190_v35  ;;  %v11249_v10 = vmul.f32 %v11192_v0, %v12147_v42  ;;  %v11253_v4 = vmul.f32 %v11184_v24, %v12151_v3 }
 0xc26   : > { %v7939_v25 = vpop.eup %7938  ;;  %v11259_v23 = vmul.f32 %v11203_v57, %v12151_v3  ;;  %v11263_v63 = vmul.f32 %v11192_v0, %v8341_v6  ;;  %v11267_v29 = vmul.f32 %v11184_v24, %v12152_v12  ;;  %v11276_v31 = vmul.f32 %v11203_v57, %v12152_v12 }
 0xc27   : > { %v7941_v16 = vpop.eup %7940  ;;  %v11269_v60 = vmul.f32 %v7939_v25, %v7933_v40  ;;  %5378 = vrot.lane.b32.xlu0 %v5241_v56, %s12109_s12  ;;  %v11280_v9 = vmul.f32 %v11184_v24, %v8367_v15  ;;  %v11291_v40 = vmul.f32 %v11203_v57, %v8367_v15  ;;  %v5271_v13 = vmul.f32 %v11215_v62, %v8378_v19 }
 0xc28   : > { %v7943_v41 = vpop.eup %7942  ;;  %v11282_v1 = vmul.f32 %v7941_v16, %v7935_v39  ;;  %5794 = vrot.lane.b32.xlu1 %v5223_v45, %s12089_s26  ;;  %v11299_v39 = vmul.f32 %v11184_v24, %v8395_v27  ;;  %v11303_v45 = vmul.f32 %v11203_v57, %v8395_v27  ;;  %v5217_v35 = vmul.f32 %v11215_v62, %v8392_v26 }
 0xc29   : > { %v11293_v56 = vmul.f32 %v7943_v41, %v7937_v14  ;;  %v11311_v14 = vmul.f32 %v11269_v60, %v12148_v34  ;;  %v11315_v41 = vmul.f32 %v11215_v62, %v12145_v2  ;;  %v11333_v53 = vmul.f32 %v11269_v60, %v12149_v51 }
 0xc2a   : > { %v5347_v58 = vpack.c.bf16 %v11303_v45, %v11299_v39  ;;  %v11328_v16 = vmul.f32 %v11282_v1, %v12145_v2  ;;  %v5253_v39 = vmul.f32 %v11215_v62, %v12146_v46  ;;  %v5220_v20 = vmul.f32 %v11282_v1, %v8392_v26 }
 0xc2b   : > { %5400 = vrot.lane.b32.xlu0 %v5259_v38, %s12099_s23  ;;  %v11324_v25 = vmul.f32 %v11293_v56, %v12148_v34  ;;  %v5257_v38 = vmul.f32 %v11293_v56, %v12149_v51  ;;  %v5256_v34 = vmul.f32 %v11282_v1, %v12146_v46  ;;  %v5275_v22 = vmul.f32 %v11293_v56, %v12150_v33 }
 0xc2c   : > { %5380 = vrot.lane.b32.xlu1 %v5242_v54, %s12109_s12  ;;  %v5244_v2 = vpack.c.bf16 %v11328_v16, %v11315_v41  ;;  %v5272_v54 = vmul.f32 %v11269_v60, %v12150_v33  ;;  %v5274_v46 = vmul.f32 %v11282_v1, %v8378_v19  ;;  %v5305_v16 = vmul.f32 %v11269_v60, %v12151_v3 }
 0xc2d   : > { %v5245_v45 = vpack.c.bf16 %v11324_v25, %v11311_v14  ;;  %v5263_v51 = vpack.c.bf16 %v5257_v38, %v11333_v53  ;;  %v5262_v50 = vpack.c.bf16 %v5256_v34, %v5253_v39  ;;  %v5308_v14 = vmul.f32 %v11293_v56, %v12151_v3 }
 0xc2e   : > { %v5281_v25 = vpack.c.bf16 %v5275_v22, %v5272_v54  ;;  %v5304_v33 = vmul.f32 %v11215_v62, %v8325_v61  ;;  %v5280_v53 = vpack.c.bf16 %v5274_v46, %v5271_v13  ;;  %v5307_v41 = vmul.f32 %v11282_v1, %v8325_v61 }
 0xc2f   : > { %5422 = vrot.lane.b32.xlu0 %v5277_v36, %s12085_s16  ;;  %v5323_v19 = vmul.f32 %v11269_v60, %v12152_v12  ;;  %v5326_v36 = vmul.f32 %v11293_v56, %v12152_v12  ;;  %v5314_v22 = vpack.c.bf16 %v5308_v14, %v5305_v16  ;;  %v5322_v38 = vmul.f32 %v11215_v62, %v12147_v42 }
 0xc30   : > { %5402 = vrot.lane.b32.xlu1 %v5260_v37, %s12099_s23  ;;  %v5325_v3 = vmul.f32 %v11282_v1, %v12147_v42  ;;  %v5341_v37 = vmul.f32 %v11269_v60, %v8395_v27  ;;  %v5313_v13 = vpack.c.bf16 %v5307_v41, %v5304_v33  ;;  %v5344_v61 = vmul.f32 %v11293_v56, %v8395_v27 }
 0xc31   : > { %v5332_v39 = vpack.c.bf16 %v5326_v36, %v5323_v19  ;;  %v5340_v34 = vmul.f32 %v11215_v62, %v8341_v6  ;;  %v5343_v42 = vmul.f32 %v11282_v1, %v8341_v6  ;;  %v5218_v54 = vmul.f32 %v11269_v60, %v8367_v15 }
 0xc32   : > { %v5331_v12 = vpack.c.bf16 %v5325_v3, %v5322_v38  ;;  %v5221_v46 = vmul.f32 %v11293_v56, %v8367_v15  ;;  %v12153_v27 = vpack.c.bf16 %v11242_v32, %v11213_v21  ;;  %v5350_v16 = vpack.c.bf16 %v5344_v61, %v5341_v37 }
 0xc33   : > { %5456 = vrot.lane.b32.xlu0 %v5310_v59, %s12086_s18  ;;  %v11398_v6 = vmul.f32 %v11192_v0, %v8351_v11  ;;  %v5349_v59 = vpack.c.bf16 %v5343_v42, %v5340_v34  ;;  %v11402_v15 = vmul.f32 %v11184_v24, %v8399_v28  ;;  %v11406_v21 = vmul.f32 %v11203_v57, %v8399_v28 }
 0xc34   : > { %5424 = vrot.lane.b32.xlu1 %v12153_v27, %s12085_s16  ;;  %v5227_v14 = vpack.c.bf16 %v5221_v46, %v5218_v54  ;;  %v5226_v32 = vpack.c.bf16 %v5220_v20, %v5217_v35  ;;  %v11412_v26 = vmul.f32 %v11269_v60, %v8399_v28  ;;  %v11416_v0 = vmul.f32 %v11293_v56, %v8399_v28 }
 0xc35   : > { %v5364_v33 = vpack.c.bf16 %v11398_v6, %v11201_v48  ;;  %v12154_v24 = vpack.c.bf16 %v11249_v10, %v11195_v8  ;;  %v5365_v57 = vpack.c.bf16 %v11406_v21, %v11402_v15  ;;  %v11426_v41 = vmul.f32 %v11215_v62, %v8351_v11 }
 0xc36   : > { %v11430_v19 = vmul.f32 %v11282_v1, %v8351_v11  ;;  %v12155_v28 = vpack.c.bf16 %v11259_v23, %v11253_v4  ;;  %v5368_v8 = vpack.c.bf16 %v11416_v0, %v11412_v26  ;;  %v12156_v36 = vpack.c.bf16 %v11263_v63, %v11198_v5  ;;  %v11475_v63 = vpop.permute.xlu1 %5382 }
 0xc37   : > { %5478 = vrot.lane.b32.xlu0 %v12154_v24, %s12087_s19  ;;  %v12157_v11 = vpack.c.bf16 %v11276_v31, %v11267_v29  ;;  %v12158_v4 = vpack.c.bf16 %v11291_v40, %v11280_v9  ;;  %v12159_v23 = vpack.c.bf16 %v11282_v1, %v11215_v62  ;;  %v12160_v5 = vpack.c.bf16 %v11293_v56, %v11269_v60  ;;  %v5377_v62 = vpop.permute.xlu0 %5376 }
 0xc38   : > { %5458 = vrot.lane.b32.xlu1 %v12155_v28, %s12086_s18  ;;  %v5367_v10 = vpack.c.bf16 %v11430_v19, %v11426_v41 }
 0xc3a   : > { %v11477_v60 = vpop.permute.xlu1 %5404 }
 0xc3b   : > { %5500 = vrot.lane.b32.xlu0 %v12156_v36, %s12088_s11  ;;  %v5399_v29 = vpop.permute.xlu0 %5398 }
 0xc3c   : > { %5480 = vrot.lane.b32.xlu1 %v12157_v11, %s12087_s19 }
 0xc3e   : > { %v11479_v31 = vpop.permute.xlu1 %5426 }
 0xc3f   : > { %5796 = vrot.lane.b32.xlu0 %v12158_v4, %s12089_s26 }
 0xc40   : > { %5502 = vrot.lane.b32.xlu1 %v5347_v58, %s12088_s11 }
 0xc42   : > { %v11481_v1 = vpop.permute.xlu1 %5466 }
 0xc43   : > { %5444 = vrot.lane.b32.xlu0 %v12159_v23, %s12075_s13 }
 0xc44   : > { %5446 = vrot.lane.b32.xlu1 %v12160_v5, %s12075_s13 }
 0xc46   : > { %v11485_v56 = vpop.permute.xlu1 %5488 }
 0xc47   : > { %5386 = vrot.lane.b32.xlu0 %v5245_v45, %s12109_s12 }
 0xc48   : > { %5384 = vrot.lane.b32.xlu1 %v5244_v2, %s12109_s12 }
 0xc4a   : > { %v11489_v45 = vpop.permute.xlu1 %5510 }
 0xc4b   : > { %5408 = vrot.lane.b32.xlu0 %v5263_v51, %s12099_s23 }
 0xc4c   : > { %5406 = vrot.lane.b32.xlu1 %v5262_v50, %s12099_s23  ;;  %v5421_v50 = vpop.permute.xlu0 %5420 }
 0xc4e   : > { %v11491_v51 = vpop.permute.xlu1 %5798 }
 0xc4f   : > { %5430 = vrot.lane.b32.xlu0 %v5281_v25, %s12085_s16 }
 0xc50   : > { %5428 = vrot.lane.b32.xlu1 %v5280_v53, %s12085_s16  ;;  %v5461_v9 = vpop.permute.xlu0 %5460 }
 0xc53   : > { %5464 = vrot.lane.b32.xlu0 %v5314_v22, %s12086_s18 }
 0xc54   : > { %5462 = vrot.lane.b32.xlu1 %v5313_v13, %s12086_s18  ;;  %v11483_v40 = vpop.permute.xlu0 %5482 }
 0xc57   : > { %5486 = vrot.lane.b32.xlu0 %v5332_v39, %s12087_s19 }
 0xc58   : > { %5484 = vrot.lane.b32.xlu1 %v5331_v12, %s12087_s19  ;;  %v11487_v58 = vpop.permute.xlu0 %5504 }
 0xc5b   : > { %5508 = vrot.lane.b32.xlu0 %v5350_v16, %s12088_s11 }
 0xc5c   : > { %5506 = vrot.lane.b32.xlu1 %v5349_v59, %s12088_s11  ;;  %v5793_v2 = vpop.permute.xlu0 %5792 }
 0xc5f   : > { %5802 = vrot.lane.b32.xlu0 %v5227_v14, %s12089_s26 }
 0xc60   : > { %5800 = vrot.lane.b32.xlu1 %v5226_v32, %s12089_s26 }
 0xc95   : > { %v5441_v25 = vpop.permute.xlu0 %5440 }
 0xc96   : > { %v5443_v53 = vpop.permute.xlu1 %5442  ;;  %5840 = vrot.lane.b32.xlu0 %v5441_v25, %s12089_s26 }
 0xc97   : > { %5844 = vrot.lane.b32.xlu1 %v5443_v53, %s12089_s26  ;;  %v5448_v38 = vsel %vm582_vm6, %v5441_v25, %v5443_v53 }
 0xc99   : > { %v5379_v22 = vpop.permute.xlu0 %5378 }
 0xc9a   : > { %v5795_v3 = vpop.permute.xlu1 %5794  ;;  %5842 = vrot.lane.b32.xlu0 %v5448_v38, %s12089_s26  ;;  %v5388_v54 = vsel %vm690_vm3, %v5377_v62, %v5379_v22 }
 0xc9b   : > { %v5900_v28 = vsel %vm850_vm8, %v5793_v2, %v5795_v3 }
 0xc9d   : > { %v5401_v37 = vpop.permute.xlu0 %5400 }
 0xc9e   : > { %v5381_v13 = vpop.permute.xlu1 %5380  ;;  %v5410_v35 = vsel %vm914_vm9, %v5399_v29, %v5401_v37 }
 0xc9f   : > { %5808 = vrot.lane.b32.xlu1 %v5381_v13, %s12089_s26  ;;  %v5389_v11 = vsel %vm690_vm3, %v5379_v22, %v5381_v13 }
 0xca1   : > { %v5423_v39 = vpop.permute.xlu0 %5422 }
 0xca2   : > { %v5403_v61 = vpop.permute.xlu1 %5402  ;;  %v5432_v14 = vsel %vm618_vm1, %v5421_v50, %v5423_v39 }
 0xca3   : > { %5820 = vrot.lane.b32.xlu1 %v5403_v61, %s12089_s26  ;;  %v5411_v62 = vsel %vm914_vm9, %v5401_v37, %v5403_v61 }
 0xca5   : > { %v5457_v34 = vpop.permute.xlu0 %5456 }
 0xca6   : > { %v5425_v12 = vpop.permute.xlu1 %5424  ;;  %5852 = vrot.lane.b32.xlu0 %v5457_v34, %s12089_s26 }
 0xca7   : > { %5832 = vrot.lane.b32.xlu1 %v5425_v12, %s12089_s26  ;;  %v5433_v50 = vsel %vm618_vm1, %v5423_v39, %v5425_v12 }
 0xca9   : > { %v11501_v42 = vpop.permute.xlu0 %5478 }
 0xcaa   : > { %v5459_v46 = vpop.permute.xlu1 %5458  ;;  %5804 = vrot.lane.b32.xlu0 %v5388_v54, %s12089_s26 }
 0xcab   : > { %v5469_v27 = vsel %vm975_vm10, %v5459_v46, %v5461_v9  ;;  %v5468_v53 = vsel %vm975_vm10, %v5457_v34, %v5459_v46 }
 0xcac   : > { %5856 = vrot.lane.b32.xlu1 %v5469_v27, %s12089_s26 }
 0xcad   : > { %v11507_v16 = vpop.permute.xlu0 %5500 }
 0xcae   : > { %v5481_v20 = vpop.permute.xlu1 %5480  ;;  %5816 = vrot.lane.b32.xlu0 %v5410_v35, %s12089_s26 }
 0xcb1   : > { %v5797_v59 = vpop.permute.xlu0 %5796 }
 0xcb2   : > { %v11512_v32 = vpop.permute.xlu1 %5502  ;;  %5828 = vrot.lane.b32.xlu0 %v5432_v14, %s12089_s26  ;;  %v5901_v24 = vsel %vm850_vm8, %v5795_v3, %v5797_v59  ;;  %v5490_v59 = vsel %vm998_vm11, %v11501_v42, %v5481_v20  ;;  %v5491_v14 = vsel %vm998_vm11, %v5481_v20, %v11483_v40 }
 0xcb3   : > { %5996 = vmatprep.subr.bf16.mxu0 %v5901_v24  ;;  %7046 = vmatprep.subr.bf16.mxu1 %v5901_v24  ;;  %v5512_v40 = vsel %vm1021_vm12, %v11507_v16, %v11512_v32 }
 0xcb4   : > { %5997 = vmatpush1.bf16.msra.mxu0 %v5900_v28  ;;  %7062 = vmatpush1.bf16.msra.mxu1 %v5900_v28 }
 0xcb5   : > { %v5445_v36 = vpop.permute.xlu0 %5444 }
 0xcb6   : > { %v5447_v4 = vpop.permute.xlu1 %5446  ;;  %5806 = vrot.lane.b32.xlu0 %v5389_v11, %s12089_s26  ;;  %5846 = vrot.lane.b32.xlu1 %v5445_v36, %s12089_s26 }
 0xcb7   : > { %v5449_v23 = vsel %vm582_vm6, %v5445_v36, %v5447_v4 }
 0xcb9   : > { %v5387_v5 = vpop.permute.xlu0 %5386 }
 0xcba   : > { %v5385_v29 = vpop.permute.xlu1 %5384  ;;  %5818 = vrot.lane.b32.xlu0 %v5411_v62, %s12089_s26  ;;  %5848 = vrot.lane.b32.xlu1 %v5449_v23, %s12089_s26 }
 0xcbb   : > { %v5390_v9 = vsel %vm690_vm3, %v11475_v63, %v5385_v29  ;;  %v5391_v39 = vsel %vm690_vm3, %v5385_v29, %v5387_v5 }
 0xcbd   : > { %v5409_v2 = vpop.permute.xlu0 %5408 }
 0xcbe   : > { %v5407_v25 = vpop.permute.xlu1 %5406  ;;  %5830 = vrot.lane.b32.xlu0 %v5433_v50, %s12089_s26  ;;  %5810 = vrot.lane.b32.xlu1 %v5390_v9, %s12089_s26 }
 0xcbf   : > { %v5412_v22 = vsel %vm914_vm9, %v11477_v60, %v5407_v25 }
 0xcc1   : > { %v5431_v38 = vpop.permute.xlu0 %5430 }
 0xcc2   : > { %v5429_v3 = vpop.permute.xlu1 %5428  ;;  %5854 = vrot.lane.b32.xlu0 %v5468_v53, %s12089_s26  ;;  %5822 = vrot.lane.b32.xlu1 %v5412_v22, %s12089_s26 }
 0xcc3   : > { %v5434_v63 = vsel %vm618_vm1, %v11479_v31, %v5429_v3  ;;  %v5413_v31 = vsel %vm914_vm9, %v5407_v25, %v5409_v2  ;;  %v5435_v24 = vsel %vm618_vm1, %v5429_v3, %v5431_v38 }
 0xcc5   : > { %v5465_v37 = vpop.permute.xlu0 %5464 }
 0xcc6   : > { %v5463_v13 = vpop.permute.xlu1 %5462  ;;  %5850 = vrot.lane.b32.xlu0 %v5447_v4, %s12089_s26  ;;  %5834 = vrot.lane.b32.xlu1 %v5434_v63, %s12089_s26  ;;  %v5471_v48 = vsel %vm975_vm10, %v5465_v37, %v11481_v1 }
 0xcc7   : > { %v5470_v6 = vsel %vm975_vm10, %v5463_v13, %v5465_v37 }
 0xcc9   : > { %v5487_v61 = vpop.permute.xlu0 %5486 }
 0xcca   : > { %v5485_v34 = vpop.permute.xlu1 %5484  ;;  %5812 = vrot.lane.b32.xlu1 %v5391_v39, %s12089_s26  ;;  %5814 = vrot.lane.b32.xlu0 %v5387_v5, %s12089_s26  ;;  %v5493_v15 = vsel %vm998_vm11, %v5487_v61, %v11485_v56 }
 0xccb   : > { %v5492_v21 = vsel %vm998_vm11, %v5485_v34, %v5487_v61 }
 0xccd   : > { %v5509_v60 = vpop.permute.xlu0 %5508 }
 0xcce   : > { %v5507_v12 = vpop.permute.xlu1 %5506  ;;  %5858 = vrot.lane.b32.xlu1 %v5463_v13, %s12089_s26  ;;  %5826 = vrot.lane.b32.xlu0 %v5409_v2, %s12089_s26  ;;  %v5515_v26 = vsel %vm1021_vm12, %v5509_v60, %v11489_v45 }
 0xccf   : > { %v5514_v0 = vsel %vm1021_vm12, %v5507_v12, %v5509_v60 }
 0xcd1   : > { %v5803_v54 = vpop.permute.xlu0 %5802 }
 0xcd2   : > { %v5801_v46 = vpop.permute.xlu1 %5800  ;;  %5824 = vrot.lane.b32.xlu1 %v5413_v31, %s12089_s26  ;;  %5838 = vrot.lane.b32.xlu0 %v5431_v38, %s12089_s26 }
 0xcd3   : > { %v5902_v27 = vsel %vm850_vm8, %v11491_v51, %v5801_v46  ;;  %v5903_v35 = vsel %vm850_vm8, %v5801_v46, %v5803_v54  ;;  %v5513_v51 = vsel %vm1021_vm12, %v11512_v32, %v11487_v58 }
 0xcd4   : > { %5998 = vmatprep.subr.bf16.mxu0 %v5903_v35  ;;  %7047 = vmatprep.subr.bf16.mxu1 %v5903_v35 }
 0xcd5   : > { %5999 = vmatpush1.bf16.msra.mxu0 %v5902_v27  ;;  %7063 = vmatpush1.bf16.msra.mxu1 %v5902_v27 }
 0xcd6   : > { %5868 = vrot.lane.b32.xlu1 %v5491_v14, %s12089_s26  ;;  %5866 = vrot.lane.b32.xlu0 %v5490_v59, %s12089_s26 }
 0xcda   : > { %5836 = vrot.lane.b32.xlu1 %v5435_v24, %s12089_s26  ;;  %5864 = vrot.lane.b32.xlu0 %v11501_v42, %s12089_s26 }
 0xcde   : > { %5522 = vrot.lane.b32.xlu1 %v5364_v33, %s12083_s29  ;;  %5524 = vrot.lane.b32.xlu0 %v5365_v57, %s12083_s29  ;;  %v7528_v33 = vld [vmem:[%s11981_s6 + $0x4] ss:$12 sps:$4 sm:$0xff]  }
 0xcdf   : > { %6028 = vmatprep.mubr.bf16.mxu0 %v7528_v33 }
 0xce2   : > { %5526 = vrot.lane.b32.xlu1 %v12084_v49, %s12083_s29  ;;  %5870 = vrot.lane.b32.xlu0 %v5485_v34, %s12089_s26 }
 0xce6   : > { %5878 = vrot.lane.b32.xlu1 %v5512_v40, %s12089_s26  ;;  %5880 = vrot.lane.b32.xlu0 %v5513_v51, %s12089_s26 }
 0xcea   : > { %5862 = vrot.lane.b32.xlu0 %v5471_v48, %s12089_s26  ;;  %5860 = vrot.lane.b32.xlu1 %v5470_v6, %s12089_s26 }
 0xcee   : > { %5530 = vrot.lane.b32.xlu0 %v5368_v8, %s12083_s29  ;;  %5528 = vrot.lane.b32.xlu1 %v5367_v10, %s12083_s29 }
 0xcf2   : > { %5874 = vrot.lane.b32.xlu0 %v5493_v15, %s12089_s26  ;;  %5872 = vrot.lane.b32.xlu1 %v5492_v21, %s12089_s26 }
 0xcf6   : > { %5876 = vrot.lane.b32.xlu0 %v11507_v16, %s12089_s26  ;;  %5532 = vrot.lane.b32.xlu1 %v12084_v49, %s12083_s29  ;;  %v7531_v49 = vld [vmem:[%s11981_s6 + $0x1c] ss:$12 sps:$4 sm:$0xff]  }
 0xcf7   : > { %6038 = vmatprep.mubr.bf16.mxu1 %v7531_v49 }
 0xcfa   : > { %5886 = vrot.lane.b32.xlu0 %v5515_v26, %s12089_s26  ;;  %5884 = vrot.lane.b32.xlu1 %v5514_v0, %s12089_s26 }
 0xcfe   : > { %5882 = vrot.lane.b32.xlu1 %v5507_v12, %s12089_s26 }
 0xd08   : > { %v11609_v57 = vpop.permute.xlu0 %5840 }
 0xd09   : > { %v11611_v41 = vpop.permute.xlu1 %5844 }
 0xd0c   : > { %v11616_v8 = vpop.permute.xlu0 %5842 }
 0xd0d   : > { %v5917_v14 = vsel %vm850_vm8, %v11616_v8, %v11611_v41  ;;  %v5916_v48 = vsel %vm850_vm8, %v11609_v57, %v11616_v8 }
 0xd11   : > { %v5809_v19 = vpop.permute.xlu1 %5808 }
 0xd15   : > { %v5821_v10 = vpop.permute.xlu1 %5820 }
 0xd18   : > { %v11618_v1 = vpop.permute.xlu0 %5852 }
 0xd19   : > { %v5833_v58 = vpop.permute.xlu1 %5832 }
 0xd1c   : > { %v5805_v56 = vpop.permute.xlu0 %5804 }
 0xd1e   : > { %v11620_v42 = vpop.permute.xlu1 %5856 }
 0xd20   : > { %v5817_v45 = vpop.permute.xlu0 %5816 }
 0xd24   : > { %v5829_v16 = vpop.permute.xlu0 %5828 }
 0xd28   : > { %v11622_v20 = vpop.permute.xlu1 %5846  ;;  %v5807_v32 = vpop.permute.xlu0 %5806 }
 0xd29   : > { %v5904_v28 = vsel %vm850_vm8, %v5805_v56, %v5807_v32  ;;  %v5905_v36 = vsel %vm850_vm8, %v5807_v32, %v5809_v19 }
 0xd2a   : > { %6000 = vmatprep.subr.bf16.mxu0 %v5905_v36  ;;  %7048 = vmatprep.subr.bf16.mxu1 %v5905_v36 }
 0xd2b   : > { %6001 = vmatpush1.bf16.msra.mxu0 %v5904_v28  ;;  %7064 = vmatpush1.bf16.msra.mxu1 %v5904_v28 }
 0xd2c   : > { %v11626_v11 = vpop.permute.xlu1 %5848  ;;  %v5819_v4 = vpop.permute.xlu0 %5818 }
 0xd2d   : > { %v5909_v38 = vsel %vm850_vm8, %v5819_v4, %v5821_v10  ;;  %v5908_v37 = vsel %vm850_vm8, %v5817_v45, %v5819_v4  ;;  %v5918_v26 = vsel %vm850_vm8, %v11622_v20, %v11626_v11  ;;  %v5571_v4 = vld [vmem:[%s11982_s7 + $0x8] sm:$0xff] }
 0xd30   : > { %v5811_v23 = vpop.permute.xlu1 %5810  ;;  %v5831_v5 = vpop.permute.xlu0 %5830 }
 0xd31   : > { %v5913_v60 = vsel %vm850_vm8, %v5831_v5, %v5833_v58  ;;  %v5912_v54 = vsel %vm850_vm8, %v5829_v16, %v5831_v5 }
 0xd34   : > { %v5823_v62 = vpop.permute.xlu1 %5822  ;;  %v11628_v29 = vpop.permute.xlu0 %5854 }
 0xd35   : > { %v5921_v0 = vsel %vm850_vm8, %v11628_v29, %v11620_v42  ;;  %v5920_v19 = vsel %vm850_vm8, %v11618_v1, %v11628_v29 }
 0xd38   : > { %v5835_v50 = vpop.permute.xlu1 %5834  ;;  %v5851_v9 = vpop.permute.xlu0 %5850 }
 0xd39   : > { %v5919_v6 = vsel %vm850_vm8, %v11626_v11, %v5851_v9  ;;  %v5575_v9 = vld [vmem:[%s11982_s7 + $0x28] sm:$0xff] }
 0xd3c   : > { %v5813_v2 = vpop.permute.xlu1 %5812  ;;  %v5815_v25 = vpop.permute.xlu0 %5814 }
 0xd3d   : > { %v5906_v53 = vsel %vm850_vm8, %v5811_v23, %v5813_v2  ;;  %v5907_v22 = vsel %vm850_vm8, %v5813_v2, %v5815_v25 }
 0xd3e   : > { %6002 = vmatprep.subr.bf16.mxu0 %v5907_v22  ;;  %7049 = vmatprep.subr.bf16.mxu1 %v5907_v22  ;;  %v5574_v22 = vld [vmem:[%s11982_s7 + $0x20] sm:$0xff] }
 0xd3f   : > { %6003 = vmatpush1.bf16.msra.mxu0 %v5906_v53  ;;  %7065 = vmatpush1.bf16.msra.mxu1 %v5906_v53 }
 0xd40   : > { %v11633_v3 = vpop.permute.xlu1 %5858  ;;  %6004 = vmatprep.subr.bf16.mxu0 %v5909_v38  ;;  %7050 = vmatprep.subr.bf16.mxu1 %v5909_v38  ;;  %v5827_v63 = vpop.permute.xlu0 %5826  ;;  %v5573_v38 = vld [vmem:[%s11982_s7 + $0x18] sm:$0xff] }
 0xd43   : > { %6005 = vmatpush1.bf16.msra.mxu0 %v5908_v37  ;;  %7066 = vmatpush1.bf16.msra.mxu1 %v5908_v37  ;;  %v7526_v37 = vld [vmem:[%s11981_s6] ss:$12 sps:$4 sm:$0xff]  }
 0xd44   : > { %v5825_v13 = vpop.permute.xlu1 %5824  ;;  %v5839_v39 = vpop.permute.xlu0 %5838 }
 0xd45   : > { %v5910_v61 = vsel %vm850_vm8, %v5823_v62, %v5825_v13  ;;  %v5911_v34 = vsel %vm850_vm8, %v5825_v13, %v5827_v63  ;;  %v5572_v13 = vld [vmem:[%s11982_s7 + $0x10] sm:$0xff] }
 0xd46   : > { %6006 = vmatprep.subr.bf16.mxu0 %v5911_v34  ;;  %7051 = vmatprep.subr.bf16.mxu1 %v5911_v34  ;;  %v7532_v34 = vld [vmem:[%s11981_s6 + $0x34] ss:$12 sps:$4 sm:$0xff]  }
 0xd47   : > { %6007 = vmatpush1.bf16.msra.mxu0 %v5910_v61  ;;  %7067 = vmatpush1.bf16.msra.mxu1 %v5910_v61  ;;  %v5577_v61 = vld [vmem:[%s11982_s7 + $0x38] sm:$0xff] }
 0xd48   : > { %v5869_v12 = vpop.permute.xlu1 %5868  ;;  %6008 = vmatprep.subr.bf16.mxu0 %v5913_v60  ;;  %7052 = vmatprep.subr.bf16.mxu1 %v5913_v60  ;;  %v5867_v31 = vpop.permute.xlu0 %5866  ;;  %v5576_v60 = vld [vmem:[%s11982_s7 + $0x30] sm:$0xff] }
 0xd49   : > { %v5925_v58 = vsel %vm850_vm8, %v5867_v31, %v5869_v12  ;;  %v5579_v12 = vld [vmem:[%s11982_s7 + $0x48] sm:$0xff] }
 0xd4b   : > { %6009 = vmatpush1.bf16.msra.mxu0 %v5912_v54  ;;  %7068 = vmatpush1.bf16.msra.mxu1 %v5912_v54  ;;  %v7534_v54 = vld [vmem:[%s11981_s6 + $0x30] ss:$12 sps:$4 sm:$0xff]  }
 0xd4c   : > { %v5837_v46 = vpop.permute.xlu1 %5836  ;;  %v5865_v27 = vpop.permute.xlu0 %5864 }
 0xd4d   : > { %v5914_v35 = vsel %vm850_vm8, %v5835_v50, %v5837_v46  ;;  %v5915_v59 = vsel %vm850_vm8, %v5837_v46, %v5839_v39  ;;  %v5924_v16 = vsel %vm850_vm8, %v5865_v27, %v5867_v31  ;;  %v5570_v50 = vld [vmem:[%s11982_s7] sm:$0xff]  ;;  %v5583_v46 = vld [vmem:[%s11982_s7 + $0x68] sm:$0xff] }
 0xd4e   : > { %6010 = vmatprep.subr.bf16.mxu0 %v5915_v59  ;;  %7053 = vmatprep.subr.bf16.mxu1 %v5915_v59  ;;  %v7529_v39 = vld [vmem:[%s11981_s6 + $0x18] ss:$12 sps:$4 sm:$0xff]  }
 0xd4f   : > { %6011 = vmatpush1.bf16.msra.mxu0 %v5914_v35  ;;  %7069 = vmatpush1.bf16.msra.mxu1 %v5914_v35  ;;  %v5578_v31 = vld [vmem:[%s11982_s7 + $0x40] sm:$0xff]  ;;  %v7535_v27 = vld [vmem:[%s11981_s6 + $0x4c] ss:$12 sps:$4 sm:$0xff]  }
 0xd50   : > { %v5523_v24 = vpop.permute.xlu1 %5522  ;;  %6012 = vmatprep.subr.bf16.mxu0 %v5917_v14  ;;  %7054 = vmatprep.subr.bf16.mxu1 %v5917_v14  ;;  %v5525_v40 = vpop.permute.xlu0 %5524  ;;  %v5582_v35 = vld [vmem:[%s11982_s7 + $0x60] sm:$0xff]  ;;  %v5581_v59 = vld [vmem:[%s11982_s7 + $0x58] sm:$0xff]  ;;  %v5580_v14 = vld [vmem:[%s11982_s7 + $0x50] sm:$0xff] }
 0xd51   : > { %v5534_v51 = vsel %vm1044_vm13, %v5523_v24, %v5525_v40 }
 0xd52   : > { %5890 = vrot.lane.b32.xlu0 %v5534_v51, %s12089_s26  ;;  %v7538_v51 = vld [vmem:[%s11981_s6 + $0x64] ss:$12 sps:$4 sm:$0xff]  }
 0xd53   : > { %6013 = vmatpush1.bf16.msra.mxu0 %v5916_v48  ;;  %7070 = vmatpush1.bf16.msra.mxu1 %v5916_v48  ;;  %v5584_v48 = vld [vmem:[%s11982_s7 + $0x70] sm:$0xff] }
 0xd54   : > { %v5527_v15 = vpop.permute.xlu1 %5526  ;;  %6014 = vmatprep.subr.bf16.mxu0 %v5919_v6  ;;  %7055 = vmatprep.subr.bf16.mxu1 %v5919_v6  ;;  %v5871_v21 = vpop.permute.xlu0 %5870  ;;  %v6492_v6 = vld [vmem:[%s11984_s9 + $0x8] sm:$0xff] }
 0xd55   : > { %v5535_v33 = vsel %vm1044_vm13, %v5525_v40, %v5527_v15  ;;  %v5585_v40 = vld [vmem:[%s11982_s7 + $0x78] sm:$0xff]  ;;  %v6491_v15 = vld [vmem:[%s11984_s9] sm:$0xff] }
 0xd56   : > { %5892 = vrot.lane.b32.xlu1 %v5535_v33, %s12089_s26  ;;  %5888 = vrot.lane.b32.xlu0 %v5523_v24, %s12089_s26  ;;  %v7537_v24 = vld [vmem:[%s11981_s6 + $0x48] ss:$12 sps:$4 sm:$0xff]   ;;  %v6494_v33 = vld [vmem:[%s11984_s9 + $0x18] sm:$0xff] }
 0xd57   : > { %6015 = vmatpush1.bf16.msra.mxu0 %v5918_v26  ;;  %7071 = vmatpush1.bf16.msra.mxu1 %v5918_v26  ;;  %v7541_v26 = vld [vmem:[%s11981_s6 + $0x7c] ss:$12 sps:$4 sm:$0xff]  }
 0xd58   : > { %v5879_v57 = vpop.permute.xlu1 %5878  ;;  %6016 = vmatprep.subr.bf16.mxu0 %v5921_v0  ;;  %7056 = vmatprep.subr.bf16.mxu1 %v5921_v0  ;;  %v5881_v41 = vpop.permute.xlu0 %5880  ;;  %v6493_v0 = vld [vmem:[%s11984_s9 + $0x10] sm:$0xff] }
 0xd59   : > { %v5929_v11 = vsel %vm850_vm8, %v5879_v57, %v5881_v41  ;;  %v7544_v41 = vld [vmem:[%s11981_s6 + $0x94] ss:$12 sps:$4 sm:$0xff]  }
 0xd5b   : > { %6017 = vmatpush1.bf16.msra.mxu0 %v5920_v19  ;;  %7072 = vmatpush1.bf16.msra.mxu1 %v5920_v19  ;;  %v7546_v19 = vld [vmem:[%s11981_s6 + $0x90] ss:$12 sps:$4 sm:$0xff]  }
 0xd5c   : > { %v5861_v49 = vpop.permute.xlu1 %5860  ;;  %v5863_v8 = vpop.permute.xlu0 %5862 }
 0xd5d   : > { %v5922_v10 = vsel %vm850_vm8, %v11633_v3, %v5861_v49  ;;  %v5923_v56 = vsel %vm850_vm8, %v5861_v49, %v5863_v8  ;;  %v7547_v49 = vld [vmem:[%s11981_s6 + $0xac] ss:$12 sps:$4 sm:$0xff]   ;;  %v7549_v8 = vld [vmem:[%s11981_s6 + $0xa8] ss:$12 sps:$4 sm:$0xff]  }
 0xd5e   : > { %6018 = vmatprep.subr.bf16.mxu0 %v5923_v56  ;;  %7057 = vmatprep.subr.bf16.mxu1 %v5923_v56 }
 0xd5f   : > { %6019 = vmatpush1.bf16.msra.mxu0 %v5922_v10  ;;  %7073 = vmatpush1.bf16.msra.mxu1 %v5922_v10 }
 0xd60   : > { %v5529_v45 = vpop.permute.xlu1 %5528  ;;  %6020 = vmatprep.subr.bf16.mxu0 %v5925_v58  ;;  %7058 = vmatprep.subr.bf16.mxu1 %v5925_v58  ;;  %v5531_v42 = vpop.permute.xlu0 %5530 }
 0xd61   : > { %v5536_v1 = vsel %vm1044_vm13, %v5529_v45, %v5531_v42 }
 0xd62   : > { %5896 = vrot.lane.b32.xlu1 %v5536_v1, %s12089_s26 }
 0xd63   : > { %6021 = vmatpush1.bf16.msra.mxu0 %v5924_v16  ;;  %7074 = vmatpush1.bf16.msra.mxu1 %v5924_v16 }
 0xd64   : > { %v5873_v20 = vpop.permute.xlu1 %5872  ;;  %v5875_v32 = vpop.permute.xlu0 %5874 }
 0xd65   : > { %v5926_v28 = vsel %vm850_vm8, %v5871_v21, %v5873_v20  ;;  %v5927_v36 = vsel %vm850_vm8, %v5873_v20, %v5875_v32  ;;  %v7540_v21 = vld [vmem:[%s11981_s6 + $0x60] ss:$12 sps:$4 sm:$0xff]  }
 0xd66   : > { %5894 = vrot.lane.b32.xlu1 %v5529_v45, %s12089_s26  ;;  %6022 = vmatprep.subr.bf16.mxu0 %v5927_v36 }
 0xd67   : > { %7059 = vmatprep.subr.bf16.mxu1 %v5927_v36  ;;  %6023 = vmatpush1.bf16.msra.mxu0 %v5926_v28  ;;  %v7550_v36 = vld [vmem:[%s11981_s6 + $0x8] ss:$12 sps:$4 sm:$0xff]  }
 0xd68   : > { %7075 = vmatpush1.bf16.msra.mxu1 %v5926_v28  ;;  %v5533_v23 = vpop.permute.xlu1 %5532  ;;  %6024 = vmatprep.subr.bf16.mxu0 %v5929_v11  ;;  %v5877_v5 = vpop.permute.xlu0 %5876 }
 0xd69   : > { %v5537_v62 = vsel %vm1044_vm13, %v5531_v42, %v5533_v23  ;;  %7060 = vmatprep.subr.bf16.mxu1 %v5929_v11  ;;  %v5928_v29 = vsel %vm850_vm8, %v5877_v5, %v5879_v57  ;;  %v7543_v57 = vld [vmem:[%s11981_s6 + $0x78] ss:$12 sps:$4 sm:$0xff]   ;;  %v7551_v11 = vld [vmem:[%s11981_s6 + $0x20] ss:$12 sps:$4 sm:$0xff]   ;;  %v7553_v23 = vld [vmem:[%s11981_s6 + $0x50] ss:$12 sps:$4 sm:$0xff]  }
 0xd6a   : > { %5898 = vrot.lane.b32.xlu0 %v5537_v62, %s12089_s26  ;;  %5593 = vperm.xlu1 %7405, %v5571_v4   ;;  %v7552_v4 = vld [vmem:[%s11981_s6 + $0x38] ss:$12 sps:$4 sm:$0xff]   ;;  %v7554_v5 = vld [vmem:[%s11981_s6 + $0x68] ss:$12 sps:$4 sm:$0xff]   ;;  %v7555_v62 = vld [vmem:[%s11981_s6 + $0x80] ss:$12 sps:$4 sm:$0xff]  }
 0xd6b   : > { %6025 = vmatpush1.bf16.msra.mxu0 %v5928_v29 }
 0xd6c   : > { %7076 = vmatpush1.bf16.msra.mxu1 %v5928_v29  ;;  %v5885_v2 = vpop.permute.xlu1 %5884  ;;  %v5887_v25 = vpop.permute.xlu0 %5886  ;;  %v7556_v29 = vld [vmem:[%s11981_s6 + $0x98] ss:$12 sps:$4 sm:$0xff]  }
 0xd6d   : > { %v5931_v53 = vsel %vm850_vm8, %v5885_v2, %v5887_v25 }
 0xd6e   : > { %5588 = vperm.xlu0 %7404, %v5570_v50   ;;  %5613 = vperm.xlu1 %7405, %v5575_v9   ;;  %v7557_v50 = vld [vmem:[%s11981_s6 + $0xb0] ss:$12 sps:$4 sm:$0xff]  }
 0xd6f   : > { %6026 = vmatprep.subr.bf16.mxu0 %v5931_v53  ;;  %7061 = vmatprep.subr.bf16.mxu1 %v5931_v53 }
 0xd70   : > { %v5883_v3 = vpop.permute.xlu1 %5882 }
 0xd71   : > { %v5930_v63 = vsel %vm850_vm8, %v5883_v3, %v5885_v2 }
 0xd72   : > { %5608 = vperm.xlu0 %7404, %v5574_v22   ;;  %5603 = vperm.xlu1 %7405, %v5573_v38  }
 0xd73   : > { %6027 = vmatpush1.bf16.msra.mxu0 %v5930_v63  ;;  %7077 = vmatpush1.bf16.msra.mxu1 %v5930_v63 }
 0xd76   : > { %6029 = vmatmul.mubr.bf16.vlgmr.msra.gmra.mrb[88].mxu0 %v7526_v37  ;;  %5598 = vperm.xlu0 %7404, %v5572_v13  }
 0xd77   : > { %5623 = vperm.xlu1 %7405, %v5577_v61   ;;  %6039 = vmatmul.mubr.bf16.vlgmr.msra.gmra.mrb[48].mxu1 %v7529_v39 }
 0xd78   : > { %6048 = vmatprep.mubr.bf16.mxu1 %v7532_v34  ;;  %6470 = vmatprep.mubr.bf16.mxu0 %v12074_v18 }
 0xd7a   : > { %5618 = vperm.xlu0 %7404, %v5576_v60  }
 0xd7b   : > { %5633 = vperm.xlu1 %7405, %v5579_v12  }
 0xd7e   : > { %5628 = vperm.xlu0 %7404, %v5578_v31  }
 0xd7f   : > { %5653 = vperm.xlu1 %7405, %v5583_v46   ;;  %6049 = vmatmul.mubr.bf16.gmra.mrb[52].mxu1 %v7534_v54 }
 0xd80   : > { %6058 = vmatprep.mubr.bf16.mxu1 %v7535_v27 }
 0xd82   : > { %5648 = vperm.xlu0 %7404, %v5582_v35  }
 0xd83   : > { %5643 = vperm.xlu1 %7405, %v5581_v59  }
 0xd86   : > { %5638 = vperm.xlu0 %7404, %v5580_v14  }
 0xd87   : > { %5663 = vperm.xlu1 %7405, %v5585_v40   ;;  %6059 = vmatmul.mubr.bf16.gmra.mrb[56].mxu1 %v7537_v24 }
 0xd88   : > { %6068 = vmatprep.mubr.bf16.mxu1 %v7538_v51 }
 0xd8a   : > { %5658 = vperm.xlu0 %7404, %v5584_v48  }
 0xd8b   : > { %6502 = vperm.xlu1 %7405, %v6492_v6  }
 0xd8e   : > { %6497 = vperm.xlu0 %7404, %v6491_v15  }
 0xd8f   : > { %6512 = vperm.xlu1 %7405, %v6494_v33   ;;  %6069 = vmatmul.mubr.bf16.gmra.mrb[60].mxu1 %v7540_v21 }
 0xd90   : > { %6078 = vmatprep.mubr.bf16.mxu1 %v7541_v26 }
 0xd92   : > { %6507 = vperm.xlu0 %7404, %v6493_v0  }
 0xd97   : > { %6079 = vmatmul.mubr.bf16.gmra.mrb[64].mxu1 %v7543_v57 }
 0xd98   : > { %6088 = vmatprep.mubr.bf16.mxu1 %v7544_v41 }
 0xd9f   : > { %6089 = vmatmul.mubr.bf16.gmra.mrb[68].mxu1 %v7546_v19 }
 0xda0   : > { %6098 = vmatprep.mubr.bf16.mxu1 %v7547_v49 }
 0xda7   : > { %6099 = vmatmul.mubr.bf16.gmra.mrb[72].mxu1 %v7549_v8 }
 0xda8   : > { %6141 = vmatprep.mubr.bf16.mxu1 %v12074_v18 }
 0xdc4   : > { %v5891_v10 = vpop.permute.xlu0 %5890 }
 0xdc8   : > { %v5893_v56 = vpop.permute.xlu1 %5892  ;;  %v5889_v58 = vpop.permute.xlu0 %5888 }
 0xdc9   : > { %v5932_v45 = vsel %vm850_vm8, %v5889_v58, %v5891_v10  ;;  %v5933_v42 = vsel %vm850_vm8, %v5891_v10, %v5893_v56 }
 0xdca   : > { %6109 = vmatprep.subr.bf16.mxu1 %v5933_v42 }
 0xdcb   : > { %6110 = vmatpush1.bf16.msra.mxu1 %v5932_v45 }
 0xdd4   : > { %v5897_v1 = vpop.permute.xlu1 %5896 }
 0xdd8   : > { %v5895_v16 = vpop.permute.xlu1 %5894 }
 0xdd9   : > { %v5934_v28 = vsel %vm850_vm8, %v5895_v16, %v5897_v1 }
 0xddc   : > { %v5899_v20 = vpop.permute.xlu0 %5898 }
 0xddd   : > { %v5935_v32 = vsel %vm850_vm8, %v5897_v1, %v5899_v20 }
 0xdde   : > { %6111 = vmatprep.subr.bf16.mxu1 %v5935_v32 }
 0xddf   : > { %6112 = vmatpush1.bf16.msra.mxu1 %v5934_v28 }
 0xde2   : > { %7003 = vmatmul.mubr.msk.bf16.vlgmr.msra.gmra.mrb[76].mxu1 %vm489_vm0, %v7550_v36 }
 0xde3   : > { %6151 = vmatprep.mubr.bf16.mxu1 %v12074_v18 }
 0xde9   : > { %v5594_v38 = vpop.permute.xlu1 %5593 }
 0xdea   : > { %7004 = vmatmul.mubr.msk.bf16.gmra.mrb[48].mxu1 %vm489_vm0, %v7551_v11 }
 0xdeb   : > { %6161 = vmatprep.mubr.bf16.mxu1 %v12074_v18 }
 0xded   : > { %v5589_v22 = vpop.permute.xlu0 %5588  ;;  %v5614_v35 = vpop.permute.xlu1 %5613 }
 0xdf1   : > { %v5609_v34 = vpop.permute.xlu0 %5608  ;;  %v5604_v21 = vpop.permute.xlu1 %5603 }
 0xdf2   : > { %7005 = vmatmul.mubr.msk.bf16.gmra.mrb[52].mxu1 %vm489_vm0, %v7552_v4 }
 0xdf3   : > { %6171 = vmatprep.mubr.bf16.mxu1 %v12074_v18 }
 0xdf5   : > { %v5599_v51 = vpop.permute.xlu0 %5598 }
 0xdfa   : > { %7006 = vmatmul.mubr.msk.bf16.gmra.mrb[56].mxu1 %vm489_vm0, %v7553_v23 }
 0xdfb   : > { %6181 = vmatprep.mubr.bf16.mxu1 %v12074_v18 }
 0xe02   : > { %7007 = vmatmul.mubr.msk.bf16.gmra.mrb[60].mxu1 %vm489_vm0, %v7554_v5 }
 0xe03   : > { %6191 = vmatprep.mubr.bf16.mxu1 %v12074_v18 }
 0xe0a   : > { %7008 = vmatmul.mubr.msk.bf16.gmra.mrb[64].mxu1 %vm489_vm0, %v7555_v62 }
 0xe0b   : > { %6201 = vmatprep.mubr.bf16.mxu1 %v12074_v18 }
 0xe12   : > { %7009 = vmatmul.mubr.msk.bf16.gmra.mrb[68].mxu1 %vm489_vm0, %v7556_v29 }
 0xe13   : > { %6211 = vmatprep.mubr.bf16.mxu1 %v12074_v18 }
 0xe1a   : > { %7010 = vmatmul.mubr.msk.bf16.gmra.mrb[72].mxu1 %vm489_vm0, %v7557_v50 }
 0xe49   : > { %v6030_v9 = vpop.f32.mrb[88].mxu0 }
 0xe4a   : > { %v6032_v2 = vpop.f32.mrb[89].mxu0  ;;  %v6031_v3 = vadd.f32 %v6030_v9, %v5589_v22 }
 0xe4b   : > { %v6034_v25 = vpop.f32.mrb[90].mxu0  ;;  %v6033_v63 = vadd.f32 %v6032_v2, %v5589_v22 }
 0xe4c   : > { %v6036_v53 = vpop.f32.mrb[91].mxu0  ;;  %v6035_v13 = vadd.f32 %v6034_v25, %v5594_v38 }
 0xe4d   : > { %v6037_v60 = vadd.f32 %v6036_v53, %v5594_v38  ;;  %v5619_v38 = vpop.permute.xlu0 %5618 }
 0xeb5   : > { %v6143_v37 = vpop.f32.mrb[76].mxu1 }
 0xeb6   : > { %v6144_v39 = vadd.f32 %v6143_v37, %v6031_v3  ;;  %v6145_v61 = vpop.f32.mrb[77].mxu1 }
 0xeb7   : > { %v6146_v12 = vadd.f32 %v6145_v61, %v6033_v63  ;;  %v6147_v31 = vpop.f32.mrb[78].mxu1 }
 0xeb8   : > { %v7011_v54 = vmul.f32 -1.442695, %v6144_v39  ;;  %v6148_v46 = vadd.f32 %v6147_v31, %v6035_v13  ;;  %v6149_v27 = vpop.f32.mrb[79].mxu1 }
 0xeb9   : > { %v7012_v59 = vmul.f32 -1.442695, %v6146_v12  ;;  %v6150_v14 = vadd.f32 %v6149_v27, %v6037_v60 }
 0xeba   : > { %7944 = vpow2.f32 %v7011_v54  ;;  %v7013_v24 = vmul.f32 -1.442695, %v6148_v46 }
 0xebb   : > { %7946 = vpow2.f32 %v7012_v59  ;;  %v7014_v40 = vmul.f32 -1.442695, %v6150_v14 }
 0xebc   : > { %7948 = vpow2.f32 %v7013_v24 }
 0xebd   : > { %v6153_v48 = vpop.f32.mrb[48].mxu1  ;;  %7950 = vpow2.f32 %v7014_v40 }
 0xebe   : > { %v7214_v6 = vadd.f32 %v6153_v48, %v5599_v51  ;;  %v6155_v15 = vpop.f32.mrb[49].mxu1  ;;  %v5629_v48 = vpop.permute.xlu0 %5628 }
 0xebf   : > { %v7215_v33 = vadd.f32 %v6155_v15, %v5599_v51  ;;  %v6157_v26 = vpop.f32.mrb[50].mxu1 }
 0xec0   : > { %v7015_v0 = vmul.f32 -1.442695, %v7214_v6  ;;  %v7216_v57 = vadd.f32 %v6157_v26, %v5604_v21  ;;  %v6159_v41 = vpop.f32.mrb[51].mxu1 }
 0xec1   : > { %v7016_v19 = vmul.f32 -1.442695, %v7215_v33  ;;  %v7217_v49 = vadd.f32 %v6159_v41, %v5604_v21 }
 0xec2   : > { %7952 = vpow2.f32 %v7015_v0  ;;  %v7017_v8 = vmul.f32 -1.442695, %v7216_v57 }
 0xec3   : > { %7954 = vpow2.f32 %v7016_v19  ;;  %v7018_v10 = vmul.f32 -1.442695, %v7217_v49 }
 0xec4   : > { %v7945_v56 = vpop.eup %7944  ;;  %7956 = vpow2.f32 %v7017_v8 }
 0xec5   : > { %v7947_v58 = vpop.eup %7946  ;;  %v6246_v45 = vadd.f32 1.0, %v7945_v56  ;;  %v6163_v42 = vpop.f32.mrb[52].mxu1  ;;  %7958 = vpow2.f32 %v7018_v10 }
 0xec6   : > { %v7949_v1 = vpop.eup %7948  ;;  %v6247_v16 = vadd.f32 1.0, %v7947_v58  ;;  %v7218_v20 = vadd.f32 %v6163_v42, %v5609_v34  ;;  %v6165_v32 = vpop.f32.mrb[53].mxu1 }
 0xec7   : > { %v6248_v28 = vadd.f32 1.0, %v7949_v1  ;;  %v7219_v36 = vadd.f32 %v6165_v32, %v5609_v34  ;;  %v6167_v11 = vpop.f32.mrb[54].mxu1  ;;  %v7951_v4 = vpop.eup %7950  ;;  %7960 = vrcp.f32 %v6246_v45 }
 0xec8   : > { %v7019_v23 = vmul.f32 -1.442695, %v7218_v20  ;;  %v7220_v5 = vadd.f32 %v6167_v11, %v5614_v35  ;;  %v6169_v62 = vpop.f32.mrb[55].mxu1  ;;  %7962 = vrcp.f32 %v6247_v16  ;;  %v6249_v2 = vadd.f32 1.0, %v7951_v4  ;;  %v5624_v34 = vpop.permute.xlu1 %5623 }
 0xec9   : > { %v7020_v29 = vmul.f32 -1.442695, %v7219_v36  ;;  %v7221_v50 = vadd.f32 %v6169_v62, %v5614_v35  ;;  %7964 = vrcp.f32 %v6248_v28  ;;  %v5649_v16 = vpop.permute.xlu0 %5648 }
 0xeca   : > { %v7021_v9 = vmul.f32 -1.442695, %v7220_v5  ;;  %7966 = vpow2.f32 %v7019_v23 }
 0xecb   : > { %v7022_v25 = vmul.f32 -1.442695, %v7221_v50  ;;  %7968 = vpow2.f32 %v7020_v29 }
 0xecc   : > { %v7953_v53 = vpop.eup %7952  ;;  %7970 = vpow2.f32 %v7021_v9  ;;  %v5634_v26 = vpop.permute.xlu1 %5633 }
 0xecd   : > { %v7955_v22 = vpop.eup %7954  ;;  %v6250_v3 = vadd.f32 1.0, %v7953_v53  ;;  %v6173_v63 = vpop.f32.mrb[56].mxu1  ;;  %7972 = vpow2.f32 %v7022_v25 }
 0xece   : > { %v7957_v37 = vpop.eup %7956  ;;  %v6251_v13 = vadd.f32 1.0, %v7955_v22  ;;  %v7222_v39 = vadd.f32 %v6173_v63, %v5619_v38  ;;  %v6175_v61 = vpop.f32.mrb[57].mxu1  ;;  %7974 = vrcp.f32 %v6249_v2 }
 0xecf   : > { %v6252_v60 = vadd.f32 1.0, %v7957_v37  ;;  %v7223_v12 = vadd.f32 %v6175_v61, %v5619_v38  ;;  %v6177_v31 = vpop.f32.mrb[58].mxu1  ;;  %v7959_v54 = vpop.eup %7958  ;;  %7976 = vrcp.f32 %v6250_v3 }
 0xed0   : > { %v7023_v46 = vmul.f32 -1.442695, %v7222_v39  ;;  %v7224_v27 = vadd.f32 %v6177_v31, %v5624_v34  ;;  %v6179_v35 = vpop.f32.mrb[59].mxu1  ;;  %7978 = vrcp.f32 %v6251_v13  ;;  %v6253_v6 = vadd.f32 1.0, %v7959_v54  ;;  %v5654_v4 = vpop.permute.xlu1 %5653 }
 0xed1   : > { %v7024_v59 = vmul.f32 -1.442695, %v7223_v12  ;;  %v7225_v14 = vadd.f32 %v6179_v35, %v5624_v34  ;;  %v11827_v24 = vpop.eup %7960  ;;  %7980 = vrcp.f32 %v6252_v60  ;;  %v5639_v53 = vpop.permute.xlu0 %5638 }
 0xed2   : > { %v7025_v40 = vmul.f32 -1.442695, %v7224_v27  ;;  %v11829_v51 = vpop.eup %7962  ;;  %7982 = vpow2.f32 %v7023_v46 }
 0xed3   : > { %v7026_v15 = vmul.f32 -1.442695, %v7225_v14  ;;  %v11831_v21 = vpop.eup %7964  ;;  %7984 = vpow2.f32 %v7024_v59 }
 0xed4   : > { %v7967_v33 = vpop.eup %7966  ;;  %7986 = vpow2.f32 %v7025_v40  ;;  %v5644_v61 = vpop.permute.xlu1 %5643 }
 0xed5   : > { %v6183_v0 = vpop.f32.mrb[60].mxu1  ;;  %v7969_v57 = vpop.eup %7968  ;;  %v6294_v41 = vadd.f32 1.0, %v7967_v33  ;;  %7988 = vpow2.f32 %v7026_v15 }
 0xed6   : > { %v6185_v19 = vpop.f32.mrb[61].mxu1  ;;  %v7971_v49 = vpop.eup %7970  ;;  %7990 = vrcp.f32 %v6253_v6  ;;  %v6295_v8 = vadd.f32 1.0, %v7969_v57  ;;  %v7226_v45 = vadd.f32 %v6183_v0, %v5629_v48 }
 0xed7   : > { %v6187_v10 = vpop.f32.mrb[62].mxu1  ;;  %v7973_v56 = vpop.eup %7972  ;;  %7992 = vrcp.f32 %v6294_v41  ;;  %v6296_v58 = vadd.f32 1.0, %v7971_v49  ;;  %v7227_v32 = vadd.f32 %v6185_v19, %v5629_v48 }
 0xed8   : > { %v6189_v42 = vpop.f32.mrb[63].mxu1  ;;  %v11833_v1 = vpop.eup %7974  ;;  %7994 = vrcp.f32 %v6295_v8  ;;  %v6297_v20 = vadd.f32 1.0, %v7973_v56  ;;  %v7228_v36 = vadd.f32 %v6187_v10, %v5634_v26 }
 0xed9   : > { %v11835_v28 = vpop.eup %7976  ;;  %7996 = vrcp.f32 %v6296_v58  ;;  %v7229_v23 = vadd.f32 %v6189_v42, %v5634_v26 }
 0xeda   : > { %v11837_v11 = vpop.eup %7978  ;;  %7998 = vrcp.f32 %v6297_v20 }
 0xedb   : > { %v11839_v5 = vpop.eup %7980  ;;  %8000 = vtanh.f32 %v7226_v45 }
 0xedc   : > { %v7983_v62 = vpop.eup %7982  ;;  %8002 = vtanh.f32 %v7227_v32 }
 0xedd   : > { %v6193_v29 = vpop.f32.mrb[64].mxu1  ;;  %v7985_v50 = vpop.eup %7984  ;;  %v6298_v9 = vadd.f32 1.0, %v7983_v62  ;;  %8004 = vtanh.f32 %v7228_v36 }
 0xede   : > { %v6195_v2 = vpop.f32.mrb[65].mxu1  ;;  %v7987_v25 = vpop.eup %7986  ;;  %v6299_v22 = vadd.f32 1.0, %v7985_v50  ;;  %8006 = vtanh.f32 %v7229_v23  ;;  %v7230_v37 = vadd.f32 %v6193_v29, %v5639_v53 }
 0xedf   : > { %v6197_v38 = vpop.f32.mrb[66].mxu1  ;;  %v7989_v3 = vpop.eup %7988  ;;  %8008 = vrcp.f32 %v6298_v9  ;;  %v6300_v63 = vadd.f32 1.0, %v7987_v25  ;;  %v7231_v60 = vadd.f32 %v6195_v2, %v5639_v53 }
 0xee0   : > { %v6199_v13 = vpop.f32.mrb[67].mxu1  ;;  %v11841_v39 = vpop.eup %7990  ;;  %8010 = vrcp.f32 %v6299_v22  ;;  %v6301_v34 = vadd.f32 1.0, %v7989_v3  ;;  %v7232_v31 = vadd.f32 %v6197_v38, %v5644_v61 }
 0xee1   : > { %v7993_v12 = vpop.eup %7992  ;;  %8012 = vrcp.f32 %v6300_v63  ;;  %v7233_v46 = vadd.f32 %v6199_v13, %v5644_v61  ;;  %v5659_v29 = vpop.permute.xlu0 %5658 }
 0xee2   : > { %v7995_v54 = vpop.eup %7994  ;;  %8014 = vrcp.f32 %v6301_v34  ;;  %v6374_v59 = vmul.f32 %v7993_v12, %v11145_v7  ;;  %v5664_v13 = vpop.permute.xlu1 %5663 }
 0xee3   : > { %v7997_v27 = vpop.eup %7996  ;;  %8016 = vtanh.f32 %v7230_v37  ;;  %v6375_v48 = vmul.f32 %v7995_v54, %v11148_v30 }
 0xee4   : > { %v7999_v35 = vpop.eup %7998  ;;  %8018 = vtanh.f32 %v7231_v60  ;;  %v6376_v26 = vmul.f32 %v7997_v27, %v11151_v52 }
 0xee5   : > { %v6203_v14 = vpop.f32.mrb[68].mxu1  ;;  %v8001_v40 = vpop.eup %8000  ;;  %8020 = vtanh.f32 %v7232_v31  ;;  %v6377_v49 = vmul.f32 %v7999_v35, %v11153_v47 }
 0xee6   : > { %v7234_v6 = vadd.f32 %v6203_v14, %v5649_v16  ;;  %v6205_v15 = vpop.f32.mrb[69].mxu1  ;;  %v8003_v33 = vpop.eup %8002  ;;  %v6382_v0 = vmul.f32 %v8001_v40, %v11827_v24  ;;  %8022 = vtanh.f32 %v7233_v46 }
 0xee7   : > { %v7235_v57 = vadd.f32 %v6205_v15, %v5649_v16  ;;  %v6207_v41 = vpop.f32.mrb[70].mxu1  ;;  %v8005_v19 = vpop.eup %8004  ;;  %v6383_v7 = vmul.f32 %v8003_v33, %v11829_v51 }
 0xee8   : > { %v7027_v8 = vmul.f32 -1.442695, %v7234_v6  ;;  %v7236_v10 = vadd.f32 %v6207_v41, %v5654_v4  ;;  %v6209_v56 = vpop.f32.mrb[71].mxu1  ;;  %v8007_v30 = vpop.eup %8006  ;;  %v6390_v58 = vadd.f32 %v6382_v0, %v6374_v59  ;;  %v6384_v45 = vmul.f32 %v8005_v19, %v11831_v21 }
 0xee9   : > { %v7237_v42 = vadd.f32 %v6209_v56, %v5654_v4  ;;  %v8009_v20 = vpop.eup %8008  ;;  %v6391_v52 = vadd.f32 %v6383_v7, %v6375_v48  ;;  %v6385_v24 = vmul.f32 %v8007_v30, %v11833_v1  ;;  %v7028_v36 = vmul.f32 -1.442695, %v7235_v57 }
 0xeea   : > { %8024 = vpow2.f32 %v7027_v8  ;;  %v8011_v16 = vpop.eup %8010  ;;  %v6392_v32 = vadd.f32 %v6384_v45, %v6376_v26  ;;  %v7029_v62 = vmul.f32 -1.442695, %v7236_v10  ;;  %v6378_v50 = vmul.f32 %v8009_v20, %v11161_v17 }
 0xeeb   : > { %v8013_v23 = vpop.eup %8012  ;;  %v6393_v47 = vadd.f32 %v6385_v24, %v6377_v49  ;;  %v7030_v9 = vmul.f32 -1.442695, %v7237_v42  ;;  %v6379_v21 = vmul.f32 %v8011_v16, %v11164_v44  ;;  %8026 = vpow2.f32 %v7028_v36 }
 0xeec   : > { %v8015_v51 = vpop.eup %8014  ;;  %v6380_v1 = vmul.f32 %v8013_v23, %v11168_v43  ;;  %8028 = vpow2.f32 %v7029_v62 }
 0xeed   : > { %v6213_v2 = vpop.f32.mrb[72].mxu1  ;;  %v8017_v25 = vpop.eup %8016  ;;  %v6381_v38 = vmul.f32 %v8015_v51, %v11171_v55  ;;  %8030 = vpow2.f32 %v7030_v9 }
 0xeee   : > { %v7238_v4 = vadd.f32 %v6213_v2, %v5659_v29  ;;  %v6215_v53 = vpop.f32.mrb[73].mxu1  ;;  %v8019_v22 = vpop.eup %8018  ;;  %v6386_v3 = vmul.f32 %v8017_v25, %v11835_v28 }
 0xeef   : > { %v6217_v63 = vpop.f32.mrb[74].mxu1  ;;  %v8021_v37 = vpop.eup %8020  ;;  %v6387_v17 = vmul.f32 %v8019_v22, %v11837_v11  ;;  %v7239_v34 = vadd.f32 %v6215_v53, %v5659_v29 }
 0xef0   : > { %v7031_v61 = vmul.f32 -1.442695, %v7238_v4  ;;  %v6219_v60 = vpop.f32.mrb[75].mxu1  ;;  %v8023_v44 = vpop.eup %8022  ;;  %v6394_v12 = vadd.f32 %v6386_v3, %v6378_v50  ;;  %v6388_v31 = vmul.f32 %v8021_v37, %v11839_v5  ;;  %v7240_v43 = vadd.f32 %v6217_v63, %v5664_v13  ;;  %v7558_v63 = vld [vmem:[%s11983_s8] sm:$0xff]   ;;  %v7559_v37 = vld [vmem:[%s11983_s8 + $0x8] sm:$0xff]  }
 0xef1   : > { %v6395_v54 = vadd.f32 %v6387_v17, %v6379_v21  ;;  %v6389_v55 = vmul.f32 %v8023_v44, %v11841_v39  ;;  %v7241_v46 = vadd.f32 %v6219_v60, %v5664_v13  ;;  %v7032_v35 = vmul.f32 -1.442695, %v7239_v34  ;;  %v6503_v44 = vpop.permute.xlu1 %6502 }
 0xef2   : > { %8032 = vpow2.f32 %v7031_v61  ;;  %v6396_v28 = vadd.f32 %v6388_v31, %v6380_v1  ;;  %v7033_v14 = vmul.f32 -1.442695, %v7240_v43  ;;  %v6498_v61 = vpop.permute.xlu0 %6497 }
 0xef3   : > { %8034 = vtanh.f32 %v6390_v58  ;;  %v6397_v11 = vadd.f32 %v6389_v55, %v6381_v38  ;;  %v7034_v40 = vmul.f32 -1.442695, %v7241_v46 }
 0xef4   : > { %v8025_v27 = vpop.eup %8024  ;;  %8036 = vtanh.f32 %v6391_v52 }
 0xef5   : > { %8038 = vtanh.f32 %v6392_v32  ;;  %v6350_v59 = vadd.f32 1.0, %v8025_v27  ;;  %v8027_v5 = vpop.eup %8026  ;;  %v6513_v55 = vpop.permute.xlu1 %6512 }
 0xef6   : > { %8040 = vtanh.f32 %v6393_v47  ;;  %v8029_v48 = vpop.eup %8028  ;;  %v6351_v6 = vadd.f32 1.0, %v8027_v5 }
 0xef7   : > { %8042 = vrcp.f32 %v6350_v59  ;;  %v8031_v39 = vpop.eup %8030  ;;  %v6352_v15 = vadd.f32 1.0, %v8029_v48 }
 0xef8   : > { %8044 = vpow2.f32 %v7032_v35  ;;  %v6353_v26 = vadd.f32 1.0, %v8031_v39 }
 0xef9   : > { %8046 = vpow2.f32 %v7033_v14 }
 0xefa   : > { %8048 = vpow2.f32 %v7034_v40 }
 0xefb   : > { %8050 = vtanh.f32 %v6394_v12 }
 0xefc   : > { %v8033_v33 = vpop.eup %8032  ;;  %8052 = vrcp.f32 %v6351_v6 }
 0xefd   : > { %v8035_v0 = vpop.eup %8034  ;;  %8054 = vrcp.f32 %v6352_v15  ;;  %v6354_v57 = vadd.f32 1.0, %v8033_v33 }
 0xefe   : > { %v8037_v41 = vpop.eup %8036  ;;  %8056 = vrcp.f32 %v6353_v26 }
 0xeff   : > { %v8039_v19 = vpop.eup %8038  ;;  %8058 = vrcp.f32 %v6354_v57 }
 0xf00   : > { %v8041_v49 = vpop.eup %8040  ;;  %8060 = vtanh.f32 %v6395_v54 }
 0xf01   : > { %v8043_v7 = vpop.eup %8042  ;;  %8062 = vtanh.f32 %v6396_v28 }
 0xf02   : > { %v8045_v8 = vpop.eup %8044  ;;  %v6406_v10 = vmul.f32 %v8043_v7, %v8035_v0  ;;  %8064 = vtanh.f32 %v6397_v11 }
 0xf03   : > { %v8047_v56 = vpop.eup %8046  ;;  %v6355_v30 = vadd.f32 1.0, %v8045_v8 }
 0xf04   : > { %v8049_v58 = vpop.eup %8048  ;;  %v6356_v45 = vadd.f32 1.0, %v8047_v56  ;;  %6601 = vst [vmem:[%s8902_s30 + $0x40] sm:$0xff] %v6406_v10 }
 0xf05   : > { %v8051_v42 = vpop.eup %8050  ;;  %8066 = vrcp.f32 %v6355_v30  ;;  %v6357_v20 = vadd.f32 1.0, %v8049_v58 }
 0xf06   : > { %v8053_v52 = vpop.eup %8052  ;;  %8068 = vrcp.f32 %v6356_v45 }
 0xf07   : > { %v8055_v24 = vpop.eup %8054  ;;  %8070 = vrcp.f32 %v6357_v20  ;;  %v6407_v16 = vmul.f32 %v8053_v52, %v8037_v41 }
 0xf08   : > { %v8057_v32 = vpop.eup %8056  ;;  %v6408_v36 = vmul.f32 %v8055_v24, %v8039_v19 }
 0xf09   : > { %v8059_v23 = vpop.eup %8058  ;;  %v6409_v47 = vmul.f32 %v8057_v32, %v8041_v49  ;;  %6602 = vst [vmem:[%s8902_s30 + $0x48] sm:$0xff] %v6407_v16 }
 0xf0a   : > { %v6418_v62 = vpack.c.bf16 %v6408_v36, %v6406_v10  ;;  %6603 = vst [vmem:[%s8902_s30 + $0x50] sm:$0xff] %v6408_v36  ;;  %v6410_v51 = vmul.f32 %v8059_v23, %v8051_v42  ;;  %v8061_v50 = vpop.eup %8060 }
 0xf0b   : > { %v6419_v29 = vpack.c.bf16 %v6409_v47, %v6407_v16  ;;  %6604 = vst [vmem:[%s8902_s30 + $0x58] sm:$0xff] %v6409_v47  ;;  %v8063_v9 = vpop.eup %8062 }
 0xf0c   : > { %6605 = vst [vmem:[%s8902_s30 + $0x60] sm:$0xff] %v6410_v51  ;;  %v8065_v2 = vpop.eup %8064 }
 0xf0d   : > { %6438 = vmatprep.subr.bf16.mxu0 %v6419_v29 }
 0xf0e   : > { %6439 = vmatpush1.bf16.msra.mxu0 %v6418_v62 }
 0xf0f   : > { %v8067_v25 = vpop.eup %8066 }
 0xf10   : > { %v8069_v21 = vpop.eup %8068  ;;  %v6411_v4 = vmul.f32 %v8067_v25, %v8061_v50 }
 0xf11   : > { %v8071_v53 = vpop.eup %8070  ;;  %v6412_v22 = vmul.f32 %v8069_v21, %v8063_v9 }
 0xf12   : > { %v6413_v1 = vmul.f32 %v8071_v53, %v8065_v2  ;;  %6606 = vst [vmem:[%s8902_s30 + $0x68] sm:$0xff] %v6411_v4 }
 0xf13   : > { %v6420_v38 = vpack.c.bf16 %v6412_v22, %v6410_v51  ;;  %6607 = vst [vmem:[%s8902_s30 + $0x70] sm:$0xff] %v6412_v22 }
 0xf14   : > { %v6421_v3 = vpack.c.bf16 %v6413_v1, %v6411_v4  ;;  %6608 = vst [vmem:[%s8902_s30 + $0x78] sm:$0xff] %v6413_v1 }
 0xf16   : > { %6440 = vmatprep.subr.bf16.mxu0 %v6421_v3 }
 0xf17   : > { %6441 = vmatpush1.bf16.msra.mxu0 %v6420_v38 }
 0xf1a   : > { %7037 = vmatmul.mubr.msk.bf16.vlgmr.msra.gmra.mrb[92].mxu0 %vm489_vm0, %v7558_v63 }
 0xf1b   : > { %6480 = vmatprep.mubr.bf16.mxu0 %v12074_v18  ;;  %v6508_v18 = vpop.permute.xlu0 %6507 }
 0xf22   : > { %7038 = vmatmul.mubr.msk.bf16.gmra.mrb[96].mxu0 %vm489_vm0, %v7559_v37 }
 0xfed   : > { %v6472_v13 = vpop.f32.mrb[92].mxu0 }
 0xfee   : > { %6609 = vst [vmem:[%s8902_s30 + $0x80] sm:$0xff] %v6472_v13  ;;  %v6474_v17 = vpop.f32.mrb[93].mxu0  ;;  %v6515_v31 = vadd.f32 %v6498_v61, %v6472_v13 }
 0xfef   : > { %6610 = vst [vmem:[%s8902_s30 + $0x88] sm:$0xff] %v6474_v17  ;;  %v6476_v34 = vpop.f32.mrb[94].mxu0  ;;  %v6516_v28 = vadd.f32 %v6498_v61, %v6474_v17 }
 0xff0   : > { %6611 = vst [vmem:[%s8902_s30 + $0x90] sm:$0xff] %v6476_v34  ;;  %v6478_v60 = vpop.f32.mrb[95].mxu0  ;;  %v6517_v11 = vadd.f32 %v6503_v44, %v6476_v34 }
 0xff1   : > { %6612 = vst [vmem:[%s8902_s30 + $0x98] sm:$0xff] %v6478_v60  ;;  %v6518_v40 = vadd.f32 %v6503_v44, %v6478_v60 }
 0xff5   : > { %v6482_v12 = vpop.f32.mrb[96].mxu0 }
 0xff6   : > { %v6519_v43 = vadd.f32 %v6508_v18, %v6482_v12  ;;  %6613 = vst [vmem:[%s8902_s30 + $0xa0] sm:$0xff] %v6482_v12  ;;  %v6484_v54 = vpop.f32.mrb[97].mxu0 }
 0xff7   : > { %v6520_v46 = vadd.f32 %v6508_v18, %v6484_v54  ;;  %6614 = vst [vmem:[%s8902_s30 + $0xa8] sm:$0xff] %v6484_v54  ;;  %v6486_v27 = vpop.f32.mrb[98].mxu0 }
 0xff8   : > { %v6523_v35 = vmax.f32 %v6515_v31, %v6519_v43  ;;  %v6521_v59 = vadd.f32 %v6513_v55, %v6486_v27  ;;  %6615 = vst [vmem:[%s8902_s30 + $0xb0] sm:$0xff] %v6486_v27  ;;  %v6488_v14 = vpop.f32.mrb[99].mxu0 }
 0xff9   : > { %v6532_v5 = vmax.f32 %v6516_v28, %v6520_v46  ;;  %v6522_v48 = vadd.f32 %v6513_v55, %v6488_v14  ;;  %6616 = vst [vmem:[%s8902_s30 + $0xb8] sm:$0xff] %v6488_v14 }
 0xffa   : > { %v6524_v6 = vmax.f32 %v6517_v11, %v6521_v59 }
 0xffb   : > { %v6533_v39 = vmax.f32 %v6518_v40, %v6522_v48 }
 0xffc   : > { %v6525_v15 = vmax.f32 %v6523_v35, %v6524_v6 }
 0xffd   : > { %v6534_v33 = vmax.f32 %v6532_v5, %v6533_v39 }
 0xffe   : > { %v6526_v26 = vrot.slane %v6525_v15, 4 }
 0xfff   : > { %v6535_v0 = vrot.slane %v6534_v33, 4 }
0x1000   : > { %v6527_v57 = vmax.f32 %v6525_v15, %v6526_v26  ;;  %v6647_v26 = vld [vmem:[%s8902_s30] sm:$0xff] (%p8215_p5) }
0x1001   : > { %v6536_v41 = vmax.f32 %v6534_v33, %v6535_v0  ;;  %v6649_v0 = vld [vmem:[%s8902_s30 + $0x8] sm:$0xff] (%p8215_p5)  ;;  %6648 = vst [vmem:[%s11902_s21] sm:$0xff] (%p8215_p5), %v6647_v26 }
0x1002   : > { %v6528_v19 = vrot.slane %v6527_v57, 2  ;;  %6650 = vst [vmem:[%s11902_s21 + $0x8] sm:$0xff] (%p8215_p5), %v6649_v0 }
0x1003   : > { %v6537_v49 = vrot.slane %v6536_v41, 2 }
0x1004   : > { %v6529_v7 = vmax.f32 %v6527_v57, %v6528_v19  ;;  %v6651_v57 = vld [vmem:[%s8902_s30 + $0x10] sm:$0xff] (%p8215_p5)  ;;  %v6655_v19 = vld [vmem:[%s8902_s30 + $0x20] sm:$0xff] (%p8215_p5) }
0x1005   : > { %v6538_v8 = vmax.f32 %v6536_v41, %v6537_v49  ;;  %v6653_v41 = vld [vmem:[%s8902_s30 + $0x18] sm:$0xff] (%p8215_p5)  ;;  %v6657_v49 = vld [vmem:[%s8902_s30 + $0x28] sm:$0xff] (%p8215_p5)  ;;  %6652 = vst [vmem:[%s11902_s21 + $0x20] sm:$0xff] (%p8215_p5), %v6651_v57  ;;  %6656 = vst [vmem:[%s11902_s21 + $0x40] sm:$0xff] (%p8215_p5), %v6655_v19 }
0x1006   : > { %v6530_v10 = vrot.slane %v6529_v7, 1  ;;  %6654 = vst [vmem:[%s11902_s21 + $0x28] sm:$0xff] (%p8215_p5), %v6653_v41  ;;  %6658 = vst [vmem:[%s11902_s21 + $0x48] sm:$0xff] (%p8215_p5), %v6657_v49 }
0x1007   : > { %v6539_v56 = vrot.slane %v6538_v8, 1 }
0x1008   : > { %v6531_v30 = vmax.f32 %v6529_v7, %v6530_v10  ;;  %v6659_v7 = vld [vmem:[%s8902_s30 + $0x30] sm:$0xff] (%p8215_p5)  ;;  %v6663_v10 = vld [vmem:[%s8902_s30 + $0x40] sm:$0xff] (%p8215_p5) }
0x1009   : > { %v6540_v58 = vmax.f32 %v6538_v8, %v6539_v56  ;;  %v6661_v8 = vld [vmem:[%s8902_s30 + $0x38] sm:$0xff] (%p8215_p5)  ;;  %6660 = vst [vmem:[%s11902_s21 + $0x60] sm:$0xff] (%p8215_p5), %v6659_v7  ;;  %6664 = vst [vmem:[%s11902_s21 + $0x80] sm:$0xff] (%p8215_p5), %v6663_v10  ;;  %v6665_v56 = vld [vmem:[%s8902_s30 + $0x48] sm:$0xff] (%p8215_p5) }
0x100a   : > { %v6541_v45 = vsub.f32 %v6515_v31, %v6531_v30  ;;  %v6543_v42 = vsub.f32 %v6517_v11, %v6531_v30  ;;  %v6545_v20 = vsub.f32 %v6519_v43, %v6531_v30  ;;  %v6547_v52 = vsub.f32 %v6521_v59, %v6531_v30  ;;  %6662 = vst [vmem:[%s11902_s21 + $0x68] sm:$0xff] (%p8215_p5), %v6661_v8  ;;  %v6667_v30 = vld [vmem:[%s8902_s30 + $0x50] sm:$0xff] (%p8215_p5) }
0x100b   : > { %v6542_v24 = vsub.f32 %v6516_v28, %v6540_v58  ;;  %v6544_v16 = vsub.f32 %v6518_v40, %v6540_v58  ;;  %v6546_v32 = vsub.f32 %v6520_v46, %v6540_v58  ;;  %v6548_v36 = vsub.f32 %v6522_v48, %v6540_v58  ;;  %v6669_v58 = vld [vmem:[%s8902_s30 + $0x58] sm:$0xff] (%p8215_p5)  ;;  %6666 = vst [vmem:[%s11902_s21 + $0x88] sm:$0xff] (%p8215_p5), %v6665_v56 }
0x100c   : > { %v6549_v23 = vmul.f32 1.442695, %v6541_v45  ;;  %v6553_v47 = vmul.f32 1.442695, %v6543_v42  ;;  %v6557_v62 = vmul.f32 1.442695, %v6545_v20 }
0x100d   : > { %v6561_v51 = vmul.f32 1.442695, %v6547_v52  ;;  %v6551_v29 = vmul.f32 1.442695, %v6542_v24  ;;  %v6555_v50 = vmul.f32 1.442695, %v6544_v16 }
0x100e   : > { %8072 = vpow2.f32 %v6549_v23  ;;  %v6559_v9 = vmul.f32 1.442695, %v6546_v32  ;;  %v6563_v2 = vmul.f32 1.442695, %v6548_v36  ;;  %6668 = vst [vmem:[%s11902_s21 + $0xa0] sm:$0xff] (%p8215_p5), %v6667_v30  ;;  %6670 = vst [vmem:[%s11902_s21 + $0xa8] sm:$0xff] (%p8215_p5), %v6669_v58 }
0x100f   : > { %8074 = vpow2.f32 %v6553_v47  ;;  %v6671_v45 = vld [vmem:[%s8902_s30 + $0x60] sm:$0xff] (%p8215_p5)  ;;  %v6673_v42 = vld [vmem:[%s8902_s30 + $0x68] sm:$0xff] (%p8215_p5)  ;;  %v6675_v20 = vld [vmem:[%s8902_s30 + $0x70] sm:$0xff] (%p8215_p5) }
0x1010   : > { %8076 = vpow2.f32 %v6557_v62  ;;  %6672 = vst [vmem:[%s11902_s21 + $0xc0] sm:$0xff] (%p8215_p5), %v6671_v45  ;;  %6674 = vst [vmem:[%s11902_s21 + $0xc8] sm:$0xff] (%p8215_p5), %v6673_v42  ;;  %v6677_v52 = vld [vmem:[%s8902_s30 + $0x78] sm:$0xff] (%p8215_p5)  ;;  %v6679_v24 = vld [vmem:[%s8902_s30 + $0x80] sm:$0xff] (%p8215_p5) }
0x1011   : > { %8078 = vpow2.f32 %v6561_v51  ;;  %6676 = vst [vmem:[%s11902_s21 + $0xe0] sm:$0xff] (%p8215_p5), %v6675_v20  ;;  %v6681_v16 = vld [vmem:[%s8902_s30 + $0x88] sm:$0xff] (%p8215_p5)  ;;  %6678 = vst [vmem:[%s11902_s21 + $0xe8] sm:$0xff] (%p8215_p5), %v6677_v52  ;;  %v6683_v32 = vld [vmem:[%s8902_s30 + $0x90] sm:$0xff] (%p8215_p5) }
0x1012   : > { %8080 = vpow2.f32 %v6551_v29  ;;  %6680 = vst [vmem:[%s11902_s21 + $0x100] sm:$0xff] (%p8215_p5), %v6679_v24  ;;  %6682 = vst [vmem:[%s11902_s21 + $0x108] sm:$0xff] (%p8215_p5), %v6681_v16  ;;  %v6685_v36 = vld [vmem:[%s8902_s30 + $0x98] sm:$0xff] (%p8215_p5)  ;;  %v6687_v23 = vld [vmem:[%s8902_s30 + $0xa0] sm:$0xff] (%p8215_p5) }
0x1013   : > { %8082 = vpow2.f32 %v6555_v50  ;;  %6684 = vst [vmem:[%s11902_s21 + $0x120] sm:$0xff] (%p8215_p5), %v6683_v32  ;;  %6686 = vst [vmem:[%s11902_s21 + $0x128] sm:$0xff] (%p8215_p5), %v6685_v36  ;;  %v6689_v47 = vld [vmem:[%s8902_s30 + $0xa8] sm:$0xff] (%p8215_p5)  ;;  %v6691_v62 = vld [vmem:[%s8902_s30 + $0xb0] sm:$0xff] (%p8215_p5) }
0x1014   : > { %8084 = vpow2.f32 %v6559_v9  ;;  %6688 = vst [vmem:[%s11902_s21 + $0x140] sm:$0xff] (%p8215_p5), %v6687_v23  ;;  %v6693_v51 = vld [vmem:[%s8902_s30 + $0xb8] sm:$0xff] (%p8215_p5)  ;;  %6690 = vst [vmem:[%s11902_s21 + $0x148] sm:$0xff] (%p8215_p5), %v6689_v47 }
0x1015   : > { %8086 = vpow2.f32 %v6563_v2  ;;  %6692 = vst [vmem:[%s11902_s21 + $0x160] sm:$0xff] (%p8215_p5), %v6691_v62  ;;  %6694 = vst [vmem:[%s11902_s21 + $0x168] sm:$0xff] (%p8215_p5), %v6693_v51 }
0x1018   : > { %v8073_v25 = vpop.eup %8072 }
0x1019   : > { %v8075_v21 = vpop.eup %8074 }
0x101a   : > { %v8077_v4 = vpop.eup %8076  ;;  %v6565_v53 = vadd.f32 %v8075_v21, %v8073_v25 }
0x101b   : > { %v8079_v22 = vpop.eup %8078 }
0x101c   : > { %v8081_v1 = vpop.eup %8080  ;;  %v6566_v38 = vadd.f32 %v8077_v4, %v6565_v53 }
0x101d   : > { %v8083_v3 = vpop.eup %8082 }
0x101e   : > { %v6567_v63 = vadd.f32 %v8079_v22, %v6566_v38  ;;  %v6574_v37 = vadd.f32 %v8083_v3, %v8081_v1  ;;  %v8085_v13 = vpop.eup %8084 }
0x101f   : > { %v8087_v34 = vpop.eup %8086 }
0x1020   : > { %v6568_v17 = vrot.slane %v6567_v63, 4  ;;  %v6575_v61 = vadd.f32 %v8085_v13, %v6574_v37 }
0x1022   : > { %v6569_v60 = vadd.f32 %v6568_v17, %v6567_v63  ;;  %v6576_v44 = vadd.f32 %v8087_v34, %v6575_v61 }
0x1024   : > { %v6570_v18 = vrot.slane %v6569_v60, 2  ;;  %v6577_v12 = vrot.slane %v6576_v44, 4 }
0x1026   : > { %v6571_v31 = vadd.f32 %v6570_v18, %v6569_v60  ;;  %v6578_v43 = vadd.f32 %v6577_v12, %v6576_v44 }
0x1028   : > { %v6572_v54 = vrot.slane %v6571_v31, 1  ;;  %v6579_v55 = vrot.slane %v6578_v43, 2 }
0x102a   : > { %v6573_v28 = vadd.f32 %v6572_v54, %v6571_v31  ;;  %v6580_v46 = vadd.f32 %v6579_v55, %v6578_v43 }
0x102c   : > { %8088 = vrcp.f32 %v6573_v28  ;;  %v6581_v27 = vrot.slane %v6580_v46, 1 }
0x102e   : > { %v6582_v11 = vadd.f32 %v6581_v27, %v6580_v46 }
0x1030   : > { %8090 = vrcp.f32 %v6582_v11 }
0x1036   : > { %v8089_v35 = vpop.eup %8088 }
0x1037   : > { %v6585_v59 = vmul.f32 %v8089_v35, %v8073_v25  ;;  %v6587_v14 = vmul.f32 %v8089_v35, %v8075_v21  ;;  %v6589_v40 = vmul.f32 %v8089_v35, %v8077_v4  ;;  %v6591_v5 = vmul.f32 %v8089_v35, %v8079_v22 }
0x1038   : > { %6631 = sbr.rel (!%p8215_p5) target bundleno = 4167 (0x1047), region = 102 }
0x1039   : > { %6617 = vst [vmem:[%s8902_s30 + $0xc0] sm:$0xff] %v6585_v59  ;;  %6619 = vst [vmem:[%s8902_s30 + $0xd0] sm:$0xff] %v6587_v14 }
0x103a   : > { %6621 = vst [vmem:[%s8902_s30 + $0xe0] sm:$0xff] %v6589_v40  ;;  %6623 = vst [vmem:[%s8902_s30 + $0xf0] sm:$0xff] %v6591_v5  ;;  %v8091_v48 = vpop.eup %8090 }
0x103b   : > { %v6586_v6 = vmul.f32 %v8091_v48, %v8081_v1  ;;  %v6588_v39 = vmul.f32 %v8091_v48, %v8083_v3  ;;  %v6590_v15 = vmul.f32 %v8091_v48, %v8085_v13  ;;  %v6592_v33 = vmul.f32 %v8091_v48, %v8087_v34 }
0x103d   : > { %6618 = vst [vmem:[%s8902_s30 + $0xc8] sm:$0xff] %v6586_v6  ;;  %6620 = vst [vmem:[%s8902_s30 + $0xd8] sm:$0xff] %v6588_v39 }
0x103e   : > { %6622 = vst [vmem:[%s8902_s30 + $0xe8] sm:$0xff] %v6590_v15  ;;  %6624 = vst [vmem:[%s8902_s30 + $0xf8] sm:$0xff] %v6592_v33 }
0x1040   : > { %v6695_v29 = vld [vmem:[%s8902_s30 + $0xc0] sm:$0xff]  ;;  %v6699_v9 = vld [vmem:[%s8902_s30 + $0xd0] sm:$0xff] }
0x1041   : > { %6696 = vst [vmem:[%s11902_s21 + $0x180] sm:$0xff] %v6695_v29  ;;  %6700 = vst [vmem:[%s11902_s21 + $0x1a0] sm:$0xff] %v6699_v9  ;;  %v6703_v25 = vld [vmem:[%s8902_s30 + $0xe0] sm:$0xff]  ;;  %v6707_v4 = vld [vmem:[%s8902_s30 + $0xf0] sm:$0xff] }
0x1042   : > { %6704 = vst [vmem:[%s11902_s21 + $0x1c0] sm:$0xff] %v6703_v25  ;;  %6708 = vst [vmem:[%s11902_s21 + $0x1e0] sm:$0xff] %v6707_v4 }
0x1044   : > { %v6697_v50 = vld [vmem:[%s8902_s30 + $0xc8] sm:$0xff]  ;;  %v6701_v2 = vld [vmem:[%s8902_s30 + $0xd8] sm:$0xff] }
0x1045   : > { %6698 = vst [vmem:[%s11902_s21 + $0x188] sm:$0xff] %v6697_v50  ;;  %v6705_v21 = vld [vmem:[%s8902_s30 + $0xe8] sm:$0xff]  ;;  %6702 = vst [vmem:[%s11902_s21 + $0x1a8] sm:$0xff] %v6701_v2  ;;  %v6709_v53 = vld [vmem:[%s8902_s30 + $0xf8] sm:$0xff] }
0x1046   : > { %6706 = vst [vmem:[%s11902_s21 + $0x1c8] sm:$0xff] %v6705_v21  ;;  %6710 = vst [vmem:[%s11902_s21 + $0x1e8] sm:$0xff] %v6709_v53 }
0x1047 PF: > { %p17_p10 = scmp.ge.s32.totalorder %s8202_s17, 4   ;;  %s12162_s13 = smov %s8110_s14 }
0x1048   : > { %s12163_s14 = smov %s8213_s20  ;;  %s12164_s15 = smov %s8202_s17 }
0x1049   :  { %19 = sbr.rel (!%p17_p10) target bundleno = 8 (0x8), region = 163 }

</bundles_post_ra>
